<compile_context>
chip_gen: v7x
topology: tpu7x:2x2x1
jax: 0.10.0
libtpu: 0.0.40
codegen_flags: <defaults>
</compile_context>

<pallas_src>
import jax
import jax.numpy as jnp
from jax import lax
from jax.experimental import pallas as pl
from jax.experimental.pallas import tpu as pltpu

NUM_MODES = 9
INPUT_SIZE = NUM_MODES + 3      # 12
HIDDEN_SIZE = 32                # small stand-in for the real 512
OUTPUT_SIZE = 9
NUM_LAYERS = 3
OUT_PAD = 128                   # lane-dense padded output width


def _lstm_kernel(x_ref,                      # (T, Bt, D)    bf16
                 wih0, whh0, b0,             # (D,4H) bf16, (H,4H) bf16, (1,4H) f32
                 wih1, whh1, b1,
                 wih2, whh2, b2,
                 wfc, bfc,                   # (H, OUT_PAD) bf16, (1, OUT_PAD) f32
                 out_ref,                    # (Bt, OUT_PAD) f32
                 seq_buf,                    # (T, Bt, H)   bf16  layer output sequence
                 pre_buf,                    # (T, Bt, 4H)  bf16  hoisted pre-gates
                 c_buf):                     # (Bt, H)      f32   cell state
    T, Bt, D = x_ref.shape
    H = c_buf.shape[-1]

    def gates_to_h(gates):                   # gates: (Bt, 4H) f32, layout (i|f|o|g)
        # sigmoid(x) == 0.5*(tanh(0.5*x)+1): one EUP pass instead of exp+recip.
        ifo = 0.5 * (jnp.tanh(0.5 * gates[:, :3 * H]) + 1.0)
        g_g = jnp.tanh(gates[:, 3 * H:])
        c_new = ifo[:, H:2 * H] * c_buf[...] + ifo[:, :H] * g_g
        h_new = ifo[:, 2 * H:] * jnp.tanh(c_new)
        c_buf[...] = c_new
        return h_new.astype(jnp.bfloat16)    # single bf16 store target (seq_buf)

    def run_layer(src2d, wih_ref, whh_ref, b_ref):
        # Hoisted input projection for all T steps: one MXU matmul, bias added
        # once per layer; result stored bf16 (halves the dominant scratch).
        pre = jnp.dot(src2d, wih_ref[...],
                      preferred_element_type=jnp.float32) + b_ref[...]
        pre_buf[...] = pre.reshape(T, Bt, 4 * H).astype(jnp.bfloat16)

        c_buf[...] = jnp.zeros_like(c_buf)   # c0 = 0 (matches torch.zeros)
        whh = whh_ref[...]                   # load once; identical RHS per step

        # t = 0: h_{-1} = 0 -> no recurrent matmul at all.
        seq_buf[0] = gates_to_h(pre_buf[0].astype(jnp.float32))

        def step(t, carry):
            # Hidden state lives only as the bf16 row written at t-1: no h_buf,
            # no per-step f32->bf16 cast, one vector store per step.
            gates = pre_buf[t] + jnp.dot(seq_buf[t - 1], whh,
                                         preferred_element_type=jnp.float32)
            seq_buf[t] = gates_to_h(gates)
            return carry

        # Short stand-in T: full unroll for LLO visibility; at real T use a
        # fixed partial unroll to bound code size / vreg live ranges.
        lax.fori_loop(1, T, step, 0, unroll=True if T <= 16 else 8)

    # Layer 0 reads the input block; layers 1/2 read seq_buf (already bf16).
    # The hoisted matmul consumes all of seq_buf *before* this layer's time
    # loop overwrites it (program order => no read-after-write hazard).
    run_layer(x_ref[...].reshape(T * Bt, D), wih0, whh0, b0)
    run_layer(seq_buf[...].reshape(T * Bt, H), wih1, whh1, b1)
    run_layer(seq_buf[...].reshape(T * Bt, H), wih2, whh2, b2)

    # out = relu(fc1(out1[:, -1, :])); last seq_buf row is the final hidden.
    logits = jnp.dot(seq_buf[T - 1], wfc[...],
                     preferred_element_type=jnp.float32) + bfc[...]
    out_ref[...] = jnp.maximum(logits, 0.0)              # lane-dense store


def _resident_spec(arr, single_buffer):
    """Whole-array block, constant block index (stays resident across grid)."""
    zeros = (0,) * arr.ndim
    if single_buffer:
        # Invariant inputs: request a single VMEM buffer (no double-buffered
        # weight copies; ~10 MiB saved at H=512 on v7x's 64 MiB VMEM).
        return pl.BlockSpec(arr.shape, lambda b, _z=zeros: _z,
                            pipeline_mode=pl.Buffered(1))
    return pl.BlockSpec(arr.shape, lambda b, _z=zeros: _z)


def _pick_b_tile(batch, b_tile_max=128):
    b_pad8 = pl.cdiv(batch, 8) * 8
    bt = min(b_tile_max, b_pad8)
    # v7x has 2 TensorCores: prefer >=2 grid tiles so the "parallel" axis can
    # shard across them, as long as each tile keeps >=64 rows of MXU M-dim.
    if b_pad8 >= 128 and b_pad8 // bt < 2:
        bt = pl.cdiv(pl.cdiv(b_pad8, 2), 8) * 8
    return bt


def lstm_net_forward(x, params):
    """x: (B, T, D) float32 -> (B, OUTPUT_SIZE) float32 (eval-mode forward)."""
    B, T, D = x.shape
    H = params["whh0"].shape[0]

    b_tile = _pick_b_tile(B)
    B_pad = pl.cdiv(B, b_tile) * b_tile
    if B_pad != B:
        x = jnp.pad(x, ((0, B_pad - B), (0, 0), (0, 0)))
    x_tm = jnp.transpose(x, (1, 0, 2)).astype(jnp.bfloat16)   # (T, B_pad, D)

    args = (
        x_tm,
        params["wih0"], params["whh0"], params["b0"],
        params["wih1"], params["whh1"], params["b1"],
        params["wih2"], params["whh2"], params["b2"],
        params["wfc"], params["bfc"],
    )

    def call(single_buffer_weights):
        in_specs = [pl.BlockSpec((T, b_tile, D), lambda b: (0, b, 0))]
        in_specs += [_resident_spec(a, single_buffer_weights) for a in args[1:]]
        return pl.pallas_call(
            _lstm_kernel,
            out_shape=jax.ShapeDtypeStruct((B_pad, OUT_PAD), jnp.float32),
            grid_spec=pltpu.PrefetchScalarGridSpec(
                num_scalar_prefetch=0,
                grid=(B_pad // b_tile,),
                in_specs=in_specs,
                out_specs=pl.BlockSpec((b_tile, OUT_PAD), lambda b: (b, 0)),
                scratch_shapes=[
                    pltpu.VMEM((T, b_tile, H), jnp.bfloat16),       # seq_buf
                    pltpu.VMEM((T, b_tile, 4 * H), jnp.bfloat16),   # pre_buf
                    pltpu.VMEM((b_tile, H), jnp.float32),           # c state
                ],
            ),
            compiler_params=pltpu.CompilerParams(
                dimension_semantics=("parallel",),
                # 48 MiB fits every generation incl. v7x (64 MiB physical);
                # at real size raise toward ~100 MiB on v5e/v6e only.
                vmem_limit_bytes=48 * 1024 * 1024,
            ),
        )(*args)

    try:
        out = call(hasattr(pl, "Buffered"))
    except Exception:
        # pipeline_mode=pl.Buffered(1) not accepted by this jax/Mosaic build:
        # fall back to default (double-buffered) resident weight specs.
        out = call(False)
    return out[:B, :OUTPUT_SIZE]


def _xavier_normal(key, shape):
    fan_out, fan_in = shape
    std = (2.0 / (fan_in + fan_out)) ** 0.5
    return std * jax.random.normal(key, shape, dtype=jnp.float32)


def _reorder_gates_ifog(w):
    """torch LSTM rows are (i | f | g | o); kernel layout wants (i | f | o | g)."""
    H = w.shape[0] // 4
    return jnp.concatenate([w[:2 * H], w[3 * H:], w[2 * H:3 * H]], axis=0)


def init_params(key, input_size, hidden_size, output_size):
    """Mirrors LSTMNet.__init__ (xavier_normal_ weights, zero biases), with
    weights pre-transposed, gate-reordered to (i,f,o,g) and cast to bf16."""
    H = hidden_size
    keys = jax.random.split(key, 2 * NUM_LAYERS + 1)
    params = {}
    for l in range(NUM_LAYERS):
        din = input_size if l == 0 else H
        w_ih = _xavier_normal(keys[2 * l], (4 * H, din))        # torch layout
        w_hh = _xavier_normal(keys[2 * l + 1], (4 * H, H))
        params[f"wih{l}"] = jnp.transpose(
            _reorder_gates_ifog(w_ih)).astype(jnp.bfloat16)      # (din, 4H)
        params[f"whh{l}"] = jnp.transpose(
            _reorder_gates_ifog(w_hh)).astype(jnp.bfloat16)      # (H, 4H)
        # Single combined bias = b_ih + b_hh (both zero-initialised here).
        # NOTE: loading real trained torch weights requires passing the sum,
        # gate-reordered to (i, f, o, g).
        params[f"b{l}"] = jnp.zeros((1, 4 * H), jnp.float32)
    w_fc = _xavier_normal(keys[-1], (output_size, H))            # (9, H)
    wfc = jnp.zeros((H, OUT_PAD), jnp.float32).at[:, :output_size].set(
        jnp.transpose(w_fc))
    params["wfc"] = wfc.astype(jnp.bfloat16)                     # (H, 128)
    params["bfc"] = jnp.zeros((1, OUT_PAD), jnp.float32)
    return params


def reference_forward(x, params):
    """Pure-JAX reference of the same eval-mode forward (same bf16/f32 mix)."""
    B, T, D = x.shape
    H = params["whh0"].shape[0]
    seq = x.astype(jnp.bfloat16)                                 # (B, T, D)
    for l in range(NUM_LAYERS):
        wih, whh, b = params[f"wih{l}"], params[f"whh{l}"], params[f"b{l}"]
        pre = (jnp.einsum("btd,dg->btg", seq, wih,
                          preferred_element_type=jnp.float32)
               + b).astype(jnp.bfloat16)
        h = jnp.zeros((B, H), jnp.bfloat16)
        c = jnp.zeros((B, H), jnp.float32)
        outs = []
        for t in range(T):
            gates = pre[:, t, :].astype(jnp.float32) + jnp.dot(
                h, whh, preferred_element_type=jnp.float32)
            ifo = 0.5 * (jnp.tanh(0.5 * gates[:, :3 * H]) + 1.0)
            g_g = jnp.tanh(gates[:, 3 * H:])
            c = ifo[:, H:2 * H] * c + ifo[:, :H] * g_g
            h = (ifo[:, 2 * H:] * jnp.tanh(c)).astype(jnp.bfloat16)
            outs.append(h)
        seq = jnp.stack(outs, axis=1)                            # (B, T, H) bf16
    logits = (jnp.dot(seq[:, -1, :], params["wfc"],
                      preferred_element_type=jnp.float32) + params["bfc"])
    return jnp.maximum(logits, 0.0)[:, :OUTPUT_SIZE]


if __name__ == "__main__":
    key = jax.random.PRNGKey(0)
    pkey, xkey = jax.random.split(key)

    B, T = 2, 8
    params = init_params(pkey, INPUT_SIZE, HIDDEN_SIZE, OUTPUT_SIZE)
    x = jax.random.normal(xkey, (B, T, INPUT_SIZE), dtype=jnp.float32)

    out = jax.block_until_ready(lstm_net_forward(x, params))
    ref = jax.block_until_ready(reference_forward(x, params))

    assert out.shape == (B, OUTPUT_SIZE), out.shape
    assert jnp.allclose(out, ref, atol=2e-3, rtol=2e-3), (
        f"max abs diff {jnp.max(jnp.abs(out - ref))}")
    print("KERNEL_OK")
</pallas_src>

<mosaic_0001>
module attributes {stable_mosaic.version = 11 : i64} {
  func.func @_lstm_kernel(%arg0: i32, %arg1: memref<8x8x12xbf16, #tpu.memory_space<vmem>>, %arg2: memref<12x128xbf16, #tpu.memory_space<vmem>>, %arg3: memref<32x128xbf16, #tpu.memory_space<vmem>>, %arg4: memref<1x128xf32, #tpu.memory_space<vmem>>, %arg5: memref<32x128xbf16, #tpu.memory_space<vmem>>, %arg6: memref<32x128xbf16, #tpu.memory_space<vmem>>, %arg7: memref<1x128xf32, #tpu.memory_space<vmem>>, %arg8: memref<32x128xbf16, #tpu.memory_space<vmem>>, %arg9: memref<32x128xbf16, #tpu.memory_space<vmem>>, %arg10: memref<1x128xf32, #tpu.memory_space<vmem>>, %arg11: memref<32x128xbf16, #tpu.memory_space<vmem>>, %arg12: memref<1x128xf32, #tpu.memory_space<vmem>>, %arg13: memref<8x128xf32, #tpu.memory_space<vmem>>, %arg14: memref<8x8x32xbf16, #tpu.memory_space<vmem>>, %arg15: memref<8x8x128xbf16, #tpu.memory_space<vmem>>, %arg16: memref<8x32xf32, #tpu.memory_space<vmem>>) attributes {dimension_semantics = [#tpu.dimension_semantics<parallel>], iteration_bounds = array<i64: 1>, scalar_prefetch = 0 : i64, scratch_operands = 3 : i64, tpu.core_type = #tpu.core_type<tc>, window_params = [{transform_indices = @transform_0, window_bounds = array<i64: 8, 8, 12>}, {pipeline_mode = #tpu.pipeline_mode<synchronous>, transform_indices = @transform_1, window_bounds = array<i64: 12, 128>}, {pipeline_mode = #tpu.pipeline_mode<synchronous>, transform_indices = @transform_2, window_bounds = array<i64: 32, 128>}, {pipeline_mode = #tpu.pipeline_mode<synchronous>, transform_indices = @transform_3, window_bounds = array<i64: 1, 128>}, {pipeline_mode = #tpu.pipeline_mode<synchronous>, transform_indices = @transform_4, window_bounds = array<i64: 32, 128>}, {pipeline_mode = #tpu.pipeline_mode<synchronous>, transform_indices = @transform_5, window_bounds = array<i64: 32, 128>}, {pipeline_mode = #tpu.pipeline_mode<synchronous>, transform_indices = @transform_6, window_bounds = array<i64: 1, 128>}, {pipeline_mode = #tpu.pipeline_mode<synchronous>, transform_indices = @transform_7, window_bounds = array<i64: 32, 128>}, {pipeline_mode = #tpu.pipeline_mode<synchronous>, transform_indices = @transform_8, window_bounds = array<i64: 32, 128>}, {pipeline_mode = #tpu.pipeline_mode<synchronous>, transform_indices = @transform_9, window_bounds = array<i64: 1, 128>}, {pipeline_mode = #tpu.pipeline_mode<synchronous>, transform_indices = @transform_10, window_bounds = array<i64: 32, 128>}, {pipeline_mode = #tpu.pipeline_mode<synchronous>, transform_indices = @transform_11, window_bounds = array<i64: 1, 128>}, {transform_indices = @transform_12, window_bounds = array<i64: 8, 128>}]} {
    %c0 = arith.constant 0 : index
    %c0_0 = arith.constant 0 : index
    %c0_1 = arith.constant 0 : index
    %0 = vector.load %arg1[%c0, %c0_0, %c0_1] : memref<8x8x12xbf16, #tpu.memory_space<vmem>>, vector<8x8x12xbf16>
    %1 = vector.shape_cast %0 : vector<8x8x12xbf16> to vector<64x12xbf16>
    %c0_2 = arith.constant 0 : index
    %c0_3 = arith.constant 0 : index
    %2 = vector.load %arg2[%c0_2, %c0_3] : memref<12x128xbf16, #tpu.memory_space<vmem>>, vector<12x128xbf16>
    %cst = arith.constant dense<0.000000e+00> : vector<64x128xf32>
    %3 = tpu.matmul %1, %2, %cst {dimension_numbers = #tpu.dot_dimension_numbers<[1], [0], [0], [1], [0, 0, 1, 1], [], []>} : vector<64x12xbf16>, vector<12x128xbf16>, vector<64x128xf32> -> vector<64x128xf32>
    %c0_4 = arith.constant 0 : index
    %c0_5 = arith.constant 0 : index
    %4 = vector.load %arg4[%c0_4, %c0_5] : memref<1x128xf32, #tpu.memory_space<vmem>>, vector<1x128xf32>
    %5 = vector.broadcast %4 : vector<1x128xf32> to vector<64x128xf32>
    %6 = arith.addf %3, %5 : vector<64x128xf32>
    %7 = vector.shape_cast %6 : vector<64x128xf32> to vector<8x8x128xf32>
    %8 = arith.truncf %7 : vector<8x8x128xf32> to vector<8x8x128xbf16>
    %c0_6 = arith.constant 0 : index
    %c0_7 = arith.constant 0 : index
    %c0_8 = arith.constant 0 : index
    %9 = vector.load %arg15[%c0_6, %c0_7, %c0_8] : memref<8x8x128xbf16, #tpu.memory_space<vmem>>, vector<8x8x128xbf16>
    tpu.vector_store %arg15[%c0_6, %c0_7, %c0_8], %8 {strides = array<i32>} : memref<8x8x128xbf16, #tpu.memory_space<vmem>>, vector<8x8x128xbf16>,
    %cst_9 = arith.constant 0.000000e+00 : f32
    %10 = vector.broadcast %cst_9 : f32 to vector<8x32xf32>
    %c0_10 = arith.constant 0 : index
    %c0_11 = arith.constant 0 : index
    %11 = vector.load %arg16[%c0_10, %c0_11] : memref<8x32xf32, #tpu.memory_space<vmem>>, vector<8x32xf32>
    tpu.vector_store %arg16[%c0_10, %c0_11], %10 {strides = array<i32>} : memref<8x32xf32, #tpu.memory_space<vmem>>, vector<8x32xf32>,
    %c0_12 = arith.constant 0 : index
    %c0_13 = arith.constant 0 : index
    %12 = vector.load %arg3[%c0_12, %c0_13] : memref<32x128xbf16, #tpu.memory_space<vmem>>, vector<32x128xbf16>
    %c0_14 = arith.constant 0 : index
    %c0_15 = arith.constant 0 : index
    %c0_16 = arith.constant 0 : index
    %13 = vector.load %arg15[%c0_14, %c0_15, %c0_16] : memref<8x8x128xbf16, #tpu.memory_space<vmem>>, vector<1x8x128xbf16>
    %14 = vector.shape_cast %13 : vector<1x8x128xbf16> to vector<8x128xbf16>
    %15 = arith.extf %14 : vector<8x128xbf16> to vector<8x128xf32>
    %16 = vector.extract_strided_slice %15 {offsets = [0, 0], sizes = [8, 96], strides = [1, 1]} : vector<8x128xf32> to vector<8x96xf32>
    %cst_17 = arith.constant 5.000000e-01 : f32
    %17 = vector.broadcast %cst_17 : f32 to vector<8x96xf32>
    %18 = arith.mulf %17, %16 : vector<8x96xf32>
    %19 = math.tanh %18 : vector<8x96xf32>
    %cst_18 = arith.constant 1.000000e+00 : f32
    %20 = vector.broadcast %cst_18 : f32 to vector<8x96xf32>
    %21 = arith.addf %19, %20 : vector<8x96xf32>
    %cst_19 = arith.constant 5.000000e-01 : f32
    %22 = vector.broadcast %cst_19 : f32 to vector<8x96xf32>
    %23 = arith.mulf %22, %21 : vector<8x96xf32>
    %24 = vector.extract_strided_slice %15 {offsets = [0, 96], sizes = [8, 32], strides = [1, 1]} : vector<8x128xf32> to vector<8x32xf32>
    %25 = math.tanh %24 : vector<8x32xf32>
    %26 = vector.extract_strided_slice %23 {offsets = [0, 32], sizes = [8, 32], strides = [1, 1]} : vector<8x96xf32> to vector<8x32xf32>
    %c0_20 = arith.constant 0 : index
    %c0_21 = arith.constant 0 : index
    %27 = vector.load %arg16[%c0_20, %c0_21] : memref<8x32xf32, #tpu.memory_space<vmem>>, vector<8x32xf32>
    %28 = arith.mulf %26, %27 : vector<8x32xf32>
    %29 = vector.extract_strided_slice %23 {offsets = [0, 0], sizes = [8, 32], strides = [1, 1]} : vector<8x96xf32> to vector<8x32xf32>
    %30 = arith.mulf %29, %25 : vector<8x32xf32>
    %31 = arith.addf %28, %30 : vector<8x32xf32>
    %32 = vector.extract_strided_slice %23 {offsets = [0, 64], sizes = [8, 32], strides = [1, 1]} : vector<8x96xf32> to vector<8x32xf32>
    %33 = math.tanh %31 : vector<8x32xf32>
    %34 = arith.mulf %32, %33 : vector<8x32xf32>
    %c0_22 = arith.constant 0 : index
    %c0_23 = arith.constant 0 : index
    %35 = vector.load %arg16[%c0_22, %c0_23] : memref<8x32xf32, #tpu.memory_space<vmem>>, vector<8x32xf32>
    tpu.vector_store %arg16[%c0_22, %c0_23], %31 {strides = array<i32>} : memref<8x32xf32, #tpu.memory_space<vmem>>, vector<8x32xf32>,
    %36 = arith.truncf %34 : vector<8x32xf32> to vector<8x32xbf16>
    %c0_24 = arith.constant 0 : index
    %c0_25 = arith.constant 0 : index
    %c0_26 = arith.constant 0 : index
    %37 = vector.load %arg14[%c0_24, %c0_25, %c0_26] : memref<8x8x32xbf16, #tpu.memory_space<vmem>>, vector<1x8x32xbf16>
    %38 = vector.shape_cast %37 : vector<1x8x32xbf16> to vector<8x32xbf16>
    %39 = vector.shape_cast %36 : vector<8x32xbf16> to vector<1x8x32xbf16>
    tpu.vector_store %arg14[%c0_24, %c0_25, %c0_26], %39 {strides = array<i32>} : memref<8x8x32xbf16, #tpu.memory_space<vmem>>, vector<1x8x32xbf16>,
    %c1_i32 = arith.constant 1 : i32
    %40 = arith.index_cast %c1_i32 : i32 to index
    %c0_27 = arith.constant 0 : index
    %c0_28 = arith.constant 0 : index
    %41 = vector.load %arg15[%40, %c0_27, %c0_28] : memref<8x8x128xbf16, #tpu.memory_space<vmem>>, vector<1x8x128xbf16>
    %42 = vector.shape_cast %41 : vector<1x8x128xbf16> to vector<8x128xbf16>
    %c1_i32_29 = arith.constant 1 : i32
    %43 = arith.subi %c1_i32, %c1_i32_29 : i32
    %44 = arith.index_cast %43 : i32 to index
    %c0_30 = arith.constant 0 : index
    %c0_31 = arith.constant 0 : index
    %45 = vector.load %arg14[%44, %c0_30, %c0_31] : memref<8x8x32xbf16, #tpu.memory_space<vmem>>, vector<1x8x32xbf16>
    %46 = vector.shape_cast %45 : vector<1x8x32xbf16> to vector<8x32xbf16>
    %cst_32 = arith.constant dense<0.000000e+00> : vector<8x128xf32>
    %47 = tpu.matmul %46, %12, %cst_32 {dimension_numbers = #tpu.dot_dimension_numbers<[1], [0], [0], [1], [0, 0, 1, 1], [], []>} : vector<8x32xbf16>, vector<32x128xbf16>, vector<8x128xf32> -> vector<8x128xf32>
    %48 = arith.extf %42 : vector<8x128xbf16> to vector<8x128xf32>
    %49 = arith.addf %48, %47 : vector<8x128xf32>
    %50 = vector.extract_strided_slice %49 {offsets = [0, 0], sizes = [8, 96], strides = [1, 1]} : vector<8x128xf32> to vector<8x96xf32>
    %cst_33 = arith.constant 5.000000e-01 : f32
    %51 = vector.broadcast %cst_33 : f32 to vector<8x96xf32>
    %52 = arith.mulf %51, %50 : vector<8x96xf32>
    %53 = math.tanh %52 : vector<8x96xf32>
    %cst_34 = arith.constant 1.000000e+00 : f32
    %54 = vector.broadcast %cst_34 : f32 to vector<8x96xf32>
    %55 = arith.addf %53, %54 : vector<8x96xf32>
    %cst_35 = arith.constant 5.000000e-01 : f32
    %56 = vector.broadcast %cst_35 : f32 to vector<8x96xf32>
    %57 = arith.mulf %56, %55 : vector<8x96xf32>
    %58 = vector.extract_strided_slice %49 {offsets = [0, 96], sizes = [8, 32], strides = [1, 1]} : vector<8x128xf32> to vector<8x32xf32>
    %59 = math.tanh %58 : vector<8x32xf32>
    %60 = vector.extract_strided_slice %57 {offsets = [0, 32], sizes = [8, 32], strides = [1, 1]} : vector<8x96xf32> to vector<8x32xf32>
    %c0_36 = arith.constant 0 : index
    %c0_37 = arith.constant 0 : index
    %61 = vector.load %arg16[%c0_36, %c0_37] : memref<8x32xf32, #tpu.memory_space<vmem>>, vector<8x32xf32>
    %62 = arith.mulf %60, %61 : vector<8x32xf32>
    %63 = vector.extract_strided_slice %57 {offsets = [0, 0], sizes = [8, 32], strides = [1, 1]} : vector<8x96xf32> to vector<8x32xf32>
    %64 = arith.mulf %63, %59 : vector<8x32xf32>
    %65 = arith.addf %62, %64 : vector<8x32xf32>
    %66 = vector.extract_strided_slice %57 {offsets = [0, 64], sizes = [8, 32], strides = [1, 1]} : vector<8x96xf32> to vector<8x32xf32>
    %67 = math.tanh %65 : vector<8x32xf32>
    %68 = arith.mulf %66, %67 : vector<8x32xf32>
    %c0_38 = arith.constant 0 : index
    %c0_39 = arith.constant 0 : index
    %69 = vector.load %arg16[%c0_38, %c0_39] : memref<8x32xf32, #tpu.memory_space<vmem>>, vector<8x32xf32>
    tpu.vector_store %arg16[%c0_38, %c0_39], %65 {strides = array<i32>} : memref<8x32xf32, #tpu.memory_space<vmem>>, vector<8x32xf32>,
    %70 = arith.truncf %68 : vector<8x32xf32> to vector<8x32xbf16>
    %71 = arith.index_cast %c1_i32 : i32 to index
    %c0_40 = arith.constant 0 : index
    %c0_41 = arith.constant 0 : index
    %72 = vector.load %arg14[%71, %c0_40, %c0_41] : memref<8x8x32xbf16, #tpu.memory_space<vmem>>, vector<1x8x32xbf16>
    %73 = vector.shape_cast %72 : vector<1x8x32xbf16> to vector<8x32xbf16>
    %74 = vector.shape_cast %70 : vector<8x32xbf16> to vector<1x8x32xbf16>
    tpu.vector_store %arg14[%71, %c0_40, %c0_41], %74 {strides = array<i32>} : memref<8x8x32xbf16, #tpu.memory_space<vmem>>, vector<1x8x32xbf16>,
    %c2_i32 = arith.constant 2 : i32
    %75 = arith.index_cast %c2_i32 : i32 to index
    %c0_42 = arith.constant 0 : index
    %c0_43 = arith.constant 0 : index
    %76 = vector.load %arg15[%75, %c0_42, %c0_43] : memref<8x8x128xbf16, #tpu.memory_space<vmem>>, vector<1x8x128xbf16>
    %77 = vector.shape_cast %76 : vector<1x8x128xbf16> to vector<8x128xbf16>
    %c1_i32_44 = arith.constant 1 : i32
    %78 = arith.subi %c2_i32, %c1_i32_44 : i32
    %79 = arith.index_cast %78 : i32 to index
    %c0_45 = arith.constant 0 : index
    %c0_46 = arith.constant 0 : index
    %80 = vector.load %arg14[%79, %c0_45, %c0_46] : memref<8x8x32xbf16, #tpu.memory_space<vmem>>, vector<1x8x32xbf16>
    %81 = vector.shape_cast %80 : vector<1x8x32xbf16> to vector<8x32xbf16>
    %cst_47 = arith.constant dense<0.000000e+00> : vector<8x128xf32>
    %82 = tpu.matmul %81, %12, %cst_47 {dimension_numbers = #tpu.dot_dimension_numbers<[1], [0], [0], [1], [0, 0, 1, 1], [], []>} : vector<8x32xbf16>, vector<32x128xbf16>, vector<8x128xf32> -> vector<8x128xf32>
    %83 = arith.extf %77 : vector<8x128xbf16> to vector<8x128xf32>
    %84 = arith.addf %83, %82 : vector<8x128xf32>
    %85 = vector.extract_strided_slice %84 {offsets = [0, 0], sizes = [8, 96], strides = [1, 1]} : vector<8x128xf32> to vector<8x96xf32>
    %cst_48 = arith.constant 5.000000e-01 : f32
    %86 = vector.broadcast %cst_48 : f32 to vector<8x96xf32>
    %87 = arith.mulf %86, %85 : vector<8x96xf32>
    %88 = math.tanh %87 : vector<8x96xf32>
    %cst_49 = arith.constant 1.000000e+00 : f32
    %89 = vector.broadcast %cst_49 : f32 to vector<8x96xf32>
    %90 = arith.addf %88, %89 : vector<8x96xf32>
    %cst_50 = arith.constant 5.000000e-01 : f32
    %91 = vector.broadcast %cst_50 : f32 to vector<8x96xf32>
    %92 = arith.mulf %91, %90 : vector<8x96xf32>
    %93 = vector.extract_strided_slice %84 {offsets = [0, 96], sizes = [8, 32], strides = [1, 1]} : vector<8x128xf32> to vector<8x32xf32>
    %94 = math.tanh %93 : vector<8x32xf32>
    %95 = vector.extract_strided_slice %92 {offsets = [0, 32], sizes = [8, 32], strides = [1, 1]} : vector<8x96xf32> to vector<8x32xf32>
    %c0_51 = arith.constant 0 : index
    %c0_52 = arith.constant 0 : index
    %96 = vector.load %arg16[%c0_51, %c0_52] : memref<8x32xf32, #tpu.memory_space<vmem>>, vector<8x32xf32>
    %97 = arith.mulf %95, %96 : vector<8x32xf32>
    %98 = vector.extract_strided_slice %92 {offsets = [0, 0], sizes = [8, 32], strides = [1, 1]} : vector<8x96xf32> to vector<8x32xf32>
    %99 = arith.mulf %98, %94 : vector<8x32xf32>
    %100 = arith.addf %97, %99 : vector<8x32xf32>
    %101 = vector.extract_strided_slice %92 {offsets = [0, 64], sizes = [8, 32], strides = [1, 1]} : vector<8x96xf32> to vector<8x32xf32>
    %102 = math.tanh %100 : vector<8x32xf32>
    %103 = arith.mulf %101, %102 : vector<8x32xf32>
    %c0_53 = arith.constant 0 : index
    %c0_54 = arith.constant 0 : index
    %104 = vector.load %arg16[%c0_53, %c0_54] : memref<8x32xf32, #tpu.memory_space<vmem>>, vector<8x32xf32>
    tpu.vector_store %arg16[%c0_53, %c0_54], %100 {strides = array<i32>} : memref<8x32xf32, #tpu.memory_space<vmem>>, vector<8x32xf32>,
    %105 = arith.truncf %103 : vector<8x32xf32> to vector<8x32xbf16>
    %106 = arith.index_cast %c2_i32 : i32 to index
    %c0_55 = arith.constant 0 : index
    %c0_56 = arith.constant 0 : index
    %107 = vector.load %arg14[%106, %c0_55, %c0_56] : memref<8x8x32xbf16, #tpu.memory_space<vmem>>, vector<1x8x32xbf16>
    %108 = vector.shape_cast %107 : vector<1x8x32xbf16> to vector<8x32xbf16>
    %109 = vector.shape_cast %105 : vector<8x32xbf16> to vector<1x8x32xbf16>
    tpu.vector_store %arg14[%106, %c0_55, %c0_56], %109 {strides = array<i32>} : memref<8x8x32xbf16, #tpu.memory_space<vmem>>, vector<1x8x32xbf16>,
    %c3_i32 = arith.constant 3 : i32
    %110 = arith.index_cast %c3_i32 : i32 to index
    %c0_57 = arith.constant 0 : index
    %c0_58 = arith.constant 0 : index
    %111 = vector.load %arg15[%110, %c0_57, %c0_58] : memref<8x8x128xbf16, #tpu.memory_space<vmem>>, vector<1x8x128xbf16>
    %112 = vector.shape_cast %111 : vector<1x8x128xbf16> to vector<8x128xbf16>
    %c1_i32_59 = arith.constant 1 : i32
    %113 = arith.subi %c3_i32, %c1_i32_59 : i32
    %114 = arith.index_cast %113 : i32 to index
    %c0_60 = arith.constant 0 : index
    %c0_61 = arith.constant 0 : index
    %115 = vector.load %arg14[%114, %c0_60, %c0_61] : memref<8x8x32xbf16, #tpu.memory_space<vmem>>, vector<1x8x32xbf16>
    %116 = vector.shape_cast %115 : vector<1x8x32xbf16> to vector<8x32xbf16>
    %cst_62 = arith.constant dense<0.000000e+00> : vector<8x128xf32>
    %117 = tpu.matmul %116, %12, %cst_62 {dimension_numbers = #tpu.dot_dimension_numbers<[1], [0], [0], [1], [0, 0, 1, 1], [], []>} : vector<8x32xbf16>, vector<32x128xbf16>, vector<8x128xf32> -> vector<8x128xf32>
    %118 = arith.extf %112 : vector<8x128xbf16> to vector<8x128xf32>
    %119 = arith.addf %118, %117 : vector<8x128xf32>
    %120 = vector.extract_strided_slice %119 {offsets = [0, 0], sizes = [8, 96], strides = [1, 1]} : vector<8x128xf32> to vector<8x96xf32>
    %cst_63 = arith.constant 5.000000e-01 : f32
    %121 = vector.broadcast %cst_63 : f32 to vector<8x96xf32>
    %122 = arith.mulf %121, %120 : vector<8x96xf32>
    %123 = math.tanh %122 : vector<8x96xf32>
    %cst_64 = arith.constant 1.000000e+00 : f32
    %124 = vector.broadcast %cst_64 : f32 to vector<8x96xf32>
    %125 = arith.addf %123, %124 : vector<8x96xf32>
    %cst_65 = arith.constant 5.000000e-01 : f32
    %126 = vector.broadcast %cst_65 : f32 to vector<8x96xf32>
    %127 = arith.mulf %126, %125 : vector<8x96xf32>
    %128 = vector.extract_strided_slice %119 {offsets = [0, 96], sizes = [8, 32], strides = [1, 1]} : vector<8x128xf32> to vector<8x32xf32>
    %129 = math.tanh %128 : vector<8x32xf32>
    %130 = vector.extract_strided_slice %127 {offsets = [0, 32], sizes = [8, 32], strides = [1, 1]} : vector<8x96xf32> to vector<8x32xf32>
    %c0_66 = arith.constant 0 : index
    %c0_67 = arith.constant 0 : index
    %131 = vector.load %arg16[%c0_66, %c0_67] : memref<8x32xf32, #tpu.memory_space<vmem>>, vector<8x32xf32>
    %132 = arith.mulf %130, %131 : vector<8x32xf32>
    %133 = vector.extract_strided_slice %127 {offsets = [0, 0], sizes = [8, 32], strides = [1, 1]} : vector<8x96xf32> to vector<8x32xf32>
    %134 = arith.mulf %133, %129 : vector<8x32xf32>
    %135 = arith.addf %132, %134 : vector<8x32xf32>
    %136 = vector.extract_strided_slice %127 {offsets = [0, 64], sizes = [8, 32], strides = [1, 1]} : vector<8x96xf32> to vector<8x32xf32>
    %137 = math.tanh %135 : vector<8x32xf32>
    %138 = arith.mulf %136, %137 : vector<8x32xf32>
    %c0_68 = arith.constant 0 : index
    %c0_69 = arith.constant 0 : index
    %139 = vector.load %arg16[%c0_68, %c0_69] : memref<8x32xf32, #tpu.memory_space<vmem>>, vector<8x32xf32>
    tpu.vector_store %arg16[%c0_68, %c0_69], %135 {strides = array<i32>} : memref<8x32xf32, #tpu.memory_space<vmem>>, vector<8x32xf32>,
    %140 = arith.truncf %138 : vector<8x32xf32> to vector<8x32xbf16>
    %141 = arith.index_cast %c3_i32 : i32 to index
    %c0_70 = arith.constant 0 : index
    %c0_71 = arith.constant 0 : index
    %142 = vector.load %arg14[%141, %c0_70, %c0_71] : memref<8x8x32xbf16, #tpu.memory_space<vmem>>, vector<1x8x32xbf16>
    %143 = vector.shape_cast %142 : vector<1x8x32xbf16> to vector<8x32xbf16>
    %144 = vector.shape_cast %140 : vector<8x32xbf16> to vector<1x8x32xbf16>
    tpu.vector_store %arg14[%141, %c0_70, %c0_71], %144 {strides = array<i32>} : memref<8x8x32xbf16, #tpu.memory_space<vmem>>, vector<1x8x32xbf16>,
    %c4_i32 = arith.constant 4 : i32
    %145 = arith.index_cast %c4_i32 : i32 to index
    %c0_72 = arith.constant 0 : index
    %c0_73 = arith.constant 0 : index
    %146 = vector.load %arg15[%145, %c0_72, %c0_73] : memref<8x8x128xbf16, #tpu.memory_space<vmem>>, vector<1x8x128xbf16>
    %147 = vector.shape_cast %146 : vector<1x8x128xbf16> to vector<8x128xbf16>
    %c1_i32_74 = arith.constant 1 : i32
    %148 = arith.subi %c4_i32, %c1_i32_74 : i32
    %149 = arith.index_cast %148 : i32 to index
    %c0_75 = arith.constant 0 : index
    %c0_76 = arith.constant 0 : index
    %150 = vector.load %arg14[%149, %c0_75, %c0_76] : memref<8x8x32xbf16, #tpu.memory_space<vmem>>, vector<1x8x32xbf16>
    %151 = vector.shape_cast %150 : vector<1x8x32xbf16> to vector<8x32xbf16>
    %cst_77 = arith.constant dense<0.000000e+00> : vector<8x128xf32>
    %152 = tpu.matmul %151, %12, %cst_77 {dimension_numbers = #tpu.dot_dimension_numbers<[1], [0], [0], [1], [0, 0, 1, 1], [], []>} : vector<8x32xbf16>, vector<32x128xbf16>, vector<8x128xf32> -> vector<8x128xf32>
    %153 = arith.extf %147 : vector<8x128xbf16> to vector<8x128xf32>
    %154 = arith.addf %153, %152 : vector<8x128xf32>
    %155 = vector.extract_strided_slice %154 {offsets = [0, 0], sizes = [8, 96], strides = [1, 1]} : vector<8x128xf32> to vector<8x96xf32>
    %cst_78 = arith.constant 5.000000e-01 : f32
    %156 = vector.broadcast %cst_78 : f32 to vector<8x96xf32>
    %157 = arith.mulf %156, %155 : vector<8x96xf32>
    %158 = math.tanh %157 : vector<8x96xf32>
    %cst_79 = arith.constant 1.000000e+00 : f32
    %159 = vector.broadcast %cst_79 : f32 to vector<8x96xf32>
    %160 = arith.addf %158, %159 : vector<8x96xf32>
    %cst_80 = arith.constant 5.000000e-01 : f32
    %161 = vector.broadcast %cst_80 : f32 to vector<8x96xf32>
    %162 = arith.mulf %161, %160 : vector<8x96xf32>
    %163 = vector.extract_strided_slice %154 {offsets = [0, 96], sizes = [8, 32], strides = [1, 1]} : vector<8x128xf32> to vector<8x32xf32>
    %164 = math.tanh %163 : vector<8x32xf32>
    %165 = vector.extract_strided_slice %162 {offsets = [0, 32], sizes = [8, 32], strides = [1, 1]} : vector<8x96xf32> to vector<8x32xf32>
    %c0_81 = arith.constant 0 : index
    %c0_82 = arith.constant 0 : index
    %166 = vector.load %arg16[%c0_81, %c0_82] : memref<8x32xf32, #tpu.memory_space<vmem>>, vector<8x32xf32>
    %167 = arith.mulf %165, %166 : vector<8x32xf32>
    %168 = vector.extract_strided_slice %162 {offsets = [0, 0], sizes = [8, 32], strides = [1, 1]} : vector<8x96xf32> to vector<8x32xf32>
    %169 = arith.mulf %168, %164 : vector<8x32xf32>
    %170 = arith.addf %167, %169 : vector<8x32xf32>
    %171 = vector.extract_strided_slice %162 {offsets = [0, 64], sizes = [8, 32], strides = [1, 1]} : vector<8x96xf32> to vector<8x32xf32>
    %172 = math.tanh %170 : vector<8x32xf32>
    %173 = arith.mulf %171, %172 : vector<8x32xf32>
    %c0_83 = arith.constant 0 : index
    %c0_84 = arith.constant 0 : index
    %174 = vector.load %arg16[%c0_83, %c0_84] : memref<8x32xf32, #tpu.memory_space<vmem>>, vector<8x32xf32>
    tpu.vector_store %arg16[%c0_83, %c0_84], %170 {strides = array<i32>} : memref<8x32xf32, #tpu.memory_space<vmem>>, vector<8x32xf32>,
    %175 = arith.truncf %173 : vector<8x32xf32> to vector<8x32xbf16>
    %176 = arith.index_cast %c4_i32 : i32 to index
    %c0_85 = arith.constant 0 : index
    %c0_86 = arith.constant 0 : index
    %177 = vector.load %arg14[%176, %c0_85, %c0_86] : memref<8x8x32xbf16, #tpu.memory_space<vmem>>, vector<1x8x32xbf16>
    %178 = vector.shape_cast %177 : vector<1x8x32xbf16> to vector<8x32xbf16>
    %179 = vector.shape_cast %175 : vector<8x32xbf16> to vector<1x8x32xbf16>
    tpu.vector_store %arg14[%176, %c0_85, %c0_86], %179 {strides = array<i32>} : memref<8x8x32xbf16, #tpu.memory_space<vmem>>, vector<1x8x32xbf16>,
    %c5_i32 = arith.constant 5 : i32
    %180 = arith.index_cast %c5_i32 : i32 to index
    %c0_87 = arith.constant 0 : index
    %c0_88 = arith.constant 0 : index
    %181 = vector.load %arg15[%180, %c0_87, %c0_88] : memref<8x8x128xbf16, #tpu.memory_space<vmem>>, vector<1x8x128xbf16>
    %182 = vector.shape_cast %181 : vector<1x8x128xbf16> to vector<8x128xbf16>
    %c1_i32_89 = arith.constant 1 : i32
    %183 = arith.subi %c5_i32, %c1_i32_89 : i32
    %184 = arith.index_cast %183 : i32 to index
    %c0_90 = arith.constant 0 : index
    %c0_91 = arith.constant 0 : index
    %185 = vector.load %arg14[%184, %c0_90, %c0_91] : memref<8x8x32xbf16, #tpu.memory_space<vmem>>, vector<1x8x32xbf16>
    %186 = vector.shape_cast %185 : vector<1x8x32xbf16> to vector<8x32xbf16>
    %cst_92 = arith.constant dense<0.000000e+00> : vector<8x128xf32>
    %187 = tpu.matmul %186, %12, %cst_92 {dimension_numbers = #tpu.dot_dimension_numbers<[1], [0], [0], [1], [0, 0, 1, 1], [], []>} : vector<8x32xbf16>, vector<32x128xbf16>, vector<8x128xf32> -> vector<8x128xf32>
    %188 = arith.extf %182 : vector<8x128xbf16> to vector<8x128xf32>
    %189 = arith.addf %188, %187 : vector<8x128xf32>
    %190 = vector.extract_strided_slice %189 {offsets = [0, 0], sizes = [8, 96], strides = [1, 1]} : vector<8x128xf32> to vector<8x96xf32>
    %cst_93 = arith.constant 5.000000e-01 : f32
    %191 = vector.broadcast %cst_93 : f32 to vector<8x96xf32>
    %192 = arith.mulf %191, %190 : vector<8x96xf32>
    %193 = math.tanh %192 : vector<8x96xf32>
    %cst_94 = arith.constant 1.000000e+00 : f32
    %194 = vector.broadcast %cst_94 : f32 to vector<8x96xf32>
    %195 = arith.addf %193, %194 : vector<8x96xf32>
    %cst_95 = arith.constant 5.000000e-01 : f32
    %196 = vector.broadcast %cst_95 : f32 to vector<8x96xf32>
    %197 = arith.mulf %196, %195 : vector<8x96xf32>
    %198 = vector.extract_strided_slice %189 {offsets = [0, 96], sizes = [8, 32], strides = [1, 1]} : vector<8x128xf32> to vector<8x32xf32>
    %199 = math.tanh %198 : vector<8x32xf32>
    %200 = vector.extract_strided_slice %197 {offsets = [0, 32], sizes = [8, 32], strides = [1, 1]} : vector<8x96xf32> to vector<8x32xf32>
    %c0_96 = arith.constant 0 : index
    %c0_97 = arith.constant 0 : index
    %201 = vector.load %arg16[%c0_96, %c0_97] : memref<8x32xf32, #tpu.memory_space<vmem>>, vector<8x32xf32>
    %202 = arith.mulf %200, %201 : vector<8x32xf32>
    %203 = vector.extract_strided_slice %197 {offsets = [0, 0], sizes = [8, 32], strides = [1, 1]} : vector<8x96xf32> to vector<8x32xf32>
    %204 = arith.mulf %203, %199 : vector<8x32xf32>
    %205 = arith.addf %202, %204 : vector<8x32xf32>
    %206 = vector.extract_strided_slice %197 {offsets = [0, 64], sizes = [8, 32], strides = [1, 1]} : vector<8x96xf32> to vector<8x32xf32>
    %207 = math.tanh %205 : vector<8x32xf32>
    %208 = arith.mulf %206, %207 : vector<8x32xf32>
    %c0_98 = arith.constant 0 : index
    %c0_99 = arith.constant 0 : index
    %209 = vector.load %arg16[%c0_98, %c0_99] : memref<8x32xf32, #tpu.memory_space<vmem>>, vector<8x32xf32>
    tpu.vector_store %arg16[%c0_98, %c0_99], %205 {strides = array<i32>} : memref<8x32xf32, #tpu.memory_space<vmem>>, vector<8x32xf32>,
    %210 = arith.truncf %208 : vector<8x32xf32> to vector<8x32xbf16>
    %211 = arith.index_cast %c5_i32 : i32 to index
    %c0_100 = arith.constant 0 : index
    %c0_101 = arith.constant 0 : index
    %212 = vector.load %arg14[%211, %c0_100, %c0_101] : memref<8x8x32xbf16, #tpu.memory_space<vmem>>, vector<1x8x32xbf16>
    %213 = vector.shape_cast %212 : vector<1x8x32xbf16> to vector<8x32xbf16>
    %214 = vector.shape_cast %210 : vector<8x32xbf16> to vector<1x8x32xbf16>
    tpu.vector_store %arg14[%211, %c0_100, %c0_101], %214 {strides = array<i32>} : memref<8x8x32xbf16, #tpu.memory_space<vmem>>, vector<1x8x32xbf16>,
    %c6_i32 = arith.constant 6 : i32
    %215 = arith.index_cast %c6_i32 : i32 to index
    %c0_102 = arith.constant 0 : index
    %c0_103 = arith.constant 0 : index
    %216 = vector.load %arg15[%215, %c0_102, %c0_103] : memref<8x8x128xbf16, #tpu.memory_space<vmem>>, vector<1x8x128xbf16>
    %217 = vector.shape_cast %216 : vector<1x8x128xbf16> to vector<8x128xbf16>
    %c1_i32_104 = arith.constant 1 : i32
    %218 = arith.subi %c6_i32, %c1_i32_104 : i32
    %219 = arith.index_cast %218 : i32 to index
    %c0_105 = arith.constant 0 : index
    %c0_106 = arith.constant 0 : index
    %220 = vector.load %arg14[%219, %c0_105, %c0_106] : memref<8x8x32xbf16, #tpu.memory_space<vmem>>, vector<1x8x32xbf16>
    %221 = vector.shape_cast %220 : vector<1x8x32xbf16> to vector<8x32xbf16>
    %cst_107 = arith.constant dense<0.000000e+00> : vector<8x128xf32>
    %222 = tpu.matmul %221, %12, %cst_107 {dimension_numbers = #tpu.dot_dimension_numbers<[1], [0], [0], [1], [0, 0, 1, 1], [], []>} : vector<8x32xbf16>, vector<32x128xbf16>, vector<8x128xf32> -> vector<8x128xf32>
    %223 = arith.extf %217 : vector<8x128xbf16> to vector<8x128xf32>
    %224 = arith.addf %223, %222 : vector<8x128xf32>
    %225 = vector.extract_strided_slice %224 {offsets = [0, 0], sizes = [8, 96], strides = [1, 1]} : vector<8x128xf32> to vector<8x96xf32>
    %cst_108 = arith.constant 5.000000e-01 : f32
    %226 = vector.broadcast %cst_108 : f32 to vector<8x96xf32>
    %227 = arith.mulf %226, %225 : vector<8x96xf32>
    %228 = math.tanh %227 : vector<8x96xf32>
    %cst_109 = arith.constant 1.000000e+00 : f32
    %229 = vector.broadcast %cst_109 : f32 to vector<8x96xf32>
    %230 = arith.addf %228, %229 : vector<8x96xf32>
    %cst_110 = arith.constant 5.000000e-01 : f32
    %231 = vector.broadcast %cst_110 : f32 to vector<8x96xf32>
    %232 = arith.mulf %231, %230 : vector<8x96xf32>
    %233 = vector.extract_strided_slice %224 {offsets = [0, 96], sizes = [8, 32], strides = [1, 1]} : vector<8x128xf32> to vector<8x32xf32>
    %234 = math.tanh %233 : vector<8x32xf32>
    %235 = vector.extract_strided_slice %232 {offsets = [0, 32], sizes = [8, 32], strides = [1, 1]} : vector<8x96xf32> to vector<8x32xf32>
    %c0_111 = arith.constant 0 : index
    %c0_112 = arith.constant 0 : index
    %236 = vector.load %arg16[%c0_111, %c0_112] : memref<8x32xf32, #tpu.memory_space<vmem>>, vector<8x32xf32>
    %237 = arith.mulf %235, %236 : vector<8x32xf32>
    %238 = vector.extract_strided_slice %232 {offsets = [0, 0], sizes = [8, 32], strides = [1, 1]} : vector<8x96xf32> to vector<8x32xf32>
    %239 = arith.mulf %238, %234 : vector<8x32xf32>
    %240 = arith.addf %237, %239 : vector<8x32xf32>
    %241 = vector.extract_strided_slice %232 {offsets = [0, 64], sizes = [8, 32], strides = [1, 1]} : vector<8x96xf32> to vector<8x32xf32>
    %242 = math.tanh %240 : vector<8x32xf32>
    %243 = arith.mulf %241, %242 : vector<8x32xf32>
    %c0_113 = arith.constant 0 : index
    %c0_114 = arith.constant 0 : index
    %244 = vector.load %arg16[%c0_113, %c0_114] : memref<8x32xf32, #tpu.memory_space<vmem>>, vector<8x32xf32>
    tpu.vector_store %arg16[%c0_113, %c0_114], %240 {strides = array<i32>} : memref<8x32xf32, #tpu.memory_space<vmem>>, vector<8x32xf32>,
    %245 = arith.truncf %243 : vector<8x32xf32> to vector<8x32xbf16>
    %246 = arith.index_cast %c6_i32 : i32 to index
    %c0_115 = arith.constant 0 : index
    %c0_116 = arith.constant 0 : index
    %247 = vector.load %arg14[%246, %c0_115, %c0_116] : memref<8x8x32xbf16, #tpu.memory_space<vmem>>, vector<1x8x32xbf16>
    %248 = vector.shape_cast %247 : vector<1x8x32xbf16> to vector<8x32xbf16>
    %249 = vector.shape_cast %245 : vector<8x32xbf16> to vector<1x8x32xbf16>
    tpu.vector_store %arg14[%246, %c0_115, %c0_116], %249 {strides = array<i32>} : memref<8x8x32xbf16, #tpu.memory_space<vmem>>, vector<1x8x32xbf16>,
    %c7_i32 = arith.constant 7 : i32
    %250 = arith.index_cast %c7_i32 : i32 to index
    %c0_117 = arith.constant 0 : index
    %c0_118 = arith.constant 0 : index
    %251 = vector.load %arg15[%250, %c0_117, %c0_118] : memref<8x8x128xbf16, #tpu.memory_space<vmem>>, vector<1x8x128xbf16>
    %252 = vector.shape_cast %251 : vector<1x8x128xbf16> to vector<8x128xbf16>
    %c1_i32_119 = arith.constant 1 : i32
    %253 = arith.subi %c7_i32, %c1_i32_119 : i32
    %254 = arith.index_cast %253 : i32 to index
    %c0_120 = arith.constant 0 : index
    %c0_121 = arith.constant 0 : index
    %255 = vector.load %arg14[%254, %c0_120, %c0_121] : memref<8x8x32xbf16, #tpu.memory_space<vmem>>, vector<1x8x32xbf16>
    %256 = vector.shape_cast %255 : vector<1x8x32xbf16> to vector<8x32xbf16>
    %cst_122 = arith.constant dense<0.000000e+00> : vector<8x128xf32>
    %257 = tpu.matmul %256, %12, %cst_122 {dimension_numbers = #tpu.dot_dimension_numbers<[1], [0], [0], [1], [0, 0, 1, 1], [], []>} : vector<8x32xbf16>, vector<32x128xbf16>, vector<8x128xf32> -> vector<8x128xf32>
    %258 = arith.extf %252 : vector<8x128xbf16> to vector<8x128xf32>
    %259 = arith.addf %258, %257 : vector<8x128xf32>
    %260 = vector.extract_strided_slice %259 {offsets = [0, 0], sizes = [8, 96], strides = [1, 1]} : vector<8x128xf32> to vector<8x96xf32>
    %cst_123 = arith.constant 5.000000e-01 : f32
    %261 = vector.broadcast %cst_123 : f32 to vector<8x96xf32>
    %262 = arith.mulf %261, %260 : vector<8x96xf32>
    %263 = math.tanh %262 : vector<8x96xf32>
    %cst_124 = arith.constant 1.000000e+00 : f32
    %264 = vector.broadcast %cst_124 : f32 to vector<8x96xf32>
    %265 = arith.addf %263, %264 : vector<8x96xf32>
    %cst_125 = arith.constant 5.000000e-01 : f32
    %266 = vector.broadcast %cst_125 : f32 to vector<8x96xf32>
    %267 = arith.mulf %266, %265 : vector<8x96xf32>
    %268 = vector.extract_strided_slice %259 {offsets = [0, 96], sizes = [8, 32], strides = [1, 1]} : vector<8x128xf32> to vector<8x32xf32>
    %269 = math.tanh %268 : vector<8x32xf32>
    %270 = vector.extract_strided_slice %267 {offsets = [0, 32], sizes = [8, 32], strides = [1, 1]} : vector<8x96xf32> to vector<8x32xf32>
    %c0_126 = arith.constant 0 : index
    %c0_127 = arith.constant 0 : index
    %271 = vector.load %arg16[%c0_126, %c0_127] : memref<8x32xf32, #tpu.memory_space<vmem>>, vector<8x32xf32>
    %272 = arith.mulf %270, %271 : vector<8x32xf32>
    %273 = vector.extract_strided_slice %267 {offsets = [0, 0], sizes = [8, 32], strides = [1, 1]} : vector<8x96xf32> to vector<8x32xf32>
    %274 = arith.mulf %273, %269 : vector<8x32xf32>
    %275 = arith.addf %272, %274 : vector<8x32xf32>
    %276 = vector.extract_strided_slice %267 {offsets = [0, 64], sizes = [8, 32], strides = [1, 1]} : vector<8x96xf32> to vector<8x32xf32>
    %277 = math.tanh %275 : vector<8x32xf32>
    %278 = arith.mulf %276, %277 : vector<8x32xf32>
    %c0_128 = arith.constant 0 : index
    %c0_129 = arith.constant 0 : index
    %279 = vector.load %arg16[%c0_128, %c0_129] : memref<8x32xf32, #tpu.memory_space<vmem>>, vector<8x32xf32>
    tpu.vector_store %arg16[%c0_128, %c0_129], %275 {strides = array<i32>} : memref<8x32xf32, #tpu.memory_space<vmem>>, vector<8x32xf32>,
    %280 = arith.truncf %278 : vector<8x32xf32> to vector<8x32xbf16>
    %281 = arith.index_cast %c7_i32 : i32 to index
    %c0_130 = arith.constant 0 : index
    %c0_131 = arith.constant 0 : index
    %282 = vector.load %arg14[%281, %c0_130, %c0_131] : memref<8x8x32xbf16, #tpu.memory_space<vmem>>, vector<1x8x32xbf16>
    %283 = vector.shape_cast %282 : vector<1x8x32xbf16> to vector<8x32xbf16>
    %284 = vector.shape_cast %280 : vector<8x32xbf16> to vector<1x8x32xbf16>
    tpu.vector_store %arg14[%281, %c0_130, %c0_131], %284 {strides = array<i32>} : memref<8x8x32xbf16, #tpu.memory_space<vmem>>, vector<1x8x32xbf16>,
    %c7_i32_132 = arith.constant 7 : i32
    %c0_133 = arith.constant 0 : index
    %c0_134 = arith.constant 0 : index
    %c0_135 = arith.constant 0 : index
    %285 = vector.load %arg14[%c0_133, %c0_134, %c0_135] : memref<8x8x32xbf16, #tpu.memory_space<vmem>>, vector<8x8x32xbf16>
    %286 = vector.shape_cast %285 : vector<8x8x32xbf16> to vector<64x32xbf16>
    %c0_136 = arith.constant 0 : index
    %c0_137 = arith.constant 0 : index
    %287 = vector.load %arg5[%c0_136, %c0_137] : memref<32x128xbf16, #tpu.memory_space<vmem>>, vector<32x128xbf16>
    %cst_138 = arith.constant dense<0.000000e+00> : vector<64x128xf32>
    %288 = tpu.matmul %286, %287, %cst_138 {dimension_numbers = #tpu.dot_dimension_numbers<[1], [0], [0], [1], [0, 0, 1, 1], [], []>} : vector<64x32xbf16>, vector<32x128xbf16>, vector<64x128xf32> -> vector<64x128xf32>
    %c0_139 = arith.constant 0 : index
    %c0_140 = arith.constant 0 : index
    %289 = vector.load %arg7[%c0_139, %c0_140] : memref<1x128xf32, #tpu.memory_space<vmem>>, vector<1x128xf32>
    %290 = vector.broadcast %289 : vector<1x128xf32> to vector<64x128xf32>
    %291 = arith.addf %288, %290 : vector<64x128xf32>
    %292 = vector.shape_cast %291 : vector<64x128xf32> to vector<8x8x128xf32>
    %293 = arith.truncf %292 : vector<8x8x128xf32> to vector<8x8x128xbf16>
    %c0_141 = arith.constant 0 : index
    %c0_142 = arith.constant 0 : index
    %c0_143 = arith.constant 0 : index
    %294 = vector.load %arg15[%c0_141, %c0_142, %c0_143] : memref<8x8x128xbf16, #tpu.memory_space<vmem>>, vector<8x8x128xbf16>
    tpu.vector_store %arg15[%c0_141, %c0_142, %c0_143], %293 {strides = array<i32>} : memref<8x8x128xbf16, #tpu.memory_space<vmem>>, vector<8x8x128xbf16>,
    %cst_144 = arith.constant 0.000000e+00 : f32
    %295 = vector.broadcast %cst_144 : f32 to vector<8x32xf32>
    %c0_145 = arith.constant 0 : index
    %c0_146 = arith.constant 0 : index
    %296 = vector.load %arg16[%c0_145, %c0_146] : memref<8x32xf32, #tpu.memory_space<vmem>>, vector<8x32xf32>
    tpu.vector_store %arg16[%c0_145, %c0_146], %295 {strides = array<i32>} : memref<8x32xf32, #tpu.memory_space<vmem>>, vector<8x32xf32>,
    %c0_147 = arith.constant 0 : index
    %c0_148 = arith.constant 0 : index
    %297 = vector.load %arg6[%c0_147, %c0_148] : memref<32x128xbf16, #tpu.memory_space<vmem>>, vector<32x128xbf16>
    %c0_149 = arith.constant 0 : index
    %c0_150 = arith.constant 0 : index
    %c0_151 = arith.constant 0 : index
    %298 = vector.load %arg15[%c0_149, %c0_150, %c0_151] : memref<8x8x128xbf16, #tpu.memory_space<vmem>>, vector<1x8x128xbf16>
    %299 = vector.shape_cast %298 : vector<1x8x128xbf16> to vector<8x128xbf16>
    %300 = arith.extf %299 : vector<8x128xbf16> to vector<8x128xf32>
    %301 = vector.extract_strided_slice %300 {offsets = [0, 0], sizes = [8, 96], strides = [1, 1]} : vector<8x128xf32> to vector<8x96xf32>
    %cst_152 = arith.constant 5.000000e-01 : f32
    %302 = vector.broadcast %cst_152 : f32 to vector<8x96xf32>
    %303 = arith.mulf %302, %301 : vector<8x96xf32>
    %304 = math.tanh %303 : vector<8x96xf32>
    %cst_153 = arith.constant 1.000000e+00 : f32
    %305 = vector.broadcast %cst_153 : f32 to vector<8x96xf32>
    %306 = arith.addf %304, %305 : vector<8x96xf32>
    %cst_154 = arith.constant 5.000000e-01 : f32
    %307 = vector.broadcast %cst_154 : f32 to vector<8x96xf32>
    %308 = arith.mulf %307, %306 : vector<8x96xf32>
    %309 = vector.extract_strided_slice %300 {offsets = [0, 96], sizes = [8, 32], strides = [1, 1]} : vector<8x128xf32> to vector<8x32xf32>
    %310 = math.tanh %309 : vector<8x32xf32>
    %311 = vector.extract_strided_slice %308 {offsets = [0, 32], sizes = [8, 32], strides = [1, 1]} : vector<8x96xf32> to vector<8x32xf32>
    %c0_155 = arith.constant 0 : index
    %c0_156 = arith.constant 0 : index
    %312 = vector.load %arg16[%c0_155, %c0_156] : memref<8x32xf32, #tpu.memory_space<vmem>>, vector<8x32xf32>
    %313 = arith.mulf %311, %312 : vector<8x32xf32>
    %314 = vector.extract_strided_slice %308 {offsets = [0, 0], sizes = [8, 32], strides = [1, 1]} : vector<8x96xf32> to vector<8x32xf32>
    %315 = arith.mulf %314, %310 : vector<8x32xf32>
    %316 = arith.addf %313, %315 : vector<8x32xf32>
    %317 = vector.extract_strided_slice %308 {offsets = [0, 64], sizes = [8, 32], strides = [1, 1]} : vector<8x96xf32> to vector<8x32xf32>
    %318 = math.tanh %316 : vector<8x32xf32>
    %319 = arith.mulf %317, %318 : vector<8x32xf32>
    %c0_157 = arith.constant 0 : index
    %c0_158 = arith.constant 0 : index
    %320 = vector.load %arg16[%c0_157, %c0_158] : memref<8x32xf32, #tpu.memory_space<vmem>>, vector<8x32xf32>
    tpu.vector_store %arg16[%c0_157, %c0_158], %316 {strides = array<i32>} : memref<8x32xf32, #tpu.memory_space<vmem>>, vector<8x32xf32>,
    %321 = arith.truncf %319 : vector<8x32xf32> to vector<8x32xbf16>
    %c0_159 = arith.constant 0 : index
    %c0_160 = arith.constant 0 : index
    %c0_161 = arith.constant 0 : index
    %322 = vector.load %arg14[%c0_159, %c0_160, %c0_161] : memref<8x8x32xbf16, #tpu.memory_space<vmem>>, vector<1x8x32xbf16>
    %323 = vector.shape_cast %322 : vector<1x8x32xbf16> to vector<8x32xbf16>
    %324 = vector.shape_cast %321 : vector<8x32xbf16> to vector<1x8x32xbf16>
    tpu.vector_store %arg14[%c0_159, %c0_160, %c0_161], %324 {strides = array<i32>} : memref<8x8x32xbf16, #tpu.memory_space<vmem>>, vector<1x8x32xbf16>,
    %c1_i32_162 = arith.constant 1 : i32
    %325 = arith.index_cast %c1_i32_162 : i32 to index
    %c0_163 = arith.constant 0 : index
    %c0_164 = arith.constant 0 : index
    %326 = vector.load %arg15[%325, %c0_163, %c0_164] : memref<8x8x128xbf16, #tpu.memory_space<vmem>>, vector<1x8x128xbf16>
    %327 = vector.shape_cast %326 : vector<1x8x128xbf16> to vector<8x128xbf16>
    %c1_i32_165 = arith.constant 1 : i32
    %328 = arith.subi %c1_i32_162, %c1_i32_165 : i32
    %329 = arith.index_cast %328 : i32 to index
    %c0_166 = arith.constant 0 : index
    %c0_167 = arith.constant 0 : index
    %330 = vector.load %arg14[%329, %c0_166, %c0_167] : memref<8x8x32xbf16, #tpu.memory_space<vmem>>, vector<1x8x32xbf16>
    %331 = vector.shape_cast %330 : vector<1x8x32xbf16> to vector<8x32xbf16>
    %cst_168 = arith.constant dense<0.000000e+00> : vector<8x128xf32>
    %332 = tpu.matmul %331, %297, %cst_168 {dimension_numbers = #tpu.dot_dimension_numbers<[1], [0], [0], [1], [0, 0, 1, 1], [], []>} : vector<8x32xbf16>, vector<32x128xbf16>, vector<8x128xf32> -> vector<8x128xf32>
    %333 = arith.extf %327 : vector<8x128xbf16> to vector<8x128xf32>
    %334 = arith.addf %333, %332 : vector<8x128xf32>
    %335 = vector.extract_strided_slice %334 {offsets = [0, 0], sizes = [8, 96], strides = [1, 1]} : vector<8x128xf32> to vector<8x96xf32>
    %cst_169 = arith.constant 5.000000e-01 : f32
    %336 = vector.broadcast %cst_169 : f32 to vector<8x96xf32>
    %337 = arith.mulf %336, %335 : vector<8x96xf32>
    %338 = math.tanh %337 : vector<8x96xf32>
    %cst_170 = arith.constant 1.000000e+00 : f32
    %339 = vector.broadcast %cst_170 : f32 to vector<8x96xf32>
    %340 = arith.addf %338, %339 : vector<8x96xf32>
    %cst_171 = arith.constant 5.000000e-01 : f32
    %341 = vector.broadcast %cst_171 : f32 to vector<8x96xf32>
    %342 = arith.mulf %341, %340 : vector<8x96xf32>
    %343 = vector.extract_strided_slice %334 {offsets = [0, 96], sizes = [8, 32], strides = [1, 1]} : vector<8x128xf32> to vector<8x32xf32>
    %344 = math.tanh %343 : vector<8x32xf32>
    %345 = vector.extract_strided_slice %342 {offsets = [0, 32], sizes = [8, 32], strides = [1, 1]} : vector<8x96xf32> to vector<8x32xf32>
    %c0_172 = arith.constant 0 : index
    %c0_173 = arith.constant 0 : index
    %346 = vector.load %arg16[%c0_172, %c0_173] : memref<8x32xf32, #tpu.memory_space<vmem>>, vector<8x32xf32>
    %347 = arith.mulf %345, %346 : vector<8x32xf32>
    %348 = vector.extract_strided_slice %342 {offsets = [0, 0], sizes = [8, 32], strides = [1, 1]} : vector<8x96xf32> to vector<8x32xf32>
    %349 = arith.mulf %348, %344 : vector<8x32xf32>
    %350 = arith.addf %347, %349 : vector<8x32xf32>
    %351 = vector.extract_strided_slice %342 {offsets = [0, 64], sizes = [8, 32], strides = [1, 1]} : vector<8x96xf32> to vector<8x32xf32>
    %352 = math.tanh %350 : vector<8x32xf32>
    %353 = arith.mulf %351, %352 : vector<8x32xf32>
    %c0_174 = arith.constant 0 : index
    %c0_175 = arith.constant 0 : index
    %354 = vector.load %arg16[%c0_174, %c0_175] : memref<8x32xf32, #tpu.memory_space<vmem>>, vector<8x32xf32>
    tpu.vector_store %arg16[%c0_174, %c0_175], %350 {strides = array<i32>} : memref<8x32xf32, #tpu.memory_space<vmem>>, vector<8x32xf32>,
    %355 = arith.truncf %353 : vector<8x32xf32> to vector<8x32xbf16>
    %356 = arith.index_cast %c1_i32_162 : i32 to index
    %c0_176 = arith.constant 0 : index
    %c0_177 = arith.constant 0 : index
    %357 = vector.load %arg14[%356, %c0_176, %c0_177] : memref<8x8x32xbf16, #tpu.memory_space<vmem>>, vector<1x8x32xbf16>
    %358 = vector.shape_cast %357 : vector<1x8x32xbf16> to vector<8x32xbf16>
    %359 = vector.shape_cast %355 : vector<8x32xbf16> to vector<1x8x32xbf16>
    tpu.vector_store %arg14[%356, %c0_176, %c0_177], %359 {strides = array<i32>} : memref<8x8x32xbf16, #tpu.memory_space<vmem>>, vector<1x8x32xbf16>,
    %c2_i32_178 = arith.constant 2 : i32
    %360 = arith.index_cast %c2_i32_178 : i32 to index
    %c0_179 = arith.constant 0 : index
    %c0_180 = arith.constant 0 : index
    %361 = vector.load %arg15[%360, %c0_179, %c0_180] : memref<8x8x128xbf16, #tpu.memory_space<vmem>>, vector<1x8x128xbf16>
    %362 = vector.shape_cast %361 : vector<1x8x128xbf16> to vector<8x128xbf16>
    %c1_i32_181 = arith.constant 1 : i32
    %363 = arith.subi %c2_i32_178, %c1_i32_181 : i32
    %364 = arith.index_cast %363 : i32 to index
    %c0_182 = arith.constant 0 : index
    %c0_183 = arith.constant 0 : index
    %365 = vector.load %arg14[%364, %c0_182, %c0_183] : memref<8x8x32xbf16, #tpu.memory_space<vmem>>, vector<1x8x32xbf16>
    %366 = vector.shape_cast %365 : vector<1x8x32xbf16> to vector<8x32xbf16>
    %cst_184 = arith.constant dense<0.000000e+00> : vector<8x128xf32>
    %367 = tpu.matmul %366, %297, %cst_184 {dimension_numbers = #tpu.dot_dimension_numbers<[1], [0], [0], [1], [0, 0, 1, 1], [], []>} : vector<8x32xbf16>, vector<32x128xbf16>, vector<8x128xf32> -> vector<8x128xf32>
    %368 = arith.extf %362 : vector<8x128xbf16> to vector<8x128xf32>
    %369 = arith.addf %368, %367 : vector<8x128xf32>
    %370 = vector.extract_strided_slice %369 {offsets = [0, 0], sizes = [8, 96], strides = [1, 1]} : vector<8x128xf32> to vector<8x96xf32>
    %cst_185 = arith.constant 5.000000e-01 : f32
    %371 = vector.broadcast %cst_185 : f32 to vector<8x96xf32>
    %372 = arith.mulf %371, %370 : vector<8x96xf32>
    %373 = math.tanh %372 : vector<8x96xf32>
    %cst_186 = arith.constant 1.000000e+00 : f32
    %374 = vector.broadcast %cst_186 : f32 to vector<8x96xf32>
    %375 = arith.addf %373, %374 : vector<8x96xf32>
    %cst_187 = arith.constant 5.000000e-01 : f32
    %376 = vector.broadcast %cst_187 : f32 to vector<8x96xf32>
    %377 = arith.mulf %376, %375 : vector<8x96xf32>
    %378 = vector.extract_strided_slice %369 {offsets = [0, 96], sizes = [8, 32], strides = [1, 1]} : vector<8x128xf32> to vector<8x32xf32>
    %379 = math.tanh %378 : vector<8x32xf32>
    %380 = vector.extract_strided_slice %377 {offsets = [0, 32], sizes = [8, 32], strides = [1, 1]} : vector<8x96xf32> to vector<8x32xf32>
    %c0_188 = arith.constant 0 : index
    %c0_189 = arith.constant 0 : index
    %381 = vector.load %arg16[%c0_188, %c0_189] : memref<8x32xf32, #tpu.memory_space<vmem>>, vector<8x32xf32>
    %382 = arith.mulf %380, %381 : vector<8x32xf32>
    %383 = vector.extract_strided_slice %377 {offsets = [0, 0], sizes = [8, 32], strides = [1, 1]} : vector<8x96xf32> to vector<8x32xf32>
    %384 = arith.mulf %383, %379 : vector<8x32xf32>
    %385 = arith.addf %382, %384 : vector<8x32xf32>
    %386 = vector.extract_strided_slice %377 {offsets = [0, 64], sizes = [8, 32], strides = [1, 1]} : vector<8x96xf32> to vector<8x32xf32>
    %387 = math.tanh %385 : vector<8x32xf32>
    %388 = arith.mulf %386, %387 : vector<8x32xf32>
    %c0_190 = arith.constant 0 : index
    %c0_191 = arith.constant 0 : index
    %389 = vector.load %arg16[%c0_190, %c0_191] : memref<8x32xf32, #tpu.memory_space<vmem>>, vector<8x32xf32>
    tpu.vector_store %arg16[%c0_190, %c0_191], %385 {strides = array<i32>} : memref<8x32xf32, #tpu.memory_space<vmem>>, vector<8x32xf32>,
    %390 = arith.truncf %388 : vector<8x32xf32> to vector<8x32xbf16>
    %391 = arith.index_cast %c2_i32_178 : i32 to index
    %c0_192 = arith.constant 0 : index
    %c0_193 = arith.constant 0 : index
    %392 = vector.load %arg14[%391, %c0_192, %c0_193] : memref<8x8x32xbf16, #tpu.memory_space<vmem>>, vector<1x8x32xbf16>
    %393 = vector.shape_cast %392 : vector<1x8x32xbf16> to vector<8x32xbf16>
    %394 = vector.shape_cast %390 : vector<8x32xbf16> to vector<1x8x32xbf16>
    tpu.vector_store %arg14[%391, %c0_192, %c0_193], %394 {strides = array<i32>} : memref<8x8x32xbf16, #tpu.memory_space<vmem>>, vector<1x8x32xbf16>,
    %c3_i32_194 = arith.constant 3 : i32
    %395 = arith.index_cast %c3_i32_194 : i32 to index
    %c0_195 = arith.constant 0 : index
    %c0_196 = arith.constant 0 : index
    %396 = vector.load %arg15[%395, %c0_195, %c0_196] : memref<8x8x128xbf16, #tpu.memory_space<vmem>>, vector<1x8x128xbf16>
    %397 = vector.shape_cast %396 : vector<1x8x128xbf16> to vector<8x128xbf16>
    %c1_i32_197 = arith.constant 1 : i32
    %398 = arith.subi %c3_i32_194, %c1_i32_197 : i32
    %399 = arith.index_cast %398 : i32 to index
    %c0_198 = arith.constant 0 : index
    %c0_199 = arith.constant 0 : index
    %400 = vector.load %arg14[%399, %c0_198, %c0_199] : memref<8x8x32xbf16, #tpu.memory_space<vmem>>, vector<1x8x32xbf16>
    %401 = vector.shape_cast %400 : vector<1x8x32xbf16> to vector<8x32xbf16>
    %cst_200 = arith.constant dense<0.000000e+00> : vector<8x128xf32>
    %402 = tpu.matmul %401, %297, %cst_200 {dimension_numbers = #tpu.dot_dimension_numbers<[1], [0], [0], [1], [0, 0, 1, 1], [], []>} : vector<8x32xbf16>, vector<32x128xbf16>, vector<8x128xf32> -> vector<8x128xf32>
    %403 = arith.extf %397 : vector<8x128xbf16> to vector<8x128xf32>
    %404 = arith.addf %403, %402 : vector<8x128xf32>
    %405 = vector.extract_strided_slice %404 {offsets = [0, 0], sizes = [8, 96], strides = [1, 1]} : vector<8x128xf32> to vector<8x96xf32>
    %cst_201 = arith.constant 5.000000e-01 : f32
    %406 = vector.broadcast %cst_201 : f32 to vector<8x96xf32>
    %407 = arith.mulf %406, %405 : vector<8x96xf32>
    %408 = math.tanh %407 : vector<8x96xf32>
    %cst_202 = arith.constant 1.000000e+00 : f32
    %409 = vector.broadcast %cst_202 : f32 to vector<8x96xf32>
    %410 = arith.addf %408, %409 : vector<8x96xf32>
    %cst_203 = arith.constant 5.000000e-01 : f32
    %411 = vector.broadcast %cst_203 : f32 to vector<8x96xf32>
    %412 = arith.mulf %411, %410 : vector<8x96xf32>
    %413 = vector.extract_strided_slice %404 {offsets = [0, 96], sizes = [8, 32], strides = [1, 1]} : vector<8x128xf32> to vector<8x32xf32>
    %414 = math.tanh %413 : vector<8x32xf32>
    %415 = vector.extract_strided_slice %412 {offsets = [0, 32], sizes = [8, 32], strides = [1, 1]} : vector<8x96xf32> to vector<8x32xf32>
    %c0_204 = arith.constant 0 : index
    %c0_205 = arith.constant 0 : index
    %416 = vector.load %arg16[%c0_204, %c0_205] : memref<8x32xf32, #tpu.memory_space<vmem>>, vector<8x32xf32>
    %417 = arith.mulf %415, %416 : vector<8x32xf32>
    %418 = vector.extract_strided_slice %412 {offsets = [0, 0], sizes = [8, 32], strides = [1, 1]} : vector<8x96xf32> to vector<8x32xf32>
    %419 = arith.mulf %418, %414 : vector<8x32xf32>
    %420 = arith.addf %417, %419 : vector<8x32xf32>
    %421 = vector.extract_strided_slice %412 {offsets = [0, 64], sizes = [8, 32], strides = [1, 1]} : vector<8x96xf32> to vector<8x32xf32>
    %422 = math.tanh %420 : vector<8x32xf32>
    %423 = arith.mulf %421, %422 : vector<8x32xf32>
    %c0_206 = arith.constant 0 : index
    %c0_207 = arith.constant 0 : index
    %424 = vector.load %arg16[%c0_206, %c0_207] : memref<8x32xf32, #tpu.memory_space<vmem>>, vector<8x32xf32>
    tpu.vector_store %arg16[%c0_206, %c0_207], %420 {strides = array<i32>} : memref<8x32xf32, #tpu.memory_space<vmem>>, vector<8x32xf32>,
    %425 = arith.truncf %423 : vector<8x32xf32> to vector<8x32xbf16>
    %426 = arith.index_cast %c3_i32_194 : i32 to index
    %c0_208 = arith.constant 0 : index
    %c0_209 = arith.constant 0 : index
    %427 = vector.load %arg14[%426, %c0_208, %c0_209] : memref<8x8x32xbf16, #tpu.memory_space<vmem>>, vector<1x8x32xbf16>
    %428 = vector.shape_cast %427 : vector<1x8x32xbf16> to vector<8x32xbf16>
    %429 = vector.shape_cast %425 : vector<8x32xbf16> to vector<1x8x32xbf16>
    tpu.vector_store %arg14[%426, %c0_208, %c0_209], %429 {strides = array<i32>} : memref<8x8x32xbf16, #tpu.memory_space<vmem>>, vector<1x8x32xbf16>,
    %c4_i32_210 = arith.constant 4 : i32
    %430 = arith.index_cast %c4_i32_210 : i32 to index
    %c0_211 = arith.constant 0 : index
    %c0_212 = arith.constant 0 : index
    %431 = vector.load %arg15[%430, %c0_211, %c0_212] : memref<8x8x128xbf16, #tpu.memory_space<vmem>>, vector<1x8x128xbf16>
    %432 = vector.shape_cast %431 : vector<1x8x128xbf16> to vector<8x128xbf16>
    %c1_i32_213 = arith.constant 1 : i32
    %433 = arith.subi %c4_i32_210, %c1_i32_213 : i32
    %434 = arith.index_cast %433 : i32 to index
    %c0_214 = arith.constant 0 : index
    %c0_215 = arith.constant 0 : index
    %435 = vector.load %arg14[%434, %c0_214, %c0_215] : memref<8x8x32xbf16, #tpu.memory_space<vmem>>, vector<1x8x32xbf16>
    %436 = vector.shape_cast %435 : vector<1x8x32xbf16> to vector<8x32xbf16>
    %cst_216 = arith.constant dense<0.000000e+00> : vector<8x128xf32>
    %437 = tpu.matmul %436, %297, %cst_216 {dimension_numbers = #tpu.dot_dimension_numbers<[1], [0], [0], [1], [0, 0, 1, 1], [], []>} : vector<8x32xbf16>, vector<32x128xbf16>, vector<8x128xf32> -> vector<8x128xf32>
    %438 = arith.extf %432 : vector<8x128xbf16> to vector<8x128xf32>
    %439 = arith.addf %438, %437 : vector<8x128xf32>
    %440 = vector.extract_strided_slice %439 {offsets = [0, 0], sizes = [8, 96], strides = [1, 1]} : vector<8x128xf32> to vector<8x96xf32>
    %cst_217 = arith.constant 5.000000e-01 : f32
    %441 = vector.broadcast %cst_217 : f32 to vector<8x96xf32>
    %442 = arith.mulf %441, %440 : vector<8x96xf32>
    %443 = math.tanh %442 : vector<8x96xf32>
    %cst_218 = arith.constant 1.000000e+00 : f32
    %444 = vector.broadcast %cst_218 : f32 to vector<8x96xf32>
    %445 = arith.addf %443, %444 : vector<8x96xf32>
    %cst_219 = arith.constant 5.000000e-01 : f32
    %446 = vector.broadcast %cst_219 : f32 to vector<8x96xf32>
    %447 = arith.mulf %446, %445 : vector<8x96xf32>
    %448 = vector.extract_strided_slice %439 {offsets = [0, 96], sizes = [8, 32], strides = [1, 1]} : vector<8x128xf32> to vector<8x32xf32>
    %449 = math.tanh %448 : vector<8x32xf32>
    %450 = vector.extract_strided_slice %447 {offsets = [0, 32], sizes = [8, 32], strides = [1, 1]} : vector<8x96xf32> to vector<8x32xf32>
    %c0_220 = arith.constant 0 : index
    %c0_221 = arith.constant 0 : index
    %451 = vector.load %arg16[%c0_220, %c0_221] : memref<8x32xf32, #tpu.memory_space<vmem>>, vector<8x32xf32>
    %452 = arith.mulf %450, %451 : vector<8x32xf32>
    %453 = vector.extract_strided_slice %447 {offsets = [0, 0], sizes = [8, 32], strides = [1, 1]} : vector<8x96xf32> to vector<8x32xf32>
    %454 = arith.mulf %453, %449 : vector<8x32xf32>
    %455 = arith.addf %452, %454 : vector<8x32xf32>
    %456 = vector.extract_strided_slice %447 {offsets = [0, 64], sizes = [8, 32], strides = [1, 1]} : vector<8x96xf32> to vector<8x32xf32>
    %457 = math.tanh %455 : vector<8x32xf32>
    %458 = arith.mulf %456, %457 : vector<8x32xf32>
    %c0_222 = arith.constant 0 : index
    %c0_223 = arith.constant 0 : index
    %459 = vector.load %arg16[%c0_222, %c0_223] : memref<8x32xf32, #tpu.memory_space<vmem>>, vector<8x32xf32>
    tpu.vector_store %arg16[%c0_222, %c0_223], %455 {strides = array<i32>} : memref<8x32xf32, #tpu.memory_space<vmem>>, vector<8x32xf32>,
    %460 = arith.truncf %458 : vector<8x32xf32> to vector<8x32xbf16>
    %461 = arith.index_cast %c4_i32_210 : i32 to index
    %c0_224 = arith.constant 0 : index
    %c0_225 = arith.constant 0 : index
    %462 = vector.load %arg14[%461, %c0_224, %c0_225] : memref<8x8x32xbf16, #tpu.memory_space<vmem>>, vector<1x8x32xbf16>
    %463 = vector.shape_cast %462 : vector<1x8x32xbf16> to vector<8x32xbf16>
    %464 = vector.shape_cast %460 : vector<8x32xbf16> to vector<1x8x32xbf16>
    tpu.vector_store %arg14[%461, %c0_224, %c0_225], %464 {strides = array<i32>} : memref<8x8x32xbf16, #tpu.memory_space<vmem>>, vector<1x8x32xbf16>,
    %c5_i32_226 = arith.constant 5 : i32
    %465 = arith.index_cast %c5_i32_226 : i32 to index
    %c0_227 = arith.constant 0 : index
    %c0_228 = arith.constant 0 : index
    %466 = vector.load %arg15[%465, %c0_227, %c0_228] : memref<8x8x128xbf16, #tpu.memory_space<vmem>>, vector<1x8x128xbf16>
    %467 = vector.shape_cast %466 : vector<1x8x128xbf16> to vector<8x128xbf16>
    %c1_i32_229 = arith.constant 1 : i32
    %468 = arith.subi %c5_i32_226, %c1_i32_229 : i32
    %469 = arith.index_cast %468 : i32 to index
    %c0_230 = arith.constant 0 : index
    %c0_231 = arith.constant 0 : index
    %470 = vector.load %arg14[%469, %c0_230, %c0_231] : memref<8x8x32xbf16, #tpu.memory_space<vmem>>, vector<1x8x32xbf16>
    %471 = vector.shape_cast %470 : vector<1x8x32xbf16> to vector<8x32xbf16>
    %cst_232 = arith.constant dense<0.000000e+00> : vector<8x128xf32>
    %472 = tpu.matmul %471, %297, %cst_232 {dimension_numbers = #tpu.dot_dimension_numbers<[1], [0], [0], [1], [0, 0, 1, 1], [], []>} : vector<8x32xbf16>, vector<32x128xbf16>, vector<8x128xf32> -> vector<8x128xf32>
    %473 = arith.extf %467 : vector<8x128xbf16> to vector<8x128xf32>
    %474 = arith.addf %473, %472 : vector<8x128xf32>
    %475 = vector.extract_strided_slice %474 {offsets = [0, 0], sizes = [8, 96], strides = [1, 1]} : vector<8x128xf32> to vector<8x96xf32>
    %cst_233 = arith.constant 5.000000e-01 : f32
    %476 = vector.broadcast %cst_233 : f32 to vector<8x96xf32>
    %477 = arith.mulf %476, %475 : vector<8x96xf32>
    %478 = math.tanh %477 : vector<8x96xf32>
    %cst_234 = arith.constant 1.000000e+00 : f32
    %479 = vector.broadcast %cst_234 : f32 to vector<8x96xf32>
    %480 = arith.addf %478, %479 : vector<8x96xf32>
    %cst_235 = arith.constant 5.000000e-01 : f32
    %481 = vector.broadcast %cst_235 : f32 to vector<8x96xf32>
    %482 = arith.mulf %481, %480 : vector<8x96xf32>
    %483 = vector.extract_strided_slice %474 {offsets = [0, 96], sizes = [8, 32], strides = [1, 1]} : vector<8x128xf32> to vector<8x32xf32>
    %484 = math.tanh %483 : vector<8x32xf32>
    %485 = vector.extract_strided_slice %482 {offsets = [0, 32], sizes = [8, 32], strides = [1, 1]} : vector<8x96xf32> to vector<8x32xf32>
    %c0_236 = arith.constant 0 : index
    %c0_237 = arith.constant 0 : index
    %486 = vector.load %arg16[%c0_236, %c0_237] : memref<8x32xf32, #tpu.memory_space<vmem>>, vector<8x32xf32>
    %487 = arith.mulf %485, %486 : vector<8x32xf32>
    %488 = vector.extract_strided_slice %482 {offsets = [0, 0], sizes = [8, 32], strides = [1, 1]} : vector<8x96xf32> to vector<8x32xf32>
    %489 = arith.mulf %488, %484 : vector<8x32xf32>
    %490 = arith.addf %487, %489 : vector<8x32xf32>
    %491 = vector.extract_strided_slice %482 {offsets = [0, 64], sizes = [8, 32], strides = [1, 1]} : vector<8x96xf32> to vector<8x32xf32>
    %492 = math.tanh %490 : vector<8x32xf32>
    %493 = arith.mulf %491, %492 : vector<8x32xf32>
    %c0_238 = arith.constant 0 : index
    %c0_239 = arith.constant 0 : index
    %494 = vector.load %arg16[%c0_238, %c0_239] : memref<8x32xf32, #tpu.memory_space<vmem>>, vector<8x32xf32>
    tpu.vector_store %arg16[%c0_238, %c0_239], %490 {strides = array<i32>} : memref<8x32xf32, #tpu.memory_space<vmem>>, vector<8x32xf32>,
    %495 = arith.truncf %493 : vector<8x32xf32> to vector<8x32xbf16>
    %496 = arith.index_cast %c5_i32_226 : i32 to index
    %c0_240 = arith.constant 0 : index
    %c0_241 = arith.constant 0 : index
    %497 = vector.load %arg14[%496, %c0_240, %c0_241] : memref<8x8x32xbf16, #tpu.memory_space<vmem>>, vector<1x8x32xbf16>
    %498 = vector.shape_cast %497 : vector<1x8x32xbf16> to vector<8x32xbf16>
    %499 = vector.shape_cast %495 : vector<8x32xbf16> to vector<1x8x32xbf16>
    tpu.vector_store %arg14[%496, %c0_240, %c0_241], %499 {strides = array<i32>} : memref<8x8x32xbf16, #tpu.memory_space<vmem>>, vector<1x8x32xbf16>,
    %c6_i32_242 = arith.constant 6 : i32
    %500 = arith.index_cast %c6_i32_242 : i32 to index
    %c0_243 = arith.constant 0 : index
    %c0_244 = arith.constant 0 : index
    %501 = vector.load %arg15[%500, %c0_243, %c0_244] : memref<8x8x128xbf16, #tpu.memory_space<vmem>>, vector<1x8x128xbf16>
    %502 = vector.shape_cast %501 : vector<1x8x128xbf16> to vector<8x128xbf16>
    %c1_i32_245 = arith.constant 1 : i32
    %503 = arith.subi %c6_i32_242, %c1_i32_245 : i32
    %504 = arith.index_cast %503 : i32 to index
    %c0_246 = arith.constant 0 : index
    %c0_247 = arith.constant 0 : index
    %505 = vector.load %arg14[%504, %c0_246, %c0_247] : memref<8x8x32xbf16, #tpu.memory_space<vmem>>, vector<1x8x32xbf16>
    %506 = vector.shape_cast %505 : vector<1x8x32xbf16> to vector<8x32xbf16>
    %cst_248 = arith.constant dense<0.000000e+00> : vector<8x128xf32>
    %507 = tpu.matmul %506, %297, %cst_248 {dimension_numbers = #tpu.dot_dimension_numbers<[1], [0], [0], [1], [0, 0, 1, 1], [], []>} : vector<8x32xbf16>, vector<32x128xbf16>, vector<8x128xf32> -> vector<8x128xf32>
    %508 = arith.extf %502 : vector<8x128xbf16> to vector<8x128xf32>
    %509 = arith.addf %508, %507 : vector<8x128xf32>
    %510 = vector.extract_strided_slice %509 {offsets = [0, 0], sizes = [8, 96], strides = [1, 1]} : vector<8x128xf32> to vector<8x96xf32>
    %cst_249 = arith.constant 5.000000e-01 : f32
    %511 = vector.broadcast %cst_249 : f32 to vector<8x96xf32>
    %512 = arith.mulf %511, %510 : vector<8x96xf32>
    %513 = math.tanh %512 : vector<8x96xf32>
    %cst_250 = arith.constant 1.000000e+00 : f32
    %514 = vector.broadcast %cst_250 : f32 to vector<8x96xf32>
    %515 = arith.addf %513, %514 : vector<8x96xf32>
    %cst_251 = arith.constant 5.000000e-01 : f32
    %516 = vector.broadcast %cst_251 : f32 to vector<8x96xf32>
    %517 = arith.mulf %516, %515 : vector<8x96xf32>
    %518 = vector.extract_strided_slice %509 {offsets = [0, 96], sizes = [8, 32], strides = [1, 1]} : vector<8x128xf32> to vector<8x32xf32>
    %519 = math.tanh %518 : vector<8x32xf32>
    %520 = vector.extract_strided_slice %517 {offsets = [0, 32], sizes = [8, 32], strides = [1, 1]} : vector<8x96xf32> to vector<8x32xf32>
    %c0_252 = arith.constant 0 : index
    %c0_253 = arith.constant 0 : index
    %521 = vector.load %arg16[%c0_252, %c0_253] : memref<8x32xf32, #tpu.memory_space<vmem>>, vector<8x32xf32>
    %522 = arith.mulf %520, %521 : vector<8x32xf32>
    %523 = vector.extract_strided_slice %517 {offsets = [0, 0], sizes = [8, 32], strides = [1, 1]} : vector<8x96xf32> to vector<8x32xf32>
    %524 = arith.mulf %523, %519 : vector<8x32xf32>
    %525 = arith.addf %522, %524 : vector<8x32xf32>
    %526 = vector.extract_strided_slice %517 {offsets = [0, 64], sizes = [8, 32], strides = [1, 1]} : vector<8x96xf32> to vector<8x32xf32>
    %527 = math.tanh %525 : vector<8x32xf32>
    %528 = arith.mulf %526, %527 : vector<8x32xf32>
    %c0_254 = arith.constant 0 : index
    %c0_255 = arith.constant 0 : index
    %529 = vector.load %arg16[%c0_254, %c0_255] : memref<8x32xf32, #tpu.memory_space<vmem>>, vector<8x32xf32>
    tpu.vector_store %arg16[%c0_254, %c0_255], %525 {strides = array<i32>} : memref<8x32xf32, #tpu.memory_space<vmem>>, vector<8x32xf32>,
    %530 = arith.truncf %528 : vector<8x32xf32> to vector<8x32xbf16>
    %531 = arith.index_cast %c6_i32_242 : i32 to index
    %c0_256 = arith.constant 0 : index
    %c0_257 = arith.constant 0 : index
    %532 = vector.load %arg14[%531, %c0_256, %c0_257] : memref<8x8x32xbf16, #tpu.memory_space<vmem>>, vector<1x8x32xbf16>
    %533 = vector.shape_cast %532 : vector<1x8x32xbf16> to vector<8x32xbf16>
    %534 = vector.shape_cast %530 : vector<8x32xbf16> to vector<1x8x32xbf16>
    tpu.vector_store %arg14[%531, %c0_256, %c0_257], %534 {strides = array<i32>} : memref<8x8x32xbf16, #tpu.memory_space<vmem>>, vector<1x8x32xbf16>,
    %c7_i32_258 = arith.constant 7 : i32
    %535 = arith.index_cast %c7_i32_258 : i32 to index
    %c0_259 = arith.constant 0 : index
    %c0_260 = arith.constant 0 : index
    %536 = vector.load %arg15[%535, %c0_259, %c0_260] : memref<8x8x128xbf16, #tpu.memory_space<vmem>>, vector<1x8x128xbf16>
    %537 = vector.shape_cast %536 : vector<1x8x128xbf16> to vector<8x128xbf16>
    %c1_i32_261 = arith.constant 1 : i32
    %538 = arith.subi %c7_i32_258, %c1_i32_261 : i32
    %539 = arith.index_cast %538 : i32 to index
    %c0_262 = arith.constant 0 : index
    %c0_263 = arith.constant 0 : index
    %540 = vector.load %arg14[%539, %c0_262, %c0_263] : memref<8x8x32xbf16, #tpu.memory_space<vmem>>, vector<1x8x32xbf16>
    %541 = vector.shape_cast %540 : vector<1x8x32xbf16> to vector<8x32xbf16>
    %cst_264 = arith.constant dense<0.000000e+00> : vector<8x128xf32>
    %542 = tpu.matmul %541, %297, %cst_264 {dimension_numbers = #tpu.dot_dimension_numbers<[1], [0], [0], [1], [0, 0, 1, 1], [], []>} : vector<8x32xbf16>, vector<32x128xbf16>, vector<8x128xf32> -> vector<8x128xf32>
    %543 = arith.extf %537 : vector<8x128xbf16> to vector<8x128xf32>
    %544 = arith.addf %543, %542 : vector<8x128xf32>
    %545 = vector.extract_strided_slice %544 {offsets = [0, 0], sizes = [8, 96], strides = [1, 1]} : vector<8x128xf32> to vector<8x96xf32>
    %cst_265 = arith.constant 5.000000e-01 : f32
    %546 = vector.broadcast %cst_265 : f32 to vector<8x96xf32>
    %547 = arith.mulf %546, %545 : vector<8x96xf32>
    %548 = math.tanh %547 : vector<8x96xf32>
    %cst_266 = arith.constant 1.000000e+00 : f32
    %549 = vector.broadcast %cst_266 : f32 to vector<8x96xf32>
    %550 = arith.addf %548, %549 : vector<8x96xf32>
    %cst_267 = arith.constant 5.000000e-01 : f32
    %551 = vector.broadcast %cst_267 : f32 to vector<8x96xf32>
    %552 = arith.mulf %551, %550 : vector<8x96xf32>
    %553 = vector.extract_strided_slice %544 {offsets = [0, 96], sizes = [8, 32], strides = [1, 1]} : vector<8x128xf32> to vector<8x32xf32>
    %554 = math.tanh %553 : vector<8x32xf32>
    %555 = vector.extract_strided_slice %552 {offsets = [0, 32], sizes = [8, 32], strides = [1, 1]} : vector<8x96xf32> to vector<8x32xf32>
    %c0_268 = arith.constant 0 : index
    %c0_269 = arith.constant 0 : index
    %556 = vector.load %arg16[%c0_268, %c0_269] : memref<8x32xf32, #tpu.memory_space<vmem>>, vector<8x32xf32>
    %557 = arith.mulf %555, %556 : vector<8x32xf32>
    %558 = vector.extract_strided_slice %552 {offsets = [0, 0], sizes = [8, 32], strides = [1, 1]} : vector<8x96xf32> to vector<8x32xf32>
    %559 = arith.mulf %558, %554 : vector<8x32xf32>
    %560 = arith.addf %557, %559 : vector<8x32xf32>
    %561 = vector.extract_strided_slice %552 {offsets = [0, 64], sizes = [8, 32], strides = [1, 1]} : vector<8x96xf32> to vector<8x32xf32>
    %562 = math.tanh %560 : vector<8x32xf32>
    %563 = arith.mulf %561, %562 : vector<8x32xf32>
    %c0_270 = arith.constant 0 : index
    %c0_271 = arith.constant 0 : index
    %564 = vector.load %arg16[%c0_270, %c0_271] : memref<8x32xf32, #tpu.memory_space<vmem>>, vector<8x32xf32>
    tpu.vector_store %arg16[%c0_270, %c0_271], %560 {strides = array<i32>} : memref<8x32xf32, #tpu.memory_space<vmem>>, vector<8x32xf32>,
    %565 = arith.truncf %563 : vector<8x32xf32> to vector<8x32xbf16>
    %566 = arith.index_cast %c7_i32_258 : i32 to index
    %c0_272 = arith.constant 0 : index
    %c0_273 = arith.constant 0 : index
    %567 = vector.load %arg14[%566, %c0_272, %c0_273] : memref<8x8x32xbf16, #tpu.memory_space<vmem>>, vector<1x8x32xbf16>
    %568 = vector.shape_cast %567 : vector<1x8x32xbf16> to vector<8x32xbf16>
    %569 = vector.shape_cast %565 : vector<8x32xbf16> to vector<1x8x32xbf16>
    tpu.vector_store %arg14[%566, %c0_272, %c0_273], %569 {strides = array<i32>} : memref<8x8x32xbf16, #tpu.memory_space<vmem>>, vector<1x8x32xbf16>,
    %c7_i32_274 = arith.constant 7 : i32
    %c0_275 = arith.constant 0 : index
    %c0_276 = arith.constant 0 : index
    %c0_277 = arith.constant 0 : index
    %570 = vector.load %arg14[%c0_275, %c0_276, %c0_277] : memref<8x8x32xbf16, #tpu.memory_space<vmem>>, vector<8x8x32xbf16>
    %571 = vector.shape_cast %570 : vector<8x8x32xbf16> to vector<64x32xbf16>
    %c0_278 = arith.constant 0 : index
    %c0_279 = arith.constant 0 : index
    %572 = vector.load %arg8[%c0_278, %c0_279] : memref<32x128xbf16, #tpu.memory_space<vmem>>, vector<32x128xbf16>
    %cst_280 = arith.constant dense<0.000000e+00> : vector<64x128xf32>
    %573 = tpu.matmul %571, %572, %cst_280 {dimension_numbers = #tpu.dot_dimension_numbers<[1], [0], [0], [1], [0, 0, 1, 1], [], []>} : vector<64x32xbf16>, vector<32x128xbf16>, vector<64x128xf32> -> vector<64x128xf32>
    %c0_281 = arith.constant 0 : index
    %c0_282 = arith.constant 0 : index
    %574 = vector.load %arg10[%c0_281, %c0_282] : memref<1x128xf32, #tpu.memory_space<vmem>>, vector<1x128xf32>
    %575 = vector.broadcast %574 : vector<1x128xf32> to vector<64x128xf32>
    %576 = arith.addf %573, %575 : vector<64x128xf32>
    %577 = vector.shape_cast %576 : vector<64x128xf32> to vector<8x8x128xf32>
    %578 = arith.truncf %577 : vector<8x8x128xf32> to vector<8x8x128xbf16>
    %c0_283 = arith.constant 0 : index
    %c0_284 = arith.constant 0 : index
    %c0_285 = arith.constant 0 : index
    %579 = vector.load %arg15[%c0_283, %c0_284, %c0_285] : memref<8x8x128xbf16, #tpu.memory_space<vmem>>, vector<8x8x128xbf16>
    tpu.vector_store %arg15[%c0_283, %c0_284, %c0_285], %578 {strides = array<i32>} : memref<8x8x128xbf16, #tpu.memory_space<vmem>>, vector<8x8x128xbf16>,
    %cst_286 = arith.constant 0.000000e+00 : f32
    %580 = vector.broadcast %cst_286 : f32 to vector<8x32xf32>
    %c0_287 = arith.constant 0 : index
    %c0_288 = arith.constant 0 : index
    %581 = vector.load %arg16[%c0_287, %c0_288] : memref<8x32xf32, #tpu.memory_space<vmem>>, vector<8x32xf32>
    tpu.vector_store %arg16[%c0_287, %c0_288], %580 {strides = array<i32>} : memref<8x32xf32, #tpu.memory_space<vmem>>, vector<8x32xf32>,
    %c0_289 = arith.constant 0 : index
    %c0_290 = arith.constant 0 : index
    %582 = vector.load %arg9[%c0_289, %c0_290] : memref<32x128xbf16, #tpu.memory_space<vmem>>, vector<32x128xbf16>
    %c0_291 = arith.constant 0 : index
    %c0_292 = arith.constant 0 : index
    %c0_293 = arith.constant 0 : index
    %583 = vector.load %arg15[%c0_291, %c0_292, %c0_293] : memref<8x8x128xbf16, #tpu.memory_space<vmem>>, vector<1x8x128xbf16>
    %584 = vector.shape_cast %583 : vector<1x8x128xbf16> to vector<8x128xbf16>
    %585 = arith.extf %584 : vector<8x128xbf16> to vector<8x128xf32>
    %586 = vector.extract_strided_slice %585 {offsets = [0, 0], sizes = [8, 96], strides = [1, 1]} : vector<8x128xf32> to vector<8x96xf32>
    %cst_294 = arith.constant 5.000000e-01 : f32
    %587 = vector.broadcast %cst_294 : f32 to vector<8x96xf32>
    %588 = arith.mulf %587, %586 : vector<8x96xf32>
    %589 = math.tanh %588 : vector<8x96xf32>
    %cst_295 = arith.constant 1.000000e+00 : f32
    %590 = vector.broadcast %cst_295 : f32 to vector<8x96xf32>
    %591 = arith.addf %589, %590 : vector<8x96xf32>
    %cst_296 = arith.constant 5.000000e-01 : f32
    %592 = vector.broadcast %cst_296 : f32 to vector<8x96xf32>
    %593 = arith.mulf %592, %591 : vector<8x96xf32>
    %594 = vector.extract_strided_slice %585 {offsets = [0, 96], sizes = [8, 32], strides = [1, 1]} : vector<8x128xf32> to vector<8x32xf32>
    %595 = math.tanh %594 : vector<8x32xf32>
    %596 = vector.extract_strided_slice %593 {offsets = [0, 32], sizes = [8, 32], strides = [1, 1]} : vector<8x96xf32> to vector<8x32xf32>
    %c0_297 = arith.constant 0 : index
    %c0_298 = arith.constant 0 : index
    %597 = vector.load %arg16[%c0_297, %c0_298] : memref<8x32xf32, #tpu.memory_space<vmem>>, vector<8x32xf32>
    %598 = arith.mulf %596, %597 : vector<8x32xf32>
    %599 = vector.extract_strided_slice %593 {offsets = [0, 0], sizes = [8, 32], strides = [1, 1]} : vector<8x96xf32> to vector<8x32xf32>
    %600 = arith.mulf %599, %595 : vector<8x32xf32>
    %601 = arith.addf %598, %600 : vector<8x32xf32>
    %602 = vector.extract_strided_slice %593 {offsets = [0, 64], sizes = [8, 32], strides = [1, 1]} : vector<8x96xf32> to vector<8x32xf32>
    %603 = math.tanh %601 : vector<8x32xf32>
    %604 = arith.mulf %602, %603 : vector<8x32xf32>
    %c0_299 = arith.constant 0 : index
    %c0_300 = arith.constant 0 : index
    %605 = vector.load %arg16[%c0_299, %c0_300] : memref<8x32xf32, #tpu.memory_space<vmem>>, vector<8x32xf32>
    tpu.vector_store %arg16[%c0_299, %c0_300], %601 {strides = array<i32>} : memref<8x32xf32, #tpu.memory_space<vmem>>, vector<8x32xf32>,
    %606 = arith.truncf %604 : vector<8x32xf32> to vector<8x32xbf16>
    %c0_301 = arith.constant 0 : index
    %c0_302 = arith.constant 0 : index
    %c0_303 = arith.constant 0 : index
    %607 = vector.load %arg14[%c0_301, %c0_302, %c0_303] : memref<8x8x32xbf16, #tpu.memory_space<vmem>>, vector<1x8x32xbf16>
    %608 = vector.shape_cast %607 : vector<1x8x32xbf16> to vector<8x32xbf16>
    %609 = vector.shape_cast %606 : vector<8x32xbf16> to vector<1x8x32xbf16>
    tpu.vector_store %arg14[%c0_301, %c0_302, %c0_303], %609 {strides = array<i32>} : memref<8x8x32xbf16, #tpu.memory_space<vmem>>, vector<1x8x32xbf16>,
    %c1_i32_304 = arith.constant 1 : i32
    %610 = arith.index_cast %c1_i32_304 : i32 to index
    %c0_305 = arith.constant 0 : index
    %c0_306 = arith.constant 0 : index
    %611 = vector.load %arg15[%610, %c0_305, %c0_306] : memref<8x8x128xbf16, #tpu.memory_space<vmem>>, vector<1x8x128xbf16>
    %612 = vector.shape_cast %611 : vector<1x8x128xbf16> to vector<8x128xbf16>
    %c1_i32_307 = arith.constant 1 : i32
    %613 = arith.subi %c1_i32_304, %c1_i32_307 : i32
    %614 = arith.index_cast %613 : i32 to index
    %c0_308 = arith.constant 0 : index
    %c0_309 = arith.constant 0 : index
    %615 = vector.load %arg14[%614, %c0_308, %c0_309] : memref<8x8x32xbf16, #tpu.memory_space<vmem>>, vector<1x8x32xbf16>
    %616 = vector.shape_cast %615 : vector<1x8x32xbf16> to vector<8x32xbf16>
    %cst_310 = arith.constant dense<0.000000e+00> : vector<8x128xf32>
    %617 = tpu.matmul %616, %582, %cst_310 {dimension_numbers = #tpu.dot_dimension_numbers<[1], [0], [0], [1], [0, 0, 1, 1], [], []>} : vector<8x32xbf16>, vector<32x128xbf16>, vector<8x128xf32> -> vector<8x128xf32>
    %618 = arith.extf %612 : vector<8x128xbf16> to vector<8x128xf32>
    %619 = arith.addf %618, %617 : vector<8x128xf32>
    %620 = vector.extract_strided_slice %619 {offsets = [0, 0], sizes = [8, 96], strides = [1, 1]} : vector<8x128xf32> to vector<8x96xf32>
    %cst_311 = arith.constant 5.000000e-01 : f32
    %621 = vector.broadcast %cst_311 : f32 to vector<8x96xf32>
    %622 = arith.mulf %621, %620 : vector<8x96xf32>
    %623 = math.tanh %622 : vector<8x96xf32>
    %cst_312 = arith.constant 1.000000e+00 : f32
    %624 = vector.broadcast %cst_312 : f32 to vector<8x96xf32>
    %625 = arith.addf %623, %624 : vector<8x96xf32>
    %cst_313 = arith.constant 5.000000e-01 : f32
    %626 = vector.broadcast %cst_313 : f32 to vector<8x96xf32>
    %627 = arith.mulf %626, %625 : vector<8x96xf32>
    %628 = vector.extract_strided_slice %619 {offsets = [0, 96], sizes = [8, 32], strides = [1, 1]} : vector<8x128xf32> to vector<8x32xf32>
    %629 = math.tanh %628 : vector<8x32xf32>
    %630 = vector.extract_strided_slice %627 {offsets = [0, 32], sizes = [8, 32], strides = [1, 1]} : vector<8x96xf32> to vector<8x32xf32>
    %c0_314 = arith.constant 0 : index
    %c0_315 = arith.constant 0 : index
    %631 = vector.load %arg16[%c0_314, %c0_315] : memref<8x32xf32, #tpu.memory_space<vmem>>, vector<8x32xf32>
    %632 = arith.mulf %630, %631 : vector<8x32xf32>
    %633 = vector.extract_strided_slice %627 {offsets = [0, 0], sizes = [8, 32], strides = [1, 1]} : vector<8x96xf32> to vector<8x32xf32>
    %634 = arith.mulf %633, %629 : vector<8x32xf32>
    %635 = arith.addf %632, %634 : vector<8x32xf32>
    %636 = vector.extract_strided_slice %627 {offsets = [0, 64], sizes = [8, 32], strides = [1, 1]} : vector<8x96xf32> to vector<8x32xf32>
    %637 = math.tanh %635 : vector<8x32xf32>
    %638 = arith.mulf %636, %637 : vector<8x32xf32>
    %c0_316 = arith.constant 0 : index
    %c0_317 = arith.constant 0 : index
    %639 = vector.load %arg16[%c0_316, %c0_317] : memref<8x32xf32, #tpu.memory_space<vmem>>, vector<8x32xf32>
    tpu.vector_store %arg16[%c0_316, %c0_317], %635 {strides = array<i32>} : memref<8x32xf32, #tpu.memory_space<vmem>>, vector<8x32xf32>,
    %640 = arith.truncf %638 : vector<8x32xf32> to vector<8x32xbf16>
    %641 = arith.index_cast %c1_i32_304 : i32 to index
    %c0_318 = arith.constant 0 : index
    %c0_319 = arith.constant 0 : index
    %642 = vector.load %arg14[%641, %c0_318, %c0_319] : memref<8x8x32xbf16, #tpu.memory_space<vmem>>, vector<1x8x32xbf16>
    %643 = vector.shape_cast %642 : vector<1x8x32xbf16> to vector<8x32xbf16>
    %644 = vector.shape_cast %640 : vector<8x32xbf16> to vector<1x8x32xbf16>
    tpu.vector_store %arg14[%641, %c0_318, %c0_319], %644 {strides = array<i32>} : memref<8x8x32xbf16, #tpu.memory_space<vmem>>, vector<1x8x32xbf16>,
    %c2_i32_320 = arith.constant 2 : i32
    %645 = arith.index_cast %c2_i32_320 : i32 to index
    %c0_321 = arith.constant 0 : index
    %c0_322 = arith.constant 0 : index
    %646 = vector.load %arg15[%645, %c0_321, %c0_322] : memref<8x8x128xbf16, #tpu.memory_space<vmem>>, vector<1x8x128xbf16>
    %647 = vector.shape_cast %646 : vector<1x8x128xbf16> to vector<8x128xbf16>
    %c1_i32_323 = arith.constant 1 : i32
    %648 = arith.subi %c2_i32_320, %c1_i32_323 : i32
    %649 = arith.index_cast %648 : i32 to index
    %c0_324 = arith.constant 0 : index
    %c0_325 = arith.constant 0 : index
    %650 = vector.load %arg14[%649, %c0_324, %c0_325] : memref<8x8x32xbf16, #tpu.memory_space<vmem>>, vector<1x8x32xbf16>
    %651 = vector.shape_cast %650 : vector<1x8x32xbf16> to vector<8x32xbf16>
    %cst_326 = arith.constant dense<0.000000e+00> : vector<8x128xf32>
    %652 = tpu.matmul %651, %582, %cst_326 {dimension_numbers = #tpu.dot_dimension_numbers<[1], [0], [0], [1], [0, 0, 1, 1], [], []>} : vector<8x32xbf16>, vector<32x128xbf16>, vector<8x128xf32> -> vector<8x128xf32>
    %653 = arith.extf %647 : vector<8x128xbf16> to vector<8x128xf32>
    %654 = arith.addf %653, %652 : vector<8x128xf32>
    %655 = vector.extract_strided_slice %654 {offsets = [0, 0], sizes = [8, 96], strides = [1, 1]} : vector<8x128xf32> to vector<8x96xf32>
    %cst_327 = arith.constant 5.000000e-01 : f32
    %656 = vector.broadcast %cst_327 : f32 to vector<8x96xf32>
    %657 = arith.mulf %656, %655 : vector<8x96xf32>
    %658 = math.tanh %657 : vector<8x96xf32>
    %cst_328 = arith.constant 1.000000e+00 : f32
    %659 = vector.broadcast %cst_328 : f32 to vector<8x96xf32>
    %660 = arith.addf %658, %659 : vector<8x96xf32>
    %cst_329 = arith.constant 5.000000e-01 : f32
    %661 = vector.broadcast %cst_329 : f32 to vector<8x96xf32>
    %662 = arith.mulf %661, %660 : vector<8x96xf32>
    %663 = vector.extract_strided_slice %654 {offsets = [0, 96], sizes = [8, 32], strides = [1, 1]} : vector<8x128xf32> to vector<8x32xf32>
    %664 = math.tanh %663 : vector<8x32xf32>
    %665 = vector.extract_strided_slice %662 {offsets = [0, 32], sizes = [8, 32], strides = [1, 1]} : vector<8x96xf32> to vector<8x32xf32>
    %c0_330 = arith.constant 0 : index
    %c0_331 = arith.constant 0 : index
    %666 = vector.load %arg16[%c0_330, %c0_331] : memref<8x32xf32, #tpu.memory_space<vmem>>, vector<8x32xf32>
    %667 = arith.mulf %665, %666 : vector<8x32xf32>
    %668 = vector.extract_strided_slice %662 {offsets = [0, 0], sizes = [8, 32], strides = [1, 1]} : vector<8x96xf32> to vector<8x32xf32>
    %669 = arith.mulf %668, %664 : vector<8x32xf32>
    %670 = arith.addf %667, %669 : vector<8x32xf32>
    %671 = vector.extract_strided_slice %662 {offsets = [0, 64], sizes = [8, 32], strides = [1, 1]} : vector<8x96xf32> to vector<8x32xf32>
    %672 = math.tanh %670 : vector<8x32xf32>
    %673 = arith.mulf %671, %672 : vector<8x32xf32>
    %c0_332 = arith.constant 0 : index
    %c0_333 = arith.constant 0 : index
    %674 = vector.load %arg16[%c0_332, %c0_333] : memref<8x32xf32, #tpu.memory_space<vmem>>, vector<8x32xf32>
    tpu.vector_store %arg16[%c0_332, %c0_333], %670 {strides = array<i32>} : memref<8x32xf32, #tpu.memory_space<vmem>>, vector<8x32xf32>,
    %675 = arith.truncf %673 : vector<8x32xf32> to vector<8x32xbf16>
    %676 = arith.index_cast %c2_i32_320 : i32 to index
    %c0_334 = arith.constant 0 : index
    %c0_335 = arith.constant 0 : index
    %677 = vector.load %arg14[%676, %c0_334, %c0_335] : memref<8x8x32xbf16, #tpu.memory_space<vmem>>, vector<1x8x32xbf16>
    %678 = vector.shape_cast %677 : vector<1x8x32xbf16> to vector<8x32xbf16>
    %679 = vector.shape_cast %675 : vector<8x32xbf16> to vector<1x8x32xbf16>
    tpu.vector_store %arg14[%676, %c0_334, %c0_335], %679 {strides = array<i32>} : memref<8x8x32xbf16, #tpu.memory_space<vmem>>, vector<1x8x32xbf16>,
    %c3_i32_336 = arith.constant 3 : i32
    %680 = arith.index_cast %c3_i32_336 : i32 to index
    %c0_337 = arith.constant 0 : index
    %c0_338 = arith.constant 0 : index
    %681 = vector.load %arg15[%680, %c0_337, %c0_338] : memref<8x8x128xbf16, #tpu.memory_space<vmem>>, vector<1x8x128xbf16>
    %682 = vector.shape_cast %681 : vector<1x8x128xbf16> to vector<8x128xbf16>
    %c1_i32_339 = arith.constant 1 : i32
    %683 = arith.subi %c3_i32_336, %c1_i32_339 : i32
    %684 = arith.index_cast %683 : i32 to index
    %c0_340 = arith.constant 0 : index
    %c0_341 = arith.constant 0 : index
    %685 = vector.load %arg14[%684, %c0_340, %c0_341] : memref<8x8x32xbf16, #tpu.memory_space<vmem>>, vector<1x8x32xbf16>
    %686 = vector.shape_cast %685 : vector<1x8x32xbf16> to vector<8x32xbf16>
    %cst_342 = arith.constant dense<0.000000e+00> : vector<8x128xf32>
    %687 = tpu.matmul %686, %582, %cst_342 {dimension_numbers = #tpu.dot_dimension_numbers<[1], [0], [0], [1], [0, 0, 1, 1], [], []>} : vector<8x32xbf16>, vector<32x128xbf16>, vector<8x128xf32> -> vector<8x128xf32>
    %688 = arith.extf %682 : vector<8x128xbf16> to vector<8x128xf32>
    %689 = arith.addf %688, %687 : vector<8x128xf32>
    %690 = vector.extract_strided_slice %689 {offsets = [0, 0], sizes = [8, 96], strides = [1, 1]} : vector<8x128xf32> to vector<8x96xf32>
    %cst_343 = arith.constant 5.000000e-01 : f32
    %691 = vector.broadcast %cst_343 : f32 to vector<8x96xf32>
    %692 = arith.mulf %691, %690 : vector<8x96xf32>
    %693 = math.tanh %692 : vector<8x96xf32>
    %cst_344 = arith.constant 1.000000e+00 : f32
    %694 = vector.broadcast %cst_344 : f32 to vector<8x96xf32>
    %695 = arith.addf %693, %694 : vector<8x96xf32>
    %cst_345 = arith.constant 5.000000e-01 : f32
    %696 = vector.broadcast %cst_345 : f32 to vector<8x96xf32>
    %697 = arith.mulf %696, %695 : vector<8x96xf32>
    %698 = vector.extract_strided_slice %689 {offsets = [0, 96], sizes = [8, 32], strides = [1, 1]} : vector<8x128xf32> to vector<8x32xf32>
    %699 = math.tanh %698 : vector<8x32xf32>
    %700 = vector.extract_strided_slice %697 {offsets = [0, 32], sizes = [8, 32], strides = [1, 1]} : vector<8x96xf32> to vector<8x32xf32>
    %c0_346 = arith.constant 0 : index
    %c0_347 = arith.constant 0 : index
    %701 = vector.load %arg16[%c0_346, %c0_347] : memref<8x32xf32, #tpu.memory_space<vmem>>, vector<8x32xf32>
    %702 = arith.mulf %700, %701 : vector<8x32xf32>
    %703 = vector.extract_strided_slice %697 {offsets = [0, 0], sizes = [8, 32], strides = [1, 1]} : vector<8x96xf32> to vector<8x32xf32>
    %704 = arith.mulf %703, %699 : vector<8x32xf32>
    %705 = arith.addf %702, %704 : vector<8x32xf32>
    %706 = vector.extract_strided_slice %697 {offsets = [0, 64], sizes = [8, 32], strides = [1, 1]} : vector<8x96xf32> to vector<8x32xf32>
    %707 = math.tanh %705 : vector<8x32xf32>
    %708 = arith.mulf %706, %707 : vector<8x32xf32>
    %c0_348 = arith.constant 0 : index
    %c0_349 = arith.constant 0 : index
    %709 = vector.load %arg16[%c0_348, %c0_349] : memref<8x32xf32, #tpu.memory_space<vmem>>, vector<8x32xf32>
    tpu.vector_store %arg16[%c0_348, %c0_349], %705 {strides = array<i32>} : memref<8x32xf32, #tpu.memory_space<vmem>>, vector<8x32xf32>,
    %710 = arith.truncf %708 : vector<8x32xf32> to vector<8x32xbf16>
    %711 = arith.index_cast %c3_i32_336 : i32 to index
    %c0_350 = arith.constant 0 : index
    %c0_351 = arith.constant 0 : index
    %712 = vector.load %arg14[%711, %c0_350, %c0_351] : memref<8x8x32xbf16, #tpu.memory_space<vmem>>, vector<1x8x32xbf16>
    %713 = vector.shape_cast %712 : vector<1x8x32xbf16> to vector<8x32xbf16>
    %714 = vector.shape_cast %710 : vector<8x32xbf16> to vector<1x8x32xbf16>
    tpu.vector_store %arg14[%711, %c0_350, %c0_351], %714 {strides = array<i32>} : memref<8x8x32xbf16, #tpu.memory_space<vmem>>, vector<1x8x32xbf16>,
    %c4_i32_352 = arith.constant 4 : i32
    %715 = arith.index_cast %c4_i32_352 : i32 to index
    %c0_353 = arith.constant 0 : index
    %c0_354 = arith.constant 0 : index
    %716 = vector.load %arg15[%715, %c0_353, %c0_354] : memref<8x8x128xbf16, #tpu.memory_space<vmem>>, vector<1x8x128xbf16>
    %717 = vector.shape_cast %716 : vector<1x8x128xbf16> to vector<8x128xbf16>
    %c1_i32_355 = arith.constant 1 : i32
    %718 = arith.subi %c4_i32_352, %c1_i32_355 : i32
    %719 = arith.index_cast %718 : i32 to index
    %c0_356 = arith.constant 0 : index
    %c0_357 = arith.constant 0 : index
    %720 = vector.load %arg14[%719, %c0_356, %c0_357] : memref<8x8x32xbf16, #tpu.memory_space<vmem>>, vector<1x8x32xbf16>
    %721 = vector.shape_cast %720 : vector<1x8x32xbf16> to vector<8x32xbf16>
    %cst_358 = arith.constant dense<0.000000e+00> : vector<8x128xf32>
    %722 = tpu.matmul %721, %582, %cst_358 {dimension_numbers = #tpu.dot_dimension_numbers<[1], [0], [0], [1], [0, 0, 1, 1], [], []>} : vector<8x32xbf16>, vector<32x128xbf16>, vector<8x128xf32> -> vector<8x128xf32>
    %723 = arith.extf %717 : vector<8x128xbf16> to vector<8x128xf32>
    %724 = arith.addf %723, %722 : vector<8x128xf32>
    %725 = vector.extract_strided_slice %724 {offsets = [0, 0], sizes = [8, 96], strides = [1, 1]} : vector<8x128xf32> to vector<8x96xf32>
    %cst_359 = arith.constant 5.000000e-01 : f32
    %726 = vector.broadcast %cst_359 : f32 to vector<8x96xf32>
    %727 = arith.mulf %726, %725 : vector<8x96xf32>
    %728 = math.tanh %727 : vector<8x96xf32>
    %cst_360 = arith.constant 1.000000e+00 : f32
    %729 = vector.broadcast %cst_360 : f32 to vector<8x96xf32>
    %730 = arith.addf %728, %729 : vector<8x96xf32>
    %cst_361 = arith.constant 5.000000e-01 : f32
    %731 = vector.broadcast %cst_361 : f32 to vector<8x96xf32>
    %732 = arith.mulf %731, %730 : vector<8x96xf32>
    %733 = vector.extract_strided_slice %724 {offsets = [0, 96], sizes = [8, 32], strides = [1, 1]} : vector<8x128xf32> to vector<8x32xf32>
    %734 = math.tanh %733 : vector<8x32xf32>
    %735 = vector.extract_strided_slice %732 {offsets = [0, 32], sizes = [8, 32], strides = [1, 1]} : vector<8x96xf32> to vector<8x32xf32>
    %c0_362 = arith.constant 0 : index
    %c0_363 = arith.constant 0 : index
    %736 = vector.load %arg16[%c0_362, %c0_363] : memref<8x32xf32, #tpu.memory_space<vmem>>, vector<8x32xf32>
    %737 = arith.mulf %735, %736 : vector<8x32xf32>
    %738 = vector.extract_strided_slice %732 {offsets = [0, 0], sizes = [8, 32], strides = [1, 1]} : vector<8x96xf32> to vector<8x32xf32>
    %739 = arith.mulf %738, %734 : vector<8x32xf32>
    %740 = arith.addf %737, %739 : vector<8x32xf32>
    %741 = vector.extract_strided_slice %732 {offsets = [0, 64], sizes = [8, 32], strides = [1, 1]} : vector<8x96xf32> to vector<8x32xf32>
    %742 = math.tanh %740 : vector<8x32xf32>
    %743 = arith.mulf %741, %742 : vector<8x32xf32>
    %c0_364 = arith.constant 0 : index
    %c0_365 = arith.constant 0 : index
    %744 = vector.load %arg16[%c0_364, %c0_365] : memref<8x32xf32, #tpu.memory_space<vmem>>, vector<8x32xf32>
    tpu.vector_store %arg16[%c0_364, %c0_365], %740 {strides = array<i32>} : memref<8x32xf32, #tpu.memory_space<vmem>>, vector<8x32xf32>,
    %745 = arith.truncf %743 : vector<8x32xf32> to vector<8x32xbf16>
    %746 = arith.index_cast %c4_i32_352 : i32 to index
    %c0_366 = arith.constant 0 : index
    %c0_367 = arith.constant 0 : index
    %747 = vector.load %arg14[%746, %c0_366, %c0_367] : memref<8x8x32xbf16, #tpu.memory_space<vmem>>, vector<1x8x32xbf16>
    %748 = vector.shape_cast %747 : vector<1x8x32xbf16> to vector<8x32xbf16>
    %749 = vector.shape_cast %745 : vector<8x32xbf16> to vector<1x8x32xbf16>
    tpu.vector_store %arg14[%746, %c0_366, %c0_367], %749 {strides = array<i32>} : memref<8x8x32xbf16, #tpu.memory_space<vmem>>, vector<1x8x32xbf16>,
    %c5_i32_368 = arith.constant 5 : i32
    %750 = arith.index_cast %c5_i32_368 : i32 to index
    %c0_369 = arith.constant 0 : index
    %c0_370 = arith.constant 0 : index
    %751 = vector.load %arg15[%750, %c0_369, %c0_370] : memref<8x8x128xbf16, #tpu.memory_space<vmem>>, vector<1x8x128xbf16>
    %752 = vector.shape_cast %751 : vector<1x8x128xbf16> to vector<8x128xbf16>
    %c1_i32_371 = arith.constant 1 : i32
    %753 = arith.subi %c5_i32_368, %c1_i32_371 : i32
    %754 = arith.index_cast %753 : i32 to index
    %c0_372 = arith.constant 0 : index
    %c0_373 = arith.constant 0 : index
    %755 = vector.load %arg14[%754, %c0_372, %c0_373] : memref<8x8x32xbf16, #tpu.memory_space<vmem>>, vector<1x8x32xbf16>
    %756 = vector.shape_cast %755 : vector<1x8x32xbf16> to vector<8x32xbf16>
    %cst_374 = arith.constant dense<0.000000e+00> : vector<8x128xf32>
    %757 = tpu.matmul %756, %582, %cst_374 {dimension_numbers = #tpu.dot_dimension_numbers<[1], [0], [0], [1], [0, 0, 1, 1], [], []>} : vector<8x32xbf16>, vector<32x128xbf16>, vector<8x128xf32> -> vector<8x128xf32>
    %758 = arith.extf %752 : vector<8x128xbf16> to vector<8x128xf32>
    %759 = arith.addf %758, %757 : vector<8x128xf32>
    %760 = vector.extract_strided_slice %759 {offsets = [0, 0], sizes = [8, 96], strides = [1, 1]} : vector<8x128xf32> to vector<8x96xf32>
    %cst_375 = arith.constant 5.000000e-01 : f32
    %761 = vector.broadcast %cst_375 : f32 to vector<8x96xf32>
    %762 = arith.mulf %761, %760 : vector<8x96xf32>
    %763 = math.tanh %762 : vector<8x96xf32>
    %cst_376 = arith.constant 1.000000e+00 : f32
    %764 = vector.broadcast %cst_376 : f32 to vector<8x96xf32>
    %765 = arith.addf %763, %764 : vector<8x96xf32>
    %cst_377 = arith.constant 5.000000e-01 : f32
    %766 = vector.broadcast %cst_377 : f32 to vector<8x96xf32>
    %767 = arith.mulf %766, %765 : vector<8x96xf32>
    %768 = vector.extract_strided_slice %759 {offsets = [0, 96], sizes = [8, 32], strides = [1, 1]} : vector<8x128xf32> to vector<8x32xf32>
    %769 = math.tanh %768 : vector<8x32xf32>
    %770 = vector.extract_strided_slice %767 {offsets = [0, 32], sizes = [8, 32], strides = [1, 1]} : vector<8x96xf32> to vector<8x32xf32>
    %c0_378 = arith.constant 0 : index
    %c0_379 = arith.constant 0 : index
    %771 = vector.load %arg16[%c0_378, %c0_379] : memref<8x32xf32, #tpu.memory_space<vmem>>, vector<8x32xf32>
    %772 = arith.mulf %770, %771 : vector<8x32xf32>
    %773 = vector.extract_strided_slice %767 {offsets = [0, 0], sizes = [8, 32], strides = [1, 1]} : vector<8x96xf32> to vector<8x32xf32>
    %774 = arith.mulf %773, %769 : vector<8x32xf32>
    %775 = arith.addf %772, %774 : vector<8x32xf32>
    %776 = vector.extract_strided_slice %767 {offsets = [0, 64], sizes = [8, 32], strides = [1, 1]} : vector<8x96xf32> to vector<8x32xf32>
    %777 = math.tanh %775 : vector<8x32xf32>
    %778 = arith.mulf %776, %777 : vector<8x32xf32>
    %c0_380 = arith.constant 0 : index
    %c0_381 = arith.constant 0 : index
    %779 = vector.load %arg16[%c0_380, %c0_381] : memref<8x32xf32, #tpu.memory_space<vmem>>, vector<8x32xf32>
    tpu.vector_store %arg16[%c0_380, %c0_381], %775 {strides = array<i32>} : memref<8x32xf32, #tpu.memory_space<vmem>>, vector<8x32xf32>,
    %780 = arith.truncf %778 : vector<8x32xf32> to vector<8x32xbf16>
    %781 = arith.index_cast %c5_i32_368 : i32 to index
    %c0_382 = arith.constant 0 : index
    %c0_383 = arith.constant 0 : index
    %782 = vector.load %arg14[%781, %c0_382, %c0_383] : memref<8x8x32xbf16, #tpu.memory_space<vmem>>, vector<1x8x32xbf16>
    %783 = vector.shape_cast %782 : vector<1x8x32xbf16> to vector<8x32xbf16>
    %784 = vector.shape_cast %780 : vector<8x32xbf16> to vector<1x8x32xbf16>
    tpu.vector_store %arg14[%781, %c0_382, %c0_383], %784 {strides = array<i32>} : memref<8x8x32xbf16, #tpu.memory_space<vmem>>, vector<1x8x32xbf16>,
    %c6_i32_384 = arith.constant 6 : i32
    %785 = arith.index_cast %c6_i32_384 : i32 to index
    %c0_385 = arith.constant 0 : index
    %c0_386 = arith.constant 0 : index
    %786 = vector.load %arg15[%785, %c0_385, %c0_386] : memref<8x8x128xbf16, #tpu.memory_space<vmem>>, vector<1x8x128xbf16>
    %787 = vector.shape_cast %786 : vector<1x8x128xbf16> to vector<8x128xbf16>
    %c1_i32_387 = arith.constant 1 : i32
    %788 = arith.subi %c6_i32_384, %c1_i32_387 : i32
    %789 = arith.index_cast %788 : i32 to index
    %c0_388 = arith.constant 0 : index
    %c0_389 = arith.constant 0 : index
    %790 = vector.load %arg14[%789, %c0_388, %c0_389] : memref<8x8x32xbf16, #tpu.memory_space<vmem>>, vector<1x8x32xbf16>
    %791 = vector.shape_cast %790 : vector<1x8x32xbf16> to vector<8x32xbf16>
    %cst_390 = arith.constant dense<0.000000e+00> : vector<8x128xf32>
    %792 = tpu.matmul %791, %582, %cst_390 {dimension_numbers = #tpu.dot_dimension_numbers<[1], [0], [0], [1], [0, 0, 1, 1], [], []>} : vector<8x32xbf16>, vector<32x128xbf16>, vector<8x128xf32> -> vector<8x128xf32>
    %793 = arith.extf %787 : vector<8x128xbf16> to vector<8x128xf32>
    %794 = arith.addf %793, %792 : vector<8x128xf32>
    %795 = vector.extract_strided_slice %794 {offsets = [0, 0], sizes = [8, 96], strides = [1, 1]} : vector<8x128xf32> to vector<8x96xf32>
    %cst_391 = arith.constant 5.000000e-01 : f32
    %796 = vector.broadcast %cst_391 : f32 to vector<8x96xf32>
    %797 = arith.mulf %796, %795 : vector<8x96xf32>
    %798 = math.tanh %797 : vector<8x96xf32>
    %cst_392 = arith.constant 1.000000e+00 : f32
    %799 = vector.broadcast %cst_392 : f32 to vector<8x96xf32>
    %800 = arith.addf %798, %799 : vector<8x96xf32>
    %cst_393 = arith.constant 5.000000e-01 : f32
    %801 = vector.broadcast %cst_393 : f32 to vector<8x96xf32>
    %802 = arith.mulf %801, %800 : vector<8x96xf32>
    %803 = vector.extract_strided_slice %794 {offsets = [0, 96], sizes = [8, 32], strides = [1, 1]} : vector<8x128xf32> to vector<8x32xf32>
    %804 = math.tanh %803 : vector<8x32xf32>
    %805 = vector.extract_strided_slice %802 {offsets = [0, 32], sizes = [8, 32], strides = [1, 1]} : vector<8x96xf32> to vector<8x32xf32>
    %c0_394 = arith.constant 0 : index
    %c0_395 = arith.constant 0 : index
    %806 = vector.load %arg16[%c0_394, %c0_395] : memref<8x32xf32, #tpu.memory_space<vmem>>, vector<8x32xf32>
    %807 = arith.mulf %805, %806 : vector<8x32xf32>
    %808 = vector.extract_strided_slice %802 {offsets = [0, 0], sizes = [8, 32], strides = [1, 1]} : vector<8x96xf32> to vector<8x32xf32>
    %809 = arith.mulf %808, %804 : vector<8x32xf32>
    %810 = arith.addf %807, %809 : vector<8x32xf32>
    %811 = vector.extract_strided_slice %802 {offsets = [0, 64], sizes = [8, 32], strides = [1, 1]} : vector<8x96xf32> to vector<8x32xf32>
    %812 = math.tanh %810 : vector<8x32xf32>
    %813 = arith.mulf %811, %812 : vector<8x32xf32>
    %c0_396 = arith.constant 0 : index
    %c0_397 = arith.constant 0 : index
    %814 = vector.load %arg16[%c0_396, %c0_397] : memref<8x32xf32, #tpu.memory_space<vmem>>, vector<8x32xf32>
    tpu.vector_store %arg16[%c0_396, %c0_397], %810 {strides = array<i32>} : memref<8x32xf32, #tpu.memory_space<vmem>>, vector<8x32xf32>,
    %815 = arith.truncf %813 : vector<8x32xf32> to vector<8x32xbf16>
    %816 = arith.index_cast %c6_i32_384 : i32 to index
    %c0_398 = arith.constant 0 : index
    %c0_399 = arith.constant 0 : index
    %817 = vector.load %arg14[%816, %c0_398, %c0_399] : memref<8x8x32xbf16, #tpu.memory_space<vmem>>, vector<1x8x32xbf16>
    %818 = vector.shape_cast %817 : vector<1x8x32xbf16> to vector<8x32xbf16>
    %819 = vector.shape_cast %815 : vector<8x32xbf16> to vector<1x8x32xbf16>
    tpu.vector_store %arg14[%816, %c0_398, %c0_399], %819 {strides = array<i32>} : memref<8x8x32xbf16, #tpu.memory_space<vmem>>, vector<1x8x32xbf16>,
    %c7_i32_400 = arith.constant 7 : i32
    %820 = arith.index_cast %c7_i32_400 : i32 to index
    %c0_401 = arith.constant 0 : index
    %c0_402 = arith.constant 0 : index
    %821 = vector.load %arg15[%820, %c0_401, %c0_402] : memref<8x8x128xbf16, #tpu.memory_space<vmem>>, vector<1x8x128xbf16>
    %822 = vector.shape_cast %821 : vector<1x8x128xbf16> to vector<8x128xbf16>
    %c1_i32_403 = arith.constant 1 : i32
    %823 = arith.subi %c7_i32_400, %c1_i32_403 : i32
    %824 = arith.index_cast %823 : i32 to index
    %c0_404 = arith.constant 0 : index
    %c0_405 = arith.constant 0 : index
    %825 = vector.load %arg14[%824, %c0_404, %c0_405] : memref<8x8x32xbf16, #tpu.memory_space<vmem>>, vector<1x8x32xbf16>
    %826 = vector.shape_cast %825 : vector<1x8x32xbf16> to vector<8x32xbf16>
    %cst_406 = arith.constant dense<0.000000e+00> : vector<8x128xf32>
    %827 = tpu.matmul %826, %582, %cst_406 {dimension_numbers = #tpu.dot_dimension_numbers<[1], [0], [0], [1], [0, 0, 1, 1], [], []>} : vector<8x32xbf16>, vector<32x128xbf16>, vector<8x128xf32> -> vector<8x128xf32>
    %828 = arith.extf %822 : vector<8x128xbf16> to vector<8x128xf32>
    %829 = arith.addf %828, %827 : vector<8x128xf32>
    %830 = vector.extract_strided_slice %829 {offsets = [0, 0], sizes = [8, 96], strides = [1, 1]} : vector<8x128xf32> to vector<8x96xf32>
    %cst_407 = arith.constant 5.000000e-01 : f32
    %831 = vector.broadcast %cst_407 : f32 to vector<8x96xf32>
    %832 = arith.mulf %831, %830 : vector<8x96xf32>
    %833 = math.tanh %832 : vector<8x96xf32>
    %cst_408 = arith.constant 1.000000e+00 : f32
    %834 = vector.broadcast %cst_408 : f32 to vector<8x96xf32>
    %835 = arith.addf %833, %834 : vector<8x96xf32>
    %cst_409 = arith.constant 5.000000e-01 : f32
    %836 = vector.broadcast %cst_409 : f32 to vector<8x96xf32>
    %837 = arith.mulf %836, %835 : vector<8x96xf32>
    %838 = vector.extract_strided_slice %829 {offsets = [0, 96], sizes = [8, 32], strides = [1, 1]} : vector<8x128xf32> to vector<8x32xf32>
    %839 = math.tanh %838 : vector<8x32xf32>
    %840 = vector.extract_strided_slice %837 {offsets = [0, 32], sizes = [8, 32], strides = [1, 1]} : vector<8x96xf32> to vector<8x32xf32>
    %c0_410 = arith.constant 0 : index
    %c0_411 = arith.constant 0 : index
    %841 = vector.load %arg16[%c0_410, %c0_411] : memref<8x32xf32, #tpu.memory_space<vmem>>, vector<8x32xf32>
    %842 = arith.mulf %840, %841 : vector<8x32xf32>
    %843 = vector.extract_strided_slice %837 {offsets = [0, 0], sizes = [8, 32], strides = [1, 1]} : vector<8x96xf32> to vector<8x32xf32>
    %844 = arith.mulf %843, %839 : vector<8x32xf32>
    %845 = arith.addf %842, %844 : vector<8x32xf32>
    %846 = vector.extract_strided_slice %837 {offsets = [0, 64], sizes = [8, 32], strides = [1, 1]} : vector<8x96xf32> to vector<8x32xf32>
    %847 = math.tanh %845 : vector<8x32xf32>
    %848 = arith.mulf %846, %847 : vector<8x32xf32>
    %c0_412 = arith.constant 0 : index
    %c0_413 = arith.constant 0 : index
    %849 = vector.load %arg16[%c0_412, %c0_413] : memref<8x32xf32, #tpu.memory_space<vmem>>, vector<8x32xf32>
    tpu.vector_store %arg16[%c0_412, %c0_413], %845 {strides = array<i32>} : memref<8x32xf32, #tpu.memory_space<vmem>>, vector<8x32xf32>,
    %850 = arith.truncf %848 : vector<8x32xf32> to vector<8x32xbf16>
    %851 = arith.index_cast %c7_i32_400 : i32 to index
    %c0_414 = arith.constant 0 : index
    %c0_415 = arith.constant 0 : index
    %852 = vector.load %arg14[%851, %c0_414, %c0_415] : memref<8x8x32xbf16, #tpu.memory_space<vmem>>, vector<1x8x32xbf16>
    %853 = vector.shape_cast %852 : vector<1x8x32xbf16> to vector<8x32xbf16>
    %854 = vector.shape_cast %850 : vector<8x32xbf16> to vector<1x8x32xbf16>
    tpu.vector_store %arg14[%851, %c0_414, %c0_415], %854 {strides = array<i32>} : memref<8x8x32xbf16, #tpu.memory_space<vmem>>, vector<1x8x32xbf16>,
    %c7_i32_416 = arith.constant 7 : i32
    %c7 = arith.constant 7 : index
    %c0_417 = arith.constant 0 : index
    %c0_418 = arith.constant 0 : index
    %855 = vector.load %arg14[%c7, %c0_417, %c0_418] : memref<8x8x32xbf16, #tpu.memory_space<vmem>>, vector<1x8x32xbf16>
    %856 = vector.shape_cast %855 : vector<1x8x32xbf16> to vector<8x32xbf16>
    %c0_419 = arith.constant 0 : index
    %c0_420 = arith.constant 0 : index
    %857 = vector.load %arg11[%c0_419, %c0_420] : memref<32x128xbf16, #tpu.memory_space<vmem>>, vector<32x128xbf16>
    %cst_421 = arith.constant dense<0.000000e+00> : vector<8x128xf32>
    %858 = tpu.matmul %856, %857, %cst_421 {dimension_numbers = #tpu.dot_dimension_numbers<[1], [0], [0], [1], [0, 0, 1, 1], [], []>} : vector<8x32xbf16>, vector<32x128xbf16>, vector<8x128xf32> -> vector<8x128xf32>
    %c0_422 = arith.constant 0 : index
    %c0_423 = arith.constant 0 : index
    %859 = vector.load %arg12[%c0_422, %c0_423] : memref<1x128xf32, #tpu.memory_space<vmem>>, vector<1x128xf32>
    %860 = vector.broadcast %859 : vector<1x128xf32> to vector<8x128xf32>
    %861 = arith.addf %858, %860 : vector<8x128xf32>
    %cst_424 = arith.constant 0.000000e+00 : f32
    %862 = vector.broadcast %cst_424 : f32 to vector<8x128xf32>
    %863 = arith.maximumf %861, %862 : vector<8x128xf32>
    %c0_425 = arith.constant 0 : index
    %c0_426 = arith.constant 0 : index
    %864 = vector.load %arg13[%c0_425, %c0_426] : memref<8x128xf32, #tpu.memory_space<vmem>>, vector<8x128xf32>
    tpu.vector_store %arg13[%c0_425, %c0_426], %863 {strides = array<i32>} : memref<8x128xf32, #tpu.memory_space<vmem>>, vector<8x128xf32>,
    return
  }
  func.func @transform_0(%arg0: i32) -> (i32, i32, i32) {
    %c0_i32 = arith.constant 0 : i32
    %c0_i32_0 = arith.constant 0 : i32
    %c0_i32_1 = arith.constant 0 : i32
    return %c0_i32, %arg0, %c0_i32_0 : i32, i32, i32
  }
  func.func @transform_1(%arg0: i32) -> (i32, i32) {
    %c0_i32 = arith.constant 0 : i32
    %c0_i32_0 = arith.constant 0 : i32
    %c0_i32_1 = arith.constant 0 : i32
    return %c0_i32, %c0_i32_0 : i32, i32
  }
  func.func @transform_2(%arg0: i32) -> (i32, i32) {
    %c0_i32 = arith.constant 0 : i32
    %c0_i32_0 = arith.constant 0 : i32
    %c0_i32_1 = arith.constant 0 : i32
    return %c0_i32, %c0_i32_0 : i32, i32
  }
  func.func @transform_3(%arg0: i32) -> (i32, i32) {
    %c0_i32 = arith.constant 0 : i32
    %c0_i32_0 = arith.constant 0 : i32
    %c0_i32_1 = arith.constant 0 : i32
    return %c0_i32, %c0_i32_0 : i32, i32
  }
  func.func @transform_4(%arg0: i32) -> (i32, i32) {
    %c0_i32 = arith.constant 0 : i32
    %c0_i32_0 = arith.constant 0 : i32
    %c0_i32_1 = arith.constant 0 : i32
    return %c0_i32, %c0_i32_0 : i32, i32
  }
  func.func @transform_5(%arg0: i32) -> (i32, i32) {
    %c0_i32 = arith.constant 0 : i32
    %c0_i32_0 = arith.constant 0 : i32
    %c0_i32_1 = arith.constant 0 : i32
    return %c0_i32, %c0_i32_0 : i32, i32
  }
  func.func @transform_6(%arg0: i32) -> (i32, i32) {
    %c0_i32 = arith.constant 0 : i32
    %c0_i32_0 = arith.constant 0 : i32
    %c0_i32_1 = arith.constant 0 : i32
    return %c0_i32, %c0_i32_0 : i32, i32
  }
  func.func @transform_7(%arg0: i32) -> (i32, i32) {
    %c0_i32 = arith.constant 0 : i32
    %c0_i32_0 = arith.constant 0 : i32
    %c0_i32_1 = arith.constant 0 : i32
    return %c0_i32, %c0_i32_0 : i32, i32
  }
  func.func @transform_8(%arg0: i32) -> (i32, i32) {
    %c0_i32 = arith.constant 0 : i32
    %c0_i32_0 = arith.constant 0 : i32
    %c0_i32_1 = arith.constant 0 : i32
    return %c0_i32, %c0_i32_0 : i32, i32
  }
  func.func @transform_9(%arg0: i32) -> (i32, i32) {
    %c0_i32 = arith.constant 0 : i32
    %c0_i32_0 = arith.constant 0 : i32
    %c0_i32_1 = arith.constant 0 : i32
    return %c0_i32, %c0_i32_0 : i32, i32
  }
  func.func @transform_10(%arg0: i32) -> (i32, i32) {
    %c0_i32 = arith.constant 0 : i32
    %c0_i32_0 = arith.constant 0 : i32
    %c0_i32_1 = arith.constant 0 : i32
    return %c0_i32, %c0_i32_0 : i32, i32
  }
  func.func @transform_11(%arg0: i32) -> (i32, i32) {
    %c0_i32 = arith.constant 0 : i32
    %c0_i32_0 = arith.constant 0 : i32
    %c0_i32_1 = arith.constant 0 : i32
    return %c0_i32, %c0_i32_0 : i32, i32
  }
  func.func @transform_12(%arg0: i32) -> (i32, i32) {
    %c0_i32 = arith.constant 0 : i32
    %c0_i32_0 = arith.constant 0 : i32
    return %arg0, %c0_i32 : i32, i32
  }
}

module attributes {stable_mosaic.version = 11 : i64} {
  func.func @_lstm_kernel(%arg0: i32, %arg1: memref<8x8x12xbf16, #tpu.memory_space<vmem>>, %arg2: memref<12x128xbf16, #tpu.memory_space<vmem>>, %arg3: memref<32x128xbf16, #tpu.memory_space<vmem>>, %arg4: memref<1x128xf32, #tpu.memory_space<vmem>>, %arg5: memref<32x128xbf16, #tpu.memory_space<vmem>>, %arg6: memref<32x128xbf16, #tpu.memory_space<vmem>>, %arg7: memref<1x128xf32, #tpu.memory_space<vmem>>, %arg8: memref<32x128xbf16, #tpu.memory_space<vmem>>, %arg9: memref<32x128xbf16, #tpu.memory_space<vmem>>, %arg10: memref<1x128xf32, #tpu.memory_space<vmem>>, %arg11: memref<32x128xbf16, #tpu.memory_space<vmem>>, %arg12: memref<1x128xf32, #tpu.memory_space<vmem>>, %arg13: memref<8x128xf32, #tpu.memory_space<vmem>>, %arg14: memref<8x8x32xbf16, #tpu.memory_space<vmem>>, %arg15: memref<8x8x128xbf16, #tpu.memory_space<vmem>>, %arg16: memref<8x32xf32, #tpu.memory_space<vmem>>) attributes {dimension_semantics = [#tpu.dimension_semantics<parallel>], iteration_bounds = array<i64: 1>, scalar_prefetch = 0 : i64, scratch_operands = 3 : i64, tpu.core_type = #tpu.core_type<tc>, window_params = [{transform_indices = @transform_0, window_bounds = array<i64: 8, 8, 12>}, {pipeline_mode = #tpu.pipeline_mode<synchronous>, transform_indices = @transform_1, window_bounds = array<i64: 12, 128>}, {pipeline_mode = #tpu.pipeline_mode<synchronous>, transform_indices = @transform_2, window_bounds = array<i64: 32, 128>}, {pipeline_mode = #tpu.pipeline_mode<synchronous>, transform_indices = @transform_3, window_bounds = array<i64: 1, 128>}, {pipeline_mode = #tpu.pipeline_mode<synchronous>, transform_indices = @transform_4, window_bounds = array<i64: 32, 128>}, {pipeline_mode = #tpu.pipeline_mode<synchronous>, transform_indices = @transform_5, window_bounds = array<i64: 32, 128>}, {pipeline_mode = #tpu.pipeline_mode<synchronous>, transform_indices = @transform_6, window_bounds = array<i64: 1, 128>}, {pipeline_mode = #tpu.pipeline_mode<synchronous>, transform_indices = @transform_7, window_bounds = array<i64: 32, 128>}, {pipeline_mode = #tpu.pipeline_mode<synchronous>, transform_indices = @transform_8, window_bounds = array<i64: 32, 128>}, {pipeline_mode = #tpu.pipeline_mode<synchronous>, transform_indices = @transform_9, window_bounds = array<i64: 1, 128>}, {pipeline_mode = #tpu.pipeline_mode<synchronous>, transform_indices = @transform_10, window_bounds = array<i64: 32, 128>}, {pipeline_mode = #tpu.pipeline_mode<synchronous>, transform_indices = @transform_11, window_bounds = array<i64: 1, 128>}, {transform_indices = @transform_12, window_bounds = array<i64: 8, 128>}]} {
    %c0 = arith.constant 0 : index
    %c0_0 = arith.constant 0 : index
    %c0_1 = arith.constant 0 : index
    %0 = vector.load %arg1[%c0, %c0_0, %c0_1] : memref<8x8x12xbf16, #tpu.memory_space<vmem>>, vector<8x8x12xbf16>
    %1 = vector.shape_cast %0 : vector<8x8x12xbf16> to vector<64x12xbf16>
    %c0_2 = arith.constant 0 : index
    %c0_3 = arith.constant 0 : index
    %2 = vector.load %arg2[%c0_2, %c0_3] : memref<12x128xbf16, #tpu.memory_space<vmem>>, vector<12x128xbf16>
    %cst = arith.constant dense<0.000000e+00> : vector<64x128xf32>
    %3 = tpu.matmul %1, %2, %cst {dimension_numbers = #tpu.dot_dimension_numbers<[1], [0], [0], [1], [0, 0, 1, 1], [], []>} : vector<64x12xbf16>, vector<12x128xbf16>, vector<64x128xf32> -> vector<64x128xf32>
    %c0_4 = arith.constant 0 : index
    %c0_5 = arith.constant 0 : index
    %4 = vector.load %arg4[%c0_4, %c0_5] : memref<1x128xf32, #tpu.memory_space<vmem>>, vector<1x128xf32>
    %5 = vector.broadcast %4 : vector<1x128xf32> to vector<64x128xf32>
    %6 = arith.addf %3, %5 : vector<64x128xf32>
    %7 = vector.shape_cast %6 : vector<64x128xf32> to vector<8x8x128xf32>
    %8 = arith.truncf %7 : vector<8x8x128xf32> to vector<8x8x128xbf16>
    %c0_6 = arith.constant 0 : index
    %c0_7 = arith.constant 0 : index
    %c0_8 = arith.constant 0 : index
    %9 = vector.load %arg15[%c0_6, %c0_7, %c0_8] : memref<8x8x128xbf16, #tpu.memory_space<vmem>>, vector<8x8x128xbf16>
    tpu.vector_store %arg15[%c0_6, %c0_7, %c0_8], %8 {strides = array<i32>} : memref<8x8x128xbf16, #tpu.memory_space<vmem>>, vector<8x8x128xbf16>,
    %cst_9 = arith.constant 0.000000e+00 : f32
    %10 = vector.broadcast %cst_9 : f32 to vector<8x32xf32>
    %c0_10 = arith.constant 0 : index
    %c0_11 = arith.constant 0 : index
    %11 = vector.load %arg16[%c0_10, %c0_11] : memref<8x32xf32, #tpu.memory_space<vmem>>, vector<8x32xf32>
    tpu.vector_store %arg16[%c0_10, %c0_11], %10 {strides = array<i32>} : memref<8x32xf32, #tpu.memory_space<vmem>>, vector<8x32xf32>,
    %c0_12 = arith.constant 0 : index
    %c0_13 = arith.constant 0 : index
    %12 = vector.load %arg3[%c0_12, %c0_13] : memref<32x128xbf16, #tpu.memory_space<vmem>>, vector<32x128xbf16>
    %c0_14 = arith.constant 0 : index
    %c0_15 = arith.constant 0 : index
    %c0_16 = arith.constant 0 : index
    %13 = vector.load %arg15[%c0_14, %c0_15, %c0_16] : memref<8x8x128xbf16, #tpu.memory_space<vmem>>, vector<1x8x128xbf16>
    %14 = vector.shape_cast %13 : vector<1x8x128xbf16> to vector<8x128xbf16>
    %15 = arith.extf %14 : vector<8x128xbf16> to vector<8x128xf32>
    %16 = vector.extract_strided_slice %15 {offsets = [0, 0], sizes = [8, 96], strides = [1, 1]} : vector<8x128xf32> to vector<8x96xf32>
    %cst_17 = arith.constant 5.000000e-01 : f32
    %17 = vector.broadcast %cst_17 : f32 to vector<8x96xf32>
    %18 = arith.mulf %17, %16 : vector<8x96xf32>
    %19 = math.tanh %18 : vector<8x96xf32>
    %cst_18 = arith.constant 1.000000e+00 : f32
    %20 = vector.broadcast %cst_18 : f32 to vector<8x96xf32>
    %21 = arith.addf %19, %20 : vector<8x96xf32>
    %cst_19 = arith.constant 5.000000e-01 : f32
    %22 = vector.broadcast %cst_19 : f32 to vector<8x96xf32>
    %23 = arith.mulf %22, %21 : vector<8x96xf32>
    %24 = vector.extract_strided_slice %15 {offsets = [0, 96], sizes = [8, 32], strides = [1, 1]} : vector<8x128xf32> to vector<8x32xf32>
    %25 = math.tanh %24 : vector<8x32xf32>
    %26 = vector.extract_strided_slice %23 {offsets = [0, 32], sizes = [8, 32], strides = [1, 1]} : vector<8x96xf32> to vector<8x32xf32>
    %c0_20 = arith.constant 0 : index
    %c0_21 = arith.constant 0 : index
    %27 = vector.load %arg16[%c0_20, %c0_21] : memref<8x32xf32, #tpu.memory_space<vmem>>, vector<8x32xf32>
    %28 = arith.mulf %26, %27 : vector<8x32xf32>
    %29 = vector.extract_strided_slice %23 {offsets = [0, 0], sizes = [8, 32], strides = [1, 1]} : vector<8x96xf32> to vector<8x32xf32>
    %30 = arith.mulf %29, %25 : vector<8x32xf32>
    %31 = arith.addf %28, %30 : vector<8x32xf32>
    %32 = vector.extract_strided_slice %23 {offsets = [0, 64], sizes = [8, 32], strides = [1, 1]} : vector<8x96xf32> to vector<8x32xf32>
    %33 = math.tanh %31 : vector<8x32xf32>
    %34 = arith.mulf %32, %33 : vector<8x32xf32>
    %c0_22 = arith.constant 0 : index
    %c0_23 = arith.constant 0 : index
    %35 = vector.load %arg16[%c0_22, %c0_23] : memref<8x32xf32, #tpu.memory_space<vmem>>, vector<8x32xf32>
    tpu.vector_store %arg16[%c0_22, %c0_23], %31 {strides = array<i32>} : memref<8x32xf32, #tpu.memory_space<vmem>>, vector<8x32xf32>,
    %36 = arith.truncf %34 : vector<8x32xf32> to vector<8x32xbf16>
    %c0_24 = arith.constant 0 : index
    %c0_25 = arith.constant 0 : index
    %c0_26 = arith.constant 0 : index
    %37 = vector.load %arg14[%c0_24, %c0_25, %c0_26] : memref<8x8x32xbf16, #tpu.memory_space<vmem>>, vector<1x8x32xbf16>
    %38 = vector.shape_cast %37 : vector<1x8x32xbf16> to vector<8x32xbf16>
    %39 = vector.shape_cast %36 : vector<8x32xbf16> to vector<1x8x32xbf16>
    tpu.vector_store %arg14[%c0_24, %c0_25, %c0_26], %39 {strides = array<i32>} : memref<8x8x32xbf16, #tpu.memory_space<vmem>>, vector<1x8x32xbf16>,
    %c1_i32 = arith.constant 1 : i32
    %40 = arith.index_cast %c1_i32 : i32 to index
    %c0_27 = arith.constant 0 : index
    %c0_28 = arith.constant 0 : index
    %41 = vector.load %arg15[%40, %c0_27, %c0_28] : memref<8x8x128xbf16, #tpu.memory_space<vmem>>, vector<1x8x128xbf16>
    %42 = vector.shape_cast %41 : vector<1x8x128xbf16> to vector<8x128xbf16>
    %c1_i32_29 = arith.constant 1 : i32
    %43 = arith.subi %c1_i32, %c1_i32_29 : i32
    %44 = arith.index_cast %43 : i32 to index
    %c0_30 = arith.constant 0 : index
    %c0_31 = arith.constant 0 : index
    %45 = vector.load %arg14[%44, %c0_30, %c0_31] : memref<8x8x32xbf16, #tpu.memory_space<vmem>>, vector<1x8x32xbf16>
    %46 = vector.shape_cast %45 : vector<1x8x32xbf16> to vector<8x32xbf16>
    %cst_32 = arith.constant dense<0.000000e+00> : vector<8x128xf32>
    %47 = tpu.matmul %46, %12, %cst_32 {dimension_numbers = #tpu.dot_dimension_numbers<[1], [0], [0], [1], [0, 0, 1, 1], [], []>} : vector<8x32xbf16>, vector<32x128xbf16>, vector<8x128xf32> -> vector<8x128xf32>
    %48 = arith.extf %42 : vector<8x128xbf16> to vector<8x128xf32>
    %49 = arith.addf %48, %47 : vector<8x128xf32>
    %50 = vector.extract_strided_slice %49 {offsets = [0, 0], sizes = [8, 96], strides = [1, 1]} : vector<8x128xf32> to vector<8x96xf32>
    %cst_33 = arith.constant 5.000000e-01 : f32
    %51 = vector.broadcast %cst_33 : f32 to vector<8x96xf32>
    %52 = arith.mulf %51, %50 : vector<8x96xf32>
    %53 = math.tanh %52 : vector<8x96xf32>
    %cst_34 = arith.constant 1.000000e+00 : f32
    %54 = vector.broadcast %cst_34 : f32 to vector<8x96xf32>
    %55 = arith.addf %53, %54 : vector<8x96xf32>
    %cst_35 = arith.constant 5.000000e-01 : f32
    %56 = vector.broadcast %cst_35 : f32 to vector<8x96xf32>
    %57 = arith.mulf %56, %55 : vector<8x96xf32>
    %58 = vector.extract_strided_slice %49 {offsets = [0, 96], sizes = [8, 32], strides = [1, 1]} : vector<8x128xf32> to vector<8x32xf32>
    %59 = math.tanh %58 : vector<8x32xf32>
    %60 = vector.extract_strided_slice %57 {offsets = [0, 32], sizes = [8, 32], strides = [1, 1]} : vector<8x96xf32> to vector<8x32xf32>
    %c0_36 = arith.constant 0 : index
    %c0_37 = arith.constant 0 : index
    %61 = vector.load %arg16[%c0_36, %c0_37] : memref<8x32xf32, #tpu.memory_space<vmem>>, vector<8x32xf32>
    %62 = arith.mulf %60, %61 : vector<8x32xf32>
    %63 = vector.extract_strided_slice %57 {offsets = [0, 0], sizes = [8, 32], strides = [1, 1]} : vector<8x96xf32> to vector<8x32xf32>
    %64 = arith.mulf %63, %59 : vector<8x32xf32>
    %65 = arith.addf %62, %64 : vector<8x32xf32>
    %66 = vector.extract_strided_slice %57 {offsets = [0, 64], sizes = [8, 32], strides = [1, 1]} : vector<8x96xf32> to vector<8x32xf32>
    %67 = math.tanh %65 : vector<8x32xf32>
    %68 = arith.mulf %66, %67 : vector<8x32xf32>
    %c0_38 = arith.constant 0 : index
    %c0_39 = arith.constant 0 : index
    %69 = vector.load %arg16[%c0_38, %c0_39] : memref<8x32xf32, #tpu.memory_space<vmem>>, vector<8x32xf32>
    tpu.vector_store %arg16[%c0_38, %c0_39], %65 {strides = array<i32>} : memref<8x32xf32, #tpu.memory_space<vmem>>, vector<8x32xf32>,
    %70 = arith.truncf %68 : vector<8x32xf32> to vector<8x32xbf16>
    %71 = arith.index_cast %c1_i32 : i32 to index
    %c0_40 = arith.constant 0 : index
    %c0_41 = arith.constant 0 : index
    %72 = vector.load %arg14[%71, %c0_40, %c0_41] : memref<8x8x32xbf16, #tpu.memory_space<vmem>>, vector<1x8x32xbf16>
    %73 = vector.shape_cast %72 : vector<1x8x32xbf16> to vector<8x32xbf16>
    %74 = vector.shape_cast %70 : vector<8x32xbf16> to vector<1x8x32xbf16>
    tpu.vector_store %arg14[%71, %c0_40, %c0_41], %74 {strides = array<i32>} : memref<8x8x32xbf16, #tpu.memory_space<vmem>>, vector<1x8x32xbf16>,
    %c2_i32 = arith.constant 2 : i32
    %75 = arith.index_cast %c2_i32 : i32 to index
    %c0_42 = arith.constant 0 : index
    %c0_43 = arith.constant 0 : index
    %76 = vector.load %arg15[%75, %c0_42, %c0_43] : memref<8x8x128xbf16, #tpu.memory_space<vmem>>, vector<1x8x128xbf16>
    %77 = vector.shape_cast %76 : vector<1x8x128xbf16> to vector<8x128xbf16>
    %c1_i32_44 = arith.constant 1 : i32
    %78 = arith.subi %c2_i32, %c1_i32_44 : i32
    %79 = arith.index_cast %78 : i32 to index
    %c0_45 = arith.constant 0 : index
    %c0_46 = arith.constant 0 : index
    %80 = vector.load %arg14[%79, %c0_45, %c0_46] : memref<8x8x32xbf16, #tpu.memory_space<vmem>>, vector<1x8x32xbf16>
    %81 = vector.shape_cast %80 : vector<1x8x32xbf16> to vector<8x32xbf16>
    %cst_47 = arith.constant dense<0.000000e+00> : vector<8x128xf32>
    %82 = tpu.matmul %81, %12, %cst_47 {dimension_numbers = #tpu.dot_dimension_numbers<[1], [0], [0], [1], [0, 0, 1, 1], [], []>} : vector<8x32xbf16>, vector<32x128xbf16>, vector<8x128xf32> -> vector<8x128xf32>
    %83 = arith.extf %77 : vector<8x128xbf16> to vector<8x128xf32>
    %84 = arith.addf %83, %82 : vector<8x128xf32>
    %85 = vector.extract_strided_slice %84 {offsets = [0, 0], sizes = [8, 96], strides = [1, 1]} : vector<8x128xf32> to vector<8x96xf32>
    %cst_48 = arith.constant 5.000000e-01 : f32
    %86 = vector.broadcast %cst_48 : f32 to vector<8x96xf32>
    %87 = arith.mulf %86, %85 : vector<8x96xf32>
    %88 = math.tanh %87 : vector<8x96xf32>
    %cst_49 = arith.constant 1.000000e+00 : f32
    %89 = vector.broadcast %cst_49 : f32 to vector<8x96xf32>
    %90 = arith.addf %88, %89 : vector<8x96xf32>
    %cst_50 = arith.constant 5.000000e-01 : f32
    %91 = vector.broadcast %cst_50 : f32 to vector<8x96xf32>
    %92 = arith.mulf %91, %90 : vector<8x96xf32>
    %93 = vector.extract_strided_slice %84 {offsets = [0, 96], sizes = [8, 32], strides = [1, 1]} : vector<8x128xf32> to vector<8x32xf32>
    %94 = math.tanh %93 : vector<8x32xf32>
    %95 = vector.extract_strided_slice %92 {offsets = [0, 32], sizes = [8, 32], strides = [1, 1]} : vector<8x96xf32> to vector<8x32xf32>
    %c0_51 = arith.constant 0 : index
    %c0_52 = arith.constant 0 : index
    %96 = vector.load %arg16[%c0_51, %c0_52] : memref<8x32xf32, #tpu.memory_space<vmem>>, vector<8x32xf32>
    %97 = arith.mulf %95, %96 : vector<8x32xf32>
    %98 = vector.extract_strided_slice %92 {offsets = [0, 0], sizes = [8, 32], strides = [1, 1]} : vector<8x96xf32> to vector<8x32xf32>
    %99 = arith.mulf %98, %94 : vector<8x32xf32>
    %100 = arith.addf %97, %99 : vector<8x32xf32>
    %101 = vector.extract_strided_slice %92 {offsets = [0, 64], sizes = [8, 32], strides = [1, 1]} : vector<8x96xf32> to vector<8x32xf32>
    %102 = math.tanh %100 : vector<8x32xf32>
    %103 = arith.mulf %101, %102 : vector<8x32xf32>
    %c0_53 = arith.constant 0 : index
    %c0_54 = arith.constant 0 : index
    %104 = vector.load %arg16[%c0_53, %c0_54] : memref<8x32xf32, #tpu.memory_space<vmem>>, vector<8x32xf32>
    tpu.vector_store %arg16[%c0_53, %c0_54], %100 {strides = array<i32>} : memref<8x32xf32, #tpu.memory_space<vmem>>, vector<8x32xf32>,
    %105 = arith.truncf %103 : vector<8x32xf32> to vector<8x32xbf16>
    %106 = arith.index_cast %c2_i32 : i32 to index
    %c0_55 = arith.constant 0 : index
    %c0_56 = arith.constant 0 : index
    %107 = vector.load %arg14[%106, %c0_55, %c0_56] : memref<8x8x32xbf16, #tpu.memory_space<vmem>>, vector<1x8x32xbf16>
    %108 = vector.shape_cast %107 : vector<1x8x32xbf16> to vector<8x32xbf16>
    %109 = vector.shape_cast %105 : vector<8x32xbf16> to vector<1x8x32xbf16>
    tpu.vector_store %arg14[%106, %c0_55, %c0_56], %109 {strides = array<i32>} : memref<8x8x32xbf16, #tpu.memory_space<vmem>>, vector<1x8x32xbf16>,
    %c3_i32 = arith.constant 3 : i32
    %110 = arith.index_cast %c3_i32 : i32 to index
    %c0_57 = arith.constant 0 : index
    %c0_58 = arith.constant 0 : index
    %111 = vector.load %arg15[%110, %c0_57, %c0_58] : memref<8x8x128xbf16, #tpu.memory_space<vmem>>, vector<1x8x128xbf16>
    %112 = vector.shape_cast %111 : vector<1x8x128xbf16> to vector<8x128xbf16>
    %c1_i32_59 = arith.constant 1 : i32
    %113 = arith.subi %c3_i32, %c1_i32_59 : i32
    %114 = arith.index_cast %113 : i32 to index
    %c0_60 = arith.constant 0 : index
    %c0_61 = arith.constant 0 : index
    %115 = vector.load %arg14[%114, %c0_60, %c0_61] : memref<8x8x32xbf16, #tpu.memory_space<vmem>>, vector<1x8x32xbf16>
    %116 = vector.shape_cast %115 : vector<1x8x32xbf16> to vector<8x32xbf16>
    %cst_62 = arith.constant dense<0.000000e+00> : vector<8x128xf32>
    %117 = tpu.matmul %116, %12, %cst_62 {dimension_numbers = #tpu.dot_dimension_numbers<[1], [0], [0], [1], [0, 0, 1, 1], [], []>} : vector<8x32xbf16>, vector<32x128xbf16>, vector<8x128xf32> -> vector<8x128xf32>
    %118 = arith.extf %112 : vector<8x128xbf16> to vector<8x128xf32>
    %119 = arith.addf %118, %117 : vector<8x128xf32>
    %120 = vector.extract_strided_slice %119 {offsets = [0, 0], sizes = [8, 96], strides = [1, 1]} : vector<8x128xf32> to vector<8x96xf32>
    %cst_63 = arith.constant 5.000000e-01 : f32
    %121 = vector.broadcast %cst_63 : f32 to vector<8x96xf32>
    %122 = arith.mulf %121, %120 : vector<8x96xf32>
    %123 = math.tanh %122 : vector<8x96xf32>
    %cst_64 = arith.constant 1.000000e+00 : f32
    %124 = vector.broadcast %cst_64 : f32 to vector<8x96xf32>
    %125 = arith.addf %123, %124 : vector<8x96xf32>
    %cst_65 = arith.constant 5.000000e-01 : f32
    %126 = vector.broadcast %cst_65 : f32 to vector<8x96xf32>
    %127 = arith.mulf %126, %125 : vector<8x96xf32>
    %128 = vector.extract_strided_slice %119 {offsets = [0, 96], sizes = [8, 32], strides = [1, 1]} : vector<8x128xf32> to vector<8x32xf32>
    %129 = math.tanh %128 : vector<8x32xf32>
    %130 = vector.extract_strided_slice %127 {offsets = [0, 32], sizes = [8, 32], strides = [1, 1]} : vector<8x96xf32> to vector<8x32xf32>
    %c0_66 = arith.constant 0 : index
    %c0_67 = arith.constant 0 : index
    %131 = vector.load %arg16[%c0_66, %c0_67] : memref<8x32xf32, #tpu.memory_space<vmem>>, vector<8x32xf32>
    %132 = arith.mulf %130, %131 : vector<8x32xf32>
    %133 = vector.extract_strided_slice %127 {offsets = [0, 0], sizes = [8, 32], strides = [1, 1]} : vector<8x96xf32> to vector<8x32xf32>
    %134 = arith.mulf %133, %129 : vector<8x32xf32>
    %135 = arith.addf %132, %134 : vector<8x32xf32>
    %136 = vector.extract_strided_slice %127 {offsets = [0, 64], sizes = [8, 32], strides = [1, 1]} : vector<8x96xf32> to vector<8x32xf32>
    %137 = math.tanh %135 : vector<8x32xf32>
    %138 = arith.mulf %136, %137 : vector<8x32xf32>
    %c0_68 = arith.constant 0 : index
    %c0_69 = arith.constant 0 : index
    %139 = vector.load %arg16[%c0_68, %c0_69] : memref<8x32xf32, #tpu.memory_space<vmem>>, vector<8x32xf32>
    tpu.vector_store %arg16[%c0_68, %c0_69], %135 {strides = array<i32>} : memref<8x32xf32, #tpu.memory_space<vmem>>, vector<8x32xf32>,
    %140 = arith.truncf %138 : vector<8x32xf32> to vector<8x32xbf16>
    %141 = arith.index_cast %c3_i32 : i32 to index
    %c0_70 = arith.constant 0 : index
    %c0_71 = arith.constant 0 : index
    %142 = vector.load %arg14[%141, %c0_70, %c0_71] : memref<8x8x32xbf16, #tpu.memory_space<vmem>>, vector<1x8x32xbf16>
    %143 = vector.shape_cast %142 : vector<1x8x32xbf16> to vector<8x32xbf16>
    %144 = vector.shape_cast %140 : vector<8x32xbf16> to vector<1x8x32xbf16>
    tpu.vector_store %arg14[%141, %c0_70, %c0_71], %144 {strides = array<i32>} : memref<8x8x32xbf16, #tpu.memory_space<vmem>>, vector<1x8x32xbf16>,
    %c4_i32 = arith.constant 4 : i32
    %145 = arith.index_cast %c4_i32 : i32 to index
    %c0_72 = arith.constant 0 : index
    %c0_73 = arith.constant 0 : index
    %146 = vector.load %arg15[%145, %c0_72, %c0_73] : memref<8x8x128xbf16, #tpu.memory_space<vmem>>, vector<1x8x128xbf16>
    %147 = vector.shape_cast %146 : vector<1x8x128xbf16> to vector<8x128xbf16>
    %c1_i32_74 = arith.constant 1 : i32
    %148 = arith.subi %c4_i32, %c1_i32_74 : i32
    %149 = arith.index_cast %148 : i32 to index
    %c0_75 = arith.constant 0 : index
    %c0_76 = arith.constant 0 : index
    %150 = vector.load %arg14[%149, %c0_75, %c0_76] : memref<8x8x32xbf16, #tpu.memory_space<vmem>>, vector<1x8x32xbf16>
    %151 = vector.shape_cast %150 : vector<1x8x32xbf16> to vector<8x32xbf16>
    %cst_77 = arith.constant dense<0.000000e+00> : vector<8x128xf32>
    %152 = tpu.matmul %151, %12, %cst_77 {dimension_numbers = #tpu.dot_dimension_numbers<[1], [0], [0], [1], [0, 0, 1, 1], [], []>} : vector<8x32xbf16>, vector<32x128xbf16>, vector<8x128xf32> -> vector<8x128xf32>
    %153 = arith.extf %147 : vector<8x128xbf16> to vector<8x128xf32>
    %154 = arith.addf %153, %152 : vector<8x128xf32>
    %155 = vector.extract_strided_slice %154 {offsets = [0, 0], sizes = [8, 96], strides = [1, 1]} : vector<8x128xf32> to vector<8x96xf32>
    %cst_78 = arith.constant 5.000000e-01 : f32
    %156 = vector.broadcast %cst_78 : f32 to vector<8x96xf32>
    %157 = arith.mulf %156, %155 : vector<8x96xf32>
    %158 = math.tanh %157 : vector<8x96xf32>
    %cst_79 = arith.constant 1.000000e+00 : f32
    %159 = vector.broadcast %cst_79 : f32 to vector<8x96xf32>
    %160 = arith.addf %158, %159 : vector<8x96xf32>
    %cst_80 = arith.constant 5.000000e-01 : f32
    %161 = vector.broadcast %cst_80 : f32 to vector<8x96xf32>
    %162 = arith.mulf %161, %160 : vector<8x96xf32>
    %163 = vector.extract_strided_slice %154 {offsets = [0, 96], sizes = [8, 32], strides = [1, 1]} : vector<8x128xf32> to vector<8x32xf32>
    %164 = math.tanh %163 : vector<8x32xf32>
    %165 = vector.extract_strided_slice %162 {offsets = [0, 32], sizes = [8, 32], strides = [1, 1]} : vector<8x96xf32> to vector<8x32xf32>
    %c0_81 = arith.constant 0 : index
    %c0_82 = arith.constant 0 : index
    %166 = vector.load %arg16[%c0_81, %c0_82] : memref<8x32xf32, #tpu.memory_space<vmem>>, vector<8x32xf32>
    %167 = arith.mulf %165, %166 : vector<8x32xf32>
    %168 = vector.extract_strided_slice %162 {offsets = [0, 0], sizes = [8, 32], strides = [1, 1]} : vector<8x96xf32> to vector<8x32xf32>
    %169 = arith.mulf %168, %164 : vector<8x32xf32>
    %170 = arith.addf %167, %169 : vector<8x32xf32>
    %171 = vector.extract_strided_slice %162 {offsets = [0, 64], sizes = [8, 32], strides = [1, 1]} : vector<8x96xf32> to vector<8x32xf32>
    %172 = math.tanh %170 : vector<8x32xf32>
    %173 = arith.mulf %171, %172 : vector<8x32xf32>
    %c0_83 = arith.constant 0 : index
    %c0_84 = arith.constant 0 : index
    %174 = vector.load %arg16[%c0_83, %c0_84] : memref<8x32xf32, #tpu.memory_space<vmem>>, vector<8x32xf32>
    tpu.vector_store %arg16[%c0_83, %c0_84], %170 {strides = array<i32>} : memref<8x32xf32, #tpu.memory_space<vmem>>, vector<8x32xf32>,
    %175 = arith.truncf %173 : vector<8x32xf32> to vector<8x32xbf16>
    %176 = arith.index_cast %c4_i32 : i32 to index
    %c0_85 = arith.constant 0 : index
    %c0_86 = arith.constant 0 : index
    %177 = vector.load %arg14[%176, %c0_85, %c0_86] : memref<8x8x32xbf16, #tpu.memory_space<vmem>>, vector<1x8x32xbf16>
    %178 = vector.shape_cast %177 : vector<1x8x32xbf16> to vector<8x32xbf16>
    %179 = vector.shape_cast %175 : vector<8x32xbf16> to vector<1x8x32xbf16>
    tpu.vector_store %arg14[%176, %c0_85, %c0_86], %179 {strides = array<i32>} : memref<8x8x32xbf16, #tpu.memory_space<vmem>>, vector<1x8x32xbf16>,
    %c5_i32 = arith.constant 5 : i32
    %180 = arith.index_cast %c5_i32 : i32 to index
    %c0_87 = arith.constant 0 : index
    %c0_88 = arith.constant 0 : index
    %181 = vector.load %arg15[%180, %c0_87, %c0_88] : memref<8x8x128xbf16, #tpu.memory_space<vmem>>, vector<1x8x128xbf16>
    %182 = vector.shape_cast %181 : vector<1x8x128xbf16> to vector<8x128xbf16>
    %c1_i32_89 = arith.constant 1 : i32
    %183 = arith.subi %c5_i32, %c1_i32_89 : i32
    %184 = arith.index_cast %183 : i32 to index
    %c0_90 = arith.constant 0 : index
    %c0_91 = arith.constant 0 : index
    %185 = vector.load %arg14[%184, %c0_90, %c0_91] : memref<8x8x32xbf16, #tpu.memory_space<vmem>>, vector<1x8x32xbf16>
    %186 = vector.shape_cast %185 : vector<1x8x32xbf16> to vector<8x32xbf16>
    %cst_92 = arith.constant dense<0.000000e+00> : vector<8x128xf32>
    %187 = tpu.matmul %186, %12, %cst_92 {dimension_numbers = #tpu.dot_dimension_numbers<[1], [0], [0], [1], [0, 0, 1, 1], [], []>} : vector<8x32xbf16>, vector<32x128xbf16>, vector<8x128xf32> -> vector<8x128xf32>
    %188 = arith.extf %182 : vector<8x128xbf16> to vector<8x128xf32>
    %189 = arith.addf %188, %187 : vector<8x128xf32>
    %190 = vector.extract_strided_slice %189 {offsets = [0, 0], sizes = [8, 96], strides = [1, 1]} : vector<8x128xf32> to vector<8x96xf32>
    %cst_93 = arith.constant 5.000000e-01 : f32
    %191 = vector.broadcast %cst_93 : f32 to vector<8x96xf32>
    %192 = arith.mulf %191, %190 : vector<8x96xf32>
    %193 = math.tanh %192 : vector<8x96xf32>
    %cst_94 = arith.constant 1.000000e+00 : f32
    %194 = vector.broadcast %cst_94 : f32 to vector<8x96xf32>
    %195 = arith.addf %193, %194 : vector<8x96xf32>
    %cst_95 = arith.constant 5.000000e-01 : f32
    %196 = vector.broadcast %cst_95 : f32 to vector<8x96xf32>
    %197 = arith.mulf %196, %195 : vector<8x96xf32>
    %198 = vector.extract_strided_slice %189 {offsets = [0, 96], sizes = [8, 32], strides = [1, 1]} : vector<8x128xf32> to vector<8x32xf32>
    %199 = math.tanh %198 : vector<8x32xf32>
    %200 = vector.extract_strided_slice %197 {offsets = [0, 32], sizes = [8, 32], strides = [1, 1]} : vector<8x96xf32> to vector<8x32xf32>
    %c0_96 = arith.constant 0 : index
    %c0_97 = arith.constant 0 : index
    %201 = vector.load %arg16[%c0_96, %c0_97] : memref<8x32xf32, #tpu.memory_space<vmem>>, vector<8x32xf32>
    %202 = arith.mulf %200, %201 : vector<8x32xf32>
    %203 = vector.extract_strided_slice %197 {offsets = [0, 0], sizes = [8, 32], strides = [1, 1]} : vector<8x96xf32> to vector<8x32xf32>
    %204 = arith.mulf %203, %199 : vector<8x32xf32>
    %205 = arith.addf %202, %204 : vector<8x32xf32>
    %206 = vector.extract_strided_slice %197 {offsets = [0, 64], sizes = [8, 32], strides = [1, 1]} : vector<8x96xf32> to vector<8x32xf32>
    %207 = math.tanh %205 : vector<8x32xf32>
    %208 = arith.mulf %206, %207 : vector<8x32xf32>
    %c0_98 = arith.constant 0 : index
    %c0_99 = arith.constant 0 : index
    %209 = vector.load %arg16[%c0_98, %c0_99] : memref<8x32xf32, #tpu.memory_space<vmem>>, vector<8x32xf32>
    tpu.vector_store %arg16[%c0_98, %c0_99], %205 {strides = array<i32>} : memref<8x32xf32, #tpu.memory_space<vmem>>, vector<8x32xf32>,
    %210 = arith.truncf %208 : vector<8x32xf32> to vector<8x32xbf16>
    %211 = arith.index_cast %c5_i32 : i32 to index
    %c0_100 = arith.constant 0 : index
    %c0_101 = arith.constant 0 : index
    %212 = vector.load %arg14[%211, %c0_100, %c0_101] : memref<8x8x32xbf16, #tpu.memory_space<vmem>>, vector<1x8x32xbf16>
    %213 = vector.shape_cast %212 : vector<1x8x32xbf16> to vector<8x32xbf16>
    %214 = vector.shape_cast %210 : vector<8x32xbf16> to vector<1x8x32xbf16>
    tpu.vector_store %arg14[%211, %c0_100, %c0_101], %214 {strides = array<i32>} : memref<8x8x32xbf16, #tpu.memory_space<vmem>>, vector<1x8x32xbf16>,
    %c6_i32 = arith.constant 6 : i32
    %215 = arith.index_cast %c6_i32 : i32 to index
    %c0_102 = arith.constant 0 : index
    %c0_103 = arith.constant 0 : index
    %216 = vector.load %arg15[%215, %c0_102, %c0_103] : memref<8x8x128xbf16, #tpu.memory_space<vmem>>, vector<1x8x128xbf16>
    %217 = vector.shape_cast %216 : vector<1x8x128xbf16> to vector<8x128xbf16>
    %c1_i32_104 = arith.constant 1 : i32
    %218 = arith.subi %c6_i32, %c1_i32_104 : i32
    %219 = arith.index_cast %218 : i32 to index
    %c0_105 = arith.constant 0 : index
    %c0_106 = arith.constant 0 : index
    %220 = vector.load %arg14[%219, %c0_105, %c0_106] : memref<8x8x32xbf16, #tpu.memory_space<vmem>>, vector<1x8x32xbf16>
    %221 = vector.shape_cast %220 : vector<1x8x32xbf16> to vector<8x32xbf16>
    %cst_107 = arith.constant dense<0.000000e+00> : vector<8x128xf32>
    %222 = tpu.matmul %221, %12, %cst_107 {dimension_numbers = #tpu.dot_dimension_numbers<[1], [0], [0], [1], [0, 0, 1, 1], [], []>} : vector<8x32xbf16>, vector<32x128xbf16>, vector<8x128xf32> -> vector<8x128xf32>
    %223 = arith.extf %217 : vector<8x128xbf16> to vector<8x128xf32>
    %224 = arith.addf %223, %222 : vector<8x128xf32>
    %225 = vector.extract_strided_slice %224 {offsets = [0, 0], sizes = [8, 96], strides = [1, 1]} : vector<8x128xf32> to vector<8x96xf32>
    %cst_108 = arith.constant 5.000000e-01 : f32
    %226 = vector.broadcast %cst_108 : f32 to vector<8x96xf32>
    %227 = arith.mulf %226, %225 : vector<8x96xf32>
    %228 = math.tanh %227 : vector<8x96xf32>
    %cst_109 = arith.constant 1.000000e+00 : f32
    %229 = vector.broadcast %cst_109 : f32 to vector<8x96xf32>
    %230 = arith.addf %228, %229 : vector<8x96xf32>
    %cst_110 = arith.constant 5.000000e-01 : f32
    %231 = vector.broadcast %cst_110 : f32 to vector<8x96xf32>
    %232 = arith.mulf %231, %230 : vector<8x96xf32>
    %233 = vector.extract_strided_slice %224 {offsets = [0, 96], sizes = [8, 32], strides = [1, 1]} : vector<8x128xf32> to vector<8x32xf32>
    %234 = math.tanh %233 : vector<8x32xf32>
    %235 = vector.extract_strided_slice %232 {offsets = [0, 32], sizes = [8, 32], strides = [1, 1]} : vector<8x96xf32> to vector<8x32xf32>
    %c0_111 = arith.constant 0 : index
    %c0_112 = arith.constant 0 : index
    %236 = vector.load %arg16[%c0_111, %c0_112] : memref<8x32xf32, #tpu.memory_space<vmem>>, vector<8x32xf32>
    %237 = arith.mulf %235, %236 : vector<8x32xf32>
    %238 = vector.extract_strided_slice %232 {offsets = [0, 0], sizes = [8, 32], strides = [1, 1]} : vector<8x96xf32> to vector<8x32xf32>
    %239 = arith.mulf %238, %234 : vector<8x32xf32>
    %240 = arith.addf %237, %239 : vector<8x32xf32>
    %241 = vector.extract_strided_slice %232 {offsets = [0, 64], sizes = [8, 32], strides = [1, 1]} : vector<8x96xf32> to vector<8x32xf32>
    %242 = math.tanh %240 : vector<8x32xf32>
    %243 = arith.mulf %241, %242 : vector<8x32xf32>
    %c0_113 = arith.constant 0 : index
    %c0_114 = arith.constant 0 : index
    %244 = vector.load %arg16[%c0_113, %c0_114] : memref<8x32xf32, #tpu.memory_space<vmem>>, vector<8x32xf32>
    tpu.vector_store %arg16[%c0_113, %c0_114], %240 {strides = array<i32>} : memref<8x32xf32, #tpu.memory_space<vmem>>, vector<8x32xf32>,
    %245 = arith.truncf %243 : vector<8x32xf32> to vector<8x32xbf16>
    %246 = arith.index_cast %c6_i32 : i32 to index
    %c0_115 = arith.constant 0 : index
    %c0_116 = arith.constant 0 : index
    %247 = vector.load %arg14[%246, %c0_115, %c0_116] : memref<8x8x32xbf16, #tpu.memory_space<vmem>>, vector<1x8x32xbf16>
    %248 = vector.shape_cast %247 : vector<1x8x32xbf16> to vector<8x32xbf16>
    %249 = vector.shape_cast %245 : vector<8x32xbf16> to vector<1x8x32xbf16>
    tpu.vector_store %arg14[%246, %c0_115, %c0_116], %249 {strides = array<i32>} : memref<8x8x32xbf16, #tpu.memory_space<vmem>>, vector<1x8x32xbf16>,
    %c7_i32 = arith.constant 7 : i32
    %250 = arith.index_cast %c7_i32 : i32 to index
    %c0_117 = arith.constant 0 : index
    %c0_118 = arith.constant 0 : index
    %251 = vector.load %arg15[%250, %c0_117, %c0_118] : memref<8x8x128xbf16, #tpu.memory_space<vmem>>, vector<1x8x128xbf16>
    %252 = vector.shape_cast %251 : vector<1x8x128xbf16> to vector<8x128xbf16>
    %c1_i32_119 = arith.constant 1 : i32
    %253 = arith.subi %c7_i32, %c1_i32_119 : i32
    %254 = arith.index_cast %253 : i32 to index
    %c0_120 = arith.constant 0 : index
    %c0_121 = arith.constant 0 : index
    %255 = vector.load %arg14[%254, %c0_120, %c0_121] : memref<8x8x32xbf16, #tpu.memory_space<vmem>>, vector<1x8x32xbf16>
    %256 = vector.shape_cast %255 : vector<1x8x32xbf16> to vector<8x32xbf16>
    %cst_122 = arith.constant dense<0.000000e+00> : vector<8x128xf32>
    %257 = tpu.matmul %256, %12, %cst_122 {dimension_numbers = #tpu.dot_dimension_numbers<[1], [0], [0], [1], [0, 0, 1, 1], [], []>} : vector<8x32xbf16>, vector<32x128xbf16>, vector<8x128xf32> -> vector<8x128xf32>
    %258 = arith.extf %252 : vector<8x128xbf16> to vector<8x128xf32>
    %259 = arith.addf %258, %257 : vector<8x128xf32>
    %260 = vector.extract_strided_slice %259 {offsets = [0, 0], sizes = [8, 96], strides = [1, 1]} : vector<8x128xf32> to vector<8x96xf32>
    %cst_123 = arith.constant 5.000000e-01 : f32
    %261 = vector.broadcast %cst_123 : f32 to vector<8x96xf32>
    %262 = arith.mulf %261, %260 : vector<8x96xf32>
    %263 = math.tanh %262 : vector<8x96xf32>
    %cst_124 = arith.constant 1.000000e+00 : f32
    %264 = vector.broadcast %cst_124 : f32 to vector<8x96xf32>
    %265 = arith.addf %263, %264 : vector<8x96xf32>
    %cst_125 = arith.constant 5.000000e-01 : f32
    %266 = vector.broadcast %cst_125 : f32 to vector<8x96xf32>
    %267 = arith.mulf %266, %265 : vector<8x96xf32>
    %268 = vector.extract_strided_slice %259 {offsets = [0, 96], sizes = [8, 32], strides = [1, 1]} : vector<8x128xf32> to vector<8x32xf32>
    %269 = math.tanh %268 : vector<8x32xf32>
    %270 = vector.extract_strided_slice %267 {offsets = [0, 32], sizes = [8, 32], strides = [1, 1]} : vector<8x96xf32> to vector<8x32xf32>
    %c0_126 = arith.constant 0 : index
    %c0_127 = arith.constant 0 : index
    %271 = vector.load %arg16[%c0_126, %c0_127] : memref<8x32xf32, #tpu.memory_space<vmem>>, vector<8x32xf32>
    %272 = arith.mulf %270, %271 : vector<8x32xf32>
    %273 = vector.extract_strided_slice %267 {offsets = [0, 0], sizes = [8, 32], strides = [1, 1]} : vector<8x96xf32> to vector<8x32xf32>
    %274 = arith.mulf %273, %269 : vector<8x32xf32>
    %275 = arith.addf %272, %274 : vector<8x32xf32>
    %276 = vector.extract_strided_slice %267 {offsets = [0, 64], sizes = [8, 32], strides = [1, 1]} : vector<8x96xf32> to vector<8x32xf32>
    %277 = math.tanh %275 : vector<8x32xf32>
    %278 = arith.mulf %276, %277 : vector<8x32xf32>
    %c0_128 = arith.constant 0 : index
    %c0_129 = arith.constant 0 : index
    %279 = vector.load %arg16[%c0_128, %c0_129] : memref<8x32xf32, #tpu.memory_space<vmem>>, vector<8x32xf32>
    tpu.vector_store %arg16[%c0_128, %c0_129], %275 {strides = array<i32>} : memref<8x32xf32, #tpu.memory_space<vmem>>, vector<8x32xf32>,
    %280 = arith.truncf %278 : vector<8x32xf32> to vector<8x32xbf16>
    %281 = arith.index_cast %c7_i32 : i32 to index
    %c0_130 = arith.constant 0 : index
    %c0_131 = arith.constant 0 : index
    %282 = vector.load %arg14[%281, %c0_130, %c0_131] : memref<8x8x32xbf16, #tpu.memory_space<vmem>>, vector<1x8x32xbf16>
    %283 = vector.shape_cast %282 : vector<1x8x32xbf16> to vector<8x32xbf16>
    %284 = vector.shape_cast %280 : vector<8x32xbf16> to vector<1x8x32xbf16>
    tpu.vector_store %arg14[%281, %c0_130, %c0_131], %284 {strides = array<i32>} : memref<8x8x32xbf16, #tpu.memory_space<vmem>>, vector<1x8x32xbf16>,
    %c7_i32_132 = arith.constant 7 : i32
    %c0_133 = arith.constant 0 : index
    %c0_134 = arith.constant 0 : index
    %c0_135 = arith.constant 0 : index
    %285 = vector.load %arg14[%c0_133, %c0_134, %c0_135] : memref<8x8x32xbf16, #tpu.memory_space<vmem>>, vector<8x8x32xbf16>
    %286 = vector.shape_cast %285 : vector<8x8x32xbf16> to vector<64x32xbf16>
    %c0_136 = arith.constant 0 : index
    %c0_137 = arith.constant 0 : index
    %287 = vector.load %arg5[%c0_136, %c0_137] : memref<32x128xbf16, #tpu.memory_space<vmem>>, vector<32x128xbf16>
    %cst_138 = arith.constant dense<0.000000e+00> : vector<64x128xf32>
    %288 = tpu.matmul %286, %287, %cst_138 {dimension_numbers = #tpu.dot_dimension_numbers<[1], [0], [0], [1], [0, 0, 1, 1], [], []>} : vector<64x32xbf16>, vector<32x128xbf16>, vector<64x128xf32> -> vector<64x128xf32>
    %c0_139 = arith.constant 0 : index
    %c0_140 = arith.constant 0 : index
    %289 = vector.load %arg7[%c0_139, %c0_140] : memref<1x128xf32, #tpu.memory_space<vmem>>, vector<1x128xf32>
    %290 = vector.broadcast %289 : vector<1x128xf32> to vector<64x128xf32>
    %291 = arith.addf %288, %290 : vector<64x128xf32>
    %292 = vector.shape_cast %291 : vector<64x128xf32> to vector<8x8x128xf32>
    %293 = arith.truncf %292 : vector<8x8x128xf32> to vector<8x8x128xbf16>
    %c0_141 = arith.constant 0 : index
    %c0_142 = arith.constant 0 : index
    %c0_143 = arith.constant 0 : index
    %294 = vector.load %arg15[%c0_141, %c0_142, %c0_143] : memref<8x8x128xbf16, #tpu.memory_space<vmem>>, vector<8x8x128xbf16>
    tpu.vector_store %arg15[%c0_141, %c0_142, %c0_143], %293 {strides = array<i32>} : memref<8x8x128xbf16, #tpu.memory_space<vmem>>, vector<8x8x128xbf16>,
    %cst_144 = arith.constant 0.000000e+00 : f32
    %295 = vector.broadcast %cst_144 : f32 to vector<8x32xf32>
    %c0_145 = arith.constant 0 : index
    %c0_146 = arith.constant 0 : index
    %296 = vector.load %arg16[%c0_145, %c0_146] : memref<8x32xf32, #tpu.memory_space<vmem>>, vector<8x32xf32>
    tpu.vector_store %arg16[%c0_145, %c0_146], %295 {strides = array<i32>} : memref<8x32xf32, #tpu.memory_space<vmem>>, vector<8x32xf32>,
    %c0_147 = arith.constant 0 : index
    %c0_148 = arith.constant 0 : index
    %297 = vector.load %arg6[%c0_147, %c0_148] : memref<32x128xbf16, #tpu.memory_space<vmem>>, vector<32x128xbf16>
    %c0_149 = arith.constant 0 : index
    %c0_150 = arith.constant 0 : index
    %c0_151 = arith.constant 0 : index
    %298 = vector.load %arg15[%c0_149, %c0_150, %c0_151] : memref<8x8x128xbf16, #tpu.memory_space<vmem>>, vector<1x8x128xbf16>
    %299 = vector.shape_cast %298 : vector<1x8x128xbf16> to vector<8x128xbf16>
    %300 = arith.extf %299 : vector<8x128xbf16> to vector<8x128xf32>
    %301 = vector.extract_strided_slice %300 {offsets = [0, 0], sizes = [8, 96], strides = [1, 1]} : vector<8x128xf32> to vector<8x96xf32>
    %cst_152 = arith.constant 5.000000e-01 : f32
    %302 = vector.broadcast %cst_152 : f32 to vector<8x96xf32>
    %303 = arith.mulf %302, %301 : vector<8x96xf32>
    %304 = math.tanh %303 : vector<8x96xf32>
    %cst_153 = arith.constant 1.000000e+00 : f32
    %305 = vector.broadcast %cst_153 : f32 to vector<8x96xf32>
    %306 = arith.addf %304, %305 : vector<8x96xf32>
    %cst_154 = arith.constant 5.000000e-01 : f32
    %307 = vector.broadcast %cst_154 : f32 to vector<8x96xf32>
    %308 = arith.mulf %307, %306 : vector<8x96xf32>
    %309 = vector.extract_strided_slice %300 {offsets = [0, 96], sizes = [8, 32], strides = [1, 1]} : vector<8x128xf32> to vector<8x32xf32>
    %310 = math.tanh %309 : vector<8x32xf32>
    %311 = vector.extract_strided_slice %308 {offsets = [0, 32], sizes = [8, 32], strides = [1, 1]} : vector<8x96xf32> to vector<8x32xf32>
    %c0_155 = arith.constant 0 : index
    %c0_156 = arith.constant 0 : index
    %312 = vector.load %arg16[%c0_155, %c0_156] : memref<8x32xf32, #tpu.memory_space<vmem>>, vector<8x32xf32>
    %313 = arith.mulf %311, %312 : vector<8x32xf32>
    %314 = vector.extract_strided_slice %308 {offsets = [0, 0], sizes = [8, 32], strides = [1, 1]} : vector<8x96xf32> to vector<8x32xf32>
    %315 = arith.mulf %314, %310 : vector<8x32xf32>
    %316 = arith.addf %313, %315 : vector<8x32xf32>
    %317 = vector.extract_strided_slice %308 {offsets = [0, 64], sizes = [8, 32], strides = [1, 1]} : vector<8x96xf32> to vector<8x32xf32>
    %318 = math.tanh %316 : vector<8x32xf32>
    %319 = arith.mulf %317, %318 : vector<8x32xf32>
    %c0_157 = arith.constant 0 : index
    %c0_158 = arith.constant 0 : index
    %320 = vector.load %arg16[%c0_157, %c0_158] : memref<8x32xf32, #tpu.memory_space<vmem>>, vector<8x32xf32>
    tpu.vector_store %arg16[%c0_157, %c0_158], %316 {strides = array<i32>} : memref<8x32xf32, #tpu.memory_space<vmem>>, vector<8x32xf32>,
    %321 = arith.truncf %319 : vector<8x32xf32> to vector<8x32xbf16>
    %c0_159 = arith.constant 0 : index
    %c0_160 = arith.constant 0 : index
    %c0_161 = arith.constant 0 : index
    %322 = vector.load %arg14[%c0_159, %c0_160, %c0_161] : memref<8x8x32xbf16, #tpu.memory_space<vmem>>, vector<1x8x32xbf16>
    %323 = vector.shape_cast %322 : vector<1x8x32xbf16> to vector<8x32xbf16>
    %324 = vector.shape_cast %321 : vector<8x32xbf16> to vector<1x8x32xbf16>
    tpu.vector_store %arg14[%c0_159, %c0_160, %c0_161], %324 {strides = array<i32>} : memref<8x8x32xbf16, #tpu.memory_space<vmem>>, vector<1x8x32xbf16>,
    %c1_i32_162 = arith.constant 1 : i32
    %325 = arith.index_cast %c1_i32_162 : i32 to index
    %c0_163 = arith.constant 0 : index
    %c0_164 = arith.constant 0 : index
    %326 = vector.load %arg15[%325, %c0_163, %c0_164] : memref<8x8x128xbf16, #tpu.memory_space<vmem>>, vector<1x8x128xbf16>
    %327 = vector.shape_cast %326 : vector<1x8x128xbf16> to vector<8x128xbf16>
    %c1_i32_165 = arith.constant 1 : i32
    %328 = arith.subi %c1_i32_162, %c1_i32_165 : i32
    %329 = arith.index_cast %328 : i32 to index
    %c0_166 = arith.constant 0 : index
    %c0_167 = arith.constant 0 : index
    %330 = vector.load %arg14[%329, %c0_166, %c0_167] : memref<8x8x32xbf16, #tpu.memory_space<vmem>>, vector<1x8x32xbf16>
    %331 = vector.shape_cast %330 : vector<1x8x32xbf16> to vector<8x32xbf16>
    %cst_168 = arith.constant dense<0.000000e+00> : vector<8x128xf32>
    %332 = tpu.matmul %331, %297, %cst_168 {dimension_numbers = #tpu.dot_dimension_numbers<[1], [0], [0], [1], [0, 0, 1, 1], [], []>} : vector<8x32xbf16>, vector<32x128xbf16>, vector<8x128xf32> -> vector<8x128xf32>
    %333 = arith.extf %327 : vector<8x128xbf16> to vector<8x128xf32>
    %334 = arith.addf %333, %332 : vector<8x128xf32>
    %335 = vector.extract_strided_slice %334 {offsets = [0, 0], sizes = [8, 96], strides = [1, 1]} : vector<8x128xf32> to vector<8x96xf32>
    %cst_169 = arith.constant 5.000000e-01 : f32
    %336 = vector.broadcast %cst_169 : f32 to vector<8x96xf32>
    %337 = arith.mulf %336, %335 : vector<8x96xf32>
    %338 = math.tanh %337 : vector<8x96xf32>
    %cst_170 = arith.constant 1.000000e+00 : f32
    %339 = vector.broadcast %cst_170 : f32 to vector<8x96xf32>
    %340 = arith.addf %338, %339 : vector<8x96xf32>
    %cst_171 = arith.constant 5.000000e-01 : f32
    %341 = vector.broadcast %cst_171 : f32 to vector<8x96xf32>
    %342 = arith.mulf %341, %340 : vector<8x96xf32>
    %343 = vector.extract_strided_slice %334 {offsets = [0, 96], sizes = [8, 32], strides = [1, 1]} : vector<8x128xf32> to vector<8x32xf32>
    %344 = math.tanh %343 : vector<8x32xf32>
    %345 = vector.extract_strided_slice %342 {offsets = [0, 32], sizes = [8, 32], strides = [1, 1]} : vector<8x96xf32> to vector<8x32xf32>
    %c0_172 = arith.constant 0 : index
    %c0_173 = arith.constant 0 : index
    %346 = vector.load %arg16[%c0_172, %c0_173] : memref<8x32xf32, #tpu.memory_space<vmem>>, vector<8x32xf32>
    %347 = arith.mulf %345, %346 : vector<8x32xf32>
    %348 = vector.extract_strided_slice %342 {offsets = [0, 0], sizes = [8, 32], strides = [1, 1]} : vector<8x96xf32> to vector<8x32xf32>
    %349 = arith.mulf %348, %344 : vector<8x32xf32>
    %350 = arith.addf %347, %349 : vector<8x32xf32>
    %351 = vector.extract_strided_slice %342 {offsets = [0, 64], sizes = [8, 32], strides = [1, 1]} : vector<8x96xf32> to vector<8x32xf32>
    %352 = math.tanh %350 : vector<8x32xf32>
    %353 = arith.mulf %351, %352 : vector<8x32xf32>
    %c0_174 = arith.constant 0 : index
    %c0_175 = arith.constant 0 : index
    %354 = vector.load %arg16[%c0_174, %c0_175] : memref<8x32xf32, #tpu.memory_space<vmem>>, vector<8x32xf32>
    tpu.vector_store %arg16[%c0_174, %c0_175], %350 {strides = array<i32>} : memref<8x32xf32, #tpu.memory_space<vmem>>, vector<8x32xf32>,
    %355 = arith.truncf %353 : vector<8x32xf32> to vector<8x32xbf16>
    %356 = arith.index_cast %c1_i32_162 : i32 to index
    %c0_176 = arith.constant 0 : index
    %c0_177 = arith.constant 0 : index
    %357 = vector.load %arg14[%356, %c0_176, %c0_177] : memref<8x8x32xbf16, #tpu.memory_space<vmem>>, vector<1x8x32xbf16>
    %358 = vector.shape_cast %357 : vector<1x8x32xbf16> to vector<8x32xbf16>
    %359 = vector.shape_cast %355 : vector<8x32xbf16> to vector<1x8x32xbf16>
    tpu.vector_store %arg14[%356, %c0_176, %c0_177], %359 {strides = array<i32>} : memref<8x8x32xbf16, #tpu.memory_space<vmem>>, vector<1x8x32xbf16>,
    %c2_i32_178 = arith.constant 2 : i32
    %360 = arith.index_cast %c2_i32_178 : i32 to index
    %c0_179 = arith.constant 0 : index
    %c0_180 = arith.constant 0 : index
    %361 = vector.load %arg15[%360, %c0_179, %c0_180] : memref<8x8x128xbf16, #tpu.memory_space<vmem>>, vector<1x8x128xbf16>
    %362 = vector.shape_cast %361 : vector<1x8x128xbf16> to vector<8x128xbf16>
    %c1_i32_181 = arith.constant 1 : i32
    %363 = arith.subi %c2_i32_178, %c1_i32_181 : i32
    %364 = arith.index_cast %363 : i32 to index
    %c0_182 = arith.constant 0 : index
    %c0_183 = arith.constant 0 : index
    %365 = vector.load %arg14[%364, %c0_182, %c0_183] : memref<8x8x32xbf16, #tpu.memory_space<vmem>>, vector<1x8x32xbf16>
    %366 = vector.shape_cast %365 : vector<1x8x32xbf16> to vector<8x32xbf16>
    %cst_184 = arith.constant dense<0.000000e+00> : vector<8x128xf32>
    %367 = tpu.matmul %366, %297, %cst_184 {dimension_numbers = #tpu.dot_dimension_numbers<[1], [0], [0], [1], [0, 0, 1, 1], [], []>} : vector<8x32xbf16>, vector<32x128xbf16>, vector<8x128xf32> -> vector<8x128xf32>
    %368 = arith.extf %362 : vector<8x128xbf16> to vector<8x128xf32>
    %369 = arith.addf %368, %367 : vector<8x128xf32>
    %370 = vector.extract_strided_slice %369 {offsets = [0, 0], sizes = [8, 96], strides = [1, 1]} : vector<8x128xf32> to vector<8x96xf32>
    %cst_185 = arith.constant 5.000000e-01 : f32
    %371 = vector.broadcast %cst_185 : f32 to vector<8x96xf32>
    %372 = arith.mulf %371, %370 : vector<8x96xf32>
    %373 = math.tanh %372 : vector<8x96xf32>
    %cst_186 = arith.constant 1.000000e+00 : f32
    %374 = vector.broadcast %cst_186 : f32 to vector<8x96xf32>
    %375 = arith.addf %373, %374 : vector<8x96xf32>
    %cst_187 = arith.constant 5.000000e-01 : f32
    %376 = vector.broadcast %cst_187 : f32 to vector<8x96xf32>
    %377 = arith.mulf %376, %375 : vector<8x96xf32>
    %378 = vector.extract_strided_slice %369 {offsets = [0, 96], sizes = [8, 32], strides = [1, 1]} : vector<8x128xf32> to vector<8x32xf32>
    %379 = math.tanh %378 : vector<8x32xf32>
    %380 = vector.extract_strided_slice %377 {offsets = [0, 32], sizes = [8, 32], strides = [1, 1]} : vector<8x96xf32> to vector<8x32xf32>
    %c0_188 = arith.constant 0 : index
    %c0_189 = arith.constant 0 : index
    %381 = vector.load %arg16[%c0_188, %c0_189] : memref<8x32xf32, #tpu.memory_space<vmem>>, vector<8x32xf32>
    %382 = arith.mulf %380, %381 : vector<8x32xf32>
    %383 = vector.extract_strided_slice %377 {offsets = [0, 0], sizes = [8, 32], strides = [1, 1]} : vector<8x96xf32> to vector<8x32xf32>
    %384 = arith.mulf %383, %379 : vector<8x32xf32>
    %385 = arith.addf %382, %384 : vector<8x32xf32>
    %386 = vector.extract_strided_slice %377 {offsets = [0, 64], sizes = [8, 32], strides = [1, 1]} : vector<8x96xf32> to vector<8x32xf32>
    %387 = math.tanh %385 : vector<8x32xf32>
    %388 = arith.mulf %386, %387 : vector<8x32xf32>
    %c0_190 = arith.constant 0 : index
    %c0_191 = arith.constant 0 : index
    %389 = vector.load %arg16[%c0_190, %c0_191] : memref<8x32xf32, #tpu.memory_space<vmem>>, vector<8x32xf32>
    tpu.vector_store %arg16[%c0_190, %c0_191], %385 {strides = array<i32>} : memref<8x32xf32, #tpu.memory_space<vmem>>, vector<8x32xf32>,
    %390 = arith.truncf %388 : vector<8x32xf32> to vector<8x32xbf16>
    %391 = arith.index_cast %c2_i32_178 : i32 to index
    %c0_192 = arith.constant 0 : index
    %c0_193 = arith.constant 0 : index
    %392 = vector.load %arg14[%391, %c0_192, %c0_193] : memref<8x8x32xbf16, #tpu.memory_space<vmem>>, vector<1x8x32xbf16>
    %393 = vector.shape_cast %392 : vector<1x8x32xbf16> to vector<8x32xbf16>
    %394 = vector.shape_cast %390 : vector<8x32xbf16> to vector<1x8x32xbf16>
    tpu.vector_store %arg14[%391, %c0_192, %c0_193], %394 {strides = array<i32>} : memref<8x8x32xbf16, #tpu.memory_space<vmem>>, vector<1x8x32xbf16>,
    %c3_i32_194 = arith.constant 3 : i32
    %395 = arith.index_cast %c3_i32_194 : i32 to index
    %c0_195 = arith.constant 0 : index
    %c0_196 = arith.constant 0 : index
    %396 = vector.load %arg15[%395, %c0_195, %c0_196] : memref<8x8x128xbf16, #tpu.memory_space<vmem>>, vector<1x8x128xbf16>
    %397 = vector.shape_cast %396 : vector<1x8x128xbf16> to vector<8x128xbf16>
    %c1_i32_197 = arith.constant 1 : i32
    %398 = arith.subi %c3_i32_194, %c1_i32_197 : i32
    %399 = arith.index_cast %398 : i32 to index
    %c0_198 = arith.constant 0 : index
    %c0_199 = arith.constant 0 : index
    %400 = vector.load %arg14[%399, %c0_198, %c0_199] : memref<8x8x32xbf16, #tpu.memory_space<vmem>>, vector<1x8x32xbf16>
    %401 = vector.shape_cast %400 : vector<1x8x32xbf16> to vector<8x32xbf16>
    %cst_200 = arith.constant dense<0.000000e+00> : vector<8x128xf32>
    %402 = tpu.matmul %401, %297, %cst_200 {dimension_numbers = #tpu.dot_dimension_numbers<[1], [0], [0], [1], [0, 0, 1, 1], [], []>} : vector<8x32xbf16>, vector<32x128xbf16>, vector<8x128xf32> -> vector<8x128xf32>
    %403 = arith.extf %397 : vector<8x128xbf16> to vector<8x128xf32>
    %404 = arith.addf %403, %402 : vector<8x128xf32>
    %405 = vector.extract_strided_slice %404 {offsets = [0, 0], sizes = [8, 96], strides = [1, 1]} : vector<8x128xf32> to vector<8x96xf32>
    %cst_201 = arith.constant 5.000000e-01 : f32
    %406 = vector.broadcast %cst_201 : f32 to vector<8x96xf32>
    %407 = arith.mulf %406, %405 : vector<8x96xf32>
    %408 = math.tanh %407 : vector<8x96xf32>
    %cst_202 = arith.constant 1.000000e+00 : f32
    %409 = vector.broadcast %cst_202 : f32 to vector<8x96xf32>
    %410 = arith.addf %408, %409 : vector<8x96xf32>
    %cst_203 = arith.constant 5.000000e-01 : f32
    %411 = vector.broadcast %cst_203 : f32 to vector<8x96xf32>
    %412 = arith.mulf %411, %410 : vector<8x96xf32>
    %413 = vector.extract_strided_slice %404 {offsets = [0, 96], sizes = [8, 32], strides = [1, 1]} : vector<8x128xf32> to vector<8x32xf32>
    %414 = math.tanh %413 : vector<8x32xf32>
    %415 = vector.extract_strided_slice %412 {offsets = [0, 32], sizes = [8, 32], strides = [1, 1]} : vector<8x96xf32> to vector<8x32xf32>
    %c0_204 = arith.constant 0 : index
    %c0_205 = arith.constant 0 : index
    %416 = vector.load %arg16[%c0_204, %c0_205] : memref<8x32xf32, #tpu.memory_space<vmem>>, vector<8x32xf32>
    %417 = arith.mulf %415, %416 : vector<8x32xf32>
    %418 = vector.extract_strided_slice %412 {offsets = [0, 0], sizes = [8, 32], strides = [1, 1]} : vector<8x96xf32> to vector<8x32xf32>
    %419 = arith.mulf %418, %414 : vector<8x32xf32>
    %420 = arith.addf %417, %419 : vector<8x32xf32>
    %421 = vector.extract_strided_slice %412 {offsets = [0, 64], sizes = [8, 32], strides = [1, 1]} : vector<8x96xf32> to vector<8x32xf32>
    %422 = math.tanh %420 : vector<8x32xf32>
    %423 = arith.mulf %421, %422 : vector<8x32xf32>
    %c0_206 = arith.constant 0 : index
    %c0_207 = arith.constant 0 : index
    %424 = vector.load %arg16[%c0_206, %c0_207] : memref<8x32xf32, #tpu.memory_space<vmem>>, vector<8x32xf32>
    tpu.vector_store %arg16[%c0_206, %c0_207], %420 {strides = array<i32>} : memref<8x32xf32, #tpu.memory_space<vmem>>, vector<8x32xf32>,
    %425 = arith.truncf %423 : vector<8x32xf32> to vector<8x32xbf16>
    %426 = arith.index_cast %c3_i32_194 : i32 to index
    %c0_208 = arith.constant 0 : index
    %c0_209 = arith.constant 0 : index
    %427 = vector.load %arg14[%426, %c0_208, %c0_209] : memref<8x8x32xbf16, #tpu.memory_space<vmem>>, vector<1x8x32xbf16>
    %428 = vector.shape_cast %427 : vector<1x8x32xbf16> to vector<8x32xbf16>
    %429 = vector.shape_cast %425 : vector<8x32xbf16> to vector<1x8x32xbf16>
    tpu.vector_store %arg14[%426, %c0_208, %c0_209], %429 {strides = array<i32>} : memref<8x8x32xbf16, #tpu.memory_space<vmem>>, vector<1x8x32xbf16>,
    %c4_i32_210 = arith.constant 4 : i32
    %430 = arith.index_cast %c4_i32_210 : i32 to index
    %c0_211 = arith.constant 0 : index
    %c0_212 = arith.constant 0 : index
    %431 = vector.load %arg15[%430, %c0_211, %c0_212] : memref<8x8x128xbf16, #tpu.memory_space<vmem>>, vector<1x8x128xbf16>
    %432 = vector.shape_cast %431 : vector<1x8x128xbf16> to vector<8x128xbf16>
    %c1_i32_213 = arith.constant 1 : i32
    %433 = arith.subi %c4_i32_210, %c1_i32_213 : i32
    %434 = arith.index_cast %433 : i32 to index
    %c0_214 = arith.constant 0 : index
    %c0_215 = arith.constant 0 : index
    %435 = vector.load %arg14[%434, %c0_214, %c0_215] : memref<8x8x32xbf16, #tpu.memory_space<vmem>>, vector<1x8x32xbf16>
    %436 = vector.shape_cast %435 : vector<1x8x32xbf16> to vector<8x32xbf16>
    %cst_216 = arith.constant dense<0.000000e+00> : vector<8x128xf32>
    %437 = tpu.matmul %436, %297, %cst_216 {dimension_numbers = #tpu.dot_dimension_numbers<[1], [0], [0], [1], [0, 0, 1, 1], [], []>} : vector<8x32xbf16>, vector<32x128xbf16>, vector<8x128xf32> -> vector<8x128xf32>
    %438 = arith.extf %432 : vector<8x128xbf16> to vector<8x128xf32>
    %439 = arith.addf %438, %437 : vector<8x128xf32>
    %440 = vector.extract_strided_slice %439 {offsets = [0, 0], sizes = [8, 96], strides = [1, 1]} : vector<8x128xf32> to vector<8x96xf32>
    %cst_217 = arith.constant 5.000000e-01 : f32
    %441 = vector.broadcast %cst_217 : f32 to vector<8x96xf32>
    %442 = arith.mulf %441, %440 : vector<8x96xf32>
    %443 = math.tanh %442 : vector<8x96xf32>
    %cst_218 = arith.constant 1.000000e+00 : f32
    %444 = vector.broadcast %cst_218 : f32 to vector<8x96xf32>
    %445 = arith.addf %443, %444 : vector<8x96xf32>
    %cst_219 = arith.constant 5.000000e-01 : f32
    %446 = vector.broadcast %cst_219 : f32 to vector<8x96xf32>
    %447 = arith.mulf %446, %445 : vector<8x96xf32>
    %448 = vector.extract_strided_slice %439 {offsets = [0, 96], sizes = [8, 32], strides = [1, 1]} : vector<8x128xf32> to vector<8x32xf32>
    %449 = math.tanh %448 : vector<8x32xf32>
    %450 = vector.extract_strided_slice %447 {offsets = [0, 32], sizes = [8, 32], strides = [1, 1]} : vector<8x96xf32> to vector<8x32xf32>
    %c0_220 = arith.constant 0 : index
    %c0_221 = arith.constant 0 : index
    %451 = vector.load %arg16[%c0_220, %c0_221] : memref<8x32xf32, #tpu.memory_space<vmem>>, vector<8x32xf32>
    %452 = arith.mulf %450, %451 : vector<8x32xf32>
    %453 = vector.extract_strided_slice %447 {offsets = [0, 0], sizes = [8, 32], strides = [1, 1]} : vector<8x96xf32> to vector<8x32xf32>
    %454 = arith.mulf %453, %449 : vector<8x32xf32>
    %455 = arith.addf %452, %454 : vector<8x32xf32>
    %456 = vector.extract_strided_slice %447 {offsets = [0, 64], sizes = [8, 32], strides = [1, 1]} : vector<8x96xf32> to vector<8x32xf32>
    %457 = math.tanh %455 : vector<8x32xf32>
    %458 = arith.mulf %456, %457 : vector<8x32xf32>
    %c0_222 = arith.constant 0 : index
    %c0_223 = arith.constant 0 : index
    %459 = vector.load %arg16[%c0_222, %c0_223] : memref<8x32xf32, #tpu.memory_space<vmem>>, vector<8x32xf32>
    tpu.vector_store %arg16[%c0_222, %c0_223], %455 {strides = array<i32>} : memref<8x32xf32, #tpu.memory_space<vmem>>, vector<8x32xf32>,
    %460 = arith.truncf %458 : vector<8x32xf32> to vector<8x32xbf16>
    %461 = arith.index_cast %c4_i32_210 : i32 to index
    %c0_224 = arith.constant 0 : index
    %c0_225 = arith.constant 0 : index
    %462 = vector.load %arg14[%461, %c0_224, %c0_225] : memref<8x8x32xbf16, #tpu.memory_space<vmem>>, vector<1x8x32xbf16>
    %463 = vector.shape_cast %462 : vector<1x8x32xbf16> to vector<8x32xbf16>
    %464 = vector.shape_cast %460 : vector<8x32xbf16> to vector<1x8x32xbf16>
    tpu.vector_store %arg14[%461, %c0_224, %c0_225], %464 {strides = array<i32>} : memref<8x8x32xbf16, #tpu.memory_space<vmem>>, vector<1x8x32xbf16>,
    %c5_i32_226 = arith.constant 5 : i32
    %465 = arith.index_cast %c5_i32_226 : i32 to index
    %c0_227 = arith.constant 0 : index
    %c0_228 = arith.constant 0 : index
    %466 = vector.load %arg15[%465, %c0_227, %c0_228] : memref<8x8x128xbf16, #tpu.memory_space<vmem>>, vector<1x8x128xbf16>
    %467 = vector.shape_cast %466 : vector<1x8x128xbf16> to vector<8x128xbf16>
    %c1_i32_229 = arith.constant 1 : i32
    %468 = arith.subi %c5_i32_226, %c1_i32_229 : i32
    %469 = arith.index_cast %468 : i32 to index
    %c0_230 = arith.constant 0 : index
    %c0_231 = arith.constant 0 : index
    %470 = vector.load %arg14[%469, %c0_230, %c0_231] : memref<8x8x32xbf16, #tpu.memory_space<vmem>>, vector<1x8x32xbf16>
    %471 = vector.shape_cast %470 : vector<1x8x32xbf16> to vector<8x32xbf16>
    %cst_232 = arith.constant dense<0.000000e+00> : vector<8x128xf32>
    %472 = tpu.matmul %471, %297, %cst_232 {dimension_numbers = #tpu.dot_dimension_numbers<[1], [0], [0], [1], [0, 0, 1, 1], [], []>} : vector<8x32xbf16>, vector<32x128xbf16>, vector<8x128xf32> -> vector<8x128xf32>
    %473 = arith.extf %467 : vector<8x128xbf16> to vector<8x128xf32>
    %474 = arith.addf %473, %472 : vector<8x128xf32>
    %475 = vector.extract_strided_slice %474 {offsets = [0, 0], sizes = [8, 96], strides = [1, 1]} : vector<8x128xf32> to vector<8x96xf32>
    %cst_233 = arith.constant 5.000000e-01 : f32
    %476 = vector.broadcast %cst_233 : f32 to vector<8x96xf32>
    %477 = arith.mulf %476, %475 : vector<8x96xf32>
    %478 = math.tanh %477 : vector<8x96xf32>
    %cst_234 = arith.constant 1.000000e+00 : f32
    %479 = vector.broadcast %cst_234 : f32 to vector<8x96xf32>
    %480 = arith.addf %478, %479 : vector<8x96xf32>
    %cst_235 = arith.constant 5.000000e-01 : f32
    %481 = vector.broadcast %cst_235 : f32 to vector<8x96xf32>
    %482 = arith.mulf %481, %480 : vector<8x96xf32>
    %483 = vector.extract_strided_slice %474 {offsets = [0, 96], sizes = [8, 32], strides = [1, 1]} : vector<8x128xf32> to vector<8x32xf32>
    %484 = math.tanh %483 : vector<8x32xf32>
    %485 = vector.extract_strided_slice %482 {offsets = [0, 32], sizes = [8, 32], strides = [1, 1]} : vector<8x96xf32> to vector<8x32xf32>
    %c0_236 = arith.constant 0 : index
    %c0_237 = arith.constant 0 : index
    %486 = vector.load %arg16[%c0_236, %c0_237] : memref<8x32xf32, #tpu.memory_space<vmem>>, vector<8x32xf32>
    %487 = arith.mulf %485, %486 : vector<8x32xf32>
    %488 = vector.extract_strided_slice %482 {offsets = [0, 0], sizes = [8, 32], strides = [1, 1]} : vector<8x96xf32> to vector<8x32xf32>
    %489 = arith.mulf %488, %484 : vector<8x32xf32>
    %490 = arith.addf %487, %489 : vector<8x32xf32>
    %491 = vector.extract_strided_slice %482 {offsets = [0, 64], sizes = [8, 32], strides = [1, 1]} : vector<8x96xf32> to vector<8x32xf32>
    %492 = math.tanh %490 : vector<8x32xf32>
    %493 = arith.mulf %491, %492 : vector<8x32xf32>
    %c0_238 = arith.constant 0 : index
    %c0_239 = arith.constant 0 : index
    %494 = vector.load %arg16[%c0_238, %c0_239] : memref<8x32xf32, #tpu.memory_space<vmem>>, vector<8x32xf32>
    tpu.vector_store %arg16[%c0_238, %c0_239], %490 {strides = array<i32>} : memref<8x32xf32, #tpu.memory_space<vmem>>, vector<8x32xf32>,
    %495 = arith.truncf %493 : vector<8x32xf32> to vector<8x32xbf16>
    %496 = arith.index_cast %c5_i32_226 : i32 to index
    %c0_240 = arith.constant 0 : index
    %c0_241 = arith.constant 0 : index
    %497 = vector.load %arg14[%496, %c0_240, %c0_241] : memref<8x8x32xbf16, #tpu.memory_space<vmem>>, vector<1x8x32xbf16>
    %498 = vector.shape_cast %497 : vector<1x8x32xbf16> to vector<8x32xbf16>
    %499 = vector.shape_cast %495 : vector<8x32xbf16> to vector<1x8x32xbf16>
    tpu.vector_store %arg14[%496, %c0_240, %c0_241], %499 {strides = array<i32>} : memref<8x8x32xbf16, #tpu.memory_space<vmem>>, vector<1x8x32xbf16>,
    %c6_i32_242 = arith.constant 6 : i32
    %500 = arith.index_cast %c6_i32_242 : i32 to index
    %c0_243 = arith.constant 0 : index
    %c0_244 = arith.constant 0 : index
    %501 = vector.load %arg15[%500, %c0_243, %c0_244] : memref<8x8x128xbf16, #tpu.memory_space<vmem>>, vector<1x8x128xbf16>
    %502 = vector.shape_cast %501 : vector<1x8x128xbf16> to vector<8x128xbf16>
    %c1_i32_245 = arith.constant 1 : i32
    %503 = arith.subi %c6_i32_242, %c1_i32_245 : i32
    %504 = arith.index_cast %503 : i32 to index
    %c0_246 = arith.constant 0 : index
    %c0_247 = arith.constant 0 : index
    %505 = vector.load %arg14[%504, %c0_246, %c0_247] : memref<8x8x32xbf16, #tpu.memory_space<vmem>>, vector<1x8x32xbf16>
    %506 = vector.shape_cast %505 : vector<1x8x32xbf16> to vector<8x32xbf16>
    %cst_248 = arith.constant dense<0.000000e+00> : vector<8x128xf32>
    %507 = tpu.matmul %506, %297, %cst_248 {dimension_numbers = #tpu.dot_dimension_numbers<[1], [0], [0], [1], [0, 0, 1, 1], [], []>} : vector<8x32xbf16>, vector<32x128xbf16>, vector<8x128xf32> -> vector<8x128xf32>
    %508 = arith.extf %502 : vector<8x128xbf16> to vector<8x128xf32>
    %509 = arith.addf %508, %507 : vector<8x128xf32>
    %510 = vector.extract_strided_slice %509 {offsets = [0, 0], sizes = [8, 96], strides = [1, 1]} : vector<8x128xf32> to vector<8x96xf32>
    %cst_249 = arith.constant 5.000000e-01 : f32
    %511 = vector.broadcast %cst_249 : f32 to vector<8x96xf32>
    %512 = arith.mulf %511, %510 : vector<8x96xf32>
    %513 = math.tanh %512 : vector<8x96xf32>
    %cst_250 = arith.constant 1.000000e+00 : f32
    %514 = vector.broadcast %cst_250 : f32 to vector<8x96xf32>
    %515 = arith.addf %513, %514 : vector<8x96xf32>
    %cst_251 = arith.constant 5.000000e-01 : f32
    %516 = vector.broadcast %cst_251 : f32 to vector<8x96xf32>
    %517 = arith.mulf %516, %515 : vector<8x96xf32>
    %518 = vector.extract_strided_slice %509 {offsets = [0, 96], sizes = [8, 32], strides = [1, 1]} : vector<8x128xf32> to vector<8x32xf32>
    %519 = math.tanh %518 : vector<8x32xf32>
    %520 = vector.extract_strided_slice %517 {offsets = [0, 32], sizes = [8, 32], strides = [1, 1]} : vector<8x96xf32> to vector<8x32xf32>
    %c0_252 = arith.constant 0 : index
    %c0_253 = arith.constant 0 : index
    %521 = vector.load %arg16[%c0_252, %c0_253] : memref<8x32xf32, #tpu.memory_space<vmem>>, vector<8x32xf32>
    %522 = arith.mulf %520, %521 : vector<8x32xf32>
    %523 = vector.extract_strided_slice %517 {offsets = [0, 0], sizes = [8, 32], strides = [1, 1]} : vector<8x96xf32> to vector<8x32xf32>
    %524 = arith.mulf %523, %519 : vector<8x32xf32>
    %525 = arith.addf %522, %524 : vector<8x32xf32>
    %526 = vector.extract_strided_slice %517 {offsets = [0, 64], sizes = [8, 32], strides = [1, 1]} : vector<8x96xf32> to vector<8x32xf32>
    %527 = math.tanh %525 : vector<8x32xf32>
    %528 = arith.mulf %526, %527 : vector<8x32xf32>
    %c0_254 = arith.constant 0 : index
    %c0_255 = arith.constant 0 : index
    %529 = vector.load %arg16[%c0_254, %c0_255] : memref<8x32xf32, #tpu.memory_space<vmem>>, vector<8x32xf32>
    tpu.vector_store %arg16[%c0_254, %c0_255], %525 {strides = array<i32>} : memref<8x32xf32, #tpu.memory_space<vmem>>, vector<8x32xf32>,
    %530 = arith.truncf %528 : vector<8x32xf32> to vector<8x32xbf16>
    %531 = arith.index_cast %c6_i32_242 : i32 to index
    %c0_256 = arith.constant 0 : index
    %c0_257 = arith.constant 0 : index
    %532 = vector.load %arg14[%531, %c0_256, %c0_257] : memref<8x8x32xbf16, #tpu.memory_space<vmem>>, vector<1x8x32xbf16>
    %533 = vector.shape_cast %532 : vector<1x8x32xbf16> to vector<8x32xbf16>
    %534 = vector.shape_cast %530 : vector<8x32xbf16> to vector<1x8x32xbf16>
    tpu.vector_store %arg14[%531, %c0_256, %c0_257], %534 {strides = array<i32>} : memref<8x8x32xbf16, #tpu.memory_space<vmem>>, vector<1x8x32xbf16>,
    %c7_i32_258 = arith.constant 7 : i32
    %535 = arith.index_cast %c7_i32_258 : i32 to index
    %c0_259 = arith.constant 0 : index
    %c0_260 = arith.constant 0 : index
    %536 = vector.load %arg15[%535, %c0_259, %c0_260] : memref<8x8x128xbf16, #tpu.memory_space<vmem>>, vector<1x8x128xbf16>
    %537 = vector.shape_cast %536 : vector<1x8x128xbf16> to vector<8x128xbf16>
    %c1_i32_261 = arith.constant 1 : i32
    %538 = arith.subi %c7_i32_258, %c1_i32_261 : i32
    %539 = arith.index_cast %538 : i32 to index
    %c0_262 = arith.constant 0 : index
    %c0_263 = arith.constant 0 : index
    %540 = vector.load %arg14[%539, %c0_262, %c0_263] : memref<8x8x32xbf16, #tpu.memory_space<vmem>>, vector<1x8x32xbf16>
    %541 = vector.shape_cast %540 : vector<1x8x32xbf16> to vector<8x32xbf16>
    %cst_264 = arith.constant dense<0.000000e+00> : vector<8x128xf32>
    %542 = tpu.matmul %541, %297, %cst_264 {dimension_numbers = #tpu.dot_dimension_numbers<[1], [0], [0], [1], [0, 0, 1, 1], [], []>} : vector<8x32xbf16>, vector<32x128xbf16>, vector<8x128xf32> -> vector<8x128xf32>
    %543 = arith.extf %537 : vector<8x128xbf16> to vector<8x128xf32>
    %544 = arith.addf %543, %542 : vector<8x128xf32>
    %545 = vector.extract_strided_slice %544 {offsets = [0, 0], sizes = [8, 96], strides = [1, 1]} : vector<8x128xf32> to vector<8x96xf32>
    %cst_265 = arith.constant 5.000000e-01 : f32
    %546 = vector.broadcast %cst_265 : f32 to vector<8x96xf32>
    %547 = arith.mulf %546, %545 : vector<8x96xf32>
    %548 = math.tanh %547 : vector<8x96xf32>
    %cst_266 = arith.constant 1.000000e+00 : f32
    %549 = vector.broadcast %cst_266 : f32 to vector<8x96xf32>
    %550 = arith.addf %548, %549 : vector<8x96xf32>
    %cst_267 = arith.constant 5.000000e-01 : f32
    %551 = vector.broadcast %cst_267 : f32 to vector<8x96xf32>
    %552 = arith.mulf %551, %550 : vector<8x96xf32>
    %553 = vector.extract_strided_slice %544 {offsets = [0, 96], sizes = [8, 32], strides = [1, 1]} : vector<8x128xf32> to vector<8x32xf32>
    %554 = math.tanh %553 : vector<8x32xf32>
    %555 = vector.extract_strided_slice %552 {offsets = [0, 32], sizes = [8, 32], strides = [1, 1]} : vector<8x96xf32> to vector<8x32xf32>
    %c0_268 = arith.constant 0 : index
    %c0_269 = arith.constant 0 : index
    %556 = vector.load %arg16[%c0_268, %c0_269] : memref<8x32xf32, #tpu.memory_space<vmem>>, vector<8x32xf32>
    %557 = arith.mulf %555, %556 : vector<8x32xf32>
    %558 = vector.extract_strided_slice %552 {offsets = [0, 0], sizes = [8, 32], strides = [1, 1]} : vector<8x96xf32> to vector<8x32xf32>
    %559 = arith.mulf %558, %554 : vector<8x32xf32>
    %560 = arith.addf %557, %559 : vector<8x32xf32>
    %561 = vector.extract_strided_slice %552 {offsets = [0, 64], sizes = [8, 32], strides = [1, 1]} : vector<8x96xf32> to vector<8x32xf32>
    %562 = math.tanh %560 : vector<8x32xf32>
    %563 = arith.mulf %561, %562 : vector<8x32xf32>
    %c0_270 = arith.constant 0 : index
    %c0_271 = arith.constant 0 : index
    %564 = vector.load %arg16[%c0_270, %c0_271] : memref<8x32xf32, #tpu.memory_space<vmem>>, vector<8x32xf32>
    tpu.vector_store %arg16[%c0_270, %c0_271], %560 {strides = array<i32>} : memref<8x32xf32, #tpu.memory_space<vmem>>, vector<8x32xf32>,
    %565 = arith.truncf %563 : vector<8x32xf32> to vector<8x32xbf16>
    %566 = arith.index_cast %c7_i32_258 : i32 to index
    %c0_272 = arith.constant 0 : index
    %c0_273 = arith.constant 0 : index
    %567 = vector.load %arg14[%566, %c0_272, %c0_273] : memref<8x8x32xbf16, #tpu.memory_space<vmem>>, vector<1x8x32xbf16>
    %568 = vector.shape_cast %567 : vector<1x8x32xbf16> to vector<8x32xbf16>
    %569 = vector.shape_cast %565 : vector<8x32xbf16> to vector<1x8x32xbf16>
    tpu.vector_store %arg14[%566, %c0_272, %c0_273], %569 {strides = array<i32>} : memref<8x8x32xbf16, #tpu.memory_space<vmem>>, vector<1x8x32xbf16>,
    %c7_i32_274 = arith.constant 7 : i32
    %c0_275 = arith.constant 0 : index
    %c0_276 = arith.constant 0 : index
    %c0_277 = arith.constant 0 : index
    %570 = vector.load %arg14[%c0_275, %c0_276, %c0_277] : memref<8x8x32xbf16, #tpu.memory_space<vmem>>, vector<8x8x32xbf16>
    %571 = vector.shape_cast %570 : vector<8x8x32xbf16> to vector<64x32xbf16>
    %c0_278 = arith.constant 0 : index
    %c0_279 = arith.constant 0 : index
    %572 = vector.load %arg8[%c0_278, %c0_279] : memref<32x128xbf16, #tpu.memory_space<vmem>>, vector<32x128xbf16>
    %cst_280 = arith.constant dense<0.000000e+00> : vector<64x128xf32>
    %573 = tpu.matmul %571, %572, %cst_280 {dimension_numbers = #tpu.dot_dimension_numbers<[1], [0], [0], [1], [0, 0, 1, 1], [], []>} : vector<64x32xbf16>, vector<32x128xbf16>, vector<64x128xf32> -> vector<64x128xf32>
    %c0_281 = arith.constant 0 : index
    %c0_282 = arith.constant 0 : index
    %574 = vector.load %arg10[%c0_281, %c0_282] : memref<1x128xf32, #tpu.memory_space<vmem>>, vector<1x128xf32>
    %575 = vector.broadcast %574 : vector<1x128xf32> to vector<64x128xf32>
    %576 = arith.addf %573, %575 : vector<64x128xf32>
    %577 = vector.shape_cast %576 : vector<64x128xf32> to vector<8x8x128xf32>
    %578 = arith.truncf %577 : vector<8x8x128xf32> to vector<8x8x128xbf16>
    %c0_283 = arith.constant 0 : index
    %c0_284 = arith.constant 0 : index
    %c0_285 = arith.constant 0 : index
    %579 = vector.load %arg15[%c0_283, %c0_284, %c0_285] : memref<8x8x128xbf16, #tpu.memory_space<vmem>>, vector<8x8x128xbf16>
    tpu.vector_store %arg15[%c0_283, %c0_284, %c0_285], %578 {strides = array<i32>} : memref<8x8x128xbf16, #tpu.memory_space<vmem>>, vector<8x8x128xbf16>,
    %cst_286 = arith.constant 0.000000e+00 : f32
    %580 = vector.broadcast %cst_286 : f32 to vector<8x32xf32>
    %c0_287 = arith.constant 0 : index
    %c0_288 = arith.constant 0 : index
    %581 = vector.load %arg16[%c0_287, %c0_288] : memref<8x32xf32, #tpu.memory_space<vmem>>, vector<8x32xf32>
    tpu.vector_store %arg16[%c0_287, %c0_288], %580 {strides = array<i32>} : memref<8x32xf32, #tpu.memory_space<vmem>>, vector<8x32xf32>,
    %c0_289 = arith.constant 0 : index
    %c0_290 = arith.constant 0 : index
    %582 = vector.load %arg9[%c0_289, %c0_290] : memref<32x128xbf16, #tpu.memory_space<vmem>>, vector<32x128xbf16>
    %c0_291 = arith.constant 0 : index
    %c0_292 = arith.constant 0 : index
    %c0_293 = arith.constant 0 : index
    %583 = vector.load %arg15[%c0_291, %c0_292, %c0_293] : memref<8x8x128xbf16, #tpu.memory_space<vmem>>, vector<1x8x128xbf16>
    %584 = vector.shape_cast %583 : vector<1x8x128xbf16> to vector<8x128xbf16>
    %585 = arith.extf %584 : vector<8x128xbf16> to vector<8x128xf32>
    %586 = vector.extract_strided_slice %585 {offsets = [0, 0], sizes = [8, 96], strides = [1, 1]} : vector<8x128xf32> to vector<8x96xf32>
    %cst_294 = arith.constant 5.000000e-01 : f32
    %587 = vector.broadcast %cst_294 : f32 to vector<8x96xf32>
    %588 = arith.mulf %587, %586 : vector<8x96xf32>
    %589 = math.tanh %588 : vector<8x96xf32>
    %cst_295 = arith.constant 1.000000e+00 : f32
    %590 = vector.broadcast %cst_295 : f32 to vector<8x96xf32>
    %591 = arith.addf %589, %590 : vector<8x96xf32>
    %cst_296 = arith.constant 5.000000e-01 : f32
    %592 = vector.broadcast %cst_296 : f32 to vector<8x96xf32>
    %593 = arith.mulf %592, %591 : vector<8x96xf32>
    %594 = vector.extract_strided_slice %585 {offsets = [0, 96], sizes = [8, 32], strides = [1, 1]} : vector<8x128xf32> to vector<8x32xf32>
    %595 = math.tanh %594 : vector<8x32xf32>
    %596 = vector.extract_strided_slice %593 {offsets = [0, 32], sizes = [8, 32], strides = [1, 1]} : vector<8x96xf32> to vector<8x32xf32>
    %c0_297 = arith.constant 0 : index
    %c0_298 = arith.constant 0 : index
    %597 = vector.load %arg16[%c0_297, %c0_298] : memref<8x32xf32, #tpu.memory_space<vmem>>, vector<8x32xf32>
    %598 = arith.mulf %596, %597 : vector<8x32xf32>
    %599 = vector.extract_strided_slice %593 {offsets = [0, 0], sizes = [8, 32], strides = [1, 1]} : vector<8x96xf32> to vector<8x32xf32>
    %600 = arith.mulf %599, %595 : vector<8x32xf32>
    %601 = arith.addf %598, %600 : vector<8x32xf32>
    %602 = vector.extract_strided_slice %593 {offsets = [0, 64], sizes = [8, 32], strides = [1, 1]} : vector<8x96xf32> to vector<8x32xf32>
    %603 = math.tanh %601 : vector<8x32xf32>
    %604 = arith.mulf %602, %603 : vector<8x32xf32>
    %c0_299 = arith.constant 0 : index
    %c0_300 = arith.constant 0 : index
    %605 = vector.load %arg16[%c0_299, %c0_300] : memref<8x32xf32, #tpu.memory_space<vmem>>, vector<8x32xf32>
    tpu.vector_store %arg16[%c0_299, %c0_300], %601 {strides = array<i32>} : memref<8x32xf32, #tpu.memory_space<vmem>>, vector<8x32xf32>,
    %606 = arith.truncf %604 : vector<8x32xf32> to vector<8x32xbf16>
    %c0_301 = arith.constant 0 : index
    %c0_302 = arith.constant 0 : index
    %c0_303 = arith.constant 0 : index
    %607 = vector.load %arg14[%c0_301, %c0_302, %c0_303] : memref<8x8x32xbf16, #tpu.memory_space<vmem>>, vector<1x8x32xbf16>
    %608 = vector.shape_cast %607 : vector<1x8x32xbf16> to vector<8x32xbf16>
    %609 = vector.shape_cast %606 : vector<8x32xbf16> to vector<1x8x32xbf16>
    tpu.vector_store %arg14[%c0_301, %c0_302, %c0_303], %609 {strides = array<i32>} : memref<8x8x32xbf16, #tpu.memory_space<vmem>>, vector<1x8x32xbf16>,
    %c1_i32_304 = arith.constant 1 : i32
    %610 = arith.index_cast %c1_i32_304 : i32 to index
    %c0_305 = arith.constant 0 : index
    %c0_306 = arith.constant 0 : index
    %611 = vector.load %arg15[%610, %c0_305, %c0_306] : memref<8x8x128xbf16, #tpu.memory_space<vmem>>, vector<1x8x128xbf16>
    %612 = vector.shape_cast %611 : vector<1x8x128xbf16> to vector<8x128xbf16>
    %c1_i32_307 = arith.constant 1 : i32
    %613 = arith.subi %c1_i32_304, %c1_i32_307 : i32
    %614 = arith.index_cast %613 : i32 to index
    %c0_308 = arith.constant 0 : index
    %c0_309 = arith.constant 0 : index
    %615 = vector.load %arg14[%614, %c0_308, %c0_309] : memref<8x8x32xbf16, #tpu.memory_space<vmem>>, vector<1x8x32xbf16>
    %616 = vector.shape_cast %615 : vector<1x8x32xbf16> to vector<8x32xbf16>
    %cst_310 = arith.constant dense<0.000000e+00> : vector<8x128xf32>
    %617 = tpu.matmul %616, %582, %cst_310 {dimension_numbers = #tpu.dot_dimension_numbers<[1], [0], [0], [1], [0, 0, 1, 1], [], []>} : vector<8x32xbf16>, vector<32x128xbf16>, vector<8x128xf32> -> vector<8x128xf32>
    %618 = arith.extf %612 : vector<8x128xbf16> to vector<8x128xf32>
    %619 = arith.addf %618, %617 : vector<8x128xf32>
    %620 = vector.extract_strided_slice %619 {offsets = [0, 0], sizes = [8, 96], strides = [1, 1]} : vector<8x128xf32> to vector<8x96xf32>
    %cst_311 = arith.constant 5.000000e-01 : f32
    %621 = vector.broadcast %cst_311 : f32 to vector<8x96xf32>
    %622 = arith.mulf %621, %620 : vector<8x96xf32>
    %623 = math.tanh %622 : vector<8x96xf32>
    %cst_312 = arith.constant 1.000000e+00 : f32
    %624 = vector.broadcast %cst_312 : f32 to vector<8x96xf32>
    %625 = arith.addf %623, %624 : vector<8x96xf32>
    %cst_313 = arith.constant 5.000000e-01 : f32
    %626 = vector.broadcast %cst_313 : f32 to vector<8x96xf32>
    %627 = arith.mulf %626, %625 : vector<8x96xf32>
    %628 = vector.extract_strided_slice %619 {offsets = [0, 96], sizes = [8, 32], strides = [1, 1]} : vector<8x128xf32> to vector<8x32xf32>
    %629 = math.tanh %628 : vector<8x32xf32>
    %630 = vector.extract_strided_slice %627 {offsets = [0, 32], sizes = [8, 32], strides = [1, 1]} : vector<8x96xf32> to vector<8x32xf32>
    %c0_314 = arith.constant 0 : index
    %c0_315 = arith.constant 0 : index
    %631 = vector.load %arg16[%c0_314, %c0_315] : memref<8x32xf32, #tpu.memory_space<vmem>>, vector<8x32xf32>
    %632 = arith.mulf %630, %631 : vector<8x32xf32>
    %633 = vector.extract_strided_slice %627 {offsets = [0, 0], sizes = [8, 32], strides = [1, 1]} : vector<8x96xf32> to vector<8x32xf32>
    %634 = arith.mulf %633, %629 : vector<8x32xf32>
    %635 = arith.addf %632, %634 : vector<8x32xf32>
    %636 = vector.extract_strided_slice %627 {offsets = [0, 64], sizes = [8, 32], strides = [1, 1]} : vector<8x96xf32> to vector<8x32xf32>
    %637 = math.tanh %635 : vector<8x32xf32>
    %638 = arith.mulf %636, %637 : vector<8x32xf32>
    %c0_316 = arith.constant 0 : index
    %c0_317 = arith.constant 0 : index
    %639 = vector.load %arg16[%c0_316, %c0_317] : memref<8x32xf32, #tpu.memory_space<vmem>>, vector<8x32xf32>
    tpu.vector_store %arg16[%c0_316, %c0_317], %635 {strides = array<i32>} : memref<8x32xf32, #tpu.memory_space<vmem>>, vector<8x32xf32>,
    %640 = arith.truncf %638 : vector<8x32xf32> to vector<8x32xbf16>
    %641 = arith.index_cast %c1_i32_304 : i32 to index
    %c0_318 = arith.constant 0 : index
    %c0_319 = arith.constant 0 : index
    %642 = vector.load %arg14[%641, %c0_318, %c0_319] : memref<8x8x32xbf16, #tpu.memory_space<vmem>>, vector<1x8x32xbf16>
    %643 = vector.shape_cast %642 : vector<1x8x32xbf16> to vector<8x32xbf16>
    %644 = vector.shape_cast %640 : vector<8x32xbf16> to vector<1x8x32xbf16>
    tpu.vector_store %arg14[%641, %c0_318, %c0_319], %644 {strides = array<i32>} : memref<8x8x32xbf16, #tpu.memory_space<vmem>>, vector<1x8x32xbf16>,
    %c2_i32_320 = arith.constant 2 : i32
    %645 = arith.index_cast %c2_i32_320 : i32 to index
    %c0_321 = arith.constant 0 : index
    %c0_322 = arith.constant 0 : index
    %646 = vector.load %arg15[%645, %c0_321, %c0_322] : memref<8x8x128xbf16, #tpu.memory_space<vmem>>, vector<1x8x128xbf16>
    %647 = vector.shape_cast %646 : vector<1x8x128xbf16> to vector<8x128xbf16>
    %c1_i32_323 = arith.constant 1 : i32
    %648 = arith.subi %c2_i32_320, %c1_i32_323 : i32
    %649 = arith.index_cast %648 : i32 to index
    %c0_324 = arith.constant 0 : index
    %c0_325 = arith.constant 0 : index
    %650 = vector.load %arg14[%649, %c0_324, %c0_325] : memref<8x8x32xbf16, #tpu.memory_space<vmem>>, vector<1x8x32xbf16>
    %651 = vector.shape_cast %650 : vector<1x8x32xbf16> to vector<8x32xbf16>
    %cst_326 = arith.constant dense<0.000000e+00> : vector<8x128xf32>
    %652 = tpu.matmul %651, %582, %cst_326 {dimension_numbers = #tpu.dot_dimension_numbers<[1], [0], [0], [1], [0, 0, 1, 1], [], []>} : vector<8x32xbf16>, vector<32x128xbf16>, vector<8x128xf32> -> vector<8x128xf32>
    %653 = arith.extf %647 : vector<8x128xbf16> to vector<8x128xf32>
    %654 = arith.addf %653, %652 : vector<8x128xf32>
    %655 = vector.extract_strided_slice %654 {offsets = [0, 0], sizes = [8, 96], strides = [1, 1]} : vector<8x128xf32> to vector<8x96xf32>
    %cst_327 = arith.constant 5.000000e-01 : f32
    %656 = vector.broadcast %cst_327 : f32 to vector<8x96xf32>
    %657 = arith.mulf %656, %655 : vector<8x96xf32>
    %658 = math.tanh %657 : vector<8x96xf32>
    %cst_328 = arith.constant 1.000000e+00 : f32
    %659 = vector.broadcast %cst_328 : f32 to vector<8x96xf32>
    %660 = arith.addf %658, %659 : vector<8x96xf32>
    %cst_329 = arith.constant 5.000000e-01 : f32
    %661 = vector.broadcast %cst_329 : f32 to vector<8x96xf32>
    %662 = arith.mulf %661, %660 : vector<8x96xf32>
    %663 = vector.extract_strided_slice %654 {offsets = [0, 96], sizes = [8, 32], strides = [1, 1]} : vector<8x128xf32> to vector<8x32xf32>
    %664 = math.tanh %663 : vector<8x32xf32>
    %665 = vector.extract_strided_slice %662 {offsets = [0, 32], sizes = [8, 32], strides = [1, 1]} : vector<8x96xf32> to vector<8x32xf32>
    %c0_330 = arith.constant 0 : index
    %c0_331 = arith.constant 0 : index
    %666 = vector.load %arg16[%c0_330, %c0_331] : memref<8x32xf32, #tpu.memory_space<vmem>>, vector<8x32xf32>
    %667 = arith.mulf %665, %666 : vector<8x32xf32>
    %668 = vector.extract_strided_slice %662 {offsets = [0, 0], sizes = [8, 32], strides = [1, 1]} : vector<8x96xf32> to vector<8x32xf32>
    %669 = arith.mulf %668, %664 : vector<8x32xf32>
    %670 = arith.addf %667, %669 : vector<8x32xf32>
    %671 = vector.extract_strided_slice %662 {offsets = [0, 64], sizes = [8, 32], strides = [1, 1]} : vector<8x96xf32> to vector<8x32xf32>
    %672 = math.tanh %670 : vector<8x32xf32>
    %673 = arith.mulf %671, %672 : vector<8x32xf32>
    %c0_332 = arith.constant 0 : index
    %c0_333 = arith.constant 0 : index
    %674 = vector.load %arg16[%c0_332, %c0_333] : memref<8x32xf32, #tpu.memory_space<vmem>>, vector<8x32xf32>
    tpu.vector_store %arg16[%c0_332, %c0_333], %670 {strides = array<i32>} : memref<8x32xf32, #tpu.memory_space<vmem>>, vector<8x32xf32>,
    %675 = arith.truncf %673 : vector<8x32xf32> to vector<8x32xbf16>
    %676 = arith.index_cast %c2_i32_320 : i32 to index
    %c0_334 = arith.constant 0 : index
    %c0_335 = arith.constant 0 : index
    %677 = vector.load %arg14[%676, %c0_334, %c0_335] : memref<8x8x32xbf16, #tpu.memory_space<vmem>>, vector<1x8x32xbf16>
    %678 = vector.shape_cast %677 : vector<1x8x32xbf16> to vector<8x32xbf16>
    %679 = vector.shape_cast %675 : vector<8x32xbf16> to vector<1x8x32xbf16>
    tpu.vector_store %arg14[%676, %c0_334, %c0_335], %679 {strides = array<i32>} : memref<8x8x32xbf16, #tpu.memory_space<vmem>>, vector<1x8x32xbf16>,
    %c3_i32_336 = arith.constant 3 : i32
    %680 = arith.index_cast %c3_i32_336 : i32 to index
    %c0_337 = arith.constant 0 : index
    %c0_338 = arith.constant 0 : index
    %681 = vector.load %arg15[%680, %c0_337, %c0_338] : memref<8x8x128xbf16, #tpu.memory_space<vmem>>, vector<1x8x128xbf16>
    %682 = vector.shape_cast %681 : vector<1x8x128xbf16> to vector<8x128xbf16>
    %c1_i32_339 = arith.constant 1 : i32
    %683 = arith.subi %c3_i32_336, %c1_i32_339 : i32
    %684 = arith.index_cast %683 : i32 to index
    %c0_340 = arith.constant 0 : index
    %c0_341 = arith.constant 0 : index
    %685 = vector.load %arg14[%684, %c0_340, %c0_341] : memref<8x8x32xbf16, #tpu.memory_space<vmem>>, vector<1x8x32xbf16>
    %686 = vector.shape_cast %685 : vector<1x8x32xbf16> to vector<8x32xbf16>
    %cst_342 = arith.constant dense<0.000000e+00> : vector<8x128xf32>
    %687 = tpu.matmul %686, %582, %cst_342 {dimension_numbers = #tpu.dot_dimension_numbers<[1], [0], [0], [1], [0, 0, 1, 1], [], []>} : vector<8x32xbf16>, vector<32x128xbf16>, vector<8x128xf32> -> vector<8x128xf32>
    %688 = arith.extf %682 : vector<8x128xbf16> to vector<8x128xf32>
    %689 = arith.addf %688, %687 : vector<8x128xf32>
    %690 = vector.extract_strided_slice %689 {offsets = [0, 0], sizes = [8, 96], strides = [1, 1]} : vector<8x128xf32> to vector<8x96xf32>
    %cst_343 = arith.constant 5.000000e-01 : f32
    %691 = vector.broadcast %cst_343 : f32 to vector<8x96xf32>
    %692 = arith.mulf %691, %690 : vector<8x96xf32>
    %693 = math.tanh %692 : vector<8x96xf32>
    %cst_344 = arith.constant 1.000000e+00 : f32
    %694 = vector.broadcast %cst_344 : f32 to vector<8x96xf32>
    %695 = arith.addf %693, %694 : vector<8x96xf32>
    %cst_345 = arith.constant 5.000000e-01 : f32
    %696 = vector.broadcast %cst_345 : f32 to vector<8x96xf32>
    %697 = arith.mulf %696, %695 : vector<8x96xf32>
    %698 = vector.extract_strided_slice %689 {offsets = [0, 96], sizes = [8, 32], strides = [1, 1]} : vector<8x128xf32> to vector<8x32xf32>
    %699 = math.tanh %698 : vector<8x32xf32>
    %700 = vector.extract_strided_slice %697 {offsets = [0, 32], sizes = [8, 32], strides = [1, 1]} : vector<8x96xf32> to vector<8x32xf32>
    %c0_346 = arith.constant 0 : index
    %c0_347 = arith.constant 0 : index
    %701 = vector.load %arg16[%c0_346, %c0_347] : memref<8x32xf32, #tpu.memory_space<vmem>>, vector<8x32xf32>
    %702 = arith.mulf %700, %701 : vector<8x32xf32>
    %703 = vector.extract_strided_slice %697 {offsets = [0, 0], sizes = [8, 32], strides = [1, 1]} : vector<8x96xf32> to vector<8x32xf32>
    %704 = arith.mulf %703, %699 : vector<8x32xf32>
    %705 = arith.addf %702, %704 : vector<8x32xf32>
    %706 = vector.extract_strided_slice %697 {offsets = [0, 64], sizes = [8, 32], strides = [1, 1]} : vector<8x96xf32> to vector<8x32xf32>
    %707 = math.tanh %705 : vector<8x32xf32>
    %708 = arith.mulf %706, %707 : vector<8x32xf32>
    %c0_348 = arith.constant 0 : index
    %c0_349 = arith.constant 0 : index
    %709 = vector.load %arg16[%c0_348, %c0_349] : memref<8x32xf32, #tpu.memory_space<vmem>>, vector<8x32xf32>
    tpu.vector_store %arg16[%c0_348, %c0_349], %705 {strides = array<i32>} : memref<8x32xf32, #tpu.memory_space<vmem>>, vector<8x32xf32>,
    %710 = arith.truncf %708 : vector<8x32xf32> to vector<8x32xbf16>
    %711 = arith.index_cast %c3_i32_336 : i32 to index
    %c0_350 = arith.constant 0 : index
    %c0_351 = arith.constant 0 : index
    %712 = vector.load %arg14[%711, %c0_350, %c0_351] : memref<8x8x32xbf16, #tpu.memory_space<vmem>>, vector<1x8x32xbf16>
    %713 = vector.shape_cast %712 : vector<1x8x32xbf16> to vector<8x32xbf16>
    %714 = vector.shape_cast %710 : vector<8x32xbf16> to vector<1x8x32xbf16>
    tpu.vector_store %arg14[%711, %c0_350, %c0_351], %714 {strides = array<i32>} : memref<8x8x32xbf16, #tpu.memory_space<vmem>>, vector<1x8x32xbf16>,
    %c4_i32_352 = arith.constant 4 : i32
    %715 = arith.index_cast %c4_i32_352 : i32 to index
    %c0_353 = arith.constant 0 : index
    %c0_354 = arith.constant 0 : index
    %716 = vector.load %arg15[%715, %c0_353, %c0_354] : memref<8x8x128xbf16, #tpu.memory_space<vmem>>, vector<1x8x128xbf16>
    %717 = vector.shape_cast %716 : vector<1x8x128xbf16> to vector<8x128xbf16>
    %c1_i32_355 = arith.constant 1 : i32
    %718 = arith.subi %c4_i32_352, %c1_i32_355 : i32
    %719 = arith.index_cast %718 : i32 to index
    %c0_356 = arith.constant 0 : index
    %c0_357 = arith.constant 0 : index
    %720 = vector.load %arg14[%719, %c0_356, %c0_357] : memref<8x8x32xbf16, #tpu.memory_space<vmem>>, vector<1x8x32xbf16>
    %721 = vector.shape_cast %720 : vector<1x8x32xbf16> to vector<8x32xbf16>
    %cst_358 = arith.constant dense<0.000000e+00> : vector<8x128xf32>
    %722 = tpu.matmul %721, %582, %cst_358 {dimension_numbers = #tpu.dot_dimension_numbers<[1], [0], [0], [1], [0, 0, 1, 1], [], []>} : vector<8x32xbf16>, vector<32x128xbf16>, vector<8x128xf32> -> vector<8x128xf32>
    %723 = arith.extf %717 : vector<8x128xbf16> to vector<8x128xf32>
    %724 = arith.addf %723, %722 : vector<8x128xf32>
    %725 = vector.extract_strided_slice %724 {offsets = [0, 0], sizes = [8, 96], strides = [1, 1]} : vector<8x128xf32> to vector<8x96xf32>
    %cst_359 = arith.constant 5.000000e-01 : f32
    %726 = vector.broadcast %cst_359 : f32 to vector<8x96xf32>
    %727 = arith.mulf %726, %725 : vector<8x96xf32>
    %728 = math.tanh %727 : vector<8x96xf32>
    %cst_360 = arith.constant 1.000000e+00 : f32
    %729 = vector.broadcast %cst_360 : f32 to vector<8x96xf32>
    %730 = arith.addf %728, %729 : vector<8x96xf32>
    %cst_361 = arith.constant 5.000000e-01 : f32
    %731 = vector.broadcast %cst_361 : f32 to vector<8x96xf32>
    %732 = arith.mulf %731, %730 : vector<8x96xf32>
    %733 = vector.extract_strided_slice %724 {offsets = [0, 96], sizes = [8, 32], strides = [1, 1]} : vector<8x128xf32> to vector<8x32xf32>
    %734 = math.tanh %733 : vector<8x32xf32>
    %735 = vector.extract_strided_slice %732 {offsets = [0, 32], sizes = [8, 32], strides = [1, 1]} : vector<8x96xf32> to vector<8x32xf32>
    %c0_362 = arith.constant 0 : index
    %c0_363 = arith.constant 0 : index
    %736 = vector.load %arg16[%c0_362, %c0_363] : memref<8x32xf32, #tpu.memory_space<vmem>>, vector<8x32xf32>
    %737 = arith.mulf %735, %736 : vector<8x32xf32>
    %738 = vector.extract_strided_slice %732 {offsets = [0, 0], sizes = [8, 32], strides = [1, 1]} : vector<8x96xf32> to vector<8x32xf32>
    %739 = arith.mulf %738, %734 : vector<8x32xf32>
    %740 = arith.addf %737, %739 : vector<8x32xf32>
    %741 = vector.extract_strided_slice %732 {offsets = [0, 64], sizes = [8, 32], strides = [1, 1]} : vector<8x96xf32> to vector<8x32xf32>
    %742 = math.tanh %740 : vector<8x32xf32>
    %743 = arith.mulf %741, %742 : vector<8x32xf32>
    %c0_364 = arith.constant 0 : index
    %c0_365 = arith.constant 0 : index
    %744 = vector.load %arg16[%c0_364, %c0_365] : memref<8x32xf32, #tpu.memory_space<vmem>>, vector<8x32xf32>
    tpu.vector_store %arg16[%c0_364, %c0_365], %740 {strides = array<i32>} : memref<8x32xf32, #tpu.memory_space<vmem>>, vector<8x32xf32>,
    %745 = arith.truncf %743 : vector<8x32xf32> to vector<8x32xbf16>
    %746 = arith.index_cast %c4_i32_352 : i32 to index
    %c0_366 = arith.constant 0 : index
    %c0_367 = arith.constant 0 : index
    %747 = vector.load %arg14[%746, %c0_366, %c0_367] : memref<8x8x32xbf16, #tpu.memory_space<vmem>>, vector<1x8x32xbf16>
    %748 = vector.shape_cast %747 : vector<1x8x32xbf16> to vector<8x32xbf16>
    %749 = vector.shape_cast %745 : vector<8x32xbf16> to vector<1x8x32xbf16>
    tpu.vector_store %arg14[%746, %c0_366, %c0_367], %749 {strides = array<i32>} : memref<8x8x32xbf16, #tpu.memory_space<vmem>>, vector<1x8x32xbf16>,
    %c5_i32_368 = arith.constant 5 : i32
    %750 = arith.index_cast %c5_i32_368 : i32 to index
    %c0_369 = arith.constant 0 : index
    %c0_370 = arith.constant 0 : index
    %751 = vector.load %arg15[%750, %c0_369, %c0_370] : memref<8x8x128xbf16, #tpu.memory_space<vmem>>, vector<1x8x128xbf16>
    %752 = vector.shape_cast %751 : vector<1x8x128xbf16> to vector<8x128xbf16>
    %c1_i32_371 = arith.constant 1 : i32
    %753 = arith.subi %c5_i32_368, %c1_i32_371 : i32
    %754 = arith.index_cast %753 : i32 to index
    %c0_372 = arith.constant 0 : index
    %c0_373 = arith.constant 0 : index
    %755 = vector.load %arg14[%754, %c0_372, %c0_373] : memref<8x8x32xbf16, #tpu.memory_space<vmem>>, vector<1x8x32xbf16>
    %756 = vector.shape_cast %755 : vector<1x8x32xbf16> to vector<8x32xbf16>
    %cst_374 = arith.constant dense<0.000000e+00> : vector<8x128xf32>
    %757 = tpu.matmul %756, %582, %cst_374 {dimension_numbers = #tpu.dot_dimension_numbers<[1], [0], [0], [1], [0, 0, 1, 1], [], []>} : vector<8x32xbf16>, vector<32x128xbf16>, vector<8x128xf32> -> vector<8x128xf32>
    %758 = arith.extf %752 : vector<8x128xbf16> to vector<8x128xf32>
    %759 = arith.addf %758, %757 : vector<8x128xf32>
    %760 = vector.extract_strided_slice %759 {offsets = [0, 0], sizes = [8, 96], strides = [1, 1]} : vector<8x128xf32> to vector<8x96xf32>
    %cst_375 = arith.constant 5.000000e-01 : f32
    %761 = vector.broadcast %cst_375 : f32 to vector<8x96xf32>
    %762 = arith.mulf %761, %760 : vector<8x96xf32>
    %763 = math.tanh %762 : vector<8x96xf32>
    %cst_376 = arith.constant 1.000000e+00 : f32
    %764 = vector.broadcast %cst_376 : f32 to vector<8x96xf32>
    %765 = arith.addf %763, %764 : vector<8x96xf32>
    %cst_377 = arith.constant 5.000000e-01 : f32
    %766 = vector.broadcast %cst_377 : f32 to vector<8x96xf32>
    %767 = arith.mulf %766, %765 : vector<8x96xf32>
    %768 = vector.extract_strided_slice %759 {offsets = [0, 96], sizes = [8, 32], strides = [1, 1]} : vector<8x128xf32> to vector<8x32xf32>
    %769 = math.tanh %768 : vector<8x32xf32>
    %770 = vector.extract_strided_slice %767 {offsets = [0, 32], sizes = [8, 32], strides = [1, 1]} : vector<8x96xf32> to vector<8x32xf32>
    %c0_378 = arith.constant 0 : index
    %c0_379 = arith.constant 0 : index
    %771 = vector.load %arg16[%c0_378, %c0_379] : memref<8x32xf32, #tpu.memory_space<vmem>>, vector<8x32xf32>
    %772 = arith.mulf %770, %771 : vector<8x32xf32>
    %773 = vector.extract_strided_slice %767 {offsets = [0, 0], sizes = [8, 32], strides = [1, 1]} : vector<8x96xf32> to vector<8x32xf32>
    %774 = arith.mulf %773, %769 : vector<8x32xf32>
    %775 = arith.addf %772, %774 : vector<8x32xf32>
    %776 = vector.extract_strided_slice %767 {offsets = [0, 64], sizes = [8, 32], strides = [1, 1]} : vector<8x96xf32> to vector<8x32xf32>
    %777 = math.tanh %775 : vector<8x32xf32>
    %778 = arith.mulf %776, %777 : vector<8x32xf32>
    %c0_380 = arith.constant 0 : index
    %c0_381 = arith.constant 0 : index
    %779 = vector.load %arg16[%c0_380, %c0_381] : memref<8x32xf32, #tpu.memory_space<vmem>>, vector<8x32xf32>
    tpu.vector_store %arg16[%c0_380, %c0_381], %775 {strides = array<i32>} : memref<8x32xf32, #tpu.memory_space<vmem>>, vector<8x32xf32>,
    %780 = arith.truncf %778 : vector<8x32xf32> to vector<8x32xbf16>
    %781 = arith.index_cast %c5_i32_368 : i32 to index
    %c0_382 = arith.constant 0 : index
    %c0_383 = arith.constant 0 : index
    %782 = vector.load %arg14[%781, %c0_382, %c0_383] : memref<8x8x32xbf16, #tpu.memory_space<vmem>>, vector<1x8x32xbf16>
    %783 = vector.shape_cast %782 : vector<1x8x32xbf16> to vector<8x32xbf16>
    %784 = vector.shape_cast %780 : vector<8x32xbf16> to vector<1x8x32xbf16>
    tpu.vector_store %arg14[%781, %c0_382, %c0_383], %784 {strides = array<i32>} : memref<8x8x32xbf16, #tpu.memory_space<vmem>>, vector<1x8x32xbf16>,
    %c6_i32_384 = arith.constant 6 : i32
    %785 = arith.index_cast %c6_i32_384 : i32 to index
    %c0_385 = arith.constant 0 : index
    %c0_386 = arith.constant 0 : index
    %786 = vector.load %arg15[%785, %c0_385, %c0_386] : memref<8x8x128xbf16, #tpu.memory_space<vmem>>, vector<1x8x128xbf16>
    %787 = vector.shape_cast %786 : vector<1x8x128xbf16> to vector<8x128xbf16>
    %c1_i32_387 = arith.constant 1 : i32
    %788 = arith.subi %c6_i32_384, %c1_i32_387 : i32
    %789 = arith.index_cast %788 : i32 to index
    %c0_388 = arith.constant 0 : index
    %c0_389 = arith.constant 0 : index
    %790 = vector.load %arg14[%789, %c0_388, %c0_389] : memref<8x8x32xbf16, #tpu.memory_space<vmem>>, vector<1x8x32xbf16>
    %791 = vector.shape_cast %790 : vector<1x8x32xbf16> to vector<8x32xbf16>
    %cst_390 = arith.constant dense<0.000000e+00> : vector<8x128xf32>
    %792 = tpu.matmul %791, %582, %cst_390 {dimension_numbers = #tpu.dot_dimension_numbers<[1], [0], [0], [1], [0, 0, 1, 1], [], []>} : vector<8x32xbf16>, vector<32x128xbf16>, vector<8x128xf32> -> vector<8x128xf32>
    %793 = arith.extf %787 : vector<8x128xbf16> to vector<8x128xf32>
    %794 = arith.addf %793, %792 : vector<8x128xf32>
    %795 = vector.extract_strided_slice %794 {offsets = [0, 0], sizes = [8, 96], strides = [1, 1]} : vector<8x128xf32> to vector<8x96xf32>
    %cst_391 = arith.constant 5.000000e-01 : f32
    %796 = vector.broadcast %cst_391 : f32 to vector<8x96xf32>
    %797 = arith.mulf %796, %795 : vector<8x96xf32>
    %798 = math.tanh %797 : vector<8x96xf32>
    %cst_392 = arith.constant 1.000000e+00 : f32
    %799 = vector.broadcast %cst_392 : f32 to vector<8x96xf32>
    %800 = arith.addf %798, %799 : vector<8x96xf32>
    %cst_393 = arith.constant 5.000000e-01 : f32
    %801 = vector.broadcast %cst_393 : f32 to vector<8x96xf32>
    %802 = arith.mulf %801, %800 : vector<8x96xf32>
    %803 = vector.extract_strided_slice %794 {offsets = [0, 96], sizes = [8, 32], strides = [1, 1]} : vector<8x128xf32> to vector<8x32xf32>
    %804 = math.tanh %803 : vector<8x32xf32>
    %805 = vector.extract_strided_slice %802 {offsets = [0, 32], sizes = [8, 32], strides = [1, 1]} : vector<8x96xf32> to vector<8x32xf32>
    %c0_394 = arith.constant 0 : index
    %c0_395 = arith.constant 0 : index
    %806 = vector.load %arg16[%c0_394, %c0_395] : memref<8x32xf32, #tpu.memory_space<vmem>>, vector<8x32xf32>
    %807 = arith.mulf %805, %806 : vector<8x32xf32>
    %808 = vector.extract_strided_slice %802 {offsets = [0, 0], sizes = [8, 32], strides = [1, 1]} : vector<8x96xf32> to vector<8x32xf32>
    %809 = arith.mulf %808, %804 : vector<8x32xf32>
    %810 = arith.addf %807, %809 : vector<8x32xf32>
    %811 = vector.extract_strided_slice %802 {offsets = [0, 64], sizes = [8, 32], strides = [1, 1]} : vector<8x96xf32> to vector<8x32xf32>
    %812 = math.tanh %810 : vector<8x32xf32>
    %813 = arith.mulf %811, %812 : vector<8x32xf32>
    %c0_396 = arith.constant 0 : index
    %c0_397 = arith.constant 0 : index
    %814 = vector.load %arg16[%c0_396, %c0_397] : memref<8x32xf32, #tpu.memory_space<vmem>>, vector<8x32xf32>
    tpu.vector_store %arg16[%c0_396, %c0_397], %810 {strides = array<i32>} : memref<8x32xf32, #tpu.memory_space<vmem>>, vector<8x32xf32>,
    %815 = arith.truncf %813 : vector<8x32xf32> to vector<8x32xbf16>
    %816 = arith.index_cast %c6_i32_384 : i32 to index
    %c0_398 = arith.constant 0 : index
    %c0_399 = arith.constant 0 : index
    %817 = vector.load %arg14[%816, %c0_398, %c0_399] : memref<8x8x32xbf16, #tpu.memory_space<vmem>>, vector<1x8x32xbf16>
    %818 = vector.shape_cast %817 : vector<1x8x32xbf16> to vector<8x32xbf16>
    %819 = vector.shape_cast %815 : vector<8x32xbf16> to vector<1x8x32xbf16>
    tpu.vector_store %arg14[%816, %c0_398, %c0_399], %819 {strides = array<i32>} : memref<8x8x32xbf16, #tpu.memory_space<vmem>>, vector<1x8x32xbf16>,
    %c7_i32_400 = arith.constant 7 : i32
    %820 = arith.index_cast %c7_i32_400 : i32 to index
    %c0_401 = arith.constant 0 : index
    %c0_402 = arith.constant 0 : index
    %821 = vector.load %arg15[%820, %c0_401, %c0_402] : memref<8x8x128xbf16, #tpu.memory_space<vmem>>, vector<1x8x128xbf16>
    %822 = vector.shape_cast %821 : vector<1x8x128xbf16> to vector<8x128xbf16>
    %c1_i32_403 = arith.constant 1 : i32
    %823 = arith.subi %c7_i32_400, %c1_i32_403 : i32
    %824 = arith.index_cast %823 : i32 to index
    %c0_404 = arith.constant 0 : index
    %c0_405 = arith.constant 0 : index
    %825 = vector.load %arg14[%824, %c0_404, %c0_405] : memref<8x8x32xbf16, #tpu.memory_space<vmem>>, vector<1x8x32xbf16>
    %826 = vector.shape_cast %825 : vector<1x8x32xbf16> to vector<8x32xbf16>
    %cst_406 = arith.constant dense<0.000000e+00> : vector<8x128xf32>
    %827 = tpu.matmul %826, %582, %cst_406 {dimension_numbers = #tpu.dot_dimension_numbers<[1], [0], [0], [1], [0, 0, 1, 1], [], []>} : vector<8x32xbf16>, vector<32x128xbf16>, vector<8x128xf32> -> vector<8x128xf32>
    %828 = arith.extf %822 : vector<8x128xbf16> to vector<8x128xf32>
    %829 = arith.addf %828, %827 : vector<8x128xf32>
    %830 = vector.extract_strided_slice %829 {offsets = [0, 0], sizes = [8, 96], strides = [1, 1]} : vector<8x128xf32> to vector<8x96xf32>
    %cst_407 = arith.constant 5.000000e-01 : f32
    %831 = vector.broadcast %cst_407 : f32 to vector<8x96xf32>
    %832 = arith.mulf %831, %830 : vector<8x96xf32>
    %833 = math.tanh %832 : vector<8x96xf32>
    %cst_408 = arith.constant 1.000000e+00 : f32
    %834 = vector.broadcast %cst_408 : f32 to vector<8x96xf32>
    %835 = arith.addf %833, %834 : vector<8x96xf32>
    %cst_409 = arith.constant 5.000000e-01 : f32
    %836 = vector.broadcast %cst_409 : f32 to vector<8x96xf32>
    %837 = arith.mulf %836, %835 : vector<8x96xf32>
    %838 = vector.extract_strided_slice %829 {offsets = [0, 96], sizes = [8, 32], strides = [1, 1]} : vector<8x128xf32> to vector<8x32xf32>
    %839 = math.tanh %838 : vector<8x32xf32>
    %840 = vector.extract_strided_slice %837 {offsets = [0, 32], sizes = [8, 32], strides = [1, 1]} : vector<8x96xf32> to vector<8x32xf32>
    %c0_410 = arith.constant 0 : index
    %c0_411 = arith.constant 0 : index
    %841 = vector.load %arg16[%c0_410, %c0_411] : memref<8x32xf32, #tpu.memory_space<vmem>>, vector<8x32xf32>
    %842 = arith.mulf %840, %841 : vector<8x32xf32>
    %843 = vector.extract_strided_slice %837 {offsets = [0, 0], sizes = [8, 32], strides = [1, 1]} : vector<8x96xf32> to vector<8x32xf32>
    %844 = arith.mulf %843, %839 : vector<8x32xf32>
    %845 = arith.addf %842, %844 : vector<8x32xf32>
    %846 = vector.extract_strided_slice %837 {offsets = [0, 64], sizes = [8, 32], strides = [1, 1]} : vector<8x96xf32> to vector<8x32xf32>
    %847 = math.tanh %845 : vector<8x32xf32>
    %848 = arith.mulf %846, %847 : vector<8x32xf32>
    %c0_412 = arith.constant 0 : index
    %c0_413 = arith.constant 0 : index
    %849 = vector.load %arg16[%c0_412, %c0_413] : memref<8x32xf32, #tpu.memory_space<vmem>>, vector<8x32xf32>
    tpu.vector_store %arg16[%c0_412, %c0_413], %845 {strides = array<i32>} : memref<8x32xf32, #tpu.memory_space<vmem>>, vector<8x32xf32>,
    %850 = arith.truncf %848 : vector<8x32xf32> to vector<8x32xbf16>
    %851 = arith.index_cast %c7_i32_400 : i32 to index
    %c0_414 = arith.constant 0 : index
    %c0_415 = arith.constant 0 : index
    %852 = vector.load %arg14[%851, %c0_414, %c0_415] : memref<8x8x32xbf16, #tpu.memory_space<vmem>>, vector<1x8x32xbf16>
    %853 = vector.shape_cast %852 : vector<1x8x32xbf16> to vector<8x32xbf16>
    %854 = vector.shape_cast %850 : vector<8x32xbf16> to vector<1x8x32xbf16>
    tpu.vector_store %arg14[%851, %c0_414, %c0_415], %854 {strides = array<i32>} : memref<8x8x32xbf16, #tpu.memory_space<vmem>>, vector<1x8x32xbf16>,
    %c7_i32_416 = arith.constant 7 : i32
    %c7 = arith.constant 7 : index
    %c0_417 = arith.constant 0 : index
    %c0_418 = arith.constant 0 : index
    %855 = vector.load %arg14[%c7, %c0_417, %c0_418] : memref<8x8x32xbf16, #tpu.memory_space<vmem>>, vector<1x8x32xbf16>
    %856 = vector.shape_cast %855 : vector<1x8x32xbf16> to vector<8x32xbf16>
    %c0_419 = arith.constant 0 : index
    %c0_420 = arith.constant 0 : index
    %857 = vector.load %arg11[%c0_419, %c0_420] : memref<32x128xbf16, #tpu.memory_space<vmem>>, vector<32x128xbf16>
    %cst_421 = arith.constant dense<0.000000e+00> : vector<8x128xf32>
    %858 = tpu.matmul %856, %857, %cst_421 {dimension_numbers = #tpu.dot_dimension_numbers<[1], [0], [0], [1], [0, 0, 1, 1], [], []>} : vector<8x32xbf16>, vector<32x128xbf16>, vector<8x128xf32> -> vector<8x128xf32>
    %c0_422 = arith.constant 0 : index
    %c0_423 = arith.constant 0 : index
    %859 = vector.load %arg12[%c0_422, %c0_423] : memref<1x128xf32, #tpu.memory_space<vmem>>, vector<1x128xf32>
    %860 = vector.broadcast %859 : vector<1x128xf32> to vector<8x128xf32>
    %861 = arith.addf %858, %860 : vector<8x128xf32>
    %cst_424 = arith.constant 0.000000e+00 : f32
    %862 = vector.broadcast %cst_424 : f32 to vector<8x128xf32>
    %863 = arith.maximumf %861, %862 : vector<8x128xf32>
    %c0_425 = arith.constant 0 : index
    %c0_426 = arith.constant 0 : index
    %864 = vector.load %arg13[%c0_425, %c0_426] : memref<8x128xf32, #tpu.memory_space<vmem>>, vector<8x128xf32>
    tpu.vector_store %arg13[%c0_425, %c0_426], %863 {strides = array<i32>} : memref<8x128xf32, #tpu.memory_space<vmem>>, vector<8x128xf32>,
    return
  }
  func.func @transform_0(%arg0: i32) -> (i32, i32, i32) {
    %c0_i32 = arith.constant 0 : i32
    %c0_i32_0 = arith.constant 0 : i32
    %c0_i32_1 = arith.constant 0 : i32
    return %c0_i32, %arg0, %c0_i32_0 : i32, i32, i32
  }
  func.func @transform_1(%arg0: i32) -> (i32, i32) {
    %c0_i32 = arith.constant 0 : i32
    %c0_i32_0 = arith.constant 0 : i32
    %c0_i32_1 = arith.constant 0 : i32
    return %c0_i32, %c0_i32_0 : i32, i32
  }
  func.func @transform_2(%arg0: i32) -> (i32, i32) {
    %c0_i32 = arith.constant 0 : i32
    %c0_i32_0 = arith.constant 0 : i32
    %c0_i32_1 = arith.constant 0 : i32
    return %c0_i32, %c0_i32_0 : i32, i32
  }
  func.func @transform_3(%arg0: i32) -> (i32, i32) {
    %c0_i32 = arith.constant 0 : i32
    %c0_i32_0 = arith.constant 0 : i32
    %c0_i32_1 = arith.constant 0 : i32
    return %c0_i32, %c0_i32_0 : i32, i32
  }
  func.func @transform_4(%arg0: i32) -> (i32, i32) {
    %c0_i32 = arith.constant 0 : i32
    %c0_i32_0 = arith.constant 0 : i32
    %c0_i32_1 = arith.constant 0 : i32
    return %c0_i32, %c0_i32_0 : i32, i32
  }
  func.func @transform_5(%arg0: i32) -> (i32, i32) {
    %c0_i32 = arith.constant 0 : i32
    %c0_i32_0 = arith.constant 0 : i32
    %c0_i32_1 = arith.constant 0 : i32
    return %c0_i32, %c0_i32_0 : i32, i32
  }
  func.func @transform_6(%arg0: i32) -> (i32, i32) {
    %c0_i32 = arith.constant 0 : i32
    %c0_i32_0 = arith.constant 0 : i32
    %c0_i32_1 = arith.constant 0 : i32
    return %c0_i32, %c0_i32_0 : i32, i32
  }
  func.func @transform_7(%arg0: i32) -> (i32, i32) {
    %c0_i32 = arith.constant 0 : i32
    %c0_i32_0 = arith.constant 0 : i32
    %c0_i32_1 = arith.constant 0 : i32
    return %c0_i32, %c0_i32_0 : i32, i32
  }
  func.func @transform_8(%arg0: i32) -> (i32, i32) {
    %c0_i32 = arith.constant 0 : i32
    %c0_i32_0 = arith.constant 0 : i32
    %c0_i32_1 = arith.constant 0 : i32
    return %c0_i32, %c0_i32_0 : i32, i32
  }
  func.func @transform_9(%arg0: i32) -> (i32, i32) {
    %c0_i32 = arith.constant 0 : i32
    %c0_i32_0 = arith.constant 0 : i32
    %c0_i32_1 = arith.constant 0 : i32
    return %c0_i32, %c0_i32_0 : i32, i32
  }
  func.func @transform_10(%arg0: i32) -> (i32, i32) {
    %c0_i32 = arith.constant 0 : i32
    %c0_i32_0 = arith.constant 0 : i32
    %c0_i32_1 = arith.constant 0 : i32
    return %c0_i32, %c0_i32_0 : i32, i32
  }
  func.func @transform_11(%arg0: i32) -> (i32, i32) {
    %c0_i32 = arith.constant 0 : i32
    %c0_i32_0 = arith.constant 0 : i32
    %c0_i32_1 = arith.constant 0 : i32
    return %c0_i32, %c0_i32_0 : i32, i32
  }
  func.func @transform_12(%arg0: i32) -> (i32, i32) {
    %c0_i32 = arith.constant 0 : i32
    %c0_i32_0 = arith.constant 0 : i32
    return %arg0, %c0_i32 : i32, i32
  }
}

</mosaic_0001>

<bundles_post_ra>
// kernel: tpu_custom_call.1
= control target key start
LH: loop header
LB: loop body
LE: loop exit
PB: predicated region body
PF: predicated region fallthrough
CT: control target
= control target key end

     0   :  { %17 = vsyncpa [#allocation6], 0  ;;  %s4183_s0 = inlined_call_operand.hbm [shape: bf16[8,8,12], index: 0, kind: input, shape index: {}]   ;;  %s4184_s1 = inlined_call_operand.hbm [shape: bf16[12,128], index: 1, kind: input, shape index: {}]   ;;  %s4185_s2 = inlined_call_operand.hbm [shape: bf16[32,128], index: 2, kind: input, shape index: {}]   ;;  %s4186_s3 = inlined_call_operand.vmem [shape: f32[1,128], index: 3, kind: input, shape index: {}]   ;;  %s4187_s4 = inlined_call_operand.hbm [shape: bf16[32,128], index: 4, kind: input, shape index: {}]   ;;  %s4188_s5 = inlined_call_operand.vmem [shape: bf16[32,128], index: 5, kind: input, shape index: {}]   ;;  %s4189_s6 = inlined_call_operand.vmem [shape: f32[1,128], index: 6, kind: input, shape index: {}]   ;;  %s4190_s7 = inlined_call_operand.hbm [shape: bf16[32,128], index: 7, kind: input, shape index: {}]   ;;  %s4191_s8 = inlined_call_operand.hbm [shape: bf16[32,128], index: 8, kind: input, shape index: {}]   ;;  %s4192_s9 = inlined_call_operand.hbm [shape: f32[1,128], index: 9, kind: input, shape index: {}]   ;;  %s4193_s10 = inlined_call_operand.vmem [shape: bf16[32,128], index: 10, kind: input, shape index: {}]   ;;  %s4194_s11 = inlined_call_operand.vmem [shape: f32[1,128], index: 11, kind: input, shape index: {}]   ;;  %s4195_s12 = inlined_call_operand.hbm [shape: f32[8,128], index: 12, kind: output, shape index: {}]  }
   0x1   :  { %18 = vsyncpa [#allocation9], 0 }
   0x2   :  { %19 = vsyncpa [#allocation12], 0 }
   0x3   :  { %20 = vsyncpa [#allocation15], 0 }
   0x4   :  { %21 = vsyncpa [#allocation7], 0  ;;  %s3514_s21 = smov [#allocation8]   ;;  %s3515_s23 = smov [#allocation11]  }
   0x5   :  { %s39_s22 = sshll.u32 %s3514_s21, 4  ;;  %s65_s24 = sshll.u32 %s3515_s23, 4  ;;  %s40_s22 = int_to_ptr.vmem [resolvable:$true] %s39_s22  ;;  %s3593_s24 = int_to_ptr.vmem [resolvable:$true] %s65_s24 }
   0x6   :  { %s3328_s27 = scalar_lea.hbm %s4184_s1, 128 }
   0x7   :  { %p3329_p0 = scmp.ne.s32.totalorder %s4184_s1, %s3328_s27  ;;  %p3332_p1 = scmp.lt.u32.totalorder %s3328_s27, %s4184_s1 }
   0x9   :  { %p3334_p2 = pnand %p3332_p1, %p3329_p0 }
   0xb   :  { %3337 = shalt.err (!%p3334_p2)
}
   0xc   :  { %s3338_s14 = scalar_lea.vmem %s40_s22, 128  ;;  %p3343_p4 = scmp.lt.s32.totalorder %s40_s22, %s40_s22 }
   0xd   :  { %p3339_p3 = scmp.ne.s32.totalorder %s40_s22, %s3338_s14  ;;  %p3344_p5 = scmp.lt.s32.totalorder %s3338_s14, %s3338_s14 }
   0xf   :  { %p3345_p6 = por %p3344_p5, %p3343_p4 }
  0x11   :  { %p3346_p7 = pnand %p3345_p6, %p3339_p3 }
  0x13   :  { %3349 = shalt.err (!%p3346_p7)
}
  0x14   :  { %s3516_s15 = smov 64   ;;  %s3517_s16 = smov 4  }
  0x15   :  { %45 = dma.hbm_to_vmem [thread:$0]  %s4184_s1, 128, %s40_s22, [#allocation9], %s3516_s15, %s3516_s15, %s3517_s16  }
  0x16   :  { %s3350_s21 = scalar_lea.hbm %s4187_s4, 256 }
  0x17   :  { %p3351_p8 = scmp.ne.s32.totalorder %s4187_s4, %s3350_s21  ;;  %p3354_p9 = scmp.lt.u32.totalorder %s3350_s21, %s4187_s4 }
  0x19   :  { %p3356_p10 = pnand %p3354_p9, %p3351_p8 }
  0x1b   :  { %3359 = shalt.err (!%p3356_p10)
}
  0x1c   :  { %s3360_s28 = scalar_lea.vmem %s3593_s24, 256  ;;  %p3365_p12 = scmp.lt.s32.totalorder %s3593_s24, %s3593_s24 }
  0x1d   :  { %p3361_p11 = scmp.ne.s32.totalorder %s3593_s24, %s3360_s28  ;;  %p3366_p13 = scmp.lt.s32.totalorder %s3360_s28, %s3360_s28 }
  0x1f   :  { %p3367_p0 = por %p3366_p13, %p3365_p12 }
  0x21   :  { %p3368_p1 = pnand %p3367_p0, %p3361_p11 }
  0x23   :  { %3371 = shalt.err (!%p3368_p1)
}
  0x24   :  { %71 = dma.hbm_to_vmem [thread:$0]  %s4187_s4, 256, %s3593_s24, [#allocation12], %s3516_s15, %s3516_s15, %s3517_s16  }
  0x25   :  { %s3518_s29 = smov [#allocation14]   ;;  %s3519_s13 = smov [#allocation5]  }
  0x26   :  { %s93_s30 = sshll.u32 %s3518_s29, 4  ;;  %s27_s14 = sshll.u32 %s3519_s13, 4  ;;  %s94_s30 = int_to_ptr.vmem [resolvable:$true] %s93_s30  ;;  %s3630_s14 = int_to_ptr.vmem [resolvable:$true] %s27_s14 }
  0x27   :  { %s3372_s19 = scalar_lea.hbm %s4191_s8, 256 }
  0x28   :  { %p3373_p2 = scmp.ne.s32.totalorder %s4191_s8, %s3372_s19  ;;  %p3376_p3 = scmp.lt.u32.totalorder %s3372_s19, %s4191_s8 }
  0x2a   :  { %p3378_p4 = pnand %p3376_p3, %p3373_p2 }
  0x2c   :  { %3381 = shalt.err (!%p3378_p4)
}
  0x2d   :  { %s3382_s4 = scalar_lea.vmem %s94_s30, 256  ;;  %p3387_p6 = scmp.lt.s32.totalorder %s94_s30, %s94_s30 }
  0x2e   :  { %p3383_p5 = scmp.ne.s32.totalorder %s94_s30, %s3382_s4  ;;  %p3388_p7 = scmp.lt.s32.totalorder %s3382_s4, %s3382_s4 }
  0x30   :  { %p3389_p8 = por %p3388_p7, %p3387_p6 }
  0x32   :  { %p3390_p9 = pnand %p3389_p8, %p3383_p5 }
  0x34   :  { %3393 = shalt.err (!%p3390_p9)
}
  0x35   :  { %99 = dma.hbm_to_vmem [thread:$0]  %s4191_s8, 256, %s94_s30, [#allocation15], %s3516_s15, %s3516_s15, %s3517_s16  }
  0x36   :  { %s3394_s1 = scalar_lea.hbm %s4183_s0, 512 }
  0x37   :  { %p3395_p10 = scmp.ne.s32.totalorder %s4183_s0, %s3394_s1  ;;  %p3398_p11 = scmp.lt.u32.totalorder %s3394_s1, %s4183_s0 }
  0x39   :  { %p3400_p12 = pnand %p3398_p11, %p3395_p10 }
  0x3b   :  { %3403 = shalt.err (!%p3400_p12)
}
  0x3c   :  { %s3404_s18 = scalar_lea.vmem %s3630_s14, 512  ;;  %p3409_p0 = scmp.lt.s32.totalorder %s3630_s14, %s3630_s14 }
  0x3d   :  { %p3405_p13 = scmp.ne.s32.totalorder %s3630_s14, %s3404_s18  ;;  %p3410_p1 = scmp.lt.s32.totalorder %s3404_s18, %s3404_s18 }
  0x3f   :  { %p3411_p2 = por %p3410_p1, %p3409_p0 }
  0x41   :  { %p3412_p3 = pnand %p3411_p2, %p3405_p13 }
  0x43   :  { %3415 = shalt.err (!%p3412_p3)
}
  0x44   :  { %33 = dma.hbm_to_vmem [thread:$0]  %s4183_s0, 512, %s3630_s14, [#allocation6], %s3516_s15, %s3516_s15, %s3517_s16  }
  0x45   :  { %s3520_s19 = smov [#allocation10]   ;;  %s3521_s21 = smov [#allocation13]  }
  0x46   :  { %s51_s20 = sshll.u32 %s3520_s19, 4  ;;  %s81_s23 = sshll.u32 %s3521_s21, 4  ;;  %s52_s20 = int_to_ptr.vmem [resolvable:$true] %s51_s20  ;;  %s3667_s23 = int_to_ptr.vmem [resolvable:$true] %s81_s23 }
  0x47   :  { %s3416_s24 = scalar_lea.hbm %s4185_s2, 256 }
  0x48   :  { %p3417_p4 = scmp.ne.s32.totalorder %s4185_s2, %s3416_s24  ;;  %p3420_p5 = scmp.lt.u32.totalorder %s3416_s24, %s4185_s2 }
  0x4a   :  { %p3422_p6 = pnand %p3420_p5, %p3417_p4 }
  0x4c   :  { %3425 = shalt.err (!%p3422_p6)
}
  0x4d   :  { %s3426_s0 = scalar_lea.vmem %s52_s20, 256  ;;  %p3431_p8 = scmp.lt.s32.totalorder %s52_s20, %s52_s20 }
  0x4e   :  { %p3427_p7 = scmp.ne.s32.totalorder %s52_s20, %s3426_s0  ;;  %p3432_p9 = scmp.lt.s32.totalorder %s3426_s0, %s3426_s0 }
  0x50   :  { %p3433_p10 = por %p3432_p9, %p3431_p8 }
  0x52   :  { %p3434_p11 = pnand %p3433_p10, %p3427_p7 }
  0x54   :  { %3437 = shalt.err (!%p3434_p11)
}
  0x55   :  { %57 = dma.hbm_to_vmem [thread:$0]  %s4185_s2, 256, %s52_s20, [#allocation9], %s3516_s15, %s3516_s15, %s3517_s16  }
  0x56   :  { %s3438_s17 = scalar_lea.hbm %s4190_s7, 256 }
  0x57   :  { %p3439_p12 = scmp.ne.s32.totalorder %s4190_s7, %s3438_s17  ;;  %p3442_p13 = scmp.lt.u32.totalorder %s3438_s17, %s4190_s7 }
  0x59   :  { %p3444_p0 = pnand %p3442_p13, %p3439_p12 }
  0x5b   :  { %3447 = shalt.err (!%p3444_p0)
}
  0x5c   :  { %s3448_s21 = scalar_lea.vmem %s3667_s23, 256  ;;  %p3453_p2 = scmp.lt.s32.totalorder %s3667_s23, %s3667_s23 }
  0x5d   :  { %p3449_p1 = scmp.ne.s32.totalorder %s3667_s23, %s3448_s21  ;;  %p3454_p3 = scmp.lt.s32.totalorder %s3448_s21, %s3448_s21 }
  0x5f   :  { %p3455_p4 = por %p3454_p3, %p3453_p2 }
  0x61   :  { %p3456_p5 = pnand %p3455_p4, %p3449_p1 }
  0x63   :  { %3459 = shalt.err (!%p3456_p5)
}
  0x64   :  { %87 = dma.hbm_to_vmem [thread:$0]  %s4190_s7, 256, %s3667_s23, [#allocation12], %s3516_s15, %s3516_s15, %s3517_s16  }
  0x65   :  { %s3522_s25 = smov [#allocation16]   ;;  %s3460_s27 = scalar_lea.hbm %s4192_s9, 16 }
  0x66   :  { %s106_s4 = sshll.u32 %s3522_s25, 4  ;;  %p3461_p6 = scmp.ne.s32.totalorder %s4192_s9, %s3460_s27  ;;  %s107_s4 = int_to_ptr.vmem [resolvable:$true] %s106_s4 }
  0x67   :  { %p3464_p7 = scmp.lt.u32.totalorder %s3460_s27, %s4192_s9 }
  0x69   :  { %p3466_p8 = pnand %p3464_p7, %p3461_p6 }
  0x6b   :  { %3469 = shalt.err (!%p3466_p8)
}
  0x6c   :  { %s3470_s22 = scalar_lea.vmem %s107_s4, 16  ;;  %s3474_s7 = scalar_lea.vmem %s107_s4, 32 }
  0x6d   :  { %p3471_p9 = scmp.ne.s32.totalorder %s107_s4, %s3470_s22  ;;  %p3475_p10 = scmp.lt.s32.totalorder %s107_s4, %s107_s4 }
  0x6e   :  { %p3476_p11 = scmp.lt.s32.totalorder %s3474_s7, %s3470_s22 }
  0x70   :  { %p3477_p12 = por %p3476_p11, %p3475_p10 }
  0x72   :  { %p3478_p13 = pnand %p3477_p12, %p3471_p9 }
  0x74   :  { %3481 = shalt.err (!%p3478_p13)
}
  0x75   :  { %109 = dma.hbm_to_vmem [thread:$0]  %s4192_s9, 16, %s107_s4, [#allocation15]  }
  0x76   :  { %3504 = dma.done.wait [#allocation6], 512  }
  0x77   :  { %3505 = vsyncadd [#allocation6], 4294966784 }
  0x78   :  { %3506 = dma.done.wait [#allocation9], 384  }
  0x79   :  { %3507 = vsyncadd [#allocation9], 4294966912 }
  0x7a   :  { %3508 = dma.done.wait [#allocation12], 512  }
  0x7b   :  { %3509 = vsyncadd [#allocation12], 4294966784 }
  0x7c   :  { %3510 = dma.done.wait [#allocation15], 272  }
  0x7d   :  { %3511 = vsyncadd [#allocation15], 4294967024  ;;  %vm191_vm0 = vcmask 1045504   ;;  %vm178_vm1 = vcmask 97280   ;;  %v3159_v0 = vld [vmem:[#allocation8] sm:$0x3f]  }
  0x7e   :  { %v3160_v1 = vld [vmem:[#allocation5] sm:$0xff]   ;;  %3144 = vmatprep.subr.msk.bf16.mxu0 %vm191_vm0, %v3159_v0  ;;  %v193_v2 = vsel %vm191_vm0, %v3159_v0, 0  ;;  %v3161_v3 = vld [vmem:[#allocation5 + $0x8] sm:$0xff]   ;;  %vm276_vm2 = vcmask 261120   ;;  %v3523_v4 = vmov 0.0   ;;  %s3525_s13 = smov 96  }
  0x7f   :  { %2935 = vmatpush3.bf16.msra.mxu0 %v193_v2  ;;  %2936 = vmatprep.mubr.msk.bf16.mxu0 %vm178_vm1, %v3160_v1  ;;  %277 = vst.msk [vmem:[#allocation4] sm:$0xff] %vm276_vm2, %v3523_v4  ;;  %v3725_v6 = vld [vmem:[%s4186_s3] ss:$0 sm:$0xff]  ;;  %s3524_s3 = smov 32   ;;  %v3736_v31 = vld [vmem:[#allocation10] sm:$0xff]   ;;  %v3739_v32 = vld [vmem:[#allocation10 + $0x8] sm:$0xff]  }
  0x80   :  { %2944 = vmatprep.subr.bf16.mxu1 %v3523_v4  ;;  %2960 = vmatprep.subr.bf16.mxu0 %v3523_v4  ;;  %vm3526_vm3 = vmmov 0   ;;  %vm323_vm4 = vcmask 257024  }
  0x81   :  { %2945 = vmatpush3.bf16.msra.mxu1 %v3736_v31  ;;  %2948 = vmatprep.mubr.msk.bf16.mxu1 %vm3526_vm3, %v3523_v4 }
  0x82   :  { %2937 = vmatmul.mubr.msk.bf16.vlgmr.msra.gmra.mrb[0].mxu0 %vm178_vm1, %v3161_v3  ;;  %2946 = vmatprep.subr.bf16.mxu1 %v3523_v4 }
  0x83   :  { %2961 = vmatpush3.bf16.msra.mxu0 %v3736_v31 }
  0x84   :  { %2962 = vmatprep.subr.bf16.mxu0 %v3523_v4 }
  0x85   :  { %2947 = vmatpush3.bf16.msra.mxu1 %v3739_v32 }
  0x86   :  { %v289_v19 = vld [vmem:[#allocation4] sm:$0xff]  ;;  %2952 = vmatprep.subr.bf16.mxu1 %v3523_v4 }
  0x87   :  { %2963 = vmatpush3.bf16.msra.mxu0 %v3739_v32 }
  0x88   :  { %2976 = vmatprep.subr.bf16.mxu0 %v3523_v4 }
 0x155   :  { %v2938_v5 = vpop.f32.mrb[0].mxu0 }
 0x156   :  { %v229_v7 = vpop.f32.mrb[1].mxu0  ;;  %v238_v9 = vadd.f32 %v2938_v5, %v3725_v6 }
 0x157   :  { %v2939_v8 = vpop.f32.mrb[2].mxu0  ;;  %v230_v12 = vadd.f32 %v3725_v6, %v229_v7 }
 0x158   :  { %v241_v10 = vadd.f32 %v2939_v8, %v3725_v6  ;;  %v232_v11 = vpop.f32.mrb[3].mxu0 }
 0x159   :  { %v233_v13 = vadd.f32 %v3725_v6, %v232_v11 }
 0x15a   :  { %v2790_v14 = vpack.c.bf16 %v241_v10, %v238_v9 }
 0x15b   :  { %v2785_v15 = vpack.c.bf16 %v233_v13, %v230_v12 }
 0x15c   :  { %2842 = vst [vmem:[#allocation3 + $0x8] sm:$0xff] %v2790_v14  }
 0x15d   :  { %2786 = vst [vmem:[#allocation3] sm:$0xff] %v2785_v15  }
 0x163   :  { %v3776_v1 = vld [vmem:[#allocation3 + $0x8] sm:$0xff]  }
 0x164   :  { %v282_v16 = vld [vmem:[#allocation3] sm:$0xff]   ;;  %v472_v2 = vunpack.c.l.bf16 %v3776_v1 }
 0x165   :  { %v283_v17 = vunpack.c.l.bf16 %v282_v16  ;;  %v383_v40 = vunpack.c.h.bf16 %v282_v16 }
 0x167   :  { %3184 = vtanh.f32 %v283_v17  ;;  %v284_v20 = vmul.f32 0.5, %v283_v17 }
 0x169   :  { %3186 = vtanh.f32 %v284_v20 }
 0x171   :  { %v3185_v18 = vpop.eup %3184 }
 0x172   :  { %296 = vrot.lane.b32.xlu0 %v3185_v18, %s3524_s3 }
 0x173   :  { %v3187_v21 = vpop.eup %3186 }
 0x174   :  { %v286_v22 = vadd.f32 1.0, %v3187_v21 }
 0x176   :  { %291 = vrot.lane.b32.xlu0 %v289_v19, %s3524_s3  ;;  %v287_v23 = vmul.f32 0.5, %v286_v22  ;;  %v3164_v22 = vld [vmem:[#allocation5 + $0x10] sm:$0xff]  }
 0x177   :  { %2940 = vmatprep.mubr.msk.bf16.mxu0 %vm178_vm1, %v3164_v22 }
 0x1e4   :  { %v297_v24 = vpop.permute.xlu0 %296 }
 0x1e5   :  { %v299_v25 = vmul.f32 %v297_v24, %v287_v23 }
 0x1e7   :  { %301 = vrot.lane.b32.xlu1 %v299_v25, %s3524_s3 }
 0x1e8   :  { %v292_v26 = vpop.permute.xlu0 %291 }
 0x1e9   :  { %v294_v27 = vmul.f32 %v292_v26, %v287_v23 }
 0x259   :  { %v302_v28 = vpop.permute.xlu1 %301 }
 0x25a   :  { %v304_v29 = vadd.f32 %v302_v28, %v294_v27 }
 0x25c   :  { %3188 = vtanh.f32 %v304_v29 }
 0x266   :  { %v3189_v30 = vpop.eup %3188 }
 0x267   :  { %307 = vrot.lane.b32.xlu1 %v3189_v30, %s3524_s3 }
 0x26b   :  { %312 = vrot.lane.b32.xlu1 %v304_v29, %s3525_s13 }
 0x2d9   :  { %v308_v33 = vpop.permute.xlu1 %307 }
 0x2da   :  { %v310_v34 = vmul.f32 %v308_v33, %v287_v23  ;;  %v3165_v23 = vld [vmem:[#allocation5 + $0x18] sm:$0xff]  }
 0x2db   :  { %2941 = vmatmul.mubr.msk.bf16.gmra.mrb[4].mxu0 %vm178_vm1, %v3165_v23 }
 0x2dc   :  { %v2758_v35 = vpack.c.bf16 %v310_v34, %v310_v34  ;;  %2964 = vmatprep.mubr.msk.bf16.mxu0 %vm3526_vm3, %v3523_v4 }
 0x2dd   :  { %v313_v36 = vpop.permute.xlu1 %312 }
 0x2de   :  { %315 = vst.msk [vmem:[#allocation4] sm:$0xff] %vm276_vm2, %v313_v36  ;;  %320 = vrot.lane.b32.xlu0 %v2758_v35, %s3516_s15 }
 0x2e5   :  { %v390_v37 = vld [vmem:[#allocation4] sm:$0xff] }
 0x2e6   :  { %392 = vrot.lane.b32.xlu1 %v390_v37, %s3524_s3 }
 0x350   :  { %v321_v38 = vpop.permute.xlu0 %320 }
 0x351   :  { %324 = vst.msk [vmem:[#allocation2] sm:$0xf] %vm323_vm4, %v321_v38 }
 0x358   :  { %v327_v39 = vld [vmem:[#allocation2] sm:$0xf]  ;;  %v393_v53 = vpop.permute.xlu1 %392 }
 0x359   :  { %2949 = vmatmul.mubr.msk.bf16.vlgmr.msra.gmra.mrb[0].mxu1 %vm276_vm2, %v327_v39 }
 0x35a   :  { %2953 = vmatpush3.bf16.msra.mxu1 %v3736_v31  ;;  %2956 = vmatprep.mubr.msk.bf16.mxu1 %vm3526_vm3, %v3523_v4 }
 0x35b   :  { %2954 = vmatprep.subr.bf16.mxu1 %v3523_v4 }
 0x35e   :  { %2955 = vmatpush3.bf16.msra.mxu1 %v3739_v32 }
 0x35f   :  { %2968 = vmatprep.subr.bf16.mxu1 %v3523_v4 }
 0x3ae   :  { %v2942_v29 = vpop.f32.mrb[4].mxu0 }
 0x3af   :  { %v254_v30 = vadd.f32 %v2942_v29, %v3725_v6  ;;  %v245_v33 = vpop.f32.mrb[5].mxu0 }
 0x3b0   :  { %v246_v34 = vadd.f32 %v3725_v6, %v245_v33  ;;  %v2943_v35 = vpop.f32.mrb[6].mxu0 }
 0x3b1   :  { %v257_v36 = vadd.f32 %v2943_v35, %v3725_v6  ;;  %v248_v37 = vpop.f32.mrb[7].mxu0 }
 0x3b2   :  { %v249_v38 = vadd.f32 %v3725_v6, %v248_v37  ;;  %v561_v6 = vunpack.c.h.bf16 %v3776_v1 }
 0x3b3   :  { %v2800_v39 = vpack.c.bf16 %v257_v36, %v254_v30 }
 0x3b5   :  { %2844 = vst [vmem:[#allocation3 + $0x18] sm:$0xff] %v2800_v39  }
 0x42c   :  { %v377_v41 = vpop.f32.mrb[0].mxu1 }
 0x42d   :  { %v384_v42 = vadd.f32 %v383_v40, %v377_v41  ;;  %v2950_v43 = vpop.f32.mrb[1].mxu1  ;;  %v2795_v40 = vpack.c.bf16 %v249_v38, %v246_v34 }
 0x42e   :  { %v380_v44 = vpop.f32.mrb[2].mxu1 }
 0x42f   :  { %3190 = vtanh.f32 %v384_v42  ;;  %v2951_v45 = vpop.f32.mrb[3].mxu1  ;;  %v385_v47 = vmul.f32 0.5, %v384_v42  ;;  %2843 = vst [vmem:[#allocation3 + $0x10] sm:$0xff] %v2795_v40  }
 0x431   :  { %3192 = vtanh.f32 %v385_v47 }
 0x439   :  { %v3191_v46 = vpop.eup %3190 }
 0x43a   :  { %397 = vrot.lane.b32.xlu0 %v3191_v46, %s3524_s3 }
 0x43b   :  { %v3193_v48 = vpop.eup %3192 }
 0x43c   :  { %v387_v49 = vadd.f32 1.0, %v3193_v48 }
 0x43e   :  { %v388_v50 = vmul.f32 0.5, %v387_v49 }
 0x440   :  { %v395_v54 = vmul.f32 %v393_v53, %v388_v50 }
 0x4ac   :  { %v398_v51 = vpop.permute.xlu0 %397 }
 0x4ad   :  { %v400_v52 = vmul.f32 %v398_v51, %v388_v50 }
 0x4af   :  { %402 = vrot.lane.b32.xlu0 %v400_v52, %s3524_s3 }
 0x521   :  { %v403_v55 = vpop.permute.xlu0 %402 }
 0x522   :  { %v405_v56 = vadd.f32 %v403_v55, %v395_v54 }
 0x524   :  { %3194 = vtanh.f32 %v405_v56 }
 0x52e   :  { %v3195_v57 = vpop.eup %3194 }
 0x52f   :  { %408 = vrot.lane.b32.xlu1 %v3195_v57, %s3524_s3 }
 0x533   :  { %413 = vrot.lane.b32.xlu1 %v405_v56, %s3525_s13 }
 0x5a1   :  { %v409_v58 = vpop.permute.xlu1 %408 }
 0x5a2   :  { %v411_v59 = vmul.f32 %v409_v58, %v388_v50 }
 0x5a4   :  { %v2759_v60 = vpack.c.bf16 %v411_v59, %v411_v59 }
 0x5a5   :  { %v414_v61 = vpop.permute.xlu1 %413 }
 0x5a6   :  { %416 = vst.msk [vmem:[#allocation4] sm:$0xff] %vm276_vm2, %v414_v61  ;;  %421 = vrot.lane.b32.xlu0 %v2759_v60, %s3516_s15 }
 0x5ad   :  { %v479_v62 = vld [vmem:[#allocation4] sm:$0xff] }
 0x5ae   :  { %481 = vrot.lane.b32.xlu1 %v479_v62, %s3524_s3 }
 0x618   :  { %v422_v63 = vpop.permute.xlu0 %421 }
 0x619   :  { %425 = vst.msk [vmem:[#allocation2 + $0x4] sm:$0xf] %vm323_vm4, %v422_v63 }
 0x620   :  { %v428_v0 = vld [vmem:[#allocation2 + $0x4] sm:$0xf]  ;;  %v482_v17 = vpop.permute.xlu1 %481 }
 0x621   :  { %2957 = vmatmul.mubr.msk.bf16.vlgmr.msra.gmra.mrb[4].mxu1 %vm276_vm2, %v428_v0 }
 0x622   :  { %2969 = vmatpush3.bf16.msra.mxu1 %v3736_v31  ;;  %2972 = vmatprep.mubr.msk.bf16.mxu1 %vm3526_vm3, %v3523_v4 }
 0x623   :  { %2970 = vmatprep.subr.bf16.mxu1 %v3523_v4 }
 0x626   :  { %2971 = vmatpush3.bf16.msra.mxu1 %v3739_v32 }
 0x627   :  { %2984 = vmatprep.subr.bf16.mxu1 %v3523_v4 }
 0x6f4   :  { %v466_v3 = vpop.f32.mrb[4].mxu1 }
 0x6f5   :  { %v473_v5 = vadd.f32 %v472_v2, %v466_v3  ;;  %v2958_v7 = vpop.f32.mrb[5].mxu1  ;;  %v605_v3 = vld [vmem:[#allocation3 + $0x10] sm:$0xff]  }
 0x6f6   :  { %v469_v8 = vpop.f32.mrb[6].mxu1  ;;  %v739_v33 = vunpack.c.h.bf16 %v605_v3 }
 0x6f7   :  { %3196 = vtanh.f32 %v473_v5  ;;  %v2959_v9 = vpop.f32.mrb[7].mxu1  ;;  %v474_v11 = vmul.f32 0.5, %v473_v5  ;;  %v650_v5 = vunpack.c.l.bf16 %v605_v3 }
 0x6f9   :  { %3198 = vtanh.f32 %v474_v11 }
 0x701   :  { %v3197_v10 = vpop.eup %3196 }
 0x702   :  { %486 = vrot.lane.b32.xlu0 %v3197_v10, %s3524_s3 }
 0x703   :  { %v3199_v12 = vpop.eup %3198 }
 0x704   :  { %v476_v13 = vadd.f32 1.0, %v3199_v12 }
 0x706   :  { %v477_v14 = vmul.f32 0.5, %v476_v13 }
 0x708   :  { %v484_v18 = vmul.f32 %v482_v17, %v477_v14 }
 0x774   :  { %v487_v15 = vpop.permute.xlu0 %486 }
 0x775   :  { %v489_v16 = vmul.f32 %v487_v15, %v477_v14 }
 0x777   :  { %491 = vrot.lane.b32.xlu0 %v489_v16, %s3524_s3 }
 0x7e9   :  { %v492_v19 = vpop.permute.xlu0 %491 }
 0x7ea   :  { %v494_v20 = vadd.f32 %v492_v19, %v484_v18 }
 0x7ec   :  { %3200 = vtanh.f32 %v494_v20 }
 0x7f6   :  { %v3201_v21 = vpop.eup %3200 }
 0x7f7   :  { %497 = vrot.lane.b32.xlu1 %v3201_v21, %s3524_s3 }
 0x7fb   :  { %502 = vrot.lane.b32.xlu1 %v494_v20, %s3525_s13 }
 0x869   :  { %v498_v24 = vpop.permute.xlu1 %497 }
 0x86a   :  { %v500_v25 = vmul.f32 %v498_v24, %v477_v14 }
 0x86c   :  { %v2760_v26 = vpack.c.bf16 %v500_v25, %v500_v25 }
 0x86d   :  { %v503_v27 = vpop.permute.xlu1 %502 }
 0x86e   :  { %505 = vst.msk [vmem:[#allocation4] sm:$0xff] %vm276_vm2, %v503_v27  ;;  %510 = vrot.lane.b32.xlu0 %v2760_v26, %s3516_s15 }
 0x875   :  { %v568_v28 = vld [vmem:[#allocation4] sm:$0xff] }
 0x876   :  { %570 = vrot.lane.b32.xlu1 %v568_v28, %s3524_s3 }
 0x8e0   :  { %v511_v41 = vpop.permute.xlu0 %510 }
 0x8e1   :  { %514 = vst.msk [vmem:[#allocation2 + $0x8] sm:$0xf] %vm323_vm4, %v511_v41 }
 0x8e8   :  { %v517_v42 = vld [vmem:[#allocation2 + $0x8] sm:$0xf]  ;;  %v571_v55 = vpop.permute.xlu1 %570 }
 0x8e9   :  { %2965 = vmatmul.mubr.msk.bf16.vlgmr.msra.gmra.mrb[8].mxu0 %vm276_vm2, %v517_v42 }
 0x8ea   :  { %2977 = vmatpush3.bf16.msra.mxu0 %v3736_v31  ;;  %2980 = vmatprep.mubr.msk.bf16.mxu0 %vm3526_vm3, %v3523_v4 }
 0x8eb   :  { %2978 = vmatprep.subr.bf16.mxu0 %v3523_v4 }
 0x8ee   :  { %2979 = vmatpush3.bf16.msra.mxu0 %v3739_v32 }
 0x8ef   :  { %2992 = vmatprep.subr.bf16.mxu0 %v3523_v4 }
 0x9bc   :  { %v555_v43 = vpop.f32.mrb[8].mxu0 }
 0x9bd   :  { %v562_v44 = vadd.f32 %v561_v6, %v555_v43  ;;  %v2966_v45 = vpop.f32.mrb[9].mxu0 }
 0x9be   :  { %v558_v46 = vpop.f32.mrb[10].mxu0 }
 0x9bf   :  { %3202 = vtanh.f32 %v562_v44  ;;  %v2967_v47 = vpop.f32.mrb[11].mxu0  ;;  %v563_v49 = vmul.f32 0.5, %v562_v44 }
 0x9c1   :  { %3204 = vtanh.f32 %v563_v49 }
 0x9c9   :  { %v3203_v48 = vpop.eup %3202 }
 0x9ca   :  { %575 = vrot.lane.b32.xlu0 %v3203_v48, %s3524_s3  ;;  %v3166_v48 = vld [vmem:[#allocation11] sm:$0xff]  }
 0x9cb   :  { %v3205_v50 = vpop.eup %3204 }
 0x9cc   :  { %v565_v51 = vadd.f32 1.0, %v3205_v50 }
 0x9ce   :  { %v566_v52 = vmul.f32 0.5, %v565_v51 }
 0x9d0   :  { %v573_v56 = vmul.f32 %v571_v55, %v566_v52  ;;  %v3168_v55 = vld [vmem:[#allocation11 + $0x8] sm:$0xff]  }
 0xa3c   :  { %v576_v53 = vpop.permute.xlu0 %575 }
 0xa3d   :  { %v578_v54 = vmul.f32 %v576_v53, %v566_v52 }
 0xa3f   :  { %580 = vrot.lane.b32.xlu0 %v578_v54, %s3524_s3 }
 0xab1   :  { %v581_v57 = vpop.permute.xlu0 %580 }
 0xab2   :  { %v583_v58 = vadd.f32 %v581_v57, %v573_v56  ;;  %v3167_v57 = vld [vmem:[#allocation2] sm:$0xff]  }
 0xab4   :  { %3206 = vtanh.f32 %v583_v58 }
 0xabe   :  { %v3207_v59 = vpop.eup %3206 }
 0xabf   :  { %586 = vrot.lane.b32.xlu1 %v3207_v59, %s3524_s3 }
 0xac3   :  { %591 = vrot.lane.b32.xlu1 %v583_v58, %s3525_s13 }
 0xb31   :  { %v587_v60 = vpop.permute.xlu1 %586 }
 0xb32   :  { %v589_v61 = vmul.f32 %v587_v60, %v566_v52  ;;  %v783_v60 = vld [vmem:[#allocation3 + $0x18] sm:$0xff]  }
 0xb34   :  { %v2761_v62 = vpack.c.bf16 %v589_v61, %v589_v61  ;;  %v828_v61 = vunpack.c.l.bf16 %v783_v60 }
 0xb35   :  { %v592_v63 = vpop.permute.xlu1 %591 }
 0xb36   :  { %594 = vst.msk [vmem:[#allocation4] sm:$0xff] %vm276_vm2, %v592_v63  ;;  %599 = vrot.lane.b32.xlu0 %v2761_v62, %s3516_s15 }
 0xb3d   :  { %v657_v0 = vld [vmem:[#allocation4] sm:$0xff] }
 0xb3e   :  { %659 = vrot.lane.b32.xlu1 %v657_v0, %s3524_s3 }
 0xba8   :  { %v600_v1 = vpop.permute.xlu0 %599 }
 0xba9   :  { %603 = vst.msk [vmem:[#allocation2 + $0xc] sm:$0xf] %vm323_vm4, %v600_v1 }
 0xbb0   :  { %v606_v2 = vld [vmem:[#allocation2 + $0xc] sm:$0xf]  ;;  %v660_v19 = vpop.permute.xlu1 %659 }
 0xbb1   :  { %2973 = vmatmul.mubr.msk.bf16.vlgmr.msra.gmra.mrb[8].mxu1 %vm276_vm2, %v606_v2  ;;  %v3169_v58 = vld [vmem:[#allocation2 + $0x8] sm:$0xff]  }
 0xbb2   :  { %2985 = vmatpush3.bf16.msra.mxu1 %v3736_v31  ;;  %2988 = vmatprep.mubr.msk.bf16.mxu1 %vm3526_vm3, %v3523_v4 }
 0xbb3   :  { %2986 = vmatprep.subr.bf16.mxu1 %v3523_v4 }
 0xbb6   :  { %2987 = vmatpush3.bf16.msra.mxu1 %v3739_v32 }
 0xbb7   :  { %3000 = vmatprep.subr.bf16.mxu1 %v3166_v48 }
 0xc84   :  { %v644_v7 = vpop.f32.mrb[8].mxu1 }
 0xc85   :  { %v651_v8 = vadd.f32 %v650_v5, %v644_v7  ;;  %v2974_v9 = vpop.f32.mrb[9].mxu1  ;;  %v3848_v5 = vld [vmem:[%s4189_s6] ss:$0 sm:$0xff] }
 0xc86   :  { %v647_v10 = vpop.f32.mrb[10].mxu1 }
 0xc87   :  { %3208 = vtanh.f32 %v651_v8  ;;  %v2975_v11 = vpop.f32.mrb[11].mxu1  ;;  %v652_v13 = vmul.f32 0.5, %v651_v8 }
 0xc89   :  { %3210 = vtanh.f32 %v652_v13 }
 0xc91   :  { %v3209_v12 = vpop.eup %3208 }
 0xc92   :  { %664 = vrot.lane.b32.xlu0 %v3209_v12, %s3524_s3 }
 0xc93   :  { %v3211_v14 = vpop.eup %3210 }
 0xc94   :  { %v654_v15 = vadd.f32 1.0, %v3211_v14 }
 0xc96   :  { %v655_v16 = vmul.f32 0.5, %v654_v15 }
 0xc98   :  { %v662_v20 = vmul.f32 %v660_v19, %v655_v16 }
 0xd04   :  { %v665_v17 = vpop.permute.xlu0 %664 }
 0xd05   :  { %v667_v18 = vmul.f32 %v665_v17, %v655_v16 }
 0xd07   :  { %669 = vrot.lane.b32.xlu0 %v667_v18, %s3524_s3 }
 0xd79   :  { %v670_v21 = vpop.permute.xlu0 %669 }
 0xd7a   :  { %v672_v22 = vadd.f32 %v670_v21, %v662_v20 }
 0xd7c   :  { %3212 = vtanh.f32 %v672_v22 }
 0xd86   :  { %v3213_v23 = vpop.eup %3212 }
 0xd87   :  { %675 = vrot.lane.b32.xlu1 %v3213_v23, %s3524_s3 }
 0xd8b   :  { %680 = vrot.lane.b32.xlu1 %v672_v22, %s3525_s13 }
 0xdf9   :  { %v676_v24 = vpop.permute.xlu1 %675 }
 0xdfa   :  { %v678_v25 = vmul.f32 %v676_v24, %v655_v16 }
 0xdfc   :  { %v2762_v26 = vpack.c.bf16 %v678_v25, %v678_v25 }
 0xdfd   :  { %v681_v27 = vpop.permute.xlu1 %680 }
 0xdfe   :  { %683 = vst.msk [vmem:[#allocation4] sm:$0xff] %vm276_vm2, %v681_v27  ;;  %688 = vrot.lane.b32.xlu0 %v2762_v26, %s3516_s15 }
 0xe05   :  { %v746_v28 = vld [vmem:[#allocation4] sm:$0xff] }
 0xe06   :  { %748 = vrot.lane.b32.xlu1 %v746_v28, %s3524_s3 }
 0xe70   :  { %v689_v29 = vpop.permute.xlu0 %688 }
 0xe71   :  { %692 = vst.msk [vmem:[#allocation2 + $0x10] sm:$0xf] %vm323_vm4, %v689_v29 }
 0xe78   :  { %v695_v30 = vld [vmem:[#allocation2 + $0x10] sm:$0xf] }
 0xe79   :  { %2981 = vmatmul.mubr.msk.bf16.vlgmr.msra.gmra.mrb[12].mxu0 %vm276_vm2, %v695_v30 }
 0xe7a   :  { %2993 = vmatpush3.bf16.msra.mxu0 %v3736_v31  ;;  %2996 = vmatprep.mubr.msk.bf16.mxu0 %vm3526_vm3, %v3523_v4 }
 0xe7b   :  { %2994 = vmatprep.subr.bf16.mxu0 %v3523_v4 }
 0xe7e   :  { %2995 = vmatpush3.bf16.msra.mxu0 %v3739_v32  ;;  %v749_v32 = vpop.permute.xlu1 %748 }
 0xe7f   :  { %3012 = vmatprep.subr.bf16.mxu0 %v3523_v4 }
 0xf4c   :  { %v733_v34 = vpop.f32.mrb[12].mxu0 }
 0xf4d   :  { %v740_v35 = vadd.f32 %v739_v33, %v733_v34  ;;  %v2982_v36 = vpop.f32.mrb[13].mxu0 }
 0xf4e   :  { %v736_v37 = vpop.f32.mrb[14].mxu0 }
 0xf4f   :  { %3214 = vtanh.f32 %v740_v35  ;;  %v2983_v38 = vpop.f32.mrb[15].mxu0  ;;  %v741_v31 = vmul.f32 0.5, %v740_v35  ;;  %v917_v37 = vunpack.c.h.bf16 %v783_v60 }
 0xf51   :  { %3216 = vtanh.f32 %v741_v31 }
 0xf59   :  { %v3215_v39 = vpop.eup %3214 }
 0xf5a   :  { %753 = vrot.lane.b32.xlu0 %v3215_v39, %s3524_s3 }
 0xf5b   :  { %v3217_v40 = vpop.eup %3216 }
 0xf5c   :  { %v743_v41 = vadd.f32 1.0, %v3217_v40 }
 0xf5e   :  { %v744_v42 = vmul.f32 0.5, %v743_v41 }
 0xf60   :  { %v751_v44 = vmul.f32 %v749_v32, %v744_v42 }
 0xfcc   :  { %v754_v6 = vpop.permute.xlu0 %753 }
 0xfcd   :  { %v756_v43 = vmul.f32 %v754_v6, %v744_v42 }
 0xfcf   :  { %758 = vrot.lane.b32.xlu0 %v756_v43, %s3524_s3 }
0x1041   :  { %v759_v45 = vpop.permute.xlu0 %758 }
0x1042   :  { %v761_v46 = vadd.f32 %v759_v45, %v751_v44 }
0x1044   :  { %3218 = vtanh.f32 %v761_v46 }
0x104e   :  { %v3219_v47 = vpop.eup %3218 }
0x104f   :  { %764 = vrot.lane.b32.xlu1 %v3219_v47, %s3524_s3 }
0x1053   :  { %769 = vrot.lane.b32.xlu1 %v761_v46, %s3525_s13 }
0x10c1   :  { %v765_v49 = vpop.permute.xlu1 %764 }
0x10c2   :  { %v767_v50 = vmul.f32 %v765_v49, %v744_v42 }
0x10c4   :  { %v2763_v51 = vpack.c.bf16 %v767_v50, %v767_v50 }
0x10c5   :  { %v770_v52 = vpop.permute.xlu1 %769 }
0x10c6   :  { %772 = vst.msk [vmem:[#allocation4] sm:$0xff] %vm276_vm2, %v770_v52  ;;  %777 = vrot.lane.b32.xlu0 %v2763_v51, %s3516_s15 }
0x10cd   :  { %v835_v53 = vld [vmem:[#allocation4] sm:$0xff] }
0x10ce   :  { %837 = vrot.lane.b32.xlu1 %v835_v53, %s3524_s3 }
0x1138   :  { %v778_v54 = vpop.permute.xlu0 %777 }
0x1139   :  { %781 = vst.msk [vmem:[#allocation2 + $0x14] sm:$0xf] %vm323_vm4, %v778_v54 }
0x1140   :  { %v784_v56 = vld [vmem:[#allocation2 + $0x14] sm:$0xf]  ;;  %v838_v23 = vpop.permute.xlu1 %837 }
0x1141   :  { %2989 = vmatmul.mubr.msk.bf16.vlgmr.msra.gmra.mrb[12].mxu1 %vm276_vm2, %v784_v56  ;;  %v3170_v59 = vld [vmem:[#allocation2 + $0x10] sm:$0xff]  }
0x1142   :  { %3001 = vmatpush3.bf16.msra.mxu1 %v3166_v48  ;;  %3004 = vmatprep.mubr.msk.bf16.mxu1 %vm276_vm2, %v3167_v57 }
0x1143   :  { %3002 = vmatprep.subr.bf16.mxu1 %v3168_v55 }
0x1146   :  { %3003 = vmatpush3.bf16.msra.mxu1 %v3168_v55 }
0x1147   :  { %3028 = vmatprep.subr.bf16.mxu1 %v3523_v4 }
0x1149   :  { %3005 = vmatmul.mubr.msk.bf16.vlgmr.msra.gmra.mrb[16].mxu1 %vm276_vm2, %v3169_v58 }
0x114a   :  { %3008 = vmatprep.mubr.msk.bf16.mxu1 %vm276_vm2, %v3170_v59 }
0x1214   :  { %v822_v62 = vpop.f32.mrb[12].mxu1 }
0x1215   :  { %v829_v63 = vadd.f32 %v828_v61, %v822_v62  ;;  %v2990_v0 = vpop.f32.mrb[13].mxu1 }
0x1216   :  { %v825_v1 = vpop.f32.mrb[14].mxu1 }
0x1217   :  { %3220 = vtanh.f32 %v829_v63  ;;  %v2991_v2 = vpop.f32.mrb[15].mxu1  ;;  %v830_v17 = vmul.f32 0.5, %v829_v63 }
0x1219   :  { %3222 = vtanh.f32 %v830_v17 }
0x121c   :  { %v3006_v3 = vpop.f32.mrb[16].mxu1 }
0x121d   :  { %v1057_v7 = vpop.f32.mrb[17].mxu1  ;;  %v1066_v9 = vadd.f32 %v3006_v3, %v3848_v5  ;;  %v3889_v3 = vld [vmem:[%s4188_s5] sm:$0xff]  }
0x121e   :  { %v3007_v8 = vpop.f32.mrb[18].mxu1  ;;  %v1058_v12 = vadd.f32 %v3848_v5, %v1057_v7  ;;  %v3895_v7 = vld [vmem:[%s4188_s5 + $0x8] sm:$0xff]   ;;  %3029 = vmatpush3.bf16.msra.mxu1 %v3889_v3 }
0x121f   :  { %v1069_v10 = vadd.f32 %v3007_v8, %v3848_v5  ;;  %v1060_v11 = vpop.f32.mrb[19].mxu1  ;;  %3030 = vmatprep.subr.bf16.mxu1 %v3523_v4 }
0x1220   :  { %v1061_v13 = vadd.f32 %v3848_v5, %v1060_v11 }
0x1221   :  { %v3221_v14 = vpop.eup %3220  ;;  %v2810_v15 = vpack.c.bf16 %v1069_v10, %v1066_v9 }
0x1222   :  { %v2805_v16 = vpack.c.bf16 %v1061_v13, %v1058_v12  ;;  %842 = vrot.lane.b32.xlu0 %v3221_v14, %s3524_s3  ;;  %3031 = vmatpush3.bf16.msra.mxu1 %v3895_v7 }
0x1223   :  { %2845 = vst [vmem:[#allocation3 + $0x8] sm:$0xff] %v2810_v15   ;;  %v3223_v18 = vpop.eup %3222  ;;  %3044 = vmatprep.subr.bf16.mxu1 %v3523_v4 }
0x1224   :  { %2806 = vst [vmem:[#allocation3] sm:$0xff] %v2805_v16   ;;  %v832_v19 = vadd.f32 1.0, %v3223_v18 }
0x1226   :  { %v833_v20 = vmul.f32 0.5, %v832_v19 }
0x1228   :  { %v840_v24 = vmul.f32 %v838_v23, %v833_v20 }
0x122b   :  { %v3866_v43 = vld [vmem:[#allocation3] sm:$0xff]  }
0x122c   :  { %v1110_v44 = vunpack.c.l.bf16 %v3866_v43  ;;  %v1208_v15 = vunpack.c.h.bf16 %v3866_v43 }
0x122e   :  { %v1111_v50 = vmul.f32 0.5, %v1110_v44 }
0x1294   :  { %v843_v21 = vpop.permute.xlu0 %842 }
0x1295   :  { %v845_v22 = vmul.f32 %v843_v21, %v833_v20 }
0x1297   :  { %847 = vrot.lane.b32.xlu0 %v845_v22, %s3524_s3 }
0x1309   :  { %v848_v25 = vpop.permute.xlu0 %847 }
0x130a   :  { %v850_v26 = vadd.f32 %v848_v25, %v840_v24 }
0x130c   :  { %3224 = vtanh.f32 %v850_v26 }
0x1316   :  { %v3225_v27 = vpop.eup %3224 }
0x1317   :  { %853 = vrot.lane.b32.xlu1 %v3225_v27, %s3524_s3 }
0x131b   :  { %858 = vrot.lane.b32.xlu1 %v850_v26, %s3525_s13 }
0x1389   :  { %v854_v28 = vpop.permute.xlu1 %853 }
0x138a   :  { %v856_v29 = vmul.f32 %v854_v28, %v833_v20 }
0x138c   :  { %v2764_v30 = vpack.c.bf16 %v856_v29, %v856_v29 }
0x138d   :  { %v859_v33 = vpop.permute.xlu1 %858 }
0x138e   :  { %861 = vst.msk [vmem:[#allocation4] sm:$0xff] %vm276_vm2, %v859_v33  ;;  %866 = vrot.lane.b32.xlu0 %v2764_v30, %s3516_s15 }
0x1395   :  { %v924_v34 = vld [vmem:[#allocation4] sm:$0xff] }
0x1396   :  { %926 = vrot.lane.b32.xlu1 %v924_v34, %s3524_s3 }
0x1400   :  { %v867_v35 = vpop.permute.xlu0 %866 }
0x1401   :  { %870 = vst.msk [vmem:[#allocation2 + $0x18] sm:$0xf] %vm323_vm4, %v867_v35 }
0x1408   :  { %v873_v36 = vld [vmem:[#allocation2 + $0x18] sm:$0xf]  ;;  %v927_v52 = vpop.permute.xlu1 %926 }
0x1409   :  { %2997 = vmatmul.mubr.msk.bf16.vlgmr.msra.gmra.mrb[16].mxu0 %vm276_vm2, %v873_v36 }
0x140a   :  { %3016 = vmatprep.mubr.msk.bf16.mxu0 %vm3526_vm3, %v3523_v4  ;;  %3013 = vmatpush3.bf16.msra.mxu0 %v3889_v3 }
0x140b   :  { %3014 = vmatprep.subr.bf16.mxu0 %v3523_v4 }
0x140e   :  { %3015 = vmatpush3.bf16.msra.mxu0 %v3895_v7 }
0x140f   :  { %3020 = vmatprep.subr.bf16.mxu0 %v3523_v4 }
0x14dc   :  { %v911_v38 = vpop.f32.mrb[16].mxu0 }
0x14dd   :  { %v918_v39 = vadd.f32 %v917_v37, %v911_v38  ;;  %v2998_v31 = vpop.f32.mrb[17].mxu0 }
0x14de   :  { %v914_v40 = vpop.f32.mrb[18].mxu0 }
0x14df   :  { %3226 = vtanh.f32 %v918_v39  ;;  %v2999_v41 = vpop.f32.mrb[19].mxu0  ;;  %v919_v6 = vmul.f32 0.5, %v918_v39 }
0x14e1   :  { %3228 = vtanh.f32 %v919_v6 }
0x14e2   :  { %3230 = vtanh.f32 %v1110_v44 }
0x14e3   :  { %3232 = vtanh.f32 %v1111_v50 }
0x14e9   :  { %v3227_v42 = vpop.eup %3226 }
0x14ea   :  { %931 = vrot.lane.b32.xlu0 %v3227_v42, %s3524_s3 }
0x14eb   :  { %v3229_v32 = vpop.eup %3228 }
0x14ec   :  { %v921_v45 = vadd.f32 1.0, %v3229_v32  ;;  %v3231_v49 = vpop.eup %3230 }
0x14ed   :  { %v3233_v51 = vpop.eup %3232 }
0x14ee   :  { %v3869_v46 = vmul.f32 0.5, %v921_v45  ;;  %v1113_v54 = vadd.f32 1.0, %v3233_v51 }
0x14f0   :  { %v929_v53 = vmul.f32 %v927_v52, %v3869_v46  ;;  %v1114_v57 = vmul.f32 0.5, %v1113_v54 }
0x155c   :  { %v932_v47 = vpop.permute.xlu0 %931 }
0x155d   :  { %v934_v48 = vmul.f32 %v932_v47, %v3869_v46  ;;  %v1250_v47 = vld [vmem:[#allocation3 + $0x8] sm:$0xff]  }
0x155f   :  { %936 = vrot.lane.b32.xlu0 %v934_v48, %s3524_s3  ;;  %v1295_v48 = vunpack.c.l.bf16 %v1250_v47 }
0x1563   :  { %1123 = vrot.lane.b32.xlu0 %v3231_v49, %s3524_s3 }
0x15d1   :  { %v937_v55 = vpop.permute.xlu0 %936 }
0x15d2   :  { %v3875_v56 = vadd.f32 %v937_v55, %v929_v53 }
0x15d4   :  { %947 = vrot.lane.b32.xlu1 %v3875_v56, %s3525_s13 }
0x15d5   :  { %v1124_v58 = vpop.permute.xlu0 %1123 }
0x15d6   :  { %v1126_v59 = vmul.f32 %v1124_v58, %v1114_v57 }
0x15d8   :  { %1128 = vrot.lane.b32.xlu0 %v1126_v59, %s3524_s3 }
0x1646   :  { %v948_v60 = vpop.permute.xlu1 %947 }
0x1647   :  { %950 = vst.msk [vmem:[#allocation4] sm:$0xff] %vm276_vm2, %v948_v60 }
0x1648   :  { %1104 = vst.msk [vmem:[#allocation4] sm:$0xff] %vm276_vm2, %v3523_v4 }
0x164a   :  { %v1129_v0 = vpop.permute.xlu0 %1128 }
0x164f   :  { %v1116_v61 = vld [vmem:[#allocation4] sm:$0xff] }
0x1650   :  { %1118 = vrot.lane.b32.xlu1 %v1116_v61, %s3524_s3 }
0x16c2   :  { %v1119_v62 = vpop.permute.xlu1 %1118 }
0x16c3   :  { %v1121_v63 = vmul.f32 %v1119_v62, %v1114_v57 }
0x16c5   :  { %v1131_v1 = vadd.f32 %v1129_v0, %v1121_v63 }
0x16c7   :  { %3234 = vtanh.f32 %v1131_v1 }
0x16d1   :  { %v3235_v2 = vpop.eup %3234 }
0x16d2   :  { %1134 = vrot.lane.b32.xlu1 %v3235_v2, %s3524_s3 }
0x16d6   :  { %1139 = vrot.lane.b32.xlu1 %v1131_v1, %s3525_s13 }
0x1744   :  { %v1135_v8 = vpop.permute.xlu1 %1134 }
0x1745   :  { %v1137_v9 = vmul.f32 %v1135_v8, %v1114_v57 }
0x1747   :  { %v2766_v10 = vpack.c.bf16 %v1137_v9, %v1137_v9 }
0x1748   :  { %v1140_v11 = vpop.permute.xlu1 %1139 }
0x1749   :  { %1142 = vst.msk [vmem:[#allocation4] sm:$0xff] %vm276_vm2, %v1140_v11  ;;  %1147 = vrot.lane.b32.xlu0 %v2766_v10, %s3516_s15 }
0x1750   :  { %v1215_v12 = vld [vmem:[#allocation4] sm:$0xff] }
0x1751   :  { %1217 = vrot.lane.b32.xlu1 %v1215_v12, %s3524_s3 }
0x17bb   :  { %v1148_v13 = vpop.permute.xlu0 %1147 }
0x17bc   :  { %1150 = vst.msk [vmem:[#allocation2] sm:$0xf] %vm323_vm4, %v1148_v13 }
0x17c3   :  { %v1152_v14 = vld [vmem:[#allocation2] sm:$0xf]  ;;  %v1218_v28 = vpop.permute.xlu1 %1217 }
0x17c4   :  { %3017 = vmatmul.mubr.msk.bf16.vlgmr.msra.gmra.mrb[20].mxu0 %vm276_vm2, %v1152_v14 }
0x17c5   :  { %3021 = vmatpush3.bf16.msra.mxu0 %v3889_v3  ;;  %3024 = vmatprep.mubr.msk.bf16.mxu0 %vm3526_vm3, %v3523_v4 }
0x17c6   :  { %3022 = vmatprep.subr.bf16.mxu0 %v3523_v4 }
0x17c9   :  { %3023 = vmatpush3.bf16.msra.mxu0 %v3895_v7 }
0x17ca   :  { %3036 = vmatprep.subr.bf16.mxu0 %v3523_v4 }
0x1897   :  { %v1202_v16 = vpop.f32.mrb[20].mxu0 }
0x1898   :  { %v1209_v17 = vadd.f32 %v1208_v15, %v1202_v16  ;;  %v3018_v18 = vpop.f32.mrb[21].mxu0 }
0x1899   :  { %v1205_v19 = vpop.f32.mrb[22].mxu0 }
0x189a   :  { %3236 = vtanh.f32 %v1209_v17  ;;  %v3019_v20 = vpop.f32.mrb[23].mxu0  ;;  %v1210_v22 = vmul.f32 0.5, %v1209_v17 }
0x189c   :  { %3238 = vtanh.f32 %v1210_v22 }
0x18a4   :  { %v3237_v21 = vpop.eup %3236 }
0x18a5   :  { %1222 = vrot.lane.b32.xlu0 %v3237_v21, %s3524_s3  ;;  %v1382_v21 = vunpack.c.h.bf16 %v1250_v47 }
0x18a6   :  { %v3239_v23 = vpop.eup %3238 }
0x18a7   :  { %v1212_v24 = vadd.f32 1.0, %v3239_v23 }
0x18a9   :  { %v1213_v25 = vmul.f32 0.5, %v1212_v24 }
0x18ab   :  { %v1220_v29 = vmul.f32 %v1218_v28, %v1213_v25 }
0x1917   :  { %v1223_v26 = vpop.permute.xlu0 %1222 }
0x1918   :  { %v1225_v27 = vmul.f32 %v1223_v26, %v1213_v25 }
0x191a   :  { %1227 = vrot.lane.b32.xlu0 %v1225_v27, %s3524_s3 }
0x198c   :  { %v1228_v30 = vpop.permute.xlu0 %1227 }
0x198d   :  { %v1230_v33 = vadd.f32 %v1228_v30, %v1220_v29 }
0x198f   :  { %3240 = vtanh.f32 %v1230_v33 }
0x1990   :  { %3242 = vtanh.f32 %v3875_v56 }
0x1999   :  { %v3241_v34 = vpop.eup %3240 }
0x199a   :  { %1233 = vrot.lane.b32.xlu1 %v3241_v34, %s3524_s3  ;;  %v3243_v31 = vpop.eup %3242 }
0x199e   :  { %1238 = vrot.lane.b32.xlu1 %v1230_v33, %s3525_s13 }
0x1a0c   :  { %v1234_v35 = vpop.permute.xlu1 %1233 }
0x1a0d   :  { %v1236_v36 = vmul.f32 %v1234_v35, %v1213_v25 }
0x1a0f   :  { %v2767_v37 = vpack.c.bf16 %v1236_v36, %v1236_v36 }
0x1a10   :  { %v1239_v38 = vpop.permute.xlu1 %1238 }
0x1a11   :  { %1241 = vst.msk [vmem:[#allocation4] sm:$0xff] %vm276_vm2, %v1239_v38  ;;  %1246 = vrot.lane.b32.xlu0 %v2767_v37, %s3516_s15 }
0x1a18   :  { %v1302_v39 = vld [vmem:[#allocation4] sm:$0xff] }
0x1a19   :  { %1304 = vrot.lane.b32.xlu1 %v1302_v39, %s3524_s3 }
0x1a1d   :  { %942 = vrot.lane.b32.xlu1 %v3243_v31, %s3524_s3 }
0x1a83   :  { %v1247_v40 = vpop.permute.xlu0 %1246 }
0x1a84   :  { %1249 = vst.msk [vmem:[#allocation2 + $0x4] sm:$0xf] %vm323_vm4, %v1247_v40 }
0x1a8b   :  { %v1305_v41 = vpop.permute.xlu1 %1304  ;;  %v1251_v42 = vld [vmem:[#allocation2 + $0x4] sm:$0xf] }
0x1a8c   :  { %3025 = vmatmul.mubr.msk.bf16.vlgmr.msra.gmra.mrb[24].mxu0 %vm276_vm2, %v1251_v42 }
0x1a8d   :  { %3037 = vmatpush3.bf16.msra.mxu0 %v3889_v3  ;;  %3040 = vmatprep.mubr.msk.bf16.mxu0 %vm3526_vm3, %v3523_v4 }
0x1a8e   :  { %3038 = vmatprep.subr.bf16.mxu0 %v3523_v4 }
0x1a8f   :  { %v943_v6 = vpop.permute.xlu1 %942 }
0x1a90   :  { %v945_v43 = vmul.f32 %v943_v6, %v3869_v46 }
0x1a91   :  { %3039 = vmatpush3.bf16.msra.mxu0 %v3895_v7 }
0x1a92   :  { %v2765_v32 = vpack.c.bf16 %v945_v43, %v945_v43  ;;  %3052 = vmatprep.subr.bf16.mxu0 %v3523_v4 }
0x1a94   :  { %955 = vrot.lane.b32.xlu1 %v2765_v32, %s3516_s15 }
0x1b06   :  { %v956_v44 = vpop.permute.xlu1 %955 }
0x1b07   :  { %959 = vst.msk [vmem:[#allocation2 + $0x1c] sm:$0xf] %vm323_vm4, %v956_v44 }
0x1b0e   :  { %v3173_v45 = vld [vmem:[#allocation2 + $0x18] sm:$0xff]  }
0x1b0f   :  { %3009 = vmatmul.mubr.msk.bf16.gmra.mrb[20].mxu1 %vm276_vm2, %v3173_v45 }
0x1b10   :  { %3032 = vmatprep.mubr.msk.bf16.mxu1 %vm3526_vm3, %v3523_v4 }
0x1b5f   :  { %v1289_v49 = vpop.f32.mrb[24].mxu0 }
0x1b60   :  { %v1296_v46 = vadd.f32 %v1295_v48, %v1289_v49  ;;  %v3026_v50 = vpop.f32.mrb[25].mxu0 }
0x1b61   :  { %v1292_v51 = vpop.f32.mrb[26].mxu0 }
0x1b62   :  { %3244 = vtanh.f32 %v1296_v46  ;;  %v3027_v52 = vpop.f32.mrb[27].mxu0  ;;  %v1297_v54 = vmul.f32 0.5, %v1296_v46 }
0x1b64   :  { %3246 = vtanh.f32 %v1297_v54 }
0x1b6c   :  { %v3245_v53 = vpop.eup %3244 }
0x1b6d   :  { %1309 = vrot.lane.b32.xlu0 %v3245_v53, %s3524_s3 }
0x1b6e   :  { %v3247_v55 = vpop.eup %3246 }
0x1b6f   :  { %v1299_v56 = vadd.f32 1.0, %v3247_v55 }
0x1b71   :  { %v1300_v57 = vmul.f32 0.5, %v1299_v56 }
0x1b73   :  { %v1307_v11 = vmul.f32 %v1305_v41, %v1300_v57 }
0x1bdf   :  { %v1310_v58 = vpop.permute.xlu0 %1309 }
0x1be0   :  { %v1312_v59 = vmul.f32 %v1310_v58, %v1300_v57 }
0x1be2   :  { %1314 = vrot.lane.b32.xlu0 %v1312_v59, %s3524_s3  ;;  %v3010_v60 = vpop.f32.mrb[20].mxu1 }
0x1be3   :  { %v1073_v61 = vpop.f32.mrb[21].mxu1  ;;  %v1082_v63 = vadd.f32 %v3010_v60, %v3848_v5 }
0x1be4   :  { %v3011_v62 = vpop.f32.mrb[22].mxu1  ;;  %v1074_v2 = vadd.f32 %v3848_v5, %v1073_v61 }
0x1be5   :  { %v1085_v0 = vadd.f32 %v3011_v62, %v3848_v5  ;;  %v1076_v1 = vpop.f32.mrb[23].mxu1 }
0x1be6   :  { %v1077_v8 = vadd.f32 %v3848_v5, %v1076_v1 }
0x1be7   :  { %v2820_v9 = vpack.c.bf16 %v1085_v0, %v1082_v63 }
0x1be8   :  { %v2815_v10 = vpack.c.bf16 %v1077_v8, %v1074_v2 }
0x1be9   :  { %2847 = vst [vmem:[#allocation3 + $0x18] sm:$0xff] %v2820_v9  }
0x1bea   :  { %2846 = vst [vmem:[#allocation3 + $0x10] sm:$0xff] %v2815_v10  }
0x1bf1   :  { %v1424_v45 = vld [vmem:[#allocation3 + $0x10] sm:$0xff]  }
0x1bf2   :  { %v1469_v47 = vunpack.c.l.bf16 %v1424_v45 }
0x1c54   :  { %v1315_v12 = vpop.permute.xlu0 %1314 }
0x1c55   :  { %v1317_v13 = vadd.f32 %v1315_v12, %v1307_v11  ;;  %v1556_v12 = vunpack.c.h.bf16 %v1424_v45 }
0x1c57   :  { %3248 = vtanh.f32 %v1317_v13  ;;  %1325 = vrot.lane.b32.xlu1 %v1317_v13, %s3525_s13 }
0x1c61   :  { %v3249_v14 = vpop.eup %3248 }
0x1c62   :  { %1320 = vrot.lane.b32.xlu0 %v3249_v14, %s3524_s3 }
0x1cc9   :  { %v1326_v15 = vpop.permute.xlu1 %1325 }
0x1cca   :  { %1328 = vst.msk [vmem:[#allocation4] sm:$0xff] %vm276_vm2, %v1326_v15 }
0x1cd1   :  { %v1389_v16 = vld [vmem:[#allocation4] sm:$0xff] }
0x1cd2   :  { %1391 = vrot.lane.b32.xlu1 %v1389_v16, %s3524_s3 }
0x1cd4   :  { %v1321_v5 = vpop.permute.xlu0 %1320 }
0x1cd5   :  { %v1323_v17 = vmul.f32 %v1321_v5, %v1300_v57 }
0x1cd7   :  { %v2768_v18 = vpack.c.bf16 %v1323_v17, %v1323_v17 }
0x1cd9   :  { %1333 = vrot.lane.b32.xlu0 %v2768_v18, %s3516_s15 }
0x1d44   :  { %v1392_v36 = vpop.permute.xlu1 %1391 }
0x1d4b   :  { %v1334_v19 = vpop.permute.xlu0 %1333 }
0x1d4c   :  { %1336 = vst.msk [vmem:[#allocation2 + $0x8] sm:$0xf] %vm323_vm4, %v1334_v19 }
0x1d53   :  { %v1338_v20 = vld [vmem:[#allocation2 + $0x8] sm:$0xf] }
0x1d54   :  { %3033 = vmatmul.mubr.msk.bf16.vlgmr.msra.gmra.mrb[24].mxu1 %vm276_vm2, %v1338_v20 }
0x1d55   :  { %3045 = vmatpush3.bf16.msra.mxu1 %v3889_v3  ;;  %3048 = vmatprep.mubr.msk.bf16.mxu1 %vm3526_vm3, %v3523_v4 }
0x1d56   :  { %3046 = vmatprep.subr.bf16.mxu1 %v3523_v4 }
0x1d59   :  { %3047 = vmatpush3.bf16.msra.mxu1 %v3895_v7 }
0x1d5a   :  { %3060 = vmatprep.subr.bf16.mxu1 %v3523_v4 }
0x1e27   :  { %v1376_v22 = vpop.f32.mrb[24].mxu1 }
0x1e28   :  { %v1383_v23 = vadd.f32 %v1382_v21, %v1376_v22  ;;  %v3034_v24 = vpop.f32.mrb[25].mxu1 }
0x1e29   :  { %v1379_v25 = vpop.f32.mrb[26].mxu1 }
0x1e2a   :  { %3250 = vtanh.f32 %v1383_v23  ;;  %v3035_v26 = vpop.f32.mrb[27].mxu1  ;;  %v1384_v28 = vmul.f32 0.5, %v1383_v23 }
0x1e2c   :  { %3252 = vtanh.f32 %v1384_v28 }
0x1e34   :  { %v3251_v27 = vpop.eup %3250 }
0x1e35   :  { %1396 = vrot.lane.b32.xlu0 %v3251_v27, %s3524_s3  ;;  %v3174_v27 = vld [vmem:[#allocation13] sm:$0xff]  }
0x1e36   :  { %v3253_v29 = vpop.eup %3252 }
0x1e37   :  { %v1386_v30 = vadd.f32 1.0, %v3253_v29 }
0x1e39   :  { %v1387_v33 = vmul.f32 0.5, %v1386_v30 }
0x1e3b   :  { %v1394_v37 = vmul.f32 %v1392_v36, %v1387_v33  ;;  %v3176_v36 = vld [vmem:[#allocation13 + $0x8] sm:$0xff]  }
0x1ea7   :  { %v1397_v34 = vpop.permute.xlu0 %1396 }
0x1ea8   :  { %v1399_v35 = vmul.f32 %v1397_v34, %v1387_v33 }
0x1eaa   :  { %1401 = vrot.lane.b32.xlu0 %v1399_v35, %s3524_s3 }
0x1f1c   :  { %v1402_v38 = vpop.permute.xlu0 %1401 }
0x1f1d   :  { %v1404_v39 = vadd.f32 %v1402_v38, %v1394_v37  ;;  %v3175_v38 = vld [vmem:[#allocation2] sm:$0xff]  }
0x1f1f   :  { %3254 = vtanh.f32 %v1404_v39 }
0x1f29   :  { %v3255_v31 = vpop.eup %3254 }
0x1f2a   :  { %1407 = vrot.lane.b32.xlu1 %v3255_v31, %s3524_s3 }
0x1f2e   :  { %1412 = vrot.lane.b32.xlu1 %v1404_v39, %s3525_s13 }
0x1f9c   :  { %v1408_v40 = vpop.permute.xlu1 %1407 }
0x1f9d   :  { %v1410_v41 = vmul.f32 %v1408_v40, %v1387_v33  ;;  %v1598_v40 = vld [vmem:[#allocation3 + $0x18] sm:$0xff]  }
0x1f9f   :  { %v2769_v42 = vpack.c.bf16 %v1410_v41, %v1410_v41  ;;  %v1643_v41 = vunpack.c.l.bf16 %v1598_v40 }
0x1fa0   :  { %v1413_v6 = vpop.permute.xlu1 %1412 }
0x1fa1   :  { %1415 = vst.msk [vmem:[#allocation4] sm:$0xff] %vm276_vm2, %v1413_v6  ;;  %1420 = vrot.lane.b32.xlu0 %v2769_v42, %s3516_s15 }
0x1fa8   :  { %v1476_v43 = vld [vmem:[#allocation4] sm:$0xff] }
0x1fa9   :  { %1478 = vrot.lane.b32.xlu1 %v1476_v43, %s3524_s3 }
0x2013   :  { %v1421_v32 = vpop.permute.xlu0 %1420 }
0x2014   :  { %1423 = vst.msk [vmem:[#allocation2 + $0xc] sm:$0xf] %vm323_vm4, %v1421_v32 }
0x201b   :  { %v1425_v44 = vld [vmem:[#allocation2 + $0xc] sm:$0xf]  ;;  %v1479_v59 = vpop.permute.xlu1 %1478 }
0x201c   :  { %3041 = vmatmul.mubr.msk.bf16.vlgmr.msra.gmra.mrb[28].mxu0 %vm276_vm2, %v1425_v44  ;;  %v3177_v39 = vld [vmem:[#allocation2 + $0x8] sm:$0xff]  }
0x201d   :  { %3053 = vmatpush3.bf16.msra.mxu0 %v3889_v3  ;;  %3056 = vmatprep.mubr.msk.bf16.mxu0 %vm3526_vm3, %v3523_v4 }
0x201e   :  { %3054 = vmatprep.subr.bf16.mxu0 %v3523_v4 }
0x2021   :  { %3055 = vmatpush3.bf16.msra.mxu0 %v3895_v7 }
0x2022   :  { %3068 = vmatprep.subr.bf16.mxu0 %v3174_v27 }
0x20ef   :  { %v1463_v48 = vpop.f32.mrb[28].mxu0 }
0x20f0   :  { %v1470_v49 = vadd.f32 %v1469_v47, %v1463_v48  ;;  %v3042_v46 = vpop.f32.mrb[29].mxu0  ;;  %v4000_v47 = vld [vmem:[#allocation16] ss:$0 sm:$0xff] }
0x20f1   :  { %v1466_v50 = vpop.f32.mrb[30].mxu0 }
0x20f2   :  { %3256 = vtanh.f32 %v1470_v49  ;;  %v3043_v51 = vpop.f32.mrb[31].mxu0  ;;  %v1471_v53 = vmul.f32 0.5, %v1470_v49 }
0x20f4   :  { %3258 = vtanh.f32 %v1471_v53 }
0x20fc   :  { %v3257_v52 = vpop.eup %3256 }
0x20fd   :  { %1483 = vrot.lane.b32.xlu0 %v3257_v52, %s3524_s3 }
0x20fe   :  { %v3259_v54 = vpop.eup %3258 }
0x20ff   :  { %v1473_v55 = vadd.f32 1.0, %v3259_v54 }
0x2101   :  { %v1474_v56 = vmul.f32 0.5, %v1473_v55 }
0x2103   :  { %v1481_v60 = vmul.f32 %v1479_v59, %v1474_v56 }
0x216f   :  { %v1484_v57 = vpop.permute.xlu0 %1483 }
0x2170   :  { %v1486_v58 = vmul.f32 %v1484_v57, %v1474_v56 }
0x2172   :  { %1488 = vrot.lane.b32.xlu0 %v1486_v58, %s3524_s3 }
0x21e4   :  { %v1489_v61 = vpop.permute.xlu0 %1488 }
0x21e5   :  { %v1491_v62 = vadd.f32 %v1489_v61, %v1481_v60 }
0x21e7   :  { %3260 = vtanh.f32 %v1491_v62 }
0x21f1   :  { %v3261_v63 = vpop.eup %3260 }
0x21f2   :  { %1494 = vrot.lane.b32.xlu1 %v3261_v63, %s3524_s3 }
0x21f6   :  { %1499 = vrot.lane.b32.xlu1 %v1491_v62, %s3525_s13 }
0x2264   :  { %v1495_v0 = vpop.permute.xlu1 %1494 }
0x2265   :  { %v1497_v1 = vmul.f32 %v1495_v0, %v1474_v56 }
0x2267   :  { %v2770_v2 = vpack.c.bf16 %v1497_v1, %v1497_v1 }
0x2268   :  { %v1500_v8 = vpop.permute.xlu1 %1499 }
0x2269   :  { %1502 = vst.msk [vmem:[#allocation4] sm:$0xff] %vm276_vm2, %v1500_v8  ;;  %1507 = vrot.lane.b32.xlu0 %v2770_v2, %s3516_s15 }
0x2270   :  { %v1563_v9 = vld [vmem:[#allocation4] sm:$0xff] }
0x2271   :  { %1565 = vrot.lane.b32.xlu1 %v1563_v9, %s3524_s3 }
0x22db   :  { %v1508_v10 = vpop.permute.xlu0 %1507 }
0x22dc   :  { %1510 = vst.msk [vmem:[#allocation2 + $0x10] sm:$0xf] %vm323_vm4, %v1508_v10 }
0x22e3   :  { %v1512_v11 = vld [vmem:[#allocation2 + $0x10] sm:$0xf] }
0x22e4   :  { %3049 = vmatmul.mubr.msk.bf16.vlgmr.msra.gmra.mrb[28].mxu1 %vm276_vm2, %v1512_v11 }
0x22e5   :  { %3061 = vmatpush3.bf16.msra.mxu1 %v3889_v3  ;;  %3064 = vmatprep.mubr.msk.bf16.mxu1 %vm3526_vm3, %v3523_v4 }
0x22e6   :  { %3062 = vmatprep.subr.bf16.mxu1 %v3523_v4 }
0x22e9   :  { %3063 = vmatpush3.bf16.msra.mxu1 %v3895_v7  ;;  %v1566_v7 = vpop.permute.xlu1 %1565 }
0x22ea   :  { %3080 = vmatprep.subr.bf16.mxu1 %v3523_v4 }
0x23b7   :  { %v1550_v13 = vpop.f32.mrb[28].mxu1 }
0x23b8   :  { %v1557_v14 = vadd.f32 %v1556_v12, %v1550_v13  ;;  %v3050_v15 = vpop.f32.mrb[29].mxu1 }
0x23b9   :  { %v1553_v16 = vpop.f32.mrb[30].mxu1 }
0x23ba   :  { %3262 = vtanh.f32 %v1557_v14  ;;  %v3051_v5 = vpop.f32.mrb[31].mxu1  ;;  %v1558_v3 = vmul.f32 0.5, %v1557_v14  ;;  %v1730_v16 = vunpack.c.h.bf16 %v1598_v40 }
0x23bc   :  { %3264 = vtanh.f32 %v1558_v3 }
0x23c4   :  { %v3263_v17 = vpop.eup %3262 }
0x23c5   :  { %1570 = vrot.lane.b32.xlu0 %v3263_v17, %s3524_s3 }
0x23c6   :  { %v3265_v18 = vpop.eup %3264 }
0x23c7   :  { %v1560_v19 = vadd.f32 1.0, %v3265_v18 }
0x23c9   :  { %v1561_v20 = vmul.f32 0.5, %v1560_v19 }
0x23cb   :  { %v1568_v23 = vmul.f32 %v1566_v7, %v1561_v20 }
0x2437   :  { %v1571_v21 = vpop.permute.xlu0 %1570 }
0x2438   :  { %v1573_v22 = vmul.f32 %v1571_v21, %v1561_v20 }
0x243a   :  { %1575 = vrot.lane.b32.xlu0 %v1573_v22, %s3524_s3 }
0x24ac   :  { %v1576_v24 = vpop.permute.xlu0 %1575 }
0x24ad   :  { %v1578_v25 = vadd.f32 %v1576_v24, %v1568_v23 }
0x24af   :  { %3266 = vtanh.f32 %v1578_v25 }
0x24b9   :  { %v3267_v26 = vpop.eup %3266 }
0x24ba   :  { %1581 = vrot.lane.b32.xlu1 %v3267_v26, %s3524_s3 }
0x24be   :  { %1586 = vrot.lane.b32.xlu1 %v1578_v25, %s3525_s13 }
0x252c   :  { %v1582_v28 = vpop.permute.xlu1 %1581 }
0x252d   :  { %v1584_v29 = vmul.f32 %v1582_v28, %v1561_v20 }
0x252f   :  { %v2771_v30 = vpack.c.bf16 %v1584_v29, %v1584_v29 }
0x2530   :  { %v1587_v33 = vpop.permute.xlu1 %1586 }
0x2531   :  { %1589 = vst.msk [vmem:[#allocation4] sm:$0xff] %vm276_vm2, %v1587_v33  ;;  %1594 = vrot.lane.b32.xlu0 %v2771_v30, %s3516_s15 }
0x2538   :  { %v1650_v34 = vld [vmem:[#allocation4] sm:$0xff] }
0x2539   :  { %1652 = vrot.lane.b32.xlu1 %v1650_v34, %s3524_s3 }
0x25a3   :  { %v1595_v35 = vpop.permute.xlu0 %1594 }
0x25a4   :  { %1597 = vst.msk [vmem:[#allocation2 + $0x14] sm:$0xf] %vm323_vm4, %v1595_v35 }
0x25ab   :  { %v1599_v37 = vld [vmem:[#allocation2 + $0x14] sm:$0xf]  ;;  %v1653_v63 = vpop.permute.xlu1 %1652 }
0x25ac   :  { %3057 = vmatmul.mubr.msk.bf16.vlgmr.msra.gmra.mrb[32].mxu0 %vm276_vm2, %v1599_v37  ;;  %v3178_v31 = vld [vmem:[#allocation2 + $0x10] sm:$0xff]  }
0x25ad   :  { %3069 = vmatpush3.bf16.msra.mxu0 %v3174_v27  ;;  %3072 = vmatprep.mubr.msk.bf16.mxu0 %vm276_vm2, %v3175_v38 }
0x25ae   :  { %3070 = vmatprep.subr.bf16.mxu0 %v3176_v36 }
0x25b1   :  { %3071 = vmatpush3.bf16.msra.mxu0 %v3176_v36 }
0x25b2   :  { %3096 = vmatprep.subr.bf16.mxu0 %v3523_v4 }
0x25b4   :  { %3073 = vmatmul.mubr.msk.bf16.vlgmr.msra.gmra.mrb[36].mxu0 %vm276_vm2, %v3177_v39 }
0x25b5   :  { %3076 = vmatprep.mubr.msk.bf16.mxu0 %vm276_vm2, %v3178_v31 }
0x267f   :  { %v1637_v42 = vpop.f32.mrb[32].mxu0 }
0x2680   :  { %v1644_v6 = vadd.f32 %v1643_v41, %v1637_v42  ;;  %v3058_v43 = vpop.f32.mrb[33].mxu0 }
0x2681   :  { %v1640_v32 = vpop.f32.mrb[34].mxu0 }
0x2682   :  { %3268 = vtanh.f32 %v1644_v6  ;;  %v3059_v44 = vpop.f32.mrb[35].mxu0  ;;  %v1645_v57 = vmul.f32 0.5, %v1644_v6 }
0x2684   :  { %3270 = vtanh.f32 %v1645_v57 }
0x2687   :  { %v3074_v45 = vpop.f32.mrb[36].mxu0 }
0x2688   :  { %v1869_v48 = vpop.f32.mrb[37].mxu0  ;;  %v1878_v46 = vadd.f32 %v3074_v45, %v4000_v47  ;;  %v4038_v45 = vld [vmem:[#allocation14] sm:$0xff]  }
0x2689   :  { %v3075_v49 = vpop.f32.mrb[38].mxu0  ;;  %v1870_v52 = vadd.f32 %v4000_v47, %v1869_v48  ;;  %v4041_v48 = vld [vmem:[#allocation14 + $0x8] sm:$0xff]   ;;  %3097 = vmatpush3.bf16.msra.mxu0 %v4038_v45 }
0x268a   :  { %v1881_v50 = vadd.f32 %v3075_v49, %v4000_v47  ;;  %v1872_v51 = vpop.f32.mrb[39].mxu0  ;;  %3098 = vmatprep.subr.bf16.mxu0 %v3523_v4 }
0x268b   :  { %v1873_v53 = vadd.f32 %v4000_v47, %v1872_v51 }
0x268c   :  { %v3269_v54 = vpop.eup %3268  ;;  %v2830_v55 = vpack.c.bf16 %v1881_v50, %v1878_v46 }
0x268d   :  { %v2825_v56 = vpack.c.bf16 %v1873_v53, %v1870_v52  ;;  %1657 = vrot.lane.b32.xlu0 %v3269_v54, %s3524_s3  ;;  %3099 = vmatpush3.bf16.msra.mxu0 %v4041_v48 }
0x268e   :  { %2848 = vst [vmem:[#allocation3 + $0x8] sm:$0xff] %v2830_v55   ;;  %v3271_v58 = vpop.eup %3270  ;;  %3112 = vmatprep.subr.bf16.mxu0 %v3523_v4 }
0x268f   :  { %2826 = vst [vmem:[#allocation3] sm:$0xff] %v2825_v56   ;;  %v1647_v59 = vadd.f32 1.0, %v3271_v58 }
0x2691   :  { %v1648_v60 = vmul.f32 0.5, %v1647_v59 }
0x2693   :  { %v1655_v0 = vmul.f32 %v1653_v63, %v1648_v60 }
0x2696   :  { %v4018_v22 = vld [vmem:[#allocation3] sm:$0xff]  }
0x2697   :  { %v1922_v23 = vunpack.c.l.bf16 %v4018_v22  ;;  %v2020_v55 = vunpack.c.h.bf16 %v4018_v22 }
0x2699   :  { %v1923_v29 = vmul.f32 0.5, %v1922_v23 }
0x26ff   :  { %v1658_v61 = vpop.permute.xlu0 %1657 }
0x2700   :  { %v1660_v62 = vmul.f32 %v1658_v61, %v1648_v60 }
0x2702   :  { %1662 = vrot.lane.b32.xlu0 %v1660_v62, %s3524_s3 }
0x2774   :  { %v1663_v1 = vpop.permute.xlu0 %1662 }
0x2775   :  { %v1665_v2 = vadd.f32 %v1663_v1, %v1655_v0 }
0x2777   :  { %3272 = vtanh.f32 %v1665_v2 }
0x2781   :  { %v3273_v8 = vpop.eup %3272 }
0x2782   :  { %1668 = vrot.lane.b32.xlu1 %v3273_v8, %s3524_s3 }
0x2786   :  { %1673 = vrot.lane.b32.xlu1 %v1665_v2, %s3525_s13 }
0x27f4   :  { %v1669_v9 = vpop.permute.xlu1 %1668 }
0x27f5   :  { %v1671_v10 = vmul.f32 %v1669_v9, %v1648_v60 }
0x27f7   :  { %v2772_v11 = vpack.c.bf16 %v1671_v10, %v1671_v10 }
0x27f8   :  { %v1674_v12 = vpop.permute.xlu1 %1673 }
0x27f9   :  { %1676 = vst.msk [vmem:[#allocation4] sm:$0xff] %vm276_vm2, %v1674_v12  ;;  %1681 = vrot.lane.b32.xlu0 %v2772_v11, %s3516_s15 }
0x2800   :  { %v1737_v13 = vld [vmem:[#allocation4] sm:$0xff] }
0x2801   :  { %1739 = vrot.lane.b32.xlu1 %v1737_v13, %s3524_s3 }
0x286b   :  { %v1682_v14 = vpop.permute.xlu0 %1681 }
0x286c   :  { %1684 = vst.msk [vmem:[#allocation2 + $0x18] sm:$0xf] %vm323_vm4, %v1682_v14 }
0x2873   :  { %v1686_v15 = vld [vmem:[#allocation2 + $0x18] sm:$0xf]  ;;  %v1740_v33 = vpop.permute.xlu1 %1739 }
0x2874   :  { %3065 = vmatmul.mubr.msk.bf16.vlgmr.msra.gmra.mrb[32].mxu1 %vm276_vm2, %v1686_v15 }
0x2875   :  { %3084 = vmatprep.mubr.msk.bf16.mxu1 %vm3526_vm3, %v3523_v4  ;;  %3081 = vmatpush3.bf16.msra.mxu1 %v4038_v45 }
0x2876   :  { %3082 = vmatprep.subr.bf16.mxu1 %v3523_v4 }
0x2879   :  { %3083 = vmatpush3.bf16.msra.mxu1 %v4041_v48 }
0x287a   :  { %3088 = vmatprep.subr.bf16.mxu1 %v3523_v4 }
0x2947   :  { %v1724_v5 = vpop.f32.mrb[32].mxu1 }
0x2948   :  { %v1731_v17 = vadd.f32 %v1730_v16, %v1724_v5  ;;  %v3066_v3 = vpop.f32.mrb[33].mxu1 }
0x2949   :  { %v1727_v18 = vpop.f32.mrb[34].mxu1 }
0x294a   :  { %3274 = vtanh.f32 %v1731_v17  ;;  %v3067_v19 = vpop.f32.mrb[35].mxu1  ;;  %v1732_v21 = vmul.f32 0.5, %v1731_v17 }
0x294c   :  { %3276 = vtanh.f32 %v1732_v21 }
0x294d   :  { %3278 = vtanh.f32 %v1922_v23 }
0x294e   :  { %3280 = vtanh.f32 %v1923_v29 }
0x2954   :  { %v3275_v20 = vpop.eup %3274 }
0x2955   :  { %1744 = vrot.lane.b32.xlu0 %v3275_v20, %s3524_s3 }
0x2956   :  { %v3277_v7 = vpop.eup %3276 }
0x2957   :  { %v1734_v24 = vadd.f32 1.0, %v3277_v7  ;;  %v3279_v28 = vpop.eup %3278 }
0x2958   :  { %v3281_v30 = vpop.eup %3280 }
0x2959   :  { %v4021_v25 = vmul.f32 0.5, %v1734_v24  ;;  %v1925_v35 = vadd.f32 1.0, %v3281_v30 }
0x295b   :  { %v1742_v34 = vmul.f32 %v1740_v33, %v4021_v25  ;;  %v1926_v38 = vmul.f32 0.5, %v1925_v35 }
0x29c7   :  { %v1745_v26 = vpop.permute.xlu0 %1744 }
0x29c8   :  { %v1747_v27 = vmul.f32 %v1745_v26, %v4021_v25  ;;  %v2062_v26 = vld [vmem:[#allocation3 + $0x8] sm:$0xff]  }
0x29ca   :  { %1749 = vrot.lane.b32.xlu0 %v1747_v27, %s3524_s3  ;;  %v2107_v27 = vunpack.c.l.bf16 %v2062_v26 }
0x29ce   :  { %1935 = vrot.lane.b32.xlu0 %v3279_v28, %s3524_s3 }
0x2a3c   :  { %v1750_v36 = vpop.permute.xlu0 %1749 }
0x2a3d   :  { %v4027_v37 = vadd.f32 %v1750_v36, %v1742_v34 }
0x2a3f   :  { %1760 = vrot.lane.b32.xlu1 %v4027_v37, %s3525_s13 }
0x2a40   :  { %v1936_v39 = vpop.permute.xlu0 %1935 }
0x2a41   :  { %v1938_v31 = vmul.f32 %v1936_v39, %v1926_v38 }
0x2a43   :  { %1940 = vrot.lane.b32.xlu0 %v1938_v31, %s3524_s3 }
0x2ab1   :  { %v1761_v40 = vpop.permute.xlu1 %1760 }
0x2ab2   :  { %1763 = vst.msk [vmem:[#allocation4] sm:$0xff] %vm276_vm2, %v1761_v40 }
0x2ab3   :  { %1916 = vst.msk [vmem:[#allocation4] sm:$0xff] %vm276_vm2, %v3523_v4 }
0x2ab5   :  { %v1941_v43 = vpop.permute.xlu0 %1940 }
0x2aba   :  { %v1928_v41 = vld [vmem:[#allocation4] sm:$0xff] }
0x2abb   :  { %1930 = vrot.lane.b32.xlu1 %v1928_v41, %s3524_s3 }
0x2b2d   :  { %v1931_v42 = vpop.permute.xlu1 %1930 }
0x2b2e   :  { %v1933_v6 = vmul.f32 %v1931_v42, %v1926_v38 }
0x2b30   :  { %v1943_v32 = vadd.f32 %v1941_v43, %v1933_v6 }
0x2b32   :  { %3282 = vtanh.f32 %v1943_v32 }
0x2b3c   :  { %v3283_v44 = vpop.eup %3282 }
0x2b3d   :  { %1946 = vrot.lane.b32.xlu1 %v3283_v44, %s3524_s3 }
0x2b41   :  { %1951 = vrot.lane.b32.xlu1 %v1943_v32, %s3525_s13 }
0x2baf   :  { %v1947_v49 = vpop.permute.xlu1 %1946 }
0x2bb0   :  { %v1949_v46 = vmul.f32 %v1947_v49, %v1926_v38 }
0x2bb2   :  { %v2774_v50 = vpack.c.bf16 %v1949_v46, %v1949_v46 }
0x2bb3   :  { %v1952_v51 = vpop.permute.xlu1 %1951 }
0x2bb4   :  { %1954 = vst.msk [vmem:[#allocation4] sm:$0xff] %vm276_vm2, %v1952_v51  ;;  %1959 = vrot.lane.b32.xlu0 %v2774_v50, %s3516_s15 }
0x2bbb   :  { %v2027_v52 = vld [vmem:[#allocation4] sm:$0xff] }
0x2bbc   :  { %2029 = vrot.lane.b32.xlu1 %v2027_v52, %s3524_s3 }
0x2c26   :  { %v1960_v53 = vpop.permute.xlu0 %1959 }
0x2c27   :  { %1962 = vst.msk [vmem:[#allocation2] sm:$0xf] %vm323_vm4, %v1960_v53 }
0x2c2e   :  { %v1964_v54 = vld [vmem:[#allocation2] sm:$0xf]  ;;  %v2030_v9 = vpop.permute.xlu1 %2029 }
0x2c2f   :  { %3085 = vmatmul.mubr.msk.bf16.vlgmr.msra.gmra.mrb[36].mxu1 %vm276_vm2, %v1964_v54 }
0x2c30   :  { %3089 = vmatpush3.bf16.msra.mxu1 %v4038_v45  ;;  %3092 = vmatprep.mubr.msk.bf16.mxu1 %vm3526_vm3, %v3523_v4 }
0x2c31   :  { %3090 = vmatprep.subr.bf16.mxu1 %v3523_v4 }
0x2c34   :  { %3091 = vmatpush3.bf16.msra.mxu1 %v4041_v48 }
0x2c35   :  { %3104 = vmatprep.subr.bf16.mxu1 %v3523_v4 }
0x2d02   :  { %v2014_v56 = vpop.f32.mrb[36].mxu1 }
0x2d03   :  { %v2021_v57 = vadd.f32 %v2020_v55, %v2014_v56  ;;  %v3086_v58 = vpop.f32.mrb[37].mxu1 }
0x2d04   :  { %v2017_v59 = vpop.f32.mrb[38].mxu1 }
0x2d05   :  { %3284 = vtanh.f32 %v2021_v57  ;;  %v3087_v60 = vpop.f32.mrb[39].mxu1  ;;  %v2022_v62 = vmul.f32 0.5, %v2021_v57 }
0x2d07   :  { %3286 = vtanh.f32 %v2022_v62 }
0x2d0f   :  { %v3285_v61 = vpop.eup %3284 }
0x2d10   :  { %2034 = vrot.lane.b32.xlu0 %v3285_v61, %s3524_s3  ;;  %v2194_v61 = vunpack.c.h.bf16 %v2062_v26 }
0x2d11   :  { %v3287_v63 = vpop.eup %3286 }
0x2d12   :  { %v2024_v0 = vadd.f32 1.0, %v3287_v63 }
0x2d14   :  { %v2025_v1 = vmul.f32 0.5, %v2024_v0 }
0x2d16   :  { %v2032_v10 = vmul.f32 %v2030_v9, %v2025_v1 }
0x2d82   :  { %v2035_v2 = vpop.permute.xlu0 %2034 }
0x2d83   :  { %v2037_v8 = vmul.f32 %v2035_v2, %v2025_v1 }
0x2d85   :  { %2039 = vrot.lane.b32.xlu0 %v2037_v8, %s3524_s3 }
0x2df7   :  { %v2040_v11 = vpop.permute.xlu0 %2039 }
0x2df8   :  { %v2042_v12 = vadd.f32 %v2040_v11, %v2032_v10 }
0x2dfa   :  { %3288 = vtanh.f32 %v2042_v12 }
0x2dfb   :  { %3290 = vtanh.f32 %v4027_v37 }
0x2e04   :  { %v3289_v13 = vpop.eup %3288 }
0x2e05   :  { %2045 = vrot.lane.b32.xlu1 %v3289_v13, %s3524_s3  ;;  %v3291_v3 = vpop.eup %3290 }
0x2e09   :  { %2050 = vrot.lane.b32.xlu1 %v2042_v12, %s3525_s13 }
0x2e77   :  { %v2046_v14 = vpop.permute.xlu1 %2045 }
0x2e78   :  { %v2048_v15 = vmul.f32 %v2046_v14, %v2025_v1 }
0x2e7a   :  { %v2775_v16 = vpack.c.bf16 %v2048_v15, %v2048_v15 }
0x2e7b   :  { %v2051_v5 = vpop.permute.xlu1 %2050 }
0x2e7c   :  { %2053 = vst.msk [vmem:[#allocation4] sm:$0xff] %vm276_vm2, %v2051_v5  ;;  %2058 = vrot.lane.b32.xlu0 %v2775_v16, %s3516_s15 }
0x2e83   :  { %v2114_v17 = vld [vmem:[#allocation4] sm:$0xff] }
0x2e84   :  { %2116 = vrot.lane.b32.xlu1 %v2114_v17, %s3524_s3 }
0x2e88   :  { %1755 = vrot.lane.b32.xlu1 %v3291_v3, %s3524_s3 }
0x2eee   :  { %v2059_v18 = vpop.permute.xlu0 %2058 }
0x2eef   :  { %2061 = vst.msk [vmem:[#allocation2 + $0x4] sm:$0xf] %vm323_vm4, %v2059_v18 }
0x2ef6   :  { %v2117_v19 = vpop.permute.xlu1 %2116  ;;  %v2063_v20 = vld [vmem:[#allocation2 + $0x4] sm:$0xf] }
0x2ef7   :  { %3093 = vmatmul.mubr.msk.bf16.vlgmr.msra.gmra.mrb[40].mxu1 %vm276_vm2, %v2063_v20 }
0x2ef8   :  { %3105 = vmatpush3.bf16.msra.mxu1 %v4038_v45  ;;  %3108 = vmatprep.mubr.msk.bf16.mxu1 %vm3526_vm3, %v3523_v4 }
0x2ef9   :  { %3106 = vmatprep.subr.bf16.mxu1 %v3523_v4 }
0x2efa   :  { %v1756_v21 = vpop.permute.xlu1 %1755 }
0x2efb   :  { %v1758_v22 = vmul.f32 %v1756_v21, %v4021_v25 }
0x2efc   :  { %3107 = vmatpush3.bf16.msra.mxu1 %v4041_v48 }
0x2efd   :  { %v2773_v7 = vpack.c.bf16 %v1758_v22, %v1758_v22  ;;  %3120 = vmatprep.subr.bf16.mxu1 %v3523_v4 }
0x2eff   :  { %1768 = vrot.lane.b32.xlu1 %v2773_v7, %s3516_s15 }
0x2f71   :  { %v1769_v23 = vpop.permute.xlu1 %1768 }
0x2f72   :  { %1771 = vst.msk [vmem:[#allocation2 + $0x1c] sm:$0xf] %vm323_vm4, %v1769_v23 }
0x2f79   :  { %v3181_v24 = vld [vmem:[#allocation2 + $0x18] sm:$0xff]  }
0x2f7a   :  { %3077 = vmatmul.mubr.msk.bf16.gmra.mrb[40].mxu0 %vm276_vm2, %v3181_v24 }
0x2f7b   :  { %3100 = vmatprep.mubr.msk.bf16.mxu0 %vm3526_vm3, %v3523_v4 }
0x2fca   :  { %v2101_v28 = vpop.f32.mrb[40].mxu1 }
0x2fcb   :  { %v2108_v25 = vadd.f32 %v2107_v27, %v2101_v28  ;;  %v3094_v29 = vpop.f32.mrb[41].mxu1 }
0x2fcc   :  { %v2104_v30 = vpop.f32.mrb[42].mxu1 }
0x2fcd   :  { %3292 = vtanh.f32 %v2108_v25  ;;  %v3095_v33 = vpop.f32.mrb[43].mxu1  ;;  %v2109_v35 = vmul.f32 0.5, %v2108_v25 }
0x2fcf   :  { %3294 = vtanh.f32 %v2109_v35 }
0x2fd7   :  { %v3293_v34 = vpop.eup %3292 }
0x2fd8   :  { %2121 = vrot.lane.b32.xlu0 %v3293_v34, %s3524_s3 }
0x2fd9   :  { %v3295_v36 = vpop.eup %3294 }
0x2fda   :  { %v2111_v37 = vadd.f32 1.0, %v3295_v36 }
0x2fdc   :  { %v2112_v38 = vmul.f32 0.5, %v2111_v37 }
0x2fde   :  { %v2119_v51 = vmul.f32 %v2117_v19, %v2112_v38 }
0x304a   :  { %v2122_v39 = vpop.permute.xlu0 %2121 }
0x304b   :  { %v2124_v31 = vmul.f32 %v2122_v39, %v2112_v38 }
0x304d   :  { %2126 = vrot.lane.b32.xlu0 %v2124_v31, %s3524_s3  ;;  %v3078_v40 = vpop.f32.mrb[40].mxu0 }
0x304e   :  { %v1885_v41 = vpop.f32.mrb[41].mxu0  ;;  %v1894_v6 = vadd.f32 %v3078_v40, %v4000_v47 }
0x304f   :  { %v3079_v42 = vpop.f32.mrb[42].mxu0  ;;  %v1886_v44 = vadd.f32 %v4000_v47, %v1885_v41 }
0x3050   :  { %v1897_v43 = vadd.f32 %v3079_v42, %v4000_v47  ;;  %v1888_v32 = vpop.f32.mrb[43].mxu0 }
0x3051   :  { %v1889_v49 = vadd.f32 %v4000_v47, %v1888_v32 }
0x3052   :  { %v2840_v46 = vpack.c.bf16 %v1897_v43, %v1894_v6 }
0x3053   :  { %v2835_v50 = vpack.c.bf16 %v1889_v49, %v1886_v44 }
0x3054   :  { %2850 = vst [vmem:[#allocation3 + $0x18] sm:$0xff] %v2840_v46  }
0x3055   :  { %2849 = vst [vmem:[#allocation3 + $0x10] sm:$0xff] %v2835_v50  }
0x305c   :  { %v2236_v24 = vld [vmem:[#allocation3 + $0x10] sm:$0xff]  }
0x305d   :  { %v2281_v26 = vunpack.c.l.bf16 %v2236_v24 }
0x30bf   :  { %v2127_v52 = vpop.permute.xlu0 %2126 }
0x30c0   :  { %v2129_v53 = vadd.f32 %v2127_v52, %v2119_v51  ;;  %v2368_v52 = vunpack.c.h.bf16 %v2236_v24 }
0x30c2   :  { %3296 = vtanh.f32 %v2129_v53  ;;  %2137 = vrot.lane.b32.xlu1 %v2129_v53, %s3525_s13 }
0x30cc   :  { %v3297_v54 = vpop.eup %3296 }
0x30cd   :  { %2132 = vrot.lane.b32.xlu0 %v3297_v54, %s3524_s3 }
0x3134   :  { %v2138_v55 = vpop.permute.xlu1 %2137 }
0x3135   :  { %2140 = vst.msk [vmem:[#allocation4] sm:$0xff] %vm276_vm2, %v2138_v55 }
0x313c   :  { %v2201_v56 = vld [vmem:[#allocation4] sm:$0xff] }
0x313d   :  { %2203 = vrot.lane.b32.xlu1 %v2201_v56, %s3524_s3 }
0x313f   :  { %v2133_v47 = vpop.permute.xlu0 %2132 }
0x3140   :  { %v2135_v57 = vmul.f32 %v2133_v47, %v2112_v38 }
0x3142   :  { %v2776_v58 = vpack.c.bf16 %v2135_v57, %v2135_v57 }
0x3144   :  { %2145 = vrot.lane.b32.xlu0 %v2776_v58, %s3516_s15 }
0x31af   :  { %v2204_v15 = vpop.permute.xlu1 %2203 }
0x31b6   :  { %v2146_v59 = vpop.permute.xlu0 %2145 }
0x31b7   :  { %2148 = vst.msk [vmem:[#allocation2 + $0x8] sm:$0xf] %vm323_vm4, %v2146_v59 }
0x31be   :  { %v2150_v60 = vld [vmem:[#allocation2 + $0x8] sm:$0xf] }
0x31bf   :  { %3101 = vmatmul.mubr.msk.bf16.vlgmr.msra.gmra.mrb[44].mxu0 %vm276_vm2, %v2150_v60 }
0x31c0   :  { %3113 = vmatpush3.bf16.msra.mxu0 %v4038_v45  ;;  %3116 = vmatprep.mubr.msk.bf16.mxu0 %vm3526_vm3, %v3523_v4 }
0x31c1   :  { %3114 = vmatprep.subr.bf16.mxu0 %v3523_v4 }
0x31c4   :  { %3115 = vmatpush3.bf16.msra.mxu0 %v4041_v48 }
0x31c5   :  { %3128 = vmatprep.subr.bf16.mxu0 %v3523_v4 }
0x3292   :  { %v2188_v62 = vpop.f32.mrb[44].mxu0 }
0x3293   :  { %v2195_v63 = vadd.f32 %v2194_v61, %v2188_v62  ;;  %v3102_v0 = vpop.f32.mrb[45].mxu0 }
0x3294   :  { %v2191_v1 = vpop.f32.mrb[46].mxu0 }
0x3295   :  { %3298 = vtanh.f32 %v2195_v63  ;;  %v3103_v2 = vpop.f32.mrb[47].mxu0  ;;  %v2196_v9 = vmul.f32 0.5, %v2195_v63 }
0x3297   :  { %3300 = vtanh.f32 %v2196_v9 }
0x329f   :  { %v3299_v8 = vpop.eup %3298 }
0x32a0   :  { %2208 = vrot.lane.b32.xlu0 %v3299_v8, %s3524_s3 }
0x32a1   :  { %v3301_v10 = vpop.eup %3300 }
0x32a2   :  { %v2198_v11 = vadd.f32 1.0, %v3301_v10 }
0x32a4   :  { %v2199_v12 = vmul.f32 0.5, %v2198_v11 }
0x32a6   :  { %v2206_v16 = vmul.f32 %v2204_v15, %v2199_v12  ;;  %v2410_v15 = vld [vmem:[#allocation3 + $0x18] sm:$0xff]  }
0x3312   :  { %v2209_v13 = vpop.permute.xlu0 %2208 }
0x3313   :  { %v2211_v14 = vmul.f32 %v2209_v13, %v2199_v12 }
0x3315   :  { %2213 = vrot.lane.b32.xlu0 %v2211_v14, %s3524_s3 }
0x3387   :  { %v2214_v5 = vpop.permute.xlu0 %2213 }
0x3388   :  { %v2216_v17 = vadd.f32 %v2214_v5, %v2206_v16  ;;  %v2455_v16 = vunpack.c.l.bf16 %v2410_v15 }
0x338a   :  { %3302 = vtanh.f32 %v2216_v17 }
0x3394   :  { %v3303_v3 = vpop.eup %3302 }
0x3395   :  { %2219 = vrot.lane.b32.xlu1 %v3303_v3, %s3524_s3 }
0x3399   :  { %2224 = vrot.lane.b32.xlu1 %v2216_v17, %s3525_s13 }
0x3407   :  { %v2220_v18 = vpop.permute.xlu1 %2219 }
0x3408   :  { %v2222_v19 = vmul.f32 %v2220_v18, %v2199_v12 }
0x340a   :  { %v2777_v20 = vpack.c.bf16 %v2222_v19, %v2222_v19 }
0x340b   :  { %v2225_v21 = vpop.permute.xlu1 %2224 }
0x340c   :  { %2227 = vst.msk [vmem:[#allocation4] sm:$0xff] %vm276_vm2, %v2225_v21  ;;  %2232 = vrot.lane.b32.xlu0 %v2777_v20, %s3516_s15 }
0x3413   :  { %v2288_v22 = vld [vmem:[#allocation4] sm:$0xff] }
0x3414   :  { %2290 = vrot.lane.b32.xlu1 %v2288_v22, %s3524_s3 }
0x347e   :  { %v2233_v7 = vpop.permute.xlu0 %2232 }
0x347f   :  { %2235 = vst.msk [vmem:[#allocation2 + $0xc] sm:$0xf] %vm323_vm4, %v2233_v7 }
0x3486   :  { %v2237_v23 = vld [vmem:[#allocation2 + $0xc] sm:$0xf]  ;;  %v2291_v31 = vpop.permute.xlu1 %2290 }
0x3487   :  { %3109 = vmatmul.mubr.msk.bf16.vlgmr.msra.gmra.mrb[44].mxu1 %vm276_vm2, %v2237_v23 }
0x3488   :  { %3121 = vmatpush3.bf16.msra.mxu1 %v4038_v45  ;;  %3124 = vmatprep.mubr.msk.bf16.mxu1 %vm3526_vm3, %v3523_v4 }
0x3489   :  { %3122 = vmatprep.subr.bf16.mxu1 %v3523_v4 }
0x348c   :  { %3123 = vmatpush3.bf16.msra.mxu1 %v4041_v48 }
0x348d   :  { %3136 = vmatprep.subr.bf16.mxu1 %v3523_v4 }
0x355a   :  { %v2275_v27 = vpop.f32.mrb[44].mxu1 }
0x355b   :  { %v2282_v28 = vadd.f32 %v2281_v26, %v2275_v27  ;;  %v3110_v25 = vpop.f32.mrb[45].mxu1 }
0x355c   :  { %v2278_v29 = vpop.f32.mrb[46].mxu1 }
0x355d   :  { %3304 = vtanh.f32 %v2282_v28  ;;  %v3111_v30 = vpop.f32.mrb[47].mxu1  ;;  %v2283_v34 = vmul.f32 0.5, %v2282_v28 }
0x355f   :  { %3306 = vtanh.f32 %v2283_v34 }
0x3567   :  { %v3305_v33 = vpop.eup %3304 }
0x3568   :  { %2295 = vrot.lane.b32.xlu0 %v3305_v33, %s3524_s3 }
0x3569   :  { %v3307_v35 = vpop.eup %3306 }
0x356a   :  { %v2285_v36 = vadd.f32 1.0, %v3307_v35 }
0x356c   :  { %v2286_v37 = vmul.f32 0.5, %v2285_v36 }
0x356e   :  { %v2293_v40 = vmul.f32 %v2291_v31, %v2286_v37  ;;  %v2542_v31 = vunpack.c.h.bf16 %v2410_v15 }
0x35da   :  { %v2296_v38 = vpop.permute.xlu0 %2295 }
0x35db   :  { %v2298_v39 = vmul.f32 %v2296_v38, %v2286_v37 }
0x35dd   :  { %2300 = vrot.lane.b32.xlu0 %v2298_v39, %s3524_s3 }
0x364f   :  { %v2301_v41 = vpop.permute.xlu0 %2300 }
0x3650   :  { %v2303_v42 = vadd.f32 %v2301_v41, %v2293_v40 }
0x3652   :  { %3308 = vtanh.f32 %v2303_v42 }
0x365c   :  { %v3309_v6 = vpop.eup %3308 }
0x365d   :  { %2306 = vrot.lane.b32.xlu1 %v3309_v6, %s3524_s3 }
0x3661   :  { %2311 = vrot.lane.b32.xlu1 %v2303_v42, %s3525_s13 }
0x36cf   :  { %v2307_v43 = vpop.permute.xlu1 %2306 }
0x36d0   :  { %v2309_v32 = vmul.f32 %v2307_v43, %v2286_v37 }
0x36d2   :  { %v2778_v44 = vpack.c.bf16 %v2309_v32, %v2309_v32 }
0x36d3   :  { %v2312_v49 = vpop.permute.xlu1 %2311 }
0x36d4   :  { %2314 = vst.msk [vmem:[#allocation4] sm:$0xff] %vm276_vm2, %v2312_v49  ;;  %2319 = vrot.lane.b32.xlu0 %v2778_v44, %s3516_s15 }
0x36db   :  { %v2375_v46 = vld [vmem:[#allocation4] sm:$0xff] }
0x36dc   :  { %2377 = vrot.lane.b32.xlu1 %v2375_v46, %s3524_s3 }
0x3746   :  { %v2320_v50 = vpop.permute.xlu0 %2319 }
0x3747   :  { %2322 = vst.msk [vmem:[#allocation2 + $0x10] sm:$0xf] %vm323_vm4, %v2320_v50 }
0x374e   :  { %v2324_v51 = vld [vmem:[#allocation2 + $0x10] sm:$0xf] }
0x374f   :  { %3117 = vmatmul.mubr.msk.bf16.vlgmr.msra.gmra.mrb[48].mxu0 %vm276_vm2, %v2324_v51 }
0x3750   :  { %3129 = vmatpush3.bf16.msra.mxu0 %v4038_v45  ;;  %3132 = vmatprep.mubr.msk.bf16.mxu0 %vm3526_vm3, %v3523_v4 }
0x3751   :  { %3130 = vmatprep.subr.bf16.mxu0 %v3523_v4 }
0x3754   :  { %3131 = vmatpush3.bf16.msra.mxu0 %v4041_v48  ;;  %v2378_v48 = vpop.permute.xlu1 %2377 }
0x3822   :  { %v2362_v53 = vpop.f32.mrb[48].mxu0 }
0x3823   :  { %v2369_v54 = vadd.f32 %v2368_v52, %v2362_v53  ;;  %v3118_v55 = vpop.f32.mrb[49].mxu0 }
0x3824   :  { %v2365_v56 = vpop.f32.mrb[50].mxu0 }
0x3825   :  { %3310 = vtanh.f32 %v2369_v54  ;;  %v3119_v47 = vpop.f32.mrb[51].mxu0  ;;  %v2370_v58 = vmul.f32 0.5, %v2369_v54 }
0x3827   :  { %3312 = vtanh.f32 %v2370_v58  ;;  %v3183_v58 = vld [vmem:[%s4193_s10 + $0x8] sm:$0xff]  }
0x382f   :  { %v3311_v57 = vpop.eup %3310 }
0x3830   :  { %2382 = vrot.lane.b32.xlu0 %v3311_v57, %s3524_s3  ;;  %v3182_v57 = vld [vmem:[%s4193_s10] sm:$0xff]   ;;  %s3527_s10 = smov [#allocation17]  }
0x3831   :  { %v3313_v45 = vpop.eup %3312  ;;  %s2659_s24 = sshll.u32 %s3527_s10, 4  ;;  %s2660_s24 = int_to_ptr.vmem [resolvable:$true] %s2659_s24 }
0x3832   :  { %v2372_v59 = vadd.f32 1.0, %v3313_v45  ;;  %p3487_p1 = scmp.lt.s32.totalorder %s2660_s24, %s2660_s24 }
0x3834   :  { %v2373_v60 = vmul.f32 0.5, %v2372_v59 }
0x3836   :  { %v2380_v63 = vmul.f32 %v2378_v48, %v2373_v60 }
0x38a2   :  { %v2383_v61 = vpop.permute.xlu0 %2382 }
0x38a3   :  { %v2385_v62 = vmul.f32 %v2383_v61, %v2373_v60 }
0x38a5   :  { %2387 = vrot.lane.b32.xlu0 %v2385_v62, %s3524_s3 }
0x3917   :  { %v2388_v0 = vpop.permute.xlu0 %2387 }
0x3918   :  { %v2390_v1 = vadd.f32 %v2388_v0, %v2380_v63  ;;  %v2754_v63 = vld [vmem:[%s4194_s11] ss:$0 sm:$0xff] }
0x391a   :  { %3314 = vtanh.f32 %v2390_v1 }
0x3924   :  { %v3315_v2 = vpop.eup %3314 }
0x3925   :  { %2393 = vrot.lane.b32.xlu1 %v3315_v2, %s3524_s3 }
0x3929   :  { %2398 = vrot.lane.b32.xlu1 %v2390_v1, %s3525_s13 }
0x3997   :  { %v2394_v8 = vpop.permute.xlu1 %2393 }
0x3998   :  { %v2396_v9 = vmul.f32 %v2394_v8, %v2373_v60 }
0x399a   :  { %v2779_v10 = vpack.c.bf16 %v2396_v9, %v2396_v9 }
0x399b   :  { %v2399_v11 = vpop.permute.xlu1 %2398 }
0x399c   :  { %2401 = vst.msk [vmem:[#allocation4] sm:$0xff] %vm276_vm2, %v2399_v11  ;;  %2406 = vrot.lane.b32.xlu0 %v2779_v10, %s3516_s15 }
0x39a3   :  { %v2462_v12 = vld [vmem:[#allocation4] sm:$0xff] }
0x39a4   :  { %2464 = vrot.lane.b32.xlu1 %v2462_v12, %s3524_s3 }
0x3a0e   :  { %v2407_v13 = vpop.permute.xlu0 %2406 }
0x3a0f   :  { %2409 = vst.msk [vmem:[#allocation2 + $0x14] sm:$0xf] %vm323_vm4, %v2407_v13 }
0x3a16   :  { %v2411_v14 = vld [vmem:[#allocation2 + $0x14] sm:$0xf]  ;;  %v2465_v27 = vpop.permute.xlu1 %2464 }
0x3a17   :  { %3125 = vmatmul.mubr.msk.bf16.vlgmr.msra.gmra.mrb[48].mxu1 %vm276_vm2, %v2411_v14 }
0x3a18   :  { %3140 = vmatprep.mubr.msk.bf16.mxu1 %vm3526_vm3, %v3523_v4  ;;  %3137 = vmatpush3.bf16.msra.mxu1 %v3182_v57 }
0x3a19   :  { %3138 = vmatprep.subr.bf16.mxu1 %v3523_v4 }
0x3a1c   :  { %3139 = vmatpush3.bf16.msra.mxu1 %v3183_v58 }
0x3aea   :  { %v2449_v5 = vpop.f32.mrb[48].mxu1 }
0x3aeb   :  { %v2456_v17 = vadd.f32 %v2455_v16, %v2449_v5  ;;  %v3126_v3 = vpop.f32.mrb[49].mxu1 }
0x3aec   :  { %v2452_v18 = vpop.f32.mrb[50].mxu1 }
0x3aed   :  { %3316 = vtanh.f32 %v2456_v17  ;;  %v3127_v19 = vpop.f32.mrb[51].mxu1  ;;  %v2457_v21 = vmul.f32 0.5, %v2456_v17 }
0x3aef   :  { %3318 = vtanh.f32 %v2457_v21 }
0x3af7   :  { %v3317_v20 = vpop.eup %3316 }
0x3af8   :  { %2469 = vrot.lane.b32.xlu0 %v3317_v20, %s3524_s3 }
0x3af9   :  { %v3319_v22 = vpop.eup %3318 }
0x3afa   :  { %v2459_v7 = vadd.f32 1.0, %v3319_v22 }
0x3afc   :  { %v2460_v23 = vmul.f32 0.5, %v2459_v7 }
0x3afe   :  { %v2467_v28 = vmul.f32 %v2465_v27, %v2460_v23 }
0x3b6a   :  { %v2470_v24 = vpop.permute.xlu0 %2469 }
0x3b6b   :  { %v2472_v26 = vmul.f32 %v2470_v24, %v2460_v23 }
0x3b6d   :  { %2474 = vrot.lane.b32.xlu0 %v2472_v26, %s3524_s3 }
0x3bdf   :  { %v2475_v25 = vpop.permute.xlu0 %2474 }
0x3be0   :  { %v2477_v29 = vadd.f32 %v2475_v25, %v2467_v28 }
0x3be2   :  { %3320 = vtanh.f32 %v2477_v29 }
0x3bec   :  { %v3321_v30 = vpop.eup %3320 }
0x3bed   :  { %2480 = vrot.lane.b32.xlu1 %v3321_v30, %s3524_s3 }
0x3bf1   :  { %2485 = vrot.lane.b32.xlu1 %v2477_v29, %s3525_s13 }
0x3c5f   :  { %v2481_v33 = vpop.permute.xlu1 %2480 }
0x3c60   :  { %v2483_v34 = vmul.f32 %v2481_v33, %v2460_v23 }
0x3c62   :  { %v2780_v35 = vpack.c.bf16 %v2483_v34, %v2483_v34 }
0x3c63   :  { %v2486_v36 = vpop.permute.xlu1 %2485 }
0x3c64   :  { %2488 = vst.msk [vmem:[#allocation4] sm:$0xff] %vm276_vm2, %v2486_v36  ;;  %2493 = vrot.lane.b32.xlu0 %v2780_v35, %s3516_s15 }
0x3c6b   :  { %v2549_v37 = vld [vmem:[#allocation4] sm:$0xff] }
0x3c6c   :  { %2551 = vrot.lane.b32.xlu1 %v2549_v37, %s3524_s3 }
0x3cd6   :  { %v2494_v38 = vpop.permute.xlu0 %2493 }
0x3cd7   :  { %2496 = vst.msk [vmem:[#allocation2 + $0x18] sm:$0xf] %vm323_vm4, %v2494_v38 }
0x3cde   :  { %v2498_v39 = vld [vmem:[#allocation2 + $0x18] sm:$0xf]  ;;  %v2552_v53 = vpop.permute.xlu1 %2551 }
0x3cdf   :  { %3133 = vmatmul.mubr.msk.bf16.vlgmr.msra.gmra.mrb[52].mxu0 %vm276_vm2, %v2498_v39 }
0x3db2   :  { %v2536_v40 = vpop.f32.mrb[52].mxu0 }
0x3db3   :  { %v2543_v41 = vadd.f32 %v2542_v31, %v2536_v40  ;;  %v3134_v42 = vpop.f32.mrb[53].mxu0 }
0x3db4   :  { %v2539_v6 = vpop.f32.mrb[54].mxu0 }
0x3db5   :  { %3322 = vtanh.f32 %v2543_v41  ;;  %v3135_v43 = vpop.f32.mrb[55].mxu0  ;;  %v2544_v44 = vmul.f32 0.5, %v2543_v41 }
0x3db7   :  { %3324 = vtanh.f32 %v2544_v44 }
0x3dbf   :  { %v3323_v32 = vpop.eup %3322 }
0x3dc0   :  { %2556 = vrot.lane.b32.xlu0 %v3323_v32, %s3524_s3 }
0x3dc1   :  { %v3325_v49 = vpop.eup %3324 }
0x3dc2   :  { %v2546_v46 = vadd.f32 1.0, %v3325_v49 }
0x3dc4   :  { %v2547_v50 = vmul.f32 0.5, %v2546_v46 }
0x3dc6   :  { %v2554_v54 = vmul.f32 %v2552_v53, %v2547_v50 }
0x3e32   :  { %v2557_v51 = vpop.permute.xlu0 %2556 }
0x3e33   :  { %v2559_v52 = vmul.f32 %v2557_v51, %v2547_v50 }
0x3e35   :  { %2561 = vrot.lane.b32.xlu0 %v2559_v52, %s3524_s3 }
0x3ea7   :  { %v2562_v55 = vpop.permute.xlu0 %2561 }
0x3ea8   :  { %v2564_v56 = vadd.f32 %v2562_v55, %v2554_v54 }
0x3eaa   :  { %3326 = vtanh.f32 %v2564_v56 }
0x3eb4   :  { %v3327_v47 = vpop.eup %3326 }
0x3eb5   :  { %2567 = vrot.lane.b32.xlu1 %v3327_v47, %s3524_s3 }
0x3eb9   :  { %2572 = vrot.lane.b32.xlu1 %v2564_v56, %s3525_s13 }
0x3f27   :  { %v2568_v45 = vpop.permute.xlu1 %2567 }
0x3f28   :  { %v2570_v59 = vmul.f32 %v2568_v45, %v2547_v50 }
0x3f2a   :  { %v2781_v60 = vpack.c.bf16 %v2570_v59, %v2570_v59 }
0x3f2b   :  { %v2573_v61 = vpop.permute.xlu1 %2572 }
0x3f2c   :  { %2575 = vst.msk [vmem:[#allocation4] sm:$0xff] %vm276_vm2, %v2573_v61  ;;  %2580 = vrot.lane.b32.xlu0 %v2781_v60, %s3516_s15  ;;  %s3482_s15 = scalar_lea.vmem %s2660_s24, 128 }
0x3f2d   :  { %p3483_p0 = scmp.ne.s32.totalorder %s2660_s24, %s3482_s15  ;;  %p3488_p2 = scmp.lt.s32.totalorder %s3482_s15, %s3482_s15 }
0x3f2f   :  { %p3489_p3 = por %p3488_p2, %p3487_p1 }
0x3f31   :  { %p3490_p4 = pnand %p3489_p3, %p3483_p0 }
0x3f9e   :  { %v2581_v62 = vpop.permute.xlu0 %2580 }
0x3f9f   :  { %2583 = vst.msk [vmem:[#allocation2 + $0x1c] sm:$0xf] %vm323_vm4, %v2581_v62 }
0x3fa6   :  { %v2584_v48 = vld [vmem:[#allocation2 + $0x1c] sm:$0xf] }
0x3fa7   :  { %3141 = vmatmul.mubr.msk.bf16.vlgmr.msra.gmra.mrb[52].mxu1 %vm276_vm2, %v2584_v48 }
0x407a   :  { %v2645_v4 = vpop.f32.mrb[52].mxu1 }
0x407b   :  { %v2646_v0 = vadd.f32 %v2754_v63, %v2645_v4  ;;  %v3142_v1 = vpop.f32.mrb[53].mxu1 }
0x407c   :  { %v2648_v2 = vpop.f32.mrb[54].mxu1 }
0x407d   :  { %v2651_v8 = vmax.f32 %v2646_v0, 0.0  ;;  %v3143_v9 = vpop.f32.mrb[55].mxu1 }
0x407f   :  { %2652 = vst [vmem:[#allocation17] sm:$0xff] %v2651_v8 }
0x4080   :  { %3493 = shalt.err (!%p3490_p4)
}
0x4081   :  { %s3494_s11 = scalar_lea.hbm %s4195_s12, 128 }
0x4082   :  { %p3495_p5 = scmp.ne.s32.totalorder %s4195_s12, %s3494_s11  ;;  %p3498_p6 = scmp.lt.u32.totalorder %s3494_s11, %s4195_s12 }
0x4084   :  { %p3500_p7 = pnand %p3498_p6, %p3495_p5 }
0x4086   :  { %3503 = shalt.err (!%p3500_p7)
}
0x4087   :  { %2662 = dma.vmem_to_hbm [thread:$0]  %s2660_s24, 128, %s4195_s12, [#allocation7]  }
0x4088   :  { %3512 = dma.done.wait [#allocation7], 128  }
0x4089   :  { %3513 = vsyncadd [#allocation7], 4294967168 }
0x408a   :  { %2666 = vsyncpa [#allocation6], 1 }
0x408b   :  { %2667 = vsyncpa [#allocation9], 1 }
0x408c   :  { %2668 = vsyncpa [#allocation12], 1 }
0x408d   :  { %2669 = vsyncpa [#allocation15], 1 }
0x408e   :  { %2670 = vsyncpa [#allocation7], 1 }

// kernel: tpu_custom_call.1
= control target key start
LH: loop header
LB: loop body
LE: loop exit
PB: predicated region body
PF: predicated region fallthrough
CT: control target
= control target key end

     0   :  { %17 = vsyncpa [#allocation6], 0  ;;  %s4183_s0 = inlined_call_operand.hbm [shape: bf16[8,8,12], index: 0, kind: input, shape index: {}]   ;;  %s4184_s1 = inlined_call_operand.hbm [shape: bf16[12,128], index: 1, kind: input, shape index: {}]   ;;  %s4185_s2 = inlined_call_operand.hbm [shape: bf16[32,128], index: 2, kind: input, shape index: {}]   ;;  %s4186_s3 = inlined_call_operand.vmem [shape: f32[1,128], index: 3, kind: input, shape index: {}]   ;;  %s4187_s4 = inlined_call_operand.hbm [shape: bf16[32,128], index: 4, kind: input, shape index: {}]   ;;  %s4188_s5 = inlined_call_operand.vmem [shape: bf16[32,128], index: 5, kind: input, shape index: {}]   ;;  %s4189_s6 = inlined_call_operand.vmem [shape: f32[1,128], index: 6, kind: input, shape index: {}]   ;;  %s4190_s7 = inlined_call_operand.hbm [shape: bf16[32,128], index: 7, kind: input, shape index: {}]   ;;  %s4191_s8 = inlined_call_operand.hbm [shape: bf16[32,128], index: 8, kind: input, shape index: {}]   ;;  %s4192_s9 = inlined_call_operand.hbm [shape: f32[1,128], index: 9, kind: input, shape index: {}]   ;;  %s4193_s10 = inlined_call_operand.vmem [shape: bf16[32,128], index: 10, kind: input, shape index: {}]   ;;  %s4194_s11 = inlined_call_operand.vmem [shape: f32[1,128], index: 11, kind: input, shape index: {}]   ;;  %s4195_s12 = inlined_call_operand.hbm [shape: f32[8,128], index: 12, kind: output, shape index: {}]  }
   0x1   :  { %18 = vsyncpa [#allocation9], 0 }
   0x2   :  { %19 = vsyncpa [#allocation12], 0 }
   0x3   :  { %20 = vsyncpa [#allocation15], 0 }
   0x4   :  { %21 = vsyncpa [#allocation7], 0  ;;  %s3514_s21 = smov [#allocation8]   ;;  %s3515_s23 = smov [#allocation11]  }
   0x5   :  { %s39_s22 = sshll.u32 %s3514_s21, 4  ;;  %s65_s24 = sshll.u32 %s3515_s23, 4  ;;  %s40_s22 = int_to_ptr.vmem [resolvable:$true] %s39_s22  ;;  %s3593_s24 = int_to_ptr.vmem [resolvable:$true] %s65_s24 }
   0x6   :  { %s3328_s27 = scalar_lea.hbm %s4184_s1, 128 }
   0x7   :  { %p3329_p0 = scmp.ne.s32.totalorder %s4184_s1, %s3328_s27  ;;  %p3332_p1 = scmp.lt.u32.totalorder %s3328_s27, %s4184_s1 }
   0x9   :  { %p3334_p2 = pnand %p3332_p1, %p3329_p0 }
   0xb   :  { %3337 = shalt.err (!%p3334_p2)
}
   0xc   :  { %s3338_s14 = scalar_lea.vmem %s40_s22, 128  ;;  %p3343_p4 = scmp.lt.s32.totalorder %s40_s22, %s40_s22 }
   0xd   :  { %p3339_p3 = scmp.ne.s32.totalorder %s40_s22, %s3338_s14  ;;  %p3344_p5 = scmp.lt.s32.totalorder %s3338_s14, %s3338_s14 }
   0xf   :  { %p3345_p6 = por %p3344_p5, %p3343_p4 }
  0x11   :  { %p3346_p7 = pnand %p3345_p6, %p3339_p3 }
  0x13   :  { %3349 = shalt.err (!%p3346_p7)
}
  0x14   :  { %s3516_s15 = smov 64   ;;  %s3517_s16 = smov 4  }
  0x15   :  { %45 = dma.hbm_to_vmem [thread:$0]  %s4184_s1, 128, %s40_s22, [#allocation9], %s3516_s15, %s3516_s15, %s3517_s16  }
  0x16   :  { %s3350_s21 = scalar_lea.hbm %s4187_s4, 256 }
  0x17   :  { %p3351_p8 = scmp.ne.s32.totalorder %s4187_s4, %s3350_s21  ;;  %p3354_p9 = scmp.lt.u32.totalorder %s3350_s21, %s4187_s4 }
  0x19   :  { %p3356_p10 = pnand %p3354_p9, %p3351_p8 }
  0x1b   :  { %3359 = shalt.err (!%p3356_p10)
}
  0x1c   :  { %s3360_s28 = scalar_lea.vmem %s3593_s24, 256  ;;  %p3365_p12 = scmp.lt.s32.totalorder %s3593_s24, %s3593_s24 }
  0x1d   :  { %p3361_p11 = scmp.ne.s32.totalorder %s3593_s24, %s3360_s28  ;;  %p3366_p13 = scmp.lt.s32.totalorder %s3360_s28, %s3360_s28 }
  0x1f   :  { %p3367_p0 = por %p3366_p13, %p3365_p12 }
  0x21   :  { %p3368_p1 = pnand %p3367_p0, %p3361_p11 }
  0x23   :  { %3371 = shalt.err (!%p3368_p1)
}
  0x24   :  { %71 = dma.hbm_to_vmem [thread:$0]  %s4187_s4, 256, %s3593_s24, [#allocation12], %s3516_s15, %s3516_s15, %s3517_s16  }
  0x25   :  { %s3518_s29 = smov [#allocation14]   ;;  %s3519_s13 = smov [#allocation5]  }
  0x26   :  { %s93_s30 = sshll.u32 %s3518_s29, 4  ;;  %s27_s14 = sshll.u32 %s3519_s13, 4  ;;  %s94_s30 = int_to_ptr.vmem [resolvable:$true] %s93_s30  ;;  %s3630_s14 = int_to_ptr.vmem [resolvable:$true] %s27_s14 }
  0x27   :  { %s3372_s19 = scalar_lea.hbm %s4191_s8, 256 }
  0x28   :  { %p3373_p2 = scmp.ne.s32.totalorder %s4191_s8, %s3372_s19  ;;  %p3376_p3 = scmp.lt.u32.totalorder %s3372_s19, %s4191_s8 }
  0x2a   :  { %p3378_p4 = pnand %p3376_p3, %p3373_p2 }
  0x2c   :  { %3381 = shalt.err (!%p3378_p4)
}
  0x2d   :  { %s3382_s4 = scalar_lea.vmem %s94_s30, 256  ;;  %p3387_p6 = scmp.lt.s32.totalorder %s94_s30, %s94_s30 }
  0x2e   :  { %p3383_p5 = scmp.ne.s32.totalorder %s94_s30, %s3382_s4  ;;  %p3388_p7 = scmp.lt.s32.totalorder %s3382_s4, %s3382_s4 }
  0x30   :  { %p3389_p8 = por %p3388_p7, %p3387_p6 }
  0x32   :  { %p3390_p9 = pnand %p3389_p8, %p3383_p5 }
  0x34   :  { %3393 = shalt.err (!%p3390_p9)
}
  0x35   :  { %99 = dma.hbm_to_vmem [thread:$0]  %s4191_s8, 256, %s94_s30, [#allocation15], %s3516_s15, %s3516_s15, %s3517_s16  }
  0x36   :  { %s3394_s1 = scalar_lea.hbm %s4183_s0, 512 }
  0x37   :  { %p3395_p10 = scmp.ne.s32.totalorder %s4183_s0, %s3394_s1  ;;  %p3398_p11 = scmp.lt.u32.totalorder %s3394_s1, %s4183_s0 }
  0x39   :  { %p3400_p12 = pnand %p3398_p11, %p3395_p10 }
  0x3b   :  { %3403 = shalt.err (!%p3400_p12)
}
  0x3c   :  { %s3404_s18 = scalar_lea.vmem %s3630_s14, 512  ;;  %p3409_p0 = scmp.lt.s32.totalorder %s3630_s14, %s3630_s14 }
  0x3d   :  { %p3405_p13 = scmp.ne.s32.totalorder %s3630_s14, %s3404_s18  ;;  %p3410_p1 = scmp.lt.s32.totalorder %s3404_s18, %s3404_s18 }
  0x3f   :  { %p3411_p2 = por %p3410_p1, %p3409_p0 }
  0x41   :  { %p3412_p3 = pnand %p3411_p2, %p3405_p13 }
  0x43   :  { %3415 = shalt.err (!%p3412_p3)
}
  0x44   :  { %33 = dma.hbm_to_vmem [thread:$0]  %s4183_s0, 512, %s3630_s14, [#allocation6], %s3516_s15, %s3516_s15, %s3517_s16  }
  0x45   :  { %s3520_s19 = smov [#allocation10]   ;;  %s3521_s21 = smov [#allocation13]  }
  0x46   :  { %s51_s20 = sshll.u32 %s3520_s19, 4  ;;  %s81_s23 = sshll.u32 %s3521_s21, 4  ;;  %s52_s20 = int_to_ptr.vmem [resolvable:$true] %s51_s20  ;;  %s3667_s23 = int_to_ptr.vmem [resolvable:$true] %s81_s23 }
  0x47   :  { %s3416_s24 = scalar_lea.hbm %s4185_s2, 256 }
  0x48   :  { %p3417_p4 = scmp.ne.s32.totalorder %s4185_s2, %s3416_s24  ;;  %p3420_p5 = scmp.lt.u32.totalorder %s3416_s24, %s4185_s2 }
  0x4a   :  { %p3422_p6 = pnand %p3420_p5, %p3417_p4 }
  0x4c   :  { %3425 = shalt.err (!%p3422_p6)
}
  0x4d   :  { %s3426_s0 = scalar_lea.vmem %s52_s20, 256  ;;  %p3431_p8 = scmp.lt.s32.totalorder %s52_s20, %s52_s20 }
  0x4e   :  { %p3427_p7 = scmp.ne.s32.totalorder %s52_s20, %s3426_s0  ;;  %p3432_p9 = scmp.lt.s32.totalorder %s3426_s0, %s3426_s0 }
  0x50   :  { %p3433_p10 = por %p3432_p9, %p3431_p8 }
  0x52   :  { %p3434_p11 = pnand %p3433_p10, %p3427_p7 }
  0x54   :  { %3437 = shalt.err (!%p3434_p11)
}
  0x55   :  { %57 = dma.hbm_to_vmem [thread:$0]  %s4185_s2, 256, %s52_s20, [#allocation9], %s3516_s15, %s3516_s15, %s3517_s16  }
  0x56   :  { %s3438_s17 = scalar_lea.hbm %s4190_s7, 256 }
  0x57   :  { %p3439_p12 = scmp.ne.s32.totalorder %s4190_s7, %s3438_s17  ;;  %p3442_p13 = scmp.lt.u32.totalorder %s3438_s17, %s4190_s7 }
  0x59   :  { %p3444_p0 = pnand %p3442_p13, %p3439_p12 }
  0x5b   :  { %3447 = shalt.err (!%p3444_p0)
}
  0x5c   :  { %s3448_s21 = scalar_lea.vmem %s3667_s23, 256  ;;  %p3453_p2 = scmp.lt.s32.totalorder %s3667_s23, %s3667_s23 }
  0x5d   :  { %p3449_p1 = scmp.ne.s32.totalorder %s3667_s23, %s3448_s21  ;;  %p3454_p3 = scmp.lt.s32.totalorder %s3448_s21, %s3448_s21 }
  0x5f   :  { %p3455_p4 = por %p3454_p3, %p3453_p2 }
  0x61   :  { %p3456_p5 = pnand %p3455_p4, %p3449_p1 }
  0x63   :  { %3459 = shalt.err (!%p3456_p5)
}
  0x64   :  { %87 = dma.hbm_to_vmem [thread:$0]  %s4190_s7, 256, %s3667_s23, [#allocation12], %s3516_s15, %s3516_s15, %s3517_s16  }
  0x65   :  { %s3522_s25 = smov [#allocation16]   ;;  %s3460_s27 = scalar_lea.hbm %s4192_s9, 16 }
  0x66   :  { %s106_s4 = sshll.u32 %s3522_s25, 4  ;;  %p3461_p6 = scmp.ne.s32.totalorder %s4192_s9, %s3460_s27  ;;  %s107_s4 = int_to_ptr.vmem [resolvable:$true] %s106_s4 }
  0x67   :  { %p3464_p7 = scmp.lt.u32.totalorder %s3460_s27, %s4192_s9 }
  0x69   :  { %p3466_p8 = pnand %p3464_p7, %p3461_p6 }
  0x6b   :  { %3469 = shalt.err (!%p3466_p8)
}
  0x6c   :  { %s3470_s22 = scalar_lea.vmem %s107_s4, 16  ;;  %s3474_s7 = scalar_lea.vmem %s107_s4, 32 }
  0x6d   :  { %p3471_p9 = scmp.ne.s32.totalorder %s107_s4, %s3470_s22  ;;  %p3475_p10 = scmp.lt.s32.totalorder %s107_s4, %s107_s4 }
  0x6e   :  { %p3476_p11 = scmp.lt.s32.totalorder %s3474_s7, %s3470_s22 }
  0x70   :  { %p3477_p12 = por %p3476_p11, %p3475_p10 }
  0x72   :  { %p3478_p13 = pnand %p3477_p12, %p3471_p9 }
  0x74   :  { %3481 = shalt.err (!%p3478_p13)
}
  0x75   :  { %109 = dma.hbm_to_vmem [thread:$0]  %s4192_s9, 16, %s107_s4, [#allocation15]  }
  0x76   :  { %3504 = dma.done.wait [#allocation6], 512  }
  0x77   :  { %3505 = vsyncadd [#allocation6], 4294966784 }
  0x78   :  { %3506 = dma.done.wait [#allocation9], 384  }
  0x79   :  { %3507 = vsyncadd [#allocation9], 4294966912 }
  0x7a   :  { %3508 = dma.done.wait [#allocation12], 512  }
  0x7b   :  { %3509 = vsyncadd [#allocation12], 4294966784 }
  0x7c   :  { %3510 = dma.done.wait [#allocation15], 272  }
  0x7d   :  { %3511 = vsyncadd [#allocation15], 4294967024  ;;  %vm191_vm0 = vcmask 1045504   ;;  %vm178_vm1 = vcmask 97280   ;;  %v3159_v0 = vld [vmem:[#allocation8] sm:$0x3f]  }
  0x7e   :  { %v3160_v1 = vld [vmem:[#allocation5] sm:$0xff]   ;;  %3144 = vmatprep.subr.msk.bf16.mxu0 %vm191_vm0, %v3159_v0  ;;  %v193_v2 = vsel %vm191_vm0, %v3159_v0, 0  ;;  %v3161_v3 = vld [vmem:[#allocation5 + $0x8] sm:$0xff]   ;;  %vm276_vm2 = vcmask 261120   ;;  %v3523_v4 = vmov 0.0   ;;  %s3525_s13 = smov 96  }
  0x7f   :  { %2935 = vmatpush3.bf16.msra.mxu0 %v193_v2  ;;  %2936 = vmatprep.mubr.msk.bf16.mxu0 %vm178_vm1, %v3160_v1  ;;  %277 = vst.msk [vmem:[#allocation4] sm:$0xff] %vm276_vm2, %v3523_v4  ;;  %v3725_v6 = vld [vmem:[%s4186_s3] ss:$0 sm:$0xff]  ;;  %s3524_s3 = smov 32   ;;  %v3736_v31 = vld [vmem:[#allocation10] sm:$0xff]   ;;  %v3739_v32 = vld [vmem:[#allocation10 + $0x8] sm:$0xff]  }
  0x80   :  { %2944 = vmatprep.subr.bf16.mxu1 %v3523_v4  ;;  %2960 = vmatprep.subr.bf16.mxu0 %v3523_v4  ;;  %vm3526_vm3 = vmmov 0   ;;  %vm323_vm4 = vcmask 257024  }
  0x81   :  { %2945 = vmatpush3.bf16.msra.mxu1 %v3736_v31  ;;  %2948 = vmatprep.mubr.msk.bf16.mxu1 %vm3526_vm3, %v3523_v4 }
  0x82   :  { %2937 = vmatmul.mubr.msk.bf16.vlgmr.msra.gmra.mrb[0].mxu0 %vm178_vm1, %v3161_v3  ;;  %2946 = vmatprep.subr.bf16.mxu1 %v3523_v4 }
  0x83   :  { %2961 = vmatpush3.bf16.msra.mxu0 %v3736_v31 }
  0x84   :  { %2962 = vmatprep.subr.bf16.mxu0 %v3523_v4 }
  0x85   :  { %2947 = vmatpush3.bf16.msra.mxu1 %v3739_v32 }
  0x86   :  { %v289_v19 = vld [vmem:[#allocation4] sm:$0xff]  ;;  %2952 = vmatprep.subr.bf16.mxu1 %v3523_v4 }
  0x87   :  { %2963 = vmatpush3.bf16.msra.mxu0 %v3739_v32 }
  0x88   :  { %2976 = vmatprep.subr.bf16.mxu0 %v3523_v4 }
 0x155   :  { %v2938_v5 = vpop.f32.mrb[0].mxu0 }
 0x156   :  { %v229_v7 = vpop.f32.mrb[1].mxu0  ;;  %v238_v9 = vadd.f32 %v2938_v5, %v3725_v6 }
 0x157   :  { %v2939_v8 = vpop.f32.mrb[2].mxu0  ;;  %v230_v12 = vadd.f32 %v3725_v6, %v229_v7 }
 0x158   :  { %v241_v10 = vadd.f32 %v2939_v8, %v3725_v6  ;;  %v232_v11 = vpop.f32.mrb[3].mxu0 }
 0x159   :  { %v233_v13 = vadd.f32 %v3725_v6, %v232_v11 }
 0x15a   :  { %v2790_v14 = vpack.c.bf16 %v241_v10, %v238_v9 }
 0x15b   :  { %v2785_v15 = vpack.c.bf16 %v233_v13, %v230_v12 }
 0x15c   :  { %2842 = vst [vmem:[#allocation3 + $0x8] sm:$0xff] %v2790_v14  }
 0x15d   :  { %2786 = vst [vmem:[#allocation3] sm:$0xff] %v2785_v15  }
 0x163   :  { %v3776_v1 = vld [vmem:[#allocation3 + $0x8] sm:$0xff]  }
 0x164   :  { %v282_v16 = vld [vmem:[#allocation3] sm:$0xff]   ;;  %v472_v2 = vunpack.c.l.bf16 %v3776_v1 }
 0x165   :  { %v283_v17 = vunpack.c.l.bf16 %v282_v16  ;;  %v383_v40 = vunpack.c.h.bf16 %v282_v16 }
 0x167   :  { %3184 = vtanh.f32 %v283_v17  ;;  %v284_v20 = vmul.f32 0.5, %v283_v17 }
 0x169   :  { %3186 = vtanh.f32 %v284_v20 }
 0x171   :  { %v3185_v18 = vpop.eup %3184 }
 0x172   :  { %296 = vrot.lane.b32.xlu0 %v3185_v18, %s3524_s3 }
 0x173   :  { %v3187_v21 = vpop.eup %3186 }
 0x174   :  { %v286_v22 = vadd.f32 1.0, %v3187_v21 }
 0x176   :  { %291 = vrot.lane.b32.xlu0 %v289_v19, %s3524_s3  ;;  %v287_v23 = vmul.f32 0.5, %v286_v22  ;;  %v3164_v22 = vld [vmem:[#allocation5 + $0x10] sm:$0xff]  }
 0x177   :  { %2940 = vmatprep.mubr.msk.bf16.mxu0 %vm178_vm1, %v3164_v22 }
 0x1e4   :  { %v297_v24 = vpop.permute.xlu0 %296 }
 0x1e5   :  { %v299_v25 = vmul.f32 %v297_v24, %v287_v23 }
 0x1e7   :  { %301 = vrot.lane.b32.xlu1 %v299_v25, %s3524_s3 }
 0x1e8   :  { %v292_v26 = vpop.permute.xlu0 %291 }
 0x1e9   :  { %v294_v27 = vmul.f32 %v292_v26, %v287_v23 }
 0x259   :  { %v302_v28 = vpop.permute.xlu1 %301 }
 0x25a   :  { %v304_v29 = vadd.f32 %v302_v28, %v294_v27 }
 0x25c   :  { %3188 = vtanh.f32 %v304_v29 }
 0x266   :  { %v3189_v30 = vpop.eup %3188 }
 0x267   :  { %307 = vrot.lane.b32.xlu1 %v3189_v30, %s3524_s3 }
 0x26b   :  { %312 = vrot.lane.b32.xlu1 %v304_v29, %s3525_s13 }
 0x2d9   :  { %v308_v33 = vpop.permute.xlu1 %307 }
 0x2da   :  { %v310_v34 = vmul.f32 %v308_v33, %v287_v23  ;;  %v3165_v23 = vld [vmem:[#allocation5 + $0x18] sm:$0xff]  }
 0x2db   :  { %2941 = vmatmul.mubr.msk.bf16.gmra.mrb[4].mxu0 %vm178_vm1, %v3165_v23 }
 0x2dc   :  { %v2758_v35 = vpack.c.bf16 %v310_v34, %v310_v34  ;;  %2964 = vmatprep.mubr.msk.bf16.mxu0 %vm3526_vm3, %v3523_v4 }
 0x2dd   :  { %v313_v36 = vpop.permute.xlu1 %312 }
 0x2de   :  { %315 = vst.msk [vmem:[#allocation4] sm:$0xff] %vm276_vm2, %v313_v36  ;;  %320 = vrot.lane.b32.xlu0 %v2758_v35, %s3516_s15 }
 0x2e5   :  { %v390_v37 = vld [vmem:[#allocation4] sm:$0xff] }
 0x2e6   :  { %392 = vrot.lane.b32.xlu1 %v390_v37, %s3524_s3 }
 0x350   :  { %v321_v38 = vpop.permute.xlu0 %320 }
 0x351   :  { %324 = vst.msk [vmem:[#allocation2] sm:$0xf] %vm323_vm4, %v321_v38 }
 0x358   :  { %v327_v39 = vld [vmem:[#allocation2] sm:$0xf]  ;;  %v393_v53 = vpop.permute.xlu1 %392 }
 0x359   :  { %2949 = vmatmul.mubr.msk.bf16.vlgmr.msra.gmra.mrb[0].mxu1 %vm276_vm2, %v327_v39 }
 0x35a   :  { %2953 = vmatpush3.bf16.msra.mxu1 %v3736_v31  ;;  %2956 = vmatprep.mubr.msk.bf16.mxu1 %vm3526_vm3, %v3523_v4 }
 0x35b   :  { %2954 = vmatprep.subr.bf16.mxu1 %v3523_v4 }
 0x35e   :  { %2955 = vmatpush3.bf16.msra.mxu1 %v3739_v32 }
 0x35f   :  { %2968 = vmatprep.subr.bf16.mxu1 %v3523_v4 }
 0x3ae   :  { %v2942_v29 = vpop.f32.mrb[4].mxu0 }
 0x3af   :  { %v254_v30 = vadd.f32 %v2942_v29, %v3725_v6  ;;  %v245_v33 = vpop.f32.mrb[5].mxu0 }
 0x3b0   :  { %v246_v34 = vadd.f32 %v3725_v6, %v245_v33  ;;  %v2943_v35 = vpop.f32.mrb[6].mxu0 }
 0x3b1   :  { %v257_v36 = vadd.f32 %v2943_v35, %v3725_v6  ;;  %v248_v37 = vpop.f32.mrb[7].mxu0 }
 0x3b2   :  { %v249_v38 = vadd.f32 %v3725_v6, %v248_v37  ;;  %v561_v6 = vunpack.c.h.bf16 %v3776_v1 }
 0x3b3   :  { %v2800_v39 = vpack.c.bf16 %v257_v36, %v254_v30 }
 0x3b5   :  { %2844 = vst [vmem:[#allocation3 + $0x18] sm:$0xff] %v2800_v39  }
 0x42c   :  { %v377_v41 = vpop.f32.mrb[0].mxu1 }
 0x42d   :  { %v384_v42 = vadd.f32 %v383_v40, %v377_v41  ;;  %v2950_v43 = vpop.f32.mrb[1].mxu1  ;;  %v2795_v40 = vpack.c.bf16 %v249_v38, %v246_v34 }
 0x42e   :  { %v380_v44 = vpop.f32.mrb[2].mxu1 }
 0x42f   :  { %3190 = vtanh.f32 %v384_v42  ;;  %v2951_v45 = vpop.f32.mrb[3].mxu1  ;;  %v385_v47 = vmul.f32 0.5, %v384_v42  ;;  %2843 = vst [vmem:[#allocation3 + $0x10] sm:$0xff] %v2795_v40  }
 0x431   :  { %3192 = vtanh.f32 %v385_v47 }
 0x439   :  { %v3191_v46 = vpop.eup %3190 }
 0x43a   :  { %397 = vrot.lane.b32.xlu0 %v3191_v46, %s3524_s3 }
 0x43b   :  { %v3193_v48 = vpop.eup %3192 }
 0x43c   :  { %v387_v49 = vadd.f32 1.0, %v3193_v48 }
 0x43e   :  { %v388_v50 = vmul.f32 0.5, %v387_v49 }
 0x440   :  { %v395_v54 = vmul.f32 %v393_v53, %v388_v50 }
 0x4ac   :  { %v398_v51 = vpop.permute.xlu0 %397 }
 0x4ad   :  { %v400_v52 = vmul.f32 %v398_v51, %v388_v50 }
 0x4af   :  { %402 = vrot.lane.b32.xlu0 %v400_v52, %s3524_s3 }
 0x521   :  { %v403_v55 = vpop.permute.xlu0 %402 }
 0x522   :  { %v405_v56 = vadd.f32 %v403_v55, %v395_v54 }
 0x524   :  { %3194 = vtanh.f32 %v405_v56 }
 0x52e   :  { %v3195_v57 = vpop.eup %3194 }
 0x52f   :  { %408 = vrot.lane.b32.xlu1 %v3195_v57, %s3524_s3 }
 0x533   :  { %413 = vrot.lane.b32.xlu1 %v405_v56, %s3525_s13 }
 0x5a1   :  { %v409_v58 = vpop.permute.xlu1 %408 }
 0x5a2   :  { %v411_v59 = vmul.f32 %v409_v58, %v388_v50 }
 0x5a4   :  { %v2759_v60 = vpack.c.bf16 %v411_v59, %v411_v59 }
 0x5a5   :  { %v414_v61 = vpop.permute.xlu1 %413 }
 0x5a6   :  { %416 = vst.msk [vmem:[#allocation4] sm:$0xff] %vm276_vm2, %v414_v61  ;;  %421 = vrot.lane.b32.xlu0 %v2759_v60, %s3516_s15 }
 0x5ad   :  { %v479_v62 = vld [vmem:[#allocation4] sm:$0xff] }
 0x5ae   :  { %481 = vrot.lane.b32.xlu1 %v479_v62, %s3524_s3 }
 0x618   :  { %v422_v63 = vpop.permute.xlu0 %421 }
 0x619   :  { %425 = vst.msk [vmem:[#allocation2 + $0x4] sm:$0xf] %vm323_vm4, %v422_v63 }
 0x620   :  { %v428_v0 = vld [vmem:[#allocation2 + $0x4] sm:$0xf]  ;;  %v482_v17 = vpop.permute.xlu1 %481 }
 0x621   :  { %2957 = vmatmul.mubr.msk.bf16.vlgmr.msra.gmra.mrb[4].mxu1 %vm276_vm2, %v428_v0 }
 0x622   :  { %2969 = vmatpush3.bf16.msra.mxu1 %v3736_v31  ;;  %2972 = vmatprep.mubr.msk.bf16.mxu1 %vm3526_vm3, %v3523_v4 }
 0x623   :  { %2970 = vmatprep.subr.bf16.mxu1 %v3523_v4 }
 0x626   :  { %2971 = vmatpush3.bf16.msra.mxu1 %v3739_v32 }
 0x627   :  { %2984 = vmatprep.subr.bf16.mxu1 %v3523_v4 }
 0x6f4   :  { %v466_v3 = vpop.f32.mrb[4].mxu1 }
 0x6f5   :  { %v473_v5 = vadd.f32 %v472_v2, %v466_v3  ;;  %v2958_v7 = vpop.f32.mrb[5].mxu1  ;;  %v605_v3 = vld [vmem:[#allocation3 + $0x10] sm:$0xff]  }
 0x6f6   :  { %v469_v8 = vpop.f32.mrb[6].mxu1  ;;  %v739_v33 = vunpack.c.h.bf16 %v605_v3 }
 0x6f7   :  { %3196 = vtanh.f32 %v473_v5  ;;  %v2959_v9 = vpop.f32.mrb[7].mxu1  ;;  %v474_v11 = vmul.f32 0.5, %v473_v5  ;;  %v650_v5 = vunpack.c.l.bf16 %v605_v3 }
 0x6f9   :  { %3198 = vtanh.f32 %v474_v11 }
 0x701   :  { %v3197_v10 = vpop.eup %3196 }
 0x702   :  { %486 = vrot.lane.b32.xlu0 %v3197_v10, %s3524_s3 }
 0x703   :  { %v3199_v12 = vpop.eup %3198 }
 0x704   :  { %v476_v13 = vadd.f32 1.0, %v3199_v12 }
 0x706   :  { %v477_v14 = vmul.f32 0.5, %v476_v13 }
 0x708   :  { %v484_v18 = vmul.f32 %v482_v17, %v477_v14 }
 0x774   :  { %v487_v15 = vpop.permute.xlu0 %486 }
 0x775   :  { %v489_v16 = vmul.f32 %v487_v15, %v477_v14 }
 0x777   :  { %491 = vrot.lane.b32.xlu0 %v489_v16, %s3524_s3 }
 0x7e9   :  { %v492_v19 = vpop.permute.xlu0 %491 }
 0x7ea   :  { %v494_v20 = vadd.f32 %v492_v19, %v484_v18 }
 0x7ec   :  { %3200 = vtanh.f32 %v494_v20 }
 0x7f6   :  { %v3201_v21 = vpop.eup %3200 }
 0x7f7   :  { %497 = vrot.lane.b32.xlu1 %v3201_v21, %s3524_s3 }
 0x7fb   :  { %502 = vrot.lane.b32.xlu1 %v494_v20, %s3525_s13 }
 0x869   :  { %v498_v24 = vpop.permute.xlu1 %497 }
 0x86a   :  { %v500_v25 = vmul.f32 %v498_v24, %v477_v14 }
 0x86c   :  { %v2760_v26 = vpack.c.bf16 %v500_v25, %v500_v25 }
 0x86d   :  { %v503_v27 = vpop.permute.xlu1 %502 }
 0x86e   :  { %505 = vst.msk [vmem:[#allocation4] sm:$0xff] %vm276_vm2, %v503_v27  ;;  %510 = vrot.lane.b32.xlu0 %v2760_v26, %s3516_s15 }
 0x875   :  { %v568_v28 = vld [vmem:[#allocation4] sm:$0xff] }
 0x876   :  { %570 = vrot.lane.b32.xlu1 %v568_v28, %s3524_s3 }
 0x8e0   :  { %v511_v41 = vpop.permute.xlu0 %510 }
 0x8e1   :  { %514 = vst.msk [vmem:[#allocation2 + $0x8] sm:$0xf] %vm323_vm4, %v511_v41 }
 0x8e8   :  { %v517_v42 = vld [vmem:[#allocation2 + $0x8] sm:$0xf]  ;;  %v571_v55 = vpop.permute.xlu1 %570 }
 0x8e9   :  { %2965 = vmatmul.mubr.msk.bf16.vlgmr.msra.gmra.mrb[8].mxu0 %vm276_vm2, %v517_v42 }
 0x8ea   :  { %2977 = vmatpush3.bf16.msra.mxu0 %v3736_v31  ;;  %2980 = vmatprep.mubr.msk.bf16.mxu0 %vm3526_vm3, %v3523_v4 }
 0x8eb   :  { %2978 = vmatprep.subr.bf16.mxu0 %v3523_v4 }
 0x8ee   :  { %2979 = vmatpush3.bf16.msra.mxu0 %v3739_v32 }
 0x8ef   :  { %2992 = vmatprep.subr.bf16.mxu0 %v3523_v4 }
 0x9bc   :  { %v555_v43 = vpop.f32.mrb[8].mxu0 }
 0x9bd   :  { %v562_v44 = vadd.f32 %v561_v6, %v555_v43  ;;  %v2966_v45 = vpop.f32.mrb[9].mxu0 }
 0x9be   :  { %v558_v46 = vpop.f32.mrb[10].mxu0 }
 0x9bf   :  { %3202 = vtanh.f32 %v562_v44  ;;  %v2967_v47 = vpop.f32.mrb[11].mxu0  ;;  %v563_v49 = vmul.f32 0.5, %v562_v44 }
 0x9c1   :  { %3204 = vtanh.f32 %v563_v49 }
 0x9c9   :  { %v3203_v48 = vpop.eup %3202 }
 0x9ca   :  { %575 = vrot.lane.b32.xlu0 %v3203_v48, %s3524_s3  ;;  %v3166_v48 = vld [vmem:[#allocation11] sm:$0xff]  }
 0x9cb   :  { %v3205_v50 = vpop.eup %3204 }
 0x9cc   :  { %v565_v51 = vadd.f32 1.0, %v3205_v50 }
 0x9ce   :  { %v566_v52 = vmul.f32 0.5, %v565_v51 }
 0x9d0   :  { %v573_v56 = vmul.f32 %v571_v55, %v566_v52  ;;  %v3168_v55 = vld [vmem:[#allocation11 + $0x8] sm:$0xff]  }
 0xa3c   :  { %v576_v53 = vpop.permute.xlu0 %575 }
 0xa3d   :  { %v578_v54 = vmul.f32 %v576_v53, %v566_v52 }
 0xa3f   :  { %580 = vrot.lane.b32.xlu0 %v578_v54, %s3524_s3 }
 0xab1   :  { %v581_v57 = vpop.permute.xlu0 %580 }
 0xab2   :  { %v583_v58 = vadd.f32 %v581_v57, %v573_v56  ;;  %v3167_v57 = vld [vmem:[#allocation2] sm:$0xff]  }
 0xab4   :  { %3206 = vtanh.f32 %v583_v58 }
 0xabe   :  { %v3207_v59 = vpop.eup %3206 }
 0xabf   :  { %586 = vrot.lane.b32.xlu1 %v3207_v59, %s3524_s3 }
 0xac3   :  { %591 = vrot.lane.b32.xlu1 %v583_v58, %s3525_s13 }
 0xb31   :  { %v587_v60 = vpop.permute.xlu1 %586 }
 0xb32   :  { %v589_v61 = vmul.f32 %v587_v60, %v566_v52  ;;  %v783_v60 = vld [vmem:[#allocation3 + $0x18] sm:$0xff]  }
 0xb34   :  { %v2761_v62 = vpack.c.bf16 %v589_v61, %v589_v61  ;;  %v828_v61 = vunpack.c.l.bf16 %v783_v60 }
 0xb35   :  { %v592_v63 = vpop.permute.xlu1 %591 }
 0xb36   :  { %594 = vst.msk [vmem:[#allocation4] sm:$0xff] %vm276_vm2, %v592_v63  ;;  %599 = vrot.lane.b32.xlu0 %v2761_v62, %s3516_s15 }
 0xb3d   :  { %v657_v0 = vld [vmem:[#allocation4] sm:$0xff] }
 0xb3e   :  { %659 = vrot.lane.b32.xlu1 %v657_v0, %s3524_s3 }
 0xba8   :  { %v600_v1 = vpop.permute.xlu0 %599 }
 0xba9   :  { %603 = vst.msk [vmem:[#allocation2 + $0xc] sm:$0xf] %vm323_vm4, %v600_v1 }
 0xbb0   :  { %v606_v2 = vld [vmem:[#allocation2 + $0xc] sm:$0xf]  ;;  %v660_v19 = vpop.permute.xlu1 %659 }
 0xbb1   :  { %2973 = vmatmul.mubr.msk.bf16.vlgmr.msra.gmra.mrb[8].mxu1 %vm276_vm2, %v606_v2  ;;  %v3169_v58 = vld [vmem:[#allocation2 + $0x8] sm:$0xff]  }
 0xbb2   :  { %2985 = vmatpush3.bf16.msra.mxu1 %v3736_v31  ;;  %2988 = vmatprep.mubr.msk.bf16.mxu1 %vm3526_vm3, %v3523_v4 }
 0xbb3   :  { %2986 = vmatprep.subr.bf16.mxu1 %v3523_v4 }
 0xbb6   :  { %2987 = vmatpush3.bf16.msra.mxu1 %v3739_v32 }
 0xbb7   :  { %3000 = vmatprep.subr.bf16.mxu1 %v3166_v48 }
 0xc84   :  { %v644_v7 = vpop.f32.mrb[8].mxu1 }
 0xc85   :  { %v651_v8 = vadd.f32 %v650_v5, %v644_v7  ;;  %v2974_v9 = vpop.f32.mrb[9].mxu1  ;;  %v3848_v5 = vld [vmem:[%s4189_s6] ss:$0 sm:$0xff] }
 0xc86   :  { %v647_v10 = vpop.f32.mrb[10].mxu1 }
 0xc87   :  { %3208 = vtanh.f32 %v651_v8  ;;  %v2975_v11 = vpop.f32.mrb[11].mxu1  ;;  %v652_v13 = vmul.f32 0.5, %v651_v8 }
 0xc89   :  { %3210 = vtanh.f32 %v652_v13 }
 0xc91   :  { %v3209_v12 = vpop.eup %3208 }
 0xc92   :  { %664 = vrot.lane.b32.xlu0 %v3209_v12, %s3524_s3 }
 0xc93   :  { %v3211_v14 = vpop.eup %3210 }
 0xc94   :  { %v654_v15 = vadd.f32 1.0, %v3211_v14 }
 0xc96   :  { %v655_v16 = vmul.f32 0.5, %v654_v15 }
 0xc98   :  { %v662_v20 = vmul.f32 %v660_v19, %v655_v16 }
 0xd04   :  { %v665_v17 = vpop.permute.xlu0 %664 }
 0xd05   :  { %v667_v18 = vmul.f32 %v665_v17, %v655_v16 }
 0xd07   :  { %669 = vrot.lane.b32.xlu0 %v667_v18, %s3524_s3 }
 0xd79   :  { %v670_v21 = vpop.permute.xlu0 %669 }
 0xd7a   :  { %v672_v22 = vadd.f32 %v670_v21, %v662_v20 }
 0xd7c   :  { %3212 = vtanh.f32 %v672_v22 }
 0xd86   :  { %v3213_v23 = vpop.eup %3212 }
 0xd87   :  { %675 = vrot.lane.b32.xlu1 %v3213_v23, %s3524_s3 }
 0xd8b   :  { %680 = vrot.lane.b32.xlu1 %v672_v22, %s3525_s13 }
 0xdf9   :  { %v676_v24 = vpop.permute.xlu1 %675 }
 0xdfa   :  { %v678_v25 = vmul.f32 %v676_v24, %v655_v16 }
 0xdfc   :  { %v2762_v26 = vpack.c.bf16 %v678_v25, %v678_v25 }
 0xdfd   :  { %v681_v27 = vpop.permute.xlu1 %680 }
 0xdfe   :  { %683 = vst.msk [vmem:[#allocation4] sm:$0xff] %vm276_vm2, %v681_v27  ;;  %688 = vrot.lane.b32.xlu0 %v2762_v26, %s3516_s15 }
 0xe05   :  { %v746_v28 = vld [vmem:[#allocation4] sm:$0xff] }
 0xe06   :  { %748 = vrot.lane.b32.xlu1 %v746_v28, %s3524_s3 }
 0xe70   :  { %v689_v29 = vpop.permute.xlu0 %688 }
 0xe71   :  { %692 = vst.msk [vmem:[#allocation2 + $0x10] sm:$0xf] %vm323_vm4, %v689_v29 }
 0xe78   :  { %v695_v30 = vld [vmem:[#allocation2 + $0x10] sm:$0xf] }
 0xe79   :  { %2981 = vmatmul.mubr.msk.bf16.vlgmr.msra.gmra.mrb[12].mxu0 %vm276_vm2, %v695_v30 }
 0xe7a   :  { %2993 = vmatpush3.bf16.msra.mxu0 %v3736_v31  ;;  %2996 = vmatprep.mubr.msk.bf16.mxu0 %vm3526_vm3, %v3523_v4 }
 0xe7b   :  { %2994 = vmatprep.subr.bf16.mxu0 %v3523_v4 }
 0xe7e   :  { %2995 = vmatpush3.bf16.msra.mxu0 %v3739_v32  ;;  %v749_v32 = vpop.permute.xlu1 %748 }
 0xe7f   :  { %3012 = vmatprep.subr.bf16.mxu0 %v3523_v4 }
 0xf4c   :  { %v733_v34 = vpop.f32.mrb[12].mxu0 }
 0xf4d   :  { %v740_v35 = vadd.f32 %v739_v33, %v733_v34  ;;  %v2982_v36 = vpop.f32.mrb[13].mxu0 }
 0xf4e   :  { %v736_v37 = vpop.f32.mrb[14].mxu0 }
 0xf4f   :  { %3214 = vtanh.f32 %v740_v35  ;;  %v2983_v38 = vpop.f32.mrb[15].mxu0  ;;  %v741_v31 = vmul.f32 0.5, %v740_v35  ;;  %v917_v37 = vunpack.c.h.bf16 %v783_v60 }
 0xf51   :  { %3216 = vtanh.f32 %v741_v31 }
 0xf59   :  { %v3215_v39 = vpop.eup %3214 }
 0xf5a   :  { %753 = vrot.lane.b32.xlu0 %v3215_v39, %s3524_s3 }
 0xf5b   :  { %v3217_v40 = vpop.eup %3216 }
 0xf5c   :  { %v743_v41 = vadd.f32 1.0, %v3217_v40 }
 0xf5e   :  { %v744_v42 = vmul.f32 0.5, %v743_v41 }
 0xf60   :  { %v751_v44 = vmul.f32 %v749_v32, %v744_v42 }
 0xfcc   :  { %v754_v6 = vpop.permute.xlu0 %753 }
 0xfcd   :  { %v756_v43 = vmul.f32 %v754_v6, %v744_v42 }
 0xfcf   :  { %758 = vrot.lane.b32.xlu0 %v756_v43, %s3524_s3 }
0x1041   :  { %v759_v45 = vpop.permute.xlu0 %758 }
0x1042   :  { %v761_v46 = vadd.f32 %v759_v45, %v751_v44 }
0x1044   :  { %3218 = vtanh.f32 %v761_v46 }
0x104e   :  { %v3219_v47 = vpop.eup %3218 }
0x104f   :  { %764 = vrot.lane.b32.xlu1 %v3219_v47, %s3524_s3 }
0x1053   :  { %769 = vrot.lane.b32.xlu1 %v761_v46, %s3525_s13 }
0x10c1   :  { %v765_v49 = vpop.permute.xlu1 %764 }
0x10c2   :  { %v767_v50 = vmul.f32 %v765_v49, %v744_v42 }
0x10c4   :  { %v2763_v51 = vpack.c.bf16 %v767_v50, %v767_v50 }
0x10c5   :  { %v770_v52 = vpop.permute.xlu1 %769 }
0x10c6   :  { %772 = vst.msk [vmem:[#allocation4] sm:$0xff] %vm276_vm2, %v770_v52  ;;  %777 = vrot.lane.b32.xlu0 %v2763_v51, %s3516_s15 }
0x10cd   :  { %v835_v53 = vld [vmem:[#allocation4] sm:$0xff] }
0x10ce   :  { %837 = vrot.lane.b32.xlu1 %v835_v53, %s3524_s3 }
0x1138   :  { %v778_v54 = vpop.permute.xlu0 %777 }
0x1139   :  { %781 = vst.msk [vmem:[#allocation2 + $0x14] sm:$0xf] %vm323_vm4, %v778_v54 }
0x1140   :  { %v784_v56 = vld [vmem:[#allocation2 + $0x14] sm:$0xf]  ;;  %v838_v23 = vpop.permute.xlu1 %837 }
0x1141   :  { %2989 = vmatmul.mubr.msk.bf16.vlgmr.msra.gmra.mrb[12].mxu1 %vm276_vm2, %v784_v56  ;;  %v3170_v59 = vld [vmem:[#allocation2 + $0x10] sm:$0xff]  }
0x1142   :  { %3001 = vmatpush3.bf16.msra.mxu1 %v3166_v48  ;;  %3004 = vmatprep.mubr.msk.bf16.mxu1 %vm276_vm2, %v3167_v57 }
0x1143   :  { %3002 = vmatprep.subr.bf16.mxu1 %v3168_v55 }
0x1146   :  { %3003 = vmatpush3.bf16.msra.mxu1 %v3168_v55 }
0x1147   :  { %3028 = vmatprep.subr.bf16.mxu1 %v3523_v4 }
0x1149   :  { %3005 = vmatmul.mubr.msk.bf16.vlgmr.msra.gmra.mrb[16].mxu1 %vm276_vm2, %v3169_v58 }
0x114a   :  { %3008 = vmatprep.mubr.msk.bf16.mxu1 %vm276_vm2, %v3170_v59 }
0x1214   :  { %v822_v62 = vpop.f32.mrb[12].mxu1 }
0x1215   :  { %v829_v63 = vadd.f32 %v828_v61, %v822_v62  ;;  %v2990_v0 = vpop.f32.mrb[13].mxu1 }
0x1216   :  { %v825_v1 = vpop.f32.mrb[14].mxu1 }
0x1217   :  { %3220 = vtanh.f32 %v829_v63  ;;  %v2991_v2 = vpop.f32.mrb[15].mxu1  ;;  %v830_v17 = vmul.f32 0.5, %v829_v63 }
0x1219   :  { %3222 = vtanh.f32 %v830_v17 }
0x121c   :  { %v3006_v3 = vpop.f32.mrb[16].mxu1 }
0x121d   :  { %v1057_v7 = vpop.f32.mrb[17].mxu1  ;;  %v1066_v9 = vadd.f32 %v3006_v3, %v3848_v5  ;;  %v3889_v3 = vld [vmem:[%s4188_s5] sm:$0xff]  }
0x121e   :  { %v3007_v8 = vpop.f32.mrb[18].mxu1  ;;  %v1058_v12 = vadd.f32 %v3848_v5, %v1057_v7  ;;  %v3895_v7 = vld [vmem:[%s4188_s5 + $0x8] sm:$0xff]   ;;  %3029 = vmatpush3.bf16.msra.mxu1 %v3889_v3 }
0x121f   :  { %v1069_v10 = vadd.f32 %v3007_v8, %v3848_v5  ;;  %v1060_v11 = vpop.f32.mrb[19].mxu1  ;;  %3030 = vmatprep.subr.bf16.mxu1 %v3523_v4 }
0x1220   :  { %v1061_v13 = vadd.f32 %v3848_v5, %v1060_v11 }
0x1221   :  { %v3221_v14 = vpop.eup %3220  ;;  %v2810_v15 = vpack.c.bf16 %v1069_v10, %v1066_v9 }
0x1222   :  { %v2805_v16 = vpack.c.bf16 %v1061_v13, %v1058_v12  ;;  %842 = vrot.lane.b32.xlu0 %v3221_v14, %s3524_s3  ;;  %3031 = vmatpush3.bf16.msra.mxu1 %v3895_v7 }
0x1223   :  { %2845 = vst [vmem:[#allocation3 + $0x8] sm:$0xff] %v2810_v15   ;;  %v3223_v18 = vpop.eup %3222  ;;  %3044 = vmatprep.subr.bf16.mxu1 %v3523_v4 }
0x1224   :  { %2806 = vst [vmem:[#allocation3] sm:$0xff] %v2805_v16   ;;  %v832_v19 = vadd.f32 1.0, %v3223_v18 }
0x1226   :  { %v833_v20 = vmul.f32 0.5, %v832_v19 }
0x1228   :  { %v840_v24 = vmul.f32 %v838_v23, %v833_v20 }
0x122b   :  { %v3866_v43 = vld [vmem:[#allocation3] sm:$0xff]  }
0x122c   :  { %v1110_v44 = vunpack.c.l.bf16 %v3866_v43  ;;  %v1208_v15 = vunpack.c.h.bf16 %v3866_v43 }
0x122e   :  { %v1111_v50 = vmul.f32 0.5, %v1110_v44 }
0x1294   :  { %v843_v21 = vpop.permute.xlu0 %842 }
0x1295   :  { %v845_v22 = vmul.f32 %v843_v21, %v833_v20 }
0x1297   :  { %847 = vrot.lane.b32.xlu0 %v845_v22, %s3524_s3 }
0x1309   :  { %v848_v25 = vpop.permute.xlu0 %847 }
0x130a   :  { %v850_v26 = vadd.f32 %v848_v25, %v840_v24 }
0x130c   :  { %3224 = vtanh.f32 %v850_v26 }
0x1316   :  { %v3225_v27 = vpop.eup %3224 }
0x1317   :  { %853 = vrot.lane.b32.xlu1 %v3225_v27, %s3524_s3 }
0x131b   :  { %858 = vrot.lane.b32.xlu1 %v850_v26, %s3525_s13 }
0x1389   :  { %v854_v28 = vpop.permute.xlu1 %853 }
0x138a   :  { %v856_v29 = vmul.f32 %v854_v28, %v833_v20 }
0x138c   :  { %v2764_v30 = vpack.c.bf16 %v856_v29, %v856_v29 }
0x138d   :  { %v859_v33 = vpop.permute.xlu1 %858 }
0x138e   :  { %861 = vst.msk [vmem:[#allocation4] sm:$0xff] %vm276_vm2, %v859_v33  ;;  %866 = vrot.lane.b32.xlu0 %v2764_v30, %s3516_s15 }
0x1395   :  { %v924_v34 = vld [vmem:[#allocation4] sm:$0xff] }
0x1396   :  { %926 = vrot.lane.b32.xlu1 %v924_v34, %s3524_s3 }
0x1400   :  { %v867_v35 = vpop.permute.xlu0 %866 }
0x1401   :  { %870 = vst.msk [vmem:[#allocation2 + $0x18] sm:$0xf] %vm323_vm4, %v867_v35 }
0x1408   :  { %v873_v36 = vld [vmem:[#allocation2 + $0x18] sm:$0xf]  ;;  %v927_v52 = vpop.permute.xlu1 %926 }
0x1409   :  { %2997 = vmatmul.mubr.msk.bf16.vlgmr.msra.gmra.mrb[16].mxu0 %vm276_vm2, %v873_v36 }
0x140a   :  { %3016 = vmatprep.mubr.msk.bf16.mxu0 %vm3526_vm3, %v3523_v4  ;;  %3013 = vmatpush3.bf16.msra.mxu0 %v3889_v3 }
0x140b   :  { %3014 = vmatprep.subr.bf16.mxu0 %v3523_v4 }
0x140e   :  { %3015 = vmatpush3.bf16.msra.mxu0 %v3895_v7 }
0x140f   :  { %3020 = vmatprep.subr.bf16.mxu0 %v3523_v4 }
0x14dc   :  { %v911_v38 = vpop.f32.mrb[16].mxu0 }
0x14dd   :  { %v918_v39 = vadd.f32 %v917_v37, %v911_v38  ;;  %v2998_v31 = vpop.f32.mrb[17].mxu0 }
0x14de   :  { %v914_v40 = vpop.f32.mrb[18].mxu0 }
0x14df   :  { %3226 = vtanh.f32 %v918_v39  ;;  %v2999_v41 = vpop.f32.mrb[19].mxu0  ;;  %v919_v6 = vmul.f32 0.5, %v918_v39 }
0x14e1   :  { %3228 = vtanh.f32 %v919_v6 }
0x14e2   :  { %3230 = vtanh.f32 %v1110_v44 }
0x14e3   :  { %3232 = vtanh.f32 %v1111_v50 }
0x14e9   :  { %v3227_v42 = vpop.eup %3226 }
0x14ea   :  { %931 = vrot.lane.b32.xlu0 %v3227_v42, %s3524_s3 }
0x14eb   :  { %v3229_v32 = vpop.eup %3228 }
0x14ec   :  { %v921_v45 = vadd.f32 1.0, %v3229_v32  ;;  %v3231_v49 = vpop.eup %3230 }
0x14ed   :  { %v3233_v51 = vpop.eup %3232 }
0x14ee   :  { %v3869_v46 = vmul.f32 0.5, %v921_v45  ;;  %v1113_v54 = vadd.f32 1.0, %v3233_v51 }
0x14f0   :  { %v929_v53 = vmul.f32 %v927_v52, %v3869_v46  ;;  %v1114_v57 = vmul.f32 0.5, %v1113_v54 }
0x155c   :  { %v932_v47 = vpop.permute.xlu0 %931 }
0x155d   :  { %v934_v48 = vmul.f32 %v932_v47, %v3869_v46  ;;  %v1250_v47 = vld [vmem:[#allocation3 + $0x8] sm:$0xff]  }
0x155f   :  { %936 = vrot.lane.b32.xlu0 %v934_v48, %s3524_s3  ;;  %v1295_v48 = vunpack.c.l.bf16 %v1250_v47 }
0x1563   :  { %1123 = vrot.lane.b32.xlu0 %v3231_v49, %s3524_s3 }
0x15d1   :  { %v937_v55 = vpop.permute.xlu0 %936 }
0x15d2   :  { %v3875_v56 = vadd.f32 %v937_v55, %v929_v53 }
0x15d4   :  { %947 = vrot.lane.b32.xlu1 %v3875_v56, %s3525_s13 }
0x15d5   :  { %v1124_v58 = vpop.permute.xlu0 %1123 }
0x15d6   :  { %v1126_v59 = vmul.f32 %v1124_v58, %v1114_v57 }
0x15d8   :  { %1128 = vrot.lane.b32.xlu0 %v1126_v59, %s3524_s3 }
0x1646   :  { %v948_v60 = vpop.permute.xlu1 %947 }
0x1647   :  { %950 = vst.msk [vmem:[#allocation4] sm:$0xff] %vm276_vm2, %v948_v60 }
0x1648   :  { %1104 = vst.msk [vmem:[#allocation4] sm:$0xff] %vm276_vm2, %v3523_v4 }
0x164a   :  { %v1129_v0 = vpop.permute.xlu0 %1128 }
0x164f   :  { %v1116_v61 = vld [vmem:[#allocation4] sm:$0xff] }
0x1650   :  { %1118 = vrot.lane.b32.xlu1 %v1116_v61, %s3524_s3 }
0x16c2   :  { %v1119_v62 = vpop.permute.xlu1 %1118 }
0x16c3   :  { %v1121_v63 = vmul.f32 %v1119_v62, %v1114_v57 }
0x16c5   :  { %v1131_v1 = vadd.f32 %v1129_v0, %v1121_v63 }
0x16c7   :  { %3234 = vtanh.f32 %v1131_v1 }
0x16d1   :  { %v3235_v2 = vpop.eup %3234 }
0x16d2   :  { %1134 = vrot.lane.b32.xlu1 %v3235_v2, %s3524_s3 }
0x16d6   :  { %1139 = vrot.lane.b32.xlu1 %v1131_v1, %s3525_s13 }
0x1744   :  { %v1135_v8 = vpop.permute.xlu1 %1134 }
0x1745   :  { %v1137_v9 = vmul.f32 %v1135_v8, %v1114_v57 }
0x1747   :  { %v2766_v10 = vpack.c.bf16 %v1137_v9, %v1137_v9 }
0x1748   :  { %v1140_v11 = vpop.permute.xlu1 %1139 }
0x1749   :  { %1142 = vst.msk [vmem:[#allocation4] sm:$0xff] %vm276_vm2, %v1140_v11  ;;  %1147 = vrot.lane.b32.xlu0 %v2766_v10, %s3516_s15 }
0x1750   :  { %v1215_v12 = vld [vmem:[#allocation4] sm:$0xff] }
0x1751   :  { %1217 = vrot.lane.b32.xlu1 %v1215_v12, %s3524_s3 }
0x17bb   :  { %v1148_v13 = vpop.permute.xlu0 %1147 }
0x17bc   :  { %1150 = vst.msk [vmem:[#allocation2] sm:$0xf] %vm323_vm4, %v1148_v13 }
0x17c3   :  { %v1152_v14 = vld [vmem:[#allocation2] sm:$0xf]  ;;  %v1218_v28 = vpop.permute.xlu1 %1217 }
0x17c4   :  { %3017 = vmatmul.mubr.msk.bf16.vlgmr.msra.gmra.mrb[20].mxu0 %vm276_vm2, %v1152_v14 }
0x17c5   :  { %3021 = vmatpush3.bf16.msra.mxu0 %v3889_v3  ;;  %3024 = vmatprep.mubr.msk.bf16.mxu0 %vm3526_vm3, %v3523_v4 }
0x17c6   :  { %3022 = vmatprep.subr.bf16.mxu0 %v3523_v4 }
0x17c9   :  { %3023 = vmatpush3.bf16.msra.mxu0 %v3895_v7 }
0x17ca   :  { %3036 = vmatprep.subr.bf16.mxu0 %v3523_v4 }
0x1897   :  { %v1202_v16 = vpop.f32.mrb[20].mxu0 }
0x1898   :  { %v1209_v17 = vadd.f32 %v1208_v15, %v1202_v16  ;;  %v3018_v18 = vpop.f32.mrb[21].mxu0 }
0x1899   :  { %v1205_v19 = vpop.f32.mrb[22].mxu0 }
0x189a   :  { %3236 = vtanh.f32 %v1209_v17  ;;  %v3019_v20 = vpop.f32.mrb[23].mxu0  ;;  %v1210_v22 = vmul.f32 0.5, %v1209_v17 }
0x189c   :  { %3238 = vtanh.f32 %v1210_v22 }
0x18a4   :  { %v3237_v21 = vpop.eup %3236 }
0x18a5   :  { %1222 = vrot.lane.b32.xlu0 %v3237_v21, %s3524_s3  ;;  %v1382_v21 = vunpack.c.h.bf16 %v1250_v47 }
0x18a6   :  { %v3239_v23 = vpop.eup %3238 }
0x18a7   :  { %v1212_v24 = vadd.f32 1.0, %v3239_v23 }
0x18a9   :  { %v1213_v25 = vmul.f32 0.5, %v1212_v24 }
0x18ab   :  { %v1220_v29 = vmul.f32 %v1218_v28, %v1213_v25 }
0x1917   :  { %v1223_v26 = vpop.permute.xlu0 %1222 }
0x1918   :  { %v1225_v27 = vmul.f32 %v1223_v26, %v1213_v25 }
0x191a   :  { %1227 = vrot.lane.b32.xlu0 %v1225_v27, %s3524_s3 }
0x198c   :  { %v1228_v30 = vpop.permute.xlu0 %1227 }
0x198d   :  { %v1230_v33 = vadd.f32 %v1228_v30, %v1220_v29 }
0x198f   :  { %3240 = vtanh.f32 %v1230_v33 }
0x1990   :  { %3242 = vtanh.f32 %v3875_v56 }
0x1999   :  { %v3241_v34 = vpop.eup %3240 }
0x199a   :  { %1233 = vrot.lane.b32.xlu1 %v3241_v34, %s3524_s3  ;;  %v3243_v31 = vpop.eup %3242 }
0x199e   :  { %1238 = vrot.lane.b32.xlu1 %v1230_v33, %s3525_s13 }
0x1a0c   :  { %v1234_v35 = vpop.permute.xlu1 %1233 }
0x1a0d   :  { %v1236_v36 = vmul.f32 %v1234_v35, %v1213_v25 }
0x1a0f   :  { %v2767_v37 = vpack.c.bf16 %v1236_v36, %v1236_v36 }
0x1a10   :  { %v1239_v38 = vpop.permute.xlu1 %1238 }
0x1a11   :  { %1241 = vst.msk [vmem:[#allocation4] sm:$0xff] %vm276_vm2, %v1239_v38  ;;  %1246 = vrot.lane.b32.xlu0 %v2767_v37, %s3516_s15 }
0x1a18   :  { %v1302_v39 = vld [vmem:[#allocation4] sm:$0xff] }
0x1a19   :  { %1304 = vrot.lane.b32.xlu1 %v1302_v39, %s3524_s3 }
0x1a1d   :  { %942 = vrot.lane.b32.xlu1 %v3243_v31, %s3524_s3 }
0x1a83   :  { %v1247_v40 = vpop.permute.xlu0 %1246 }
0x1a84   :  { %1249 = vst.msk [vmem:[#allocation2 + $0x4] sm:$0xf] %vm323_vm4, %v1247_v40 }
0x1a8b   :  { %v1305_v41 = vpop.permute.xlu1 %1304  ;;  %v1251_v42 = vld [vmem:[#allocation2 + $0x4] sm:$0xf] }
0x1a8c   :  { %3025 = vmatmul.mubr.msk.bf16.vlgmr.msra.gmra.mrb[24].mxu0 %vm276_vm2, %v1251_v42 }
0x1a8d   :  { %3037 = vmatpush3.bf16.msra.mxu0 %v3889_v3  ;;  %3040 = vmatprep.mubr.msk.bf16.mxu0 %vm3526_vm3, %v3523_v4 }
0x1a8e   :  { %3038 = vmatprep.subr.bf16.mxu0 %v3523_v4 }
0x1a8f   :  { %v943_v6 = vpop.permute.xlu1 %942 }
0x1a90   :  { %v945_v43 = vmul.f32 %v943_v6, %v3869_v46 }
0x1a91   :  { %3039 = vmatpush3.bf16.msra.mxu0 %v3895_v7 }
0x1a92   :  { %v2765_v32 = vpack.c.bf16 %v945_v43, %v945_v43  ;;  %3052 = vmatprep.subr.bf16.mxu0 %v3523_v4 }
0x1a94   :  { %955 = vrot.lane.b32.xlu1 %v2765_v32, %s3516_s15 }
0x1b06   :  { %v956_v44 = vpop.permute.xlu1 %955 }
0x1b07   :  { %959 = vst.msk [vmem:[#allocation2 + $0x1c] sm:$0xf] %vm323_vm4, %v956_v44 }
0x1b0e   :  { %v3173_v45 = vld [vmem:[#allocation2 + $0x18] sm:$0xff]  }
0x1b0f   :  { %3009 = vmatmul.mubr.msk.bf16.gmra.mrb[20].mxu1 %vm276_vm2, %v3173_v45 }
0x1b10   :  { %3032 = vmatprep.mubr.msk.bf16.mxu1 %vm3526_vm3, %v3523_v4 }
0x1b5f   :  { %v1289_v49 = vpop.f32.mrb[24].mxu0 }
0x1b60   :  { %v1296_v46 = vadd.f32 %v1295_v48, %v1289_v49  ;;  %v3026_v50 = vpop.f32.mrb[25].mxu0 }
0x1b61   :  { %v1292_v51 = vpop.f32.mrb[26].mxu0 }
0x1b62   :  { %3244 = vtanh.f32 %v1296_v46  ;;  %v3027_v52 = vpop.f32.mrb[27].mxu0  ;;  %v1297_v54 = vmul.f32 0.5, %v1296_v46 }
0x1b64   :  { %3246 = vtanh.f32 %v1297_v54 }
0x1b6c   :  { %v3245_v53 = vpop.eup %3244 }
0x1b6d   :  { %1309 = vrot.lane.b32.xlu0 %v3245_v53, %s3524_s3 }
0x1b6e   :  { %v3247_v55 = vpop.eup %3246 }
0x1b6f   :  { %v1299_v56 = vadd.f32 1.0, %v3247_v55 }
0x1b71   :  { %v1300_v57 = vmul.f32 0.5, %v1299_v56 }
0x1b73   :  { %v1307_v11 = vmul.f32 %v1305_v41, %v1300_v57 }
0x1bdf   :  { %v1310_v58 = vpop.permute.xlu0 %1309 }
0x1be0   :  { %v1312_v59 = vmul.f32 %v1310_v58, %v1300_v57 }
0x1be2   :  { %1314 = vrot.lane.b32.xlu0 %v1312_v59, %s3524_s3  ;;  %v3010_v60 = vpop.f32.mrb[20].mxu1 }
0x1be3   :  { %v1073_v61 = vpop.f32.mrb[21].mxu1  ;;  %v1082_v63 = vadd.f32 %v3010_v60, %v3848_v5 }
0x1be4   :  { %v3011_v62 = vpop.f32.mrb[22].mxu1  ;;  %v1074_v2 = vadd.f32 %v3848_v5, %v1073_v61 }
0x1be5   :  { %v1085_v0 = vadd.f32 %v3011_v62, %v3848_v5  ;;  %v1076_v1 = vpop.f32.mrb[23].mxu1 }
0x1be6   :  { %v1077_v8 = vadd.f32 %v3848_v5, %v1076_v1 }
0x1be7   :  { %v2820_v9 = vpack.c.bf16 %v1085_v0, %v1082_v63 }
0x1be8   :  { %v2815_v10 = vpack.c.bf16 %v1077_v8, %v1074_v2 }
0x1be9   :  { %2847 = vst [vmem:[#allocation3 + $0x18] sm:$0xff] %v2820_v9  }
0x1bea   :  { %2846 = vst [vmem:[#allocation3 + $0x10] sm:$0xff] %v2815_v10  }
0x1bf1   :  { %v1424_v45 = vld [vmem:[#allocation3 + $0x10] sm:$0xff]  }
0x1bf2   :  { %v1469_v47 = vunpack.c.l.bf16 %v1424_v45 }
0x1c54   :  { %v1315_v12 = vpop.permute.xlu0 %1314 }
0x1c55   :  { %v1317_v13 = vadd.f32 %v1315_v12, %v1307_v11  ;;  %v1556_v12 = vunpack.c.h.bf16 %v1424_v45 }
0x1c57   :  { %3248 = vtanh.f32 %v1317_v13  ;;  %1325 = vrot.lane.b32.xlu1 %v1317_v13, %s3525_s13 }
0x1c61   :  { %v3249_v14 = vpop.eup %3248 }
0x1c62   :  { %1320 = vrot.lane.b32.xlu0 %v3249_v14, %s3524_s3 }
0x1cc9   :  { %v1326_v15 = vpop.permute.xlu1 %1325 }
0x1cca   :  { %1328 = vst.msk [vmem:[#allocation4] sm:$0xff] %vm276_vm2, %v1326_v15 }
0x1cd1   :  { %v1389_v16 = vld [vmem:[#allocation4] sm:$0xff] }
0x1cd2   :  { %1391 = vrot.lane.b32.xlu1 %v1389_v16, %s3524_s3 }
0x1cd4   :  { %v1321_v5 = vpop.permute.xlu0 %1320 }
0x1cd5   :  { %v1323_v17 = vmul.f32 %v1321_v5, %v1300_v57 }
0x1cd7   :  { %v2768_v18 = vpack.c.bf16 %v1323_v17, %v1323_v17 }
0x1cd9   :  { %1333 = vrot.lane.b32.xlu0 %v2768_v18, %s3516_s15 }
0x1d44   :  { %v1392_v36 = vpop.permute.xlu1 %1391 }
0x1d4b   :  { %v1334_v19 = vpop.permute.xlu0 %1333 }
0x1d4c   :  { %1336 = vst.msk [vmem:[#allocation2 + $0x8] sm:$0xf] %vm323_vm4, %v1334_v19 }
0x1d53   :  { %v1338_v20 = vld [vmem:[#allocation2 + $0x8] sm:$0xf] }
0x1d54   :  { %3033 = vmatmul.mubr.msk.bf16.vlgmr.msra.gmra.mrb[24].mxu1 %vm276_vm2, %v1338_v20 }
0x1d55   :  { %3045 = vmatpush3.bf16.msra.mxu1 %v3889_v3  ;;  %3048 = vmatprep.mubr.msk.bf16.mxu1 %vm3526_vm3, %v3523_v4 }
0x1d56   :  { %3046 = vmatprep.subr.bf16.mxu1 %v3523_v4 }
0x1d59   :  { %3047 = vmatpush3.bf16.msra.mxu1 %v3895_v7 }
0x1d5a   :  { %3060 = vmatprep.subr.bf16.mxu1 %v3523_v4 }
0x1e27   :  { %v1376_v22 = vpop.f32.mrb[24].mxu1 }
0x1e28   :  { %v1383_v23 = vadd.f32 %v1382_v21, %v1376_v22  ;;  %v3034_v24 = vpop.f32.mrb[25].mxu1 }
0x1e29   :  { %v1379_v25 = vpop.f32.mrb[26].mxu1 }
0x1e2a   :  { %3250 = vtanh.f32 %v1383_v23  ;;  %v3035_v26 = vpop.f32.mrb[27].mxu1  ;;  %v1384_v28 = vmul.f32 0.5, %v1383_v23 }
0x1e2c   :  { %3252 = vtanh.f32 %v1384_v28 }
0x1e34   :  { %v3251_v27 = vpop.eup %3250 }
0x1e35   :  { %1396 = vrot.lane.b32.xlu0 %v3251_v27, %s3524_s3  ;;  %v3174_v27 = vld [vmem:[#allocation13] sm:$0xff]  }
0x1e36   :  { %v3253_v29 = vpop.eup %3252 }
0x1e37   :  { %v1386_v30 = vadd.f32 1.0, %v3253_v29 }
0x1e39   :  { %v1387_v33 = vmul.f32 0.5, %v1386_v30 }
0x1e3b   :  { %v1394_v37 = vmul.f32 %v1392_v36, %v1387_v33  ;;  %v3176_v36 = vld [vmem:[#allocation13 + $0x8] sm:$0xff]  }
0x1ea7   :  { %v1397_v34 = vpop.permute.xlu0 %1396 }
0x1ea8   :  { %v1399_v35 = vmul.f32 %v1397_v34, %v1387_v33 }
0x1eaa   :  { %1401 = vrot.lane.b32.xlu0 %v1399_v35, %s3524_s3 }
0x1f1c   :  { %v1402_v38 = vpop.permute.xlu0 %1401 }
0x1f1d   :  { %v1404_v39 = vadd.f32 %v1402_v38, %v1394_v37  ;;  %v3175_v38 = vld [vmem:[#allocation2] sm:$0xff]  }
0x1f1f   :  { %3254 = vtanh.f32 %v1404_v39 }
0x1f29   :  { %v3255_v31 = vpop.eup %3254 }
0x1f2a   :  { %1407 = vrot.lane.b32.xlu1 %v3255_v31, %s3524_s3 }
0x1f2e   :  { %1412 = vrot.lane.b32.xlu1 %v1404_v39, %s3525_s13 }
0x1f9c   :  { %v1408_v40 = vpop.permute.xlu1 %1407 }
0x1f9d   :  { %v1410_v41 = vmul.f32 %v1408_v40, %v1387_v33  ;;  %v1598_v40 = vld [vmem:[#allocation3 + $0x18] sm:$0xff]  }
0x1f9f   :  { %v2769_v42 = vpack.c.bf16 %v1410_v41, %v1410_v41  ;;  %v1643_v41 = vunpack.c.l.bf16 %v1598_v40 }
0x1fa0   :  { %v1413_v6 = vpop.permute.xlu1 %1412 }
0x1fa1   :  { %1415 = vst.msk [vmem:[#allocation4] sm:$0xff] %vm276_vm2, %v1413_v6  ;;  %1420 = vrot.lane.b32.xlu0 %v2769_v42, %s3516_s15 }
0x1fa8   :  { %v1476_v43 = vld [vmem:[#allocation4] sm:$0xff] }
0x1fa9   :  { %1478 = vrot.lane.b32.xlu1 %v1476_v43, %s3524_s3 }
0x2013   :  { %v1421_v32 = vpop.permute.xlu0 %1420 }
0x2014   :  { %1423 = vst.msk [vmem:[#allocation2 + $0xc] sm:$0xf] %vm323_vm4, %v1421_v32 }
0x201b   :  { %v1425_v44 = vld [vmem:[#allocation2 + $0xc] sm:$0xf]  ;;  %v1479_v59 = vpop.permute.xlu1 %1478 }
0x201c   :  { %3041 = vmatmul.mubr.msk.bf16.vlgmr.msra.gmra.mrb[28].mxu0 %vm276_vm2, %v1425_v44  ;;  %v3177_v39 = vld [vmem:[#allocation2 + $0x8] sm:$0xff]  }
0x201d   :  { %3053 = vmatpush3.bf16.msra.mxu0 %v3889_v3  ;;  %3056 = vmatprep.mubr.msk.bf16.mxu0 %vm3526_vm3, %v3523_v4 }
0x201e   :  { %3054 = vmatprep.subr.bf16.mxu0 %v3523_v4 }
0x2021   :  { %3055 = vmatpush3.bf16.msra.mxu0 %v3895_v7 }
0x2022   :  { %3068 = vmatprep.subr.bf16.mxu0 %v3174_v27 }
0x20ef   :  { %v1463_v48 = vpop.f32.mrb[28].mxu0 }
0x20f0   :  { %v1470_v49 = vadd.f32 %v1469_v47, %v1463_v48  ;;  %v3042_v46 = vpop.f32.mrb[29].mxu0  ;;  %v4000_v47 = vld [vmem:[#allocation16] ss:$0 sm:$0xff] }
0x20f1   :  { %v1466_v50 = vpop.f32.mrb[30].mxu0 }
0x20f2   :  { %3256 = vtanh.f32 %v1470_v49  ;;  %v3043_v51 = vpop.f32.mrb[31].mxu0  ;;  %v1471_v53 = vmul.f32 0.5, %v1470_v49 }
0x20f4   :  { %3258 = vtanh.f32 %v1471_v53 }
0x20fc   :  { %v3257_v52 = vpop.eup %3256 }
0x20fd   :  { %1483 = vrot.lane.b32.xlu0 %v3257_v52, %s3524_s3 }
0x20fe   :  { %v3259_v54 = vpop.eup %3258 }
0x20ff   :  { %v1473_v55 = vadd.f32 1.0, %v3259_v54 }
0x2101   :  { %v1474_v56 = vmul.f32 0.5, %v1473_v55 }
0x2103   :  { %v1481_v60 = vmul.f32 %v1479_v59, %v1474_v56 }
0x216f   :  { %v1484_v57 = vpop.permute.xlu0 %1483 }
0x2170   :  { %v1486_v58 = vmul.f32 %v1484_v57, %v1474_v56 }
0x2172   :  { %1488 = vrot.lane.b32.xlu0 %v1486_v58, %s3524_s3 }
0x21e4   :  { %v1489_v61 = vpop.permute.xlu0 %1488 }
0x21e5   :  { %v1491_v62 = vadd.f32 %v1489_v61, %v1481_v60 }
0x21e7   :  { %3260 = vtanh.f32 %v1491_v62 }
0x21f1   :  { %v3261_v63 = vpop.eup %3260 }
0x21f2   :  { %1494 = vrot.lane.b32.xlu1 %v3261_v63, %s3524_s3 }
0x21f6   :  { %1499 = vrot.lane.b32.xlu1 %v1491_v62, %s3525_s13 }
0x2264   :  { %v1495_v0 = vpop.permute.xlu1 %1494 }
0x2265   :  { %v1497_v1 = vmul.f32 %v1495_v0, %v1474_v56 }
0x2267   :  { %v2770_v2 = vpack.c.bf16 %v1497_v1, %v1497_v1 }
0x2268   :  { %v1500_v8 = vpop.permute.xlu1 %1499 }
0x2269   :  { %1502 = vst.msk [vmem:[#allocation4] sm:$0xff] %vm276_vm2, %v1500_v8  ;;  %1507 = vrot.lane.b32.xlu0 %v2770_v2, %s3516_s15 }
0x2270   :  { %v1563_v9 = vld [vmem:[#allocation4] sm:$0xff] }
0x2271   :  { %1565 = vrot.lane.b32.xlu1 %v1563_v9, %s3524_s3 }
0x22db   :  { %v1508_v10 = vpop.permute.xlu0 %1507 }
0x22dc   :  { %1510 = vst.msk [vmem:[#allocation2 + $0x10] sm:$0xf] %vm323_vm4, %v1508_v10 }
0x22e3   :  { %v1512_v11 = vld [vmem:[#allocation2 + $0x10] sm:$0xf] }
0x22e4   :  { %3049 = vmatmul.mubr.msk.bf16.vlgmr.msra.gmra.mrb[28].mxu1 %vm276_vm2, %v1512_v11 }
0x22e5   :  { %3061 = vmatpush3.bf16.msra.mxu1 %v3889_v3  ;;  %3064 = vmatprep.mubr.msk.bf16.mxu1 %vm3526_vm3, %v3523_v4 }
0x22e6   :  { %3062 = vmatprep.subr.bf16.mxu1 %v3523_v4 }
0x22e9   :  { %3063 = vmatpush3.bf16.msra.mxu1 %v3895_v7  ;;  %v1566_v7 = vpop.permute.xlu1 %1565 }
0x22ea   :  { %3080 = vmatprep.subr.bf16.mxu1 %v3523_v4 }
0x23b7   :  { %v1550_v13 = vpop.f32.mrb[28].mxu1 }
0x23b8   :  { %v1557_v14 = vadd.f32 %v1556_v12, %v1550_v13  ;;  %v3050_v15 = vpop.f32.mrb[29].mxu1 }
0x23b9   :  { %v1553_v16 = vpop.f32.mrb[30].mxu1 }
0x23ba   :  { %3262 = vtanh.f32 %v1557_v14  ;;  %v3051_v5 = vpop.f32.mrb[31].mxu1  ;;  %v1558_v3 = vmul.f32 0.5, %v1557_v14  ;;  %v1730_v16 = vunpack.c.h.bf16 %v1598_v40 }
0x23bc   :  { %3264 = vtanh.f32 %v1558_v3 }
0x23c4   :  { %v3263_v17 = vpop.eup %3262 }
0x23c5   :  { %1570 = vrot.lane.b32.xlu0 %v3263_v17, %s3524_s3 }
0x23c6   :  { %v3265_v18 = vpop.eup %3264 }
0x23c7   :  { %v1560_v19 = vadd.f32 1.0, %v3265_v18 }
0x23c9   :  { %v1561_v20 = vmul.f32 0.5, %v1560_v19 }
0x23cb   :  { %v1568_v23 = vmul.f32 %v1566_v7, %v1561_v20 }
0x2437   :  { %v1571_v21 = vpop.permute.xlu0 %1570 }
0x2438   :  { %v1573_v22 = vmul.f32 %v1571_v21, %v1561_v20 }
0x243a   :  { %1575 = vrot.lane.b32.xlu0 %v1573_v22, %s3524_s3 }
0x24ac   :  { %v1576_v24 = vpop.permute.xlu0 %1575 }
0x24ad   :  { %v1578_v25 = vadd.f32 %v1576_v24, %v1568_v23 }
0x24af   :  { %3266 = vtanh.f32 %v1578_v25 }
0x24b9   :  { %v3267_v26 = vpop.eup %3266 }
0x24ba   :  { %1581 = vrot.lane.b32.xlu1 %v3267_v26, %s3524_s3 }
0x24be   :  { %1586 = vrot.lane.b32.xlu1 %v1578_v25, %s3525_s13 }
0x252c   :  { %v1582_v28 = vpop.permute.xlu1 %1581 }
0x252d   :  { %v1584_v29 = vmul.f32 %v1582_v28, %v1561_v20 }
0x252f   :  { %v2771_v30 = vpack.c.bf16 %v1584_v29, %v1584_v29 }
0x2530   :  { %v1587_v33 = vpop.permute.xlu1 %1586 }
0x2531   :  { %1589 = vst.msk [vmem:[#allocation4] sm:$0xff] %vm276_vm2, %v1587_v33  ;;  %1594 = vrot.lane.b32.xlu0 %v2771_v30, %s3516_s15 }
0x2538   :  { %v1650_v34 = vld [vmem:[#allocation4] sm:$0xff] }
0x2539   :  { %1652 = vrot.lane.b32.xlu1 %v1650_v34, %s3524_s3 }
0x25a3   :  { %v1595_v35 = vpop.permute.xlu0 %1594 }
0x25a4   :  { %1597 = vst.msk [vmem:[#allocation2 + $0x14] sm:$0xf] %vm323_vm4, %v1595_v35 }
0x25ab   :  { %v1599_v37 = vld [vmem:[#allocation2 + $0x14] sm:$0xf]  ;;  %v1653_v63 = vpop.permute.xlu1 %1652 }
0x25ac   :  { %3057 = vmatmul.mubr.msk.bf16.vlgmr.msra.gmra.mrb[32].mxu0 %vm276_vm2, %v1599_v37  ;;  %v3178_v31 = vld [vmem:[#allocation2 + $0x10] sm:$0xff]  }
0x25ad   :  { %3069 = vmatpush3.bf16.msra.mxu0 %v3174_v27  ;;  %3072 = vmatprep.mubr.msk.bf16.mxu0 %vm276_vm2, %v3175_v38 }
0x25ae   :  { %3070 = vmatprep.subr.bf16.mxu0 %v3176_v36 }
0x25b1   :  { %3071 = vmatpush3.bf16.msra.mxu0 %v3176_v36 }
0x25b2   :  { %3096 = vmatprep.subr.bf16.mxu0 %v3523_v4 }
0x25b4   :  { %3073 = vmatmul.mubr.msk.bf16.vlgmr.msra.gmra.mrb[36].mxu0 %vm276_vm2, %v3177_v39 }
0x25b5   :  { %3076 = vmatprep.mubr.msk.bf16.mxu0 %vm276_vm2, %v3178_v31 }
0x267f   :  { %v1637_v42 = vpop.f32.mrb[32].mxu0 }
0x2680   :  { %v1644_v6 = vadd.f32 %v1643_v41, %v1637_v42  ;;  %v3058_v43 = vpop.f32.mrb[33].mxu0 }
0x2681   :  { %v1640_v32 = vpop.f32.mrb[34].mxu0 }
0x2682   :  { %3268 = vtanh.f32 %v1644_v6  ;;  %v3059_v44 = vpop.f32.mrb[35].mxu0  ;;  %v1645_v57 = vmul.f32 0.5, %v1644_v6 }
0x2684   :  { %3270 = vtanh.f32 %v1645_v57 }
0x2687   :  { %v3074_v45 = vpop.f32.mrb[36].mxu0 }
0x2688   :  { %v1869_v48 = vpop.f32.mrb[37].mxu0  ;;  %v1878_v46 = vadd.f32 %v3074_v45, %v4000_v47  ;;  %v4038_v45 = vld [vmem:[#allocation14] sm:$0xff]  }
0x2689   :  { %v3075_v49 = vpop.f32.mrb[38].mxu0  ;;  %v1870_v52 = vadd.f32 %v4000_v47, %v1869_v48  ;;  %v4041_v48 = vld [vmem:[#allocation14 + $0x8] sm:$0xff]   ;;  %3097 = vmatpush3.bf16.msra.mxu0 %v4038_v45 }
0x268a   :  { %v1881_v50 = vadd.f32 %v3075_v49, %v4000_v47  ;;  %v1872_v51 = vpop.f32.mrb[39].mxu0  ;;  %3098 = vmatprep.subr.bf16.mxu0 %v3523_v4 }
0x268b   :  { %v1873_v53 = vadd.f32 %v4000_v47, %v1872_v51 }
0x268c   :  { %v3269_v54 = vpop.eup %3268  ;;  %v2830_v55 = vpack.c.bf16 %v1881_v50, %v1878_v46 }
0x268d   :  { %v2825_v56 = vpack.c.bf16 %v1873_v53, %v1870_v52  ;;  %1657 = vrot.lane.b32.xlu0 %v3269_v54, %s3524_s3  ;;  %3099 = vmatpush3.bf16.msra.mxu0 %v4041_v48 }
0x268e   :  { %2848 = vst [vmem:[#allocation3 + $0x8] sm:$0xff] %v2830_v55   ;;  %v3271_v58 = vpop.eup %3270  ;;  %3112 = vmatprep.subr.bf16.mxu0 %v3523_v4 }
0x268f   :  { %2826 = vst [vmem:[#allocation3] sm:$0xff] %v2825_v56   ;;  %v1647_v59 = vadd.f32 1.0, %v3271_v58 }
0x2691   :  { %v1648_v60 = vmul.f32 0.5, %v1647_v59 }
0x2693   :  { %v1655_v0 = vmul.f32 %v1653_v63, %v1648_v60 }
0x2696   :  { %v4018_v22 = vld [vmem:[#allocation3] sm:$0xff]  }
0x2697   :  { %v1922_v23 = vunpack.c.l.bf16 %v4018_v22  ;;  %v2020_v55 = vunpack.c.h.bf16 %v4018_v22 }
0x2699   :  { %v1923_v29 = vmul.f32 0.5, %v1922_v23 }
0x26ff   :  { %v1658_v61 = vpop.permute.xlu0 %1657 }
0x2700   :  { %v1660_v62 = vmul.f32 %v1658_v61, %v1648_v60 }
0x2702   :  { %1662 = vrot.lane.b32.xlu0 %v1660_v62, %s3524_s3 }
0x2774   :  { %v1663_v1 = vpop.permute.xlu0 %1662 }
0x2775   :  { %v1665_v2 = vadd.f32 %v1663_v1, %v1655_v0 }
0x2777   :  { %3272 = vtanh.f32 %v1665_v2 }
0x2781   :  { %v3273_v8 = vpop.eup %3272 }
0x2782   :  { %1668 = vrot.lane.b32.xlu1 %v3273_v8, %s3524_s3 }
0x2786   :  { %1673 = vrot.lane.b32.xlu1 %v1665_v2, %s3525_s13 }
0x27f4   :  { %v1669_v9 = vpop.permute.xlu1 %1668 }
0x27f5   :  { %v1671_v10 = vmul.f32 %v1669_v9, %v1648_v60 }
0x27f7   :  { %v2772_v11 = vpack.c.bf16 %v1671_v10, %v1671_v10 }
0x27f8   :  { %v1674_v12 = vpop.permute.xlu1 %1673 }
0x27f9   :  { %1676 = vst.msk [vmem:[#allocation4] sm:$0xff] %vm276_vm2, %v1674_v12  ;;  %1681 = vrot.lane.b32.xlu0 %v2772_v11, %s3516_s15 }
0x2800   :  { %v1737_v13 = vld [vmem:[#allocation4] sm:$0xff] }
0x2801   :  { %1739 = vrot.lane.b32.xlu1 %v1737_v13, %s3524_s3 }
0x286b   :  { %v1682_v14 = vpop.permute.xlu0 %1681 }
0x286c   :  { %1684 = vst.msk [vmem:[#allocation2 + $0x18] sm:$0xf] %vm323_vm4, %v1682_v14 }
0x2873   :  { %v1686_v15 = vld [vmem:[#allocation2 + $0x18] sm:$0xf]  ;;  %v1740_v33 = vpop.permute.xlu1 %1739 }
0x2874   :  { %3065 = vmatmul.mubr.msk.bf16.vlgmr.msra.gmra.mrb[32].mxu1 %vm276_vm2, %v1686_v15 }
0x2875   :  { %3084 = vmatprep.mubr.msk.bf16.mxu1 %vm3526_vm3, %v3523_v4  ;;  %3081 = vmatpush3.bf16.msra.mxu1 %v4038_v45 }
0x2876   :  { %3082 = vmatprep.subr.bf16.mxu1 %v3523_v4 }
0x2879   :  { %3083 = vmatpush3.bf16.msra.mxu1 %v4041_v48 }
0x287a   :  { %3088 = vmatprep.subr.bf16.mxu1 %v3523_v4 }
0x2947   :  { %v1724_v5 = vpop.f32.mrb[32].mxu1 }
0x2948   :  { %v1731_v17 = vadd.f32 %v1730_v16, %v1724_v5  ;;  %v3066_v3 = vpop.f32.mrb[33].mxu1 }
0x2949   :  { %v1727_v18 = vpop.f32.mrb[34].mxu1 }
0x294a   :  { %3274 = vtanh.f32 %v1731_v17  ;;  %v3067_v19 = vpop.f32.mrb[35].mxu1  ;;  %v1732_v21 = vmul.f32 0.5, %v1731_v17 }
0x294c   :  { %3276 = vtanh.f32 %v1732_v21 }
0x294d   :  { %3278 = vtanh.f32 %v1922_v23 }
0x294e   :  { %3280 = vtanh.f32 %v1923_v29 }
0x2954   :  { %v3275_v20 = vpop.eup %3274 }
0x2955   :  { %1744 = vrot.lane.b32.xlu0 %v3275_v20, %s3524_s3 }
0x2956   :  { %v3277_v7 = vpop.eup %3276 }
0x2957   :  { %v1734_v24 = vadd.f32 1.0, %v3277_v7  ;;  %v3279_v28 = vpop.eup %3278 }
0x2958   :  { %v3281_v30 = vpop.eup %3280 }
0x2959   :  { %v4021_v25 = vmul.f32 0.5, %v1734_v24  ;;  %v1925_v35 = vadd.f32 1.0, %v3281_v30 }
0x295b   :  { %v1742_v34 = vmul.f32 %v1740_v33, %v4021_v25  ;;  %v1926_v38 = vmul.f32 0.5, %v1925_v35 }
0x29c7   :  { %v1745_v26 = vpop.permute.xlu0 %1744 }
0x29c8   :  { %v1747_v27 = vmul.f32 %v1745_v26, %v4021_v25  ;;  %v2062_v26 = vld [vmem:[#allocation3 + $0x8] sm:$0xff]  }
0x29ca   :  { %1749 = vrot.lane.b32.xlu0 %v1747_v27, %s3524_s3  ;;  %v2107_v27 = vunpack.c.l.bf16 %v2062_v26 }
0x29ce   :  { %1935 = vrot.lane.b32.xlu0 %v3279_v28, %s3524_s3 }
0x2a3c   :  { %v1750_v36 = vpop.permute.xlu0 %1749 }
0x2a3d   :  { %v4027_v37 = vadd.f32 %v1750_v36, %v1742_v34 }
0x2a3f   :  { %1760 = vrot.lane.b32.xlu1 %v4027_v37, %s3525_s13 }
0x2a40   :  { %v1936_v39 = vpop.permute.xlu0 %1935 }
0x2a41   :  { %v1938_v31 = vmul.f32 %v1936_v39, %v1926_v38 }
0x2a43   :  { %1940 = vrot.lane.b32.xlu0 %v1938_v31, %s3524_s3 }
0x2ab1   :  { %v1761_v40 = vpop.permute.xlu1 %1760 }
0x2ab2   :  { %1763 = vst.msk [vmem:[#allocation4] sm:$0xff] %vm276_vm2, %v1761_v40 }
0x2ab3   :  { %1916 = vst.msk [vmem:[#allocation4] sm:$0xff] %vm276_vm2, %v3523_v4 }
0x2ab5   :  { %v1941_v43 = vpop.permute.xlu0 %1940 }
0x2aba   :  { %v1928_v41 = vld [vmem:[#allocation4] sm:$0xff] }
0x2abb   :  { %1930 = vrot.lane.b32.xlu1 %v1928_v41, %s3524_s3 }
0x2b2d   :  { %v1931_v42 = vpop.permute.xlu1 %1930 }
0x2b2e   :  { %v1933_v6 = vmul.f32 %v1931_v42, %v1926_v38 }
0x2b30   :  { %v1943_v32 = vadd.f32 %v1941_v43, %v1933_v6 }
0x2b32   :  { %3282 = vtanh.f32 %v1943_v32 }
0x2b3c   :  { %v3283_v44 = vpop.eup %3282 }
0x2b3d   :  { %1946 = vrot.lane.b32.xlu1 %v3283_v44, %s3524_s3 }
0x2b41   :  { %1951 = vrot.lane.b32.xlu1 %v1943_v32, %s3525_s13 }
0x2baf   :  { %v1947_v49 = vpop.permute.xlu1 %1946 }
0x2bb0   :  { %v1949_v46 = vmul.f32 %v1947_v49, %v1926_v38 }
0x2bb2   :  { %v2774_v50 = vpack.c.bf16 %v1949_v46, %v1949_v46 }
0x2bb3   :  { %v1952_v51 = vpop.permute.xlu1 %1951 }
0x2bb4   :  { %1954 = vst.msk [vmem:[#allocation4] sm:$0xff] %vm276_vm2, %v1952_v51  ;;  %1959 = vrot.lane.b32.xlu0 %v2774_v50, %s3516_s15 }
0x2bbb   :  { %v2027_v52 = vld [vmem:[#allocation4] sm:$0xff] }
0x2bbc   :  { %2029 = vrot.lane.b32.xlu1 %v2027_v52, %s3524_s3 }
0x2c26   :  { %v1960_v53 = vpop.permute.xlu0 %1959 }
0x2c27   :  { %1962 = vst.msk [vmem:[#allocation2] sm:$0xf] %vm323_vm4, %v1960_v53 }
0x2c2e   :  { %v1964_v54 = vld [vmem:[#allocation2] sm:$0xf]  ;;  %v2030_v9 = vpop.permute.xlu1 %2029 }
0x2c2f   :  { %3085 = vmatmul.mubr.msk.bf16.vlgmr.msra.gmra.mrb[36].mxu1 %vm276_vm2, %v1964_v54 }
0x2c30   :  { %3089 = vmatpush3.bf16.msra.mxu1 %v4038_v45  ;;  %3092 = vmatprep.mubr.msk.bf16.mxu1 %vm3526_vm3, %v3523_v4 }
0x2c31   :  { %3090 = vmatprep.subr.bf16.mxu1 %v3523_v4 }
0x2c34   :  { %3091 = vmatpush3.bf16.msra.mxu1 %v4041_v48 }
0x2c35   :  { %3104 = vmatprep.subr.bf16.mxu1 %v3523_v4 }
0x2d02   :  { %v2014_v56 = vpop.f32.mrb[36].mxu1 }
0x2d03   :  { %v2021_v57 = vadd.f32 %v2020_v55, %v2014_v56  ;;  %v3086_v58 = vpop.f32.mrb[37].mxu1 }
0x2d04   :  { %v2017_v59 = vpop.f32.mrb[38].mxu1 }
0x2d05   :  { %3284 = vtanh.f32 %v2021_v57  ;;  %v3087_v60 = vpop.f32.mrb[39].mxu1  ;;  %v2022_v62 = vmul.f32 0.5, %v2021_v57 }
0x2d07   :  { %3286 = vtanh.f32 %v2022_v62 }
0x2d0f   :  { %v3285_v61 = vpop.eup %3284 }
0x2d10   :  { %2034 = vrot.lane.b32.xlu0 %v3285_v61, %s3524_s3  ;;  %v2194_v61 = vunpack.c.h.bf16 %v2062_v26 }
0x2d11   :  { %v3287_v63 = vpop.eup %3286 }
0x2d12   :  { %v2024_v0 = vadd.f32 1.0, %v3287_v63 }
0x2d14   :  { %v2025_v1 = vmul.f32 0.5, %v2024_v0 }
0x2d16   :  { %v2032_v10 = vmul.f32 %v2030_v9, %v2025_v1 }
0x2d82   :  { %v2035_v2 = vpop.permute.xlu0 %2034 }
0x2d83   :  { %v2037_v8 = vmul.f32 %v2035_v2, %v2025_v1 }
0x2d85   :  { %2039 = vrot.lane.b32.xlu0 %v2037_v8, %s3524_s3 }
0x2df7   :  { %v2040_v11 = vpop.permute.xlu0 %2039 }
0x2df8   :  { %v2042_v12 = vadd.f32 %v2040_v11, %v2032_v10 }
0x2dfa   :  { %3288 = vtanh.f32 %v2042_v12 }
0x2dfb   :  { %3290 = vtanh.f32 %v4027_v37 }
0x2e04   :  { %v3289_v13 = vpop.eup %3288 }
0x2e05   :  { %2045 = vrot.lane.b32.xlu1 %v3289_v13, %s3524_s3  ;;  %v3291_v3 = vpop.eup %3290 }
0x2e09   :  { %2050 = vrot.lane.b32.xlu1 %v2042_v12, %s3525_s13 }
0x2e77   :  { %v2046_v14 = vpop.permute.xlu1 %2045 }
0x2e78   :  { %v2048_v15 = vmul.f32 %v2046_v14, %v2025_v1 }
0x2e7a   :  { %v2775_v16 = vpack.c.bf16 %v2048_v15, %v2048_v15 }
0x2e7b   :  { %v2051_v5 = vpop.permute.xlu1 %2050 }
0x2e7c   :  { %2053 = vst.msk [vmem:[#allocation4] sm:$0xff] %vm276_vm2, %v2051_v5  ;;  %2058 = vrot.lane.b32.xlu0 %v2775_v16, %s3516_s15 }
0x2e83   :  { %v2114_v17 = vld [vmem:[#allocation4] sm:$0xff] }
0x2e84   :  { %2116 = vrot.lane.b32.xlu1 %v2114_v17, %s3524_s3 }
0x2e88   :  { %1755 = vrot.lane.b32.xlu1 %v3291_v3, %s3524_s3 }
0x2eee   :  { %v2059_v18 = vpop.permute.xlu0 %2058 }
0x2eef   :  { %2061 = vst.msk [vmem:[#allocation2 + $0x4] sm:$0xf] %vm323_vm4, %v2059_v18 }
0x2ef6   :  { %v2117_v19 = vpop.permute.xlu1 %2116  ;;  %v2063_v20 = vld [vmem:[#allocation2 + $0x4] sm:$0xf] }
0x2ef7   :  { %3093 = vmatmul.mubr.msk.bf16.vlgmr.msra.gmra.mrb[40].mxu1 %vm276_vm2, %v2063_v20 }
0x2ef8   :  { %3105 = vmatpush3.bf16.msra.mxu1 %v4038_v45  ;;  %3108 = vmatprep.mubr.msk.bf16.mxu1 %vm3526_vm3, %v3523_v4 }
0x2ef9   :  { %3106 = vmatprep.subr.bf16.mxu1 %v3523_v4 }
0x2efa   :  { %v1756_v21 = vpop.permute.xlu1 %1755 }
0x2efb   :  { %v1758_v22 = vmul.f32 %v1756_v21, %v4021_v25 }
0x2efc   :  { %3107 = vmatpush3.bf16.msra.mxu1 %v4041_v48 }
0x2efd   :  { %v2773_v7 = vpack.c.bf16 %v1758_v22, %v1758_v22  ;;  %3120 = vmatprep.subr.bf16.mxu1 %v3523_v4 }
0x2eff   :  { %1768 = vrot.lane.b32.xlu1 %v2773_v7, %s3516_s15 }
0x2f71   :  { %v1769_v23 = vpop.permute.xlu1 %1768 }
0x2f72   :  { %1771 = vst.msk [vmem:[#allocation2 + $0x1c] sm:$0xf] %vm323_vm4, %v1769_v23 }
0x2f79   :  { %v3181_v24 = vld [vmem:[#allocation2 + $0x18] sm:$0xff]  }
0x2f7a   :  { %3077 = vmatmul.mubr.msk.bf16.gmra.mrb[40].mxu0 %vm276_vm2, %v3181_v24 }
0x2f7b   :  { %3100 = vmatprep.mubr.msk.bf16.mxu0 %vm3526_vm3, %v3523_v4 }
0x2fca   :  { %v2101_v28 = vpop.f32.mrb[40].mxu1 }
0x2fcb   :  { %v2108_v25 = vadd.f32 %v2107_v27, %v2101_v28  ;;  %v3094_v29 = vpop.f32.mrb[41].mxu1 }
0x2fcc   :  { %v2104_v30 = vpop.f32.mrb[42].mxu1 }
0x2fcd   :  { %3292 = vtanh.f32 %v2108_v25  ;;  %v3095_v33 = vpop.f32.mrb[43].mxu1  ;;  %v2109_v35 = vmul.f32 0.5, %v2108_v25 }
0x2fcf   :  { %3294 = vtanh.f32 %v2109_v35 }
0x2fd7   :  { %v3293_v34 = vpop.eup %3292 }
0x2fd8   :  { %2121 = vrot.lane.b32.xlu0 %v3293_v34, %s3524_s3 }
0x2fd9   :  { %v3295_v36 = vpop.eup %3294 }
0x2fda   :  { %v2111_v37 = vadd.f32 1.0, %v3295_v36 }
0x2fdc   :  { %v2112_v38 = vmul.f32 0.5, %v2111_v37 }
0x2fde   :  { %v2119_v51 = vmul.f32 %v2117_v19, %v2112_v38 }
0x304a   :  { %v2122_v39 = vpop.permute.xlu0 %2121 }
0x304b   :  { %v2124_v31 = vmul.f32 %v2122_v39, %v2112_v38 }
0x304d   :  { %2126 = vrot.lane.b32.xlu0 %v2124_v31, %s3524_s3  ;;  %v3078_v40 = vpop.f32.mrb[40].mxu0 }
0x304e   :  { %v1885_v41 = vpop.f32.mrb[41].mxu0  ;;  %v1894_v6 = vadd.f32 %v3078_v40, %v4000_v47 }
0x304f   :  { %v3079_v42 = vpop.f32.mrb[42].mxu0  ;;  %v1886_v44 = vadd.f32 %v4000_v47, %v1885_v41 }
0x3050   :  { %v1897_v43 = vadd.f32 %v3079_v42, %v4000_v47  ;;  %v1888_v32 = vpop.f32.mrb[43].mxu0 }
0x3051   :  { %v1889_v49 = vadd.f32 %v4000_v47, %v1888_v32 }
0x3052   :  { %v2840_v46 = vpack.c.bf16 %v1897_v43, %v1894_v6 }
0x3053   :  { %v2835_v50 = vpack.c.bf16 %v1889_v49, %v1886_v44 }
0x3054   :  { %2850 = vst [vmem:[#allocation3 + $0x18] sm:$0xff] %v2840_v46  }
0x3055   :  { %2849 = vst [vmem:[#allocation3 + $0x10] sm:$0xff] %v2835_v50  }
0x305c   :  { %v2236_v24 = vld [vmem:[#allocation3 + $0x10] sm:$0xff]  }
0x305d   :  { %v2281_v26 = vunpack.c.l.bf16 %v2236_v24 }
0x30bf   :  { %v2127_v52 = vpop.permute.xlu0 %2126 }
0x30c0   :  { %v2129_v53 = vadd.f32 %v2127_v52, %v2119_v51  ;;  %v2368_v52 = vunpack.c.h.bf16 %v2236_v24 }
0x30c2   :  { %3296 = vtanh.f32 %v2129_v53  ;;  %2137 = vrot.lane.b32.xlu1 %v2129_v53, %s3525_s13 }
0x30cc   :  { %v3297_v54 = vpop.eup %3296 }
0x30cd   :  { %2132 = vrot.lane.b32.xlu0 %v3297_v54, %s3524_s3 }
0x3134   :  { %v2138_v55 = vpop.permute.xlu1 %2137 }
0x3135   :  { %2140 = vst.msk [vmem:[#allocation4] sm:$0xff] %vm276_vm2, %v2138_v55 }
0x313c   :  { %v2201_v56 = vld [vmem:[#allocation4] sm:$0xff] }
0x313d   :  { %2203 = vrot.lane.b32.xlu1 %v2201_v56, %s3524_s3 }
0x313f   :  { %v2133_v47 = vpop.permute.xlu0 %2132 }
0x3140   :  { %v2135_v57 = vmul.f32 %v2133_v47, %v2112_v38 }
0x3142   :  { %v2776_v58 = vpack.c.bf16 %v2135_v57, %v2135_v57 }
0x3144   :  { %2145 = vrot.lane.b32.xlu0 %v2776_v58, %s3516_s15 }
0x31af   :  { %v2204_v15 = vpop.permute.xlu1 %2203 }
0x31b6   :  { %v2146_v59 = vpop.permute.xlu0 %2145 }
0x31b7   :  { %2148 = vst.msk [vmem:[#allocation2 + $0x8] sm:$0xf] %vm323_vm4, %v2146_v59 }
0x31be   :  { %v2150_v60 = vld [vmem:[#allocation2 + $0x8] sm:$0xf] }
0x31bf   :  { %3101 = vmatmul.mubr.msk.bf16.vlgmr.msra.gmra.mrb[44].mxu0 %vm276_vm2, %v2150_v60 }
0x31c0   :  { %3113 = vmatpush3.bf16.msra.mxu0 %v4038_v45  ;;  %3116 = vmatprep.mubr.msk.bf16.mxu0 %vm3526_vm3, %v3523_v4 }
0x31c1   :  { %3114 = vmatprep.subr.bf16.mxu0 %v3523_v4 }
0x31c4   :  { %3115 = vmatpush3.bf16.msra.mxu0 %v4041_v48 }
0x31c5   :  { %3128 = vmatprep.subr.bf16.mxu0 %v3523_v4 }
0x3292   :  { %v2188_v62 = vpop.f32.mrb[44].mxu0 }
0x3293   :  { %v2195_v63 = vadd.f32 %v2194_v61, %v2188_v62  ;;  %v3102_v0 = vpop.f32.mrb[45].mxu0 }
0x3294   :  { %v2191_v1 = vpop.f32.mrb[46].mxu0 }
0x3295   :  { %3298 = vtanh.f32 %v2195_v63  ;;  %v3103_v2 = vpop.f32.mrb[47].mxu0  ;;  %v2196_v9 = vmul.f32 0.5, %v2195_v63 }
0x3297   :  { %3300 = vtanh.f32 %v2196_v9 }
0x329f   :  { %v3299_v8 = vpop.eup %3298 }
0x32a0   :  { %2208 = vrot.lane.b32.xlu0 %v3299_v8, %s3524_s3 }
0x32a1   :  { %v3301_v10 = vpop.eup %3300 }
0x32a2   :  { %v2198_v11 = vadd.f32 1.0, %v3301_v10 }
0x32a4   :  { %v2199_v12 = vmul.f32 0.5, %v2198_v11 }
0x32a6   :  { %v2206_v16 = vmul.f32 %v2204_v15, %v2199_v12  ;;  %v2410_v15 = vld [vmem:[#allocation3 + $0x18] sm:$0xff]  }
0x3312   :  { %v2209_v13 = vpop.permute.xlu0 %2208 }
0x3313   :  { %v2211_v14 = vmul.f32 %v2209_v13, %v2199_v12 }
0x3315   :  { %2213 = vrot.lane.b32.xlu0 %v2211_v14, %s3524_s3 }
0x3387   :  { %v2214_v5 = vpop.permute.xlu0 %2213 }
0x3388   :  { %v2216_v17 = vadd.f32 %v2214_v5, %v2206_v16  ;;  %v2455_v16 = vunpack.c.l.bf16 %v2410_v15 }
0x338a   :  { %3302 = vtanh.f32 %v2216_v17 }
0x3394   :  { %v3303_v3 = vpop.eup %3302 }
0x3395   :  { %2219 = vrot.lane.b32.xlu1 %v3303_v3, %s3524_s3 }
0x3399   :  { %2224 = vrot.lane.b32.xlu1 %v2216_v17, %s3525_s13 }
0x3407   :  { %v2220_v18 = vpop.permute.xlu1 %2219 }
0x3408   :  { %v2222_v19 = vmul.f32 %v2220_v18, %v2199_v12 }
0x340a   :  { %v2777_v20 = vpack.c.bf16 %v2222_v19, %v2222_v19 }
0x340b   :  { %v2225_v21 = vpop.permute.xlu1 %2224 }
0x340c   :  { %2227 = vst.msk [vmem:[#allocation4] sm:$0xff] %vm276_vm2, %v2225_v21  ;;  %2232 = vrot.lane.b32.xlu0 %v2777_v20, %s3516_s15 }
0x3413   :  { %v2288_v22 = vld [vmem:[#allocation4] sm:$0xff] }
0x3414   :  { %2290 = vrot.lane.b32.xlu1 %v2288_v22, %s3524_s3 }
0x347e   :  { %v2233_v7 = vpop.permute.xlu0 %2232 }
0x347f   :  { %2235 = vst.msk [vmem:[#allocation2 + $0xc] sm:$0xf] %vm323_vm4, %v2233_v7 }
0x3486   :  { %v2237_v23 = vld [vmem:[#allocation2 + $0xc] sm:$0xf]  ;;  %v2291_v31 = vpop.permute.xlu1 %2290 }
0x3487   :  { %3109 = vmatmul.mubr.msk.bf16.vlgmr.msra.gmra.mrb[44].mxu1 %vm276_vm2, %v2237_v23 }
0x3488   :  { %3121 = vmatpush3.bf16.msra.mxu1 %v4038_v45  ;;  %3124 = vmatprep.mubr.msk.bf16.mxu1 %vm3526_vm3, %v3523_v4 }
0x3489   :  { %3122 = vmatprep.subr.bf16.mxu1 %v3523_v4 }
0x348c   :  { %3123 = vmatpush3.bf16.msra.mxu1 %v4041_v48 }
0x348d   :  { %3136 = vmatprep.subr.bf16.mxu1 %v3523_v4 }
0x355a   :  { %v2275_v27 = vpop.f32.mrb[44].mxu1 }
0x355b   :  { %v2282_v28 = vadd.f32 %v2281_v26, %v2275_v27  ;;  %v3110_v25 = vpop.f32.mrb[45].mxu1 }
0x355c   :  { %v2278_v29 = vpop.f32.mrb[46].mxu1 }
0x355d   :  { %3304 = vtanh.f32 %v2282_v28  ;;  %v3111_v30 = vpop.f32.mrb[47].mxu1  ;;  %v2283_v34 = vmul.f32 0.5, %v2282_v28 }
0x355f   :  { %3306 = vtanh.f32 %v2283_v34 }
0x3567   :  { %v3305_v33 = vpop.eup %3304 }
0x3568   :  { %2295 = vrot.lane.b32.xlu0 %v3305_v33, %s3524_s3 }
0x3569   :  { %v3307_v35 = vpop.eup %3306 }
0x356a   :  { %v2285_v36 = vadd.f32 1.0, %v3307_v35 }
0x356c   :  { %v2286_v37 = vmul.f32 0.5, %v2285_v36 }
0x356e   :  { %v2293_v40 = vmul.f32 %v2291_v31, %v2286_v37  ;;  %v2542_v31 = vunpack.c.h.bf16 %v2410_v15 }
0x35da   :  { %v2296_v38 = vpop.permute.xlu0 %2295 }
0x35db   :  { %v2298_v39 = vmul.f32 %v2296_v38, %v2286_v37 }
0x35dd   :  { %2300 = vrot.lane.b32.xlu0 %v2298_v39, %s3524_s3 }
0x364f   :  { %v2301_v41 = vpop.permute.xlu0 %2300 }
0x3650   :  { %v2303_v42 = vadd.f32 %v2301_v41, %v2293_v40 }
0x3652   :  { %3308 = vtanh.f32 %v2303_v42 }
0x365c   :  { %v3309_v6 = vpop.eup %3308 }
0x365d   :  { %2306 = vrot.lane.b32.xlu1 %v3309_v6, %s3524_s3 }
0x3661   :  { %2311 = vrot.lane.b32.xlu1 %v2303_v42, %s3525_s13 }
0x36cf   :  { %v2307_v43 = vpop.permute.xlu1 %2306 }
0x36d0   :  { %v2309_v32 = vmul.f32 %v2307_v43, %v2286_v37 }
0x36d2   :  { %v2778_v44 = vpack.c.bf16 %v2309_v32, %v2309_v32 }
0x36d3   :  { %v2312_v49 = vpop.permute.xlu1 %2311 }
0x36d4   :  { %2314 = vst.msk [vmem:[#allocation4] sm:$0xff] %vm276_vm2, %v2312_v49  ;;  %2319 = vrot.lane.b32.xlu0 %v2778_v44, %s3516_s15 }
0x36db   :  { %v2375_v46 = vld [vmem:[#allocation4] sm:$0xff] }
0x36dc   :  { %2377 = vrot.lane.b32.xlu1 %v2375_v46, %s3524_s3 }
0x3746   :  { %v2320_v50 = vpop.permute.xlu0 %2319 }
0x3747   :  { %2322 = vst.msk [vmem:[#allocation2 + $0x10] sm:$0xf] %vm323_vm4, %v2320_v50 }
0x374e   :  { %v2324_v51 = vld [vmem:[#allocation2 + $0x10] sm:$0xf] }
0x374f   :  { %3117 = vmatmul.mubr.msk.bf16.vlgmr.msra.gmra.mrb[48].mxu0 %vm276_vm2, %v2324_v51 }
0x3750   :  { %3129 = vmatpush3.bf16.msra.mxu0 %v4038_v45  ;;  %3132 = vmatprep.mubr.msk.bf16.mxu0 %vm3526_vm3, %v3523_v4 }
0x3751   :  { %3130 = vmatprep.subr.bf16.mxu0 %v3523_v4 }
0x3754   :  { %3131 = vmatpush3.bf16.msra.mxu0 %v4041_v48  ;;  %v2378_v48 = vpop.permute.xlu1 %2377 }
0x3822   :  { %v2362_v53 = vpop.f32.mrb[48].mxu0 }
0x3823   :  { %v2369_v54 = vadd.f32 %v2368_v52, %v2362_v53  ;;  %v3118_v55 = vpop.f32.mrb[49].mxu0 }
0x3824   :  { %v2365_v56 = vpop.f32.mrb[50].mxu0 }
0x3825   :  { %3310 = vtanh.f32 %v2369_v54  ;;  %v3119_v47 = vpop.f32.mrb[51].mxu0  ;;  %v2370_v58 = vmul.f32 0.5, %v2369_v54 }
0x3827   :  { %3312 = vtanh.f32 %v2370_v58  ;;  %v3183_v58 = vld [vmem:[%s4193_s10 + $0x8] sm:$0xff]  }
0x382f   :  { %v3311_v57 = vpop.eup %3310 }
0x3830   :  { %2382 = vrot.lane.b32.xlu0 %v3311_v57, %s3524_s3  ;;  %v3182_v57 = vld [vmem:[%s4193_s10] sm:$0xff]   ;;  %s3527_s10 = smov [#allocation17]  }
0x3831   :  { %v3313_v45 = vpop.eup %3312  ;;  %s2659_s24 = sshll.u32 %s3527_s10, 4  ;;  %s2660_s24 = int_to_ptr.vmem [resolvable:$true] %s2659_s24 }
0x3832   :  { %v2372_v59 = vadd.f32 1.0, %v3313_v45  ;;  %p3487_p1 = scmp.lt.s32.totalorder %s2660_s24, %s2660_s24 }
0x3834   :  { %v2373_v60 = vmul.f32 0.5, %v2372_v59 }
0x3836   :  { %v2380_v63 = vmul.f32 %v2378_v48, %v2373_v60 }
0x38a2   :  { %v2383_v61 = vpop.permute.xlu0 %2382 }
0x38a3   :  { %v2385_v62 = vmul.f32 %v2383_v61, %v2373_v60 }
0x38a5   :  { %2387 = vrot.lane.b32.xlu0 %v2385_v62, %s3524_s3 }
0x3917   :  { %v2388_v0 = vpop.permute.xlu0 %2387 }
0x3918   :  { %v2390_v1 = vadd.f32 %v2388_v0, %v2380_v63  ;;  %v2754_v63 = vld [vmem:[%s4194_s11] ss:$0 sm:$0xff] }
0x391a   :  { %3314 = vtanh.f32 %v2390_v1 }
0x3924   :  { %v3315_v2 = vpop.eup %3314 }
0x3925   :  { %2393 = vrot.lane.b32.xlu1 %v3315_v2, %s3524_s3 }
0x3929   :  { %2398 = vrot.lane.b32.xlu1 %v2390_v1, %s3525_s13 }
0x3997   :  { %v2394_v8 = vpop.permute.xlu1 %2393 }
0x3998   :  { %v2396_v9 = vmul.f32 %v2394_v8, %v2373_v60 }
0x399a   :  { %v2779_v10 = vpack.c.bf16 %v2396_v9, %v2396_v9 }
0x399b   :  { %v2399_v11 = vpop.permute.xlu1 %2398 }
0x399c   :  { %2401 = vst.msk [vmem:[#allocation4] sm:$0xff] %vm276_vm2, %v2399_v11  ;;  %2406 = vrot.lane.b32.xlu0 %v2779_v10, %s3516_s15 }
0x39a3   :  { %v2462_v12 = vld [vmem:[#allocation4] sm:$0xff] }
0x39a4   :  { %2464 = vrot.lane.b32.xlu1 %v2462_v12, %s3524_s3 }
0x3a0e   :  { %v2407_v13 = vpop.permute.xlu0 %2406 }
0x3a0f   :  { %2409 = vst.msk [vmem:[#allocation2 + $0x14] sm:$0xf] %vm323_vm4, %v2407_v13 }
0x3a16   :  { %v2411_v14 = vld [vmem:[#allocation2 + $0x14] sm:$0xf]  ;;  %v2465_v27 = vpop.permute.xlu1 %2464 }
0x3a17   :  { %3125 = vmatmul.mubr.msk.bf16.vlgmr.msra.gmra.mrb[48].mxu1 %vm276_vm2, %v2411_v14 }
0x3a18   :  { %3140 = vmatprep.mubr.msk.bf16.mxu1 %vm3526_vm3, %v3523_v4  ;;  %3137 = vmatpush3.bf16.msra.mxu1 %v3182_v57 }
0x3a19   :  { %3138 = vmatprep.subr.bf16.mxu1 %v3523_v4 }
0x3a1c   :  { %3139 = vmatpush3.bf16.msra.mxu1 %v3183_v58 }
0x3aea   :  { %v2449_v5 = vpop.f32.mrb[48].mxu1 }
0x3aeb   :  { %v2456_v17 = vadd.f32 %v2455_v16, %v2449_v5  ;;  %v3126_v3 = vpop.f32.mrb[49].mxu1 }
0x3aec   :  { %v2452_v18 = vpop.f32.mrb[50].mxu1 }
0x3aed   :  { %3316 = vtanh.f32 %v2456_v17  ;;  %v3127_v19 = vpop.f32.mrb[51].mxu1  ;;  %v2457_v21 = vmul.f32 0.5, %v2456_v17 }
0x3aef   :  { %3318 = vtanh.f32 %v2457_v21 }
0x3af7   :  { %v3317_v20 = vpop.eup %3316 }
0x3af8   :  { %2469 = vrot.lane.b32.xlu0 %v3317_v20, %s3524_s3 }
0x3af9   :  { %v3319_v22 = vpop.eup %3318 }
0x3afa   :  { %v2459_v7 = vadd.f32 1.0, %v3319_v22 }
0x3afc   :  { %v2460_v23 = vmul.f32 0.5, %v2459_v7 }
0x3afe   :  { %v2467_v28 = vmul.f32 %v2465_v27, %v2460_v23 }
0x3b6a   :  { %v2470_v24 = vpop.permute.xlu0 %2469 }
0x3b6b   :  { %v2472_v26 = vmul.f32 %v2470_v24, %v2460_v23 }
0x3b6d   :  { %2474 = vrot.lane.b32.xlu0 %v2472_v26, %s3524_s3 }
0x3bdf   :  { %v2475_v25 = vpop.permute.xlu0 %2474 }
0x3be0   :  { %v2477_v29 = vadd.f32 %v2475_v25, %v2467_v28 }
0x3be2   :  { %3320 = vtanh.f32 %v2477_v29 }
0x3bec   :  { %v3321_v30 = vpop.eup %3320 }
0x3bed   :  { %2480 = vrot.lane.b32.xlu1 %v3321_v30, %s3524_s3 }
0x3bf1   :  { %2485 = vrot.lane.b32.xlu1 %v2477_v29, %s3525_s13 }
0x3c5f   :  { %v2481_v33 = vpop.permute.xlu1 %2480 }
0x3c60   :  { %v2483_v34 = vmul.f32 %v2481_v33, %v2460_v23 }
0x3c62   :  { %v2780_v35 = vpack.c.bf16 %v2483_v34, %v2483_v34 }
0x3c63   :  { %v2486_v36 = vpop.permute.xlu1 %2485 }
0x3c64   :  { %2488 = vst.msk [vmem:[#allocation4] sm:$0xff] %vm276_vm2, %v2486_v36  ;;  %2493 = vrot.lane.b32.xlu0 %v2780_v35, %s3516_s15 }
0x3c6b   :  { %v2549_v37 = vld [vmem:[#allocation4] sm:$0xff] }
0x3c6c   :  { %2551 = vrot.lane.b32.xlu1 %v2549_v37, %s3524_s3 }
0x3cd6   :  { %v2494_v38 = vpop.permute.xlu0 %2493 }
0x3cd7   :  { %2496 = vst.msk [vmem:[#allocation2 + $0x18] sm:$0xf] %vm323_vm4, %v2494_v38 }
0x3cde   :  { %v2498_v39 = vld [vmem:[#allocation2 + $0x18] sm:$0xf]  ;;  %v2552_v53 = vpop.permute.xlu1 %2551 }
0x3cdf   :  { %3133 = vmatmul.mubr.msk.bf16.vlgmr.msra.gmra.mrb[52].mxu0 %vm276_vm2, %v2498_v39 }
0x3db2   :  { %v2536_v40 = vpop.f32.mrb[52].mxu0 }
0x3db3   :  { %v2543_v41 = vadd.f32 %v2542_v31, %v2536_v40  ;;  %v3134_v42 = vpop.f32.mrb[53].mxu0 }
0x3db4   :  { %v2539_v6 = vpop.f32.mrb[54].mxu0 }
0x3db5   :  { %3322 = vtanh.f32 %v2543_v41  ;;  %v3135_v43 = vpop.f32.mrb[55].mxu0  ;;  %v2544_v44 = vmul.f32 0.5, %v2543_v41 }
0x3db7   :  { %3324 = vtanh.f32 %v2544_v44 }
0x3dbf   :  { %v3323_v32 = vpop.eup %3322 }
0x3dc0   :  { %2556 = vrot.lane.b32.xlu0 %v3323_v32, %s3524_s3 }
0x3dc1   :  { %v3325_v49 = vpop.eup %3324 }
0x3dc2   :  { %v2546_v46 = vadd.f32 1.0, %v3325_v49 }
0x3dc4   :  { %v2547_v50 = vmul.f32 0.5, %v2546_v46 }
0x3dc6   :  { %v2554_v54 = vmul.f32 %v2552_v53, %v2547_v50 }
0x3e32   :  { %v2557_v51 = vpop.permute.xlu0 %2556 }
0x3e33   :  { %v2559_v52 = vmul.f32 %v2557_v51, %v2547_v50 }
0x3e35   :  { %2561 = vrot.lane.b32.xlu0 %v2559_v52, %s3524_s3 }
0x3ea7   :  { %v2562_v55 = vpop.permute.xlu0 %2561 }
0x3ea8   :  { %v2564_v56 = vadd.f32 %v2562_v55, %v2554_v54 }
0x3eaa   :  { %3326 = vtanh.f32 %v2564_v56 }
0x3eb4   :  { %v3327_v47 = vpop.eup %3326 }
0x3eb5   :  { %2567 = vrot.lane.b32.xlu1 %v3327_v47, %s3524_s3 }
0x3eb9   :  { %2572 = vrot.lane.b32.xlu1 %v2564_v56, %s3525_s13 }
0x3f27   :  { %v2568_v45 = vpop.permute.xlu1 %2567 }
0x3f28   :  { %v2570_v59 = vmul.f32 %v2568_v45, %v2547_v50 }
0x3f2a   :  { %v2781_v60 = vpack.c.bf16 %v2570_v59, %v2570_v59 }
0x3f2b   :  { %v2573_v61 = vpop.permute.xlu1 %2572 }
0x3f2c   :  { %2575 = vst.msk [vmem:[#allocation4] sm:$0xff] %vm276_vm2, %v2573_v61  ;;  %2580 = vrot.lane.b32.xlu0 %v2781_v60, %s3516_s15  ;;  %s3482_s15 = scalar_lea.vmem %s2660_s24, 128 }
0x3f2d   :  { %p3483_p0 = scmp.ne.s32.totalorder %s2660_s24, %s3482_s15  ;;  %p3488_p2 = scmp.lt.s32.totalorder %s3482_s15, %s3482_s15 }
0x3f2f   :  { %p3489_p3 = por %p3488_p2, %p3487_p1 }
0x3f31   :  { %p3490_p4 = pnand %p3489_p3, %p3483_p0 }
0x3f9e   :  { %v2581_v62 = vpop.permute.xlu0 %2580 }
0x3f9f   :  { %2583 = vst.msk [vmem:[#allocation2 + $0x1c] sm:$0xf] %vm323_vm4, %v2581_v62 }
0x3fa6   :  { %v2584_v48 = vld [vmem:[#allocation2 + $0x1c] sm:$0xf] }
0x3fa7   :  { %3141 = vmatmul.mubr.msk.bf16.vlgmr.msra.gmra.mrb[52].mxu1 %vm276_vm2, %v2584_v48 }
0x407a   :  { %v2645_v4 = vpop.f32.mrb[52].mxu1 }
0x407b   :  { %v2646_v0 = vadd.f32 %v2754_v63, %v2645_v4  ;;  %v3142_v1 = vpop.f32.mrb[53].mxu1 }
0x407c   :  { %v2648_v2 = vpop.f32.mrb[54].mxu1 }
0x407d   :  { %v2651_v8 = vmax.f32 %v2646_v0, 0.0  ;;  %v3143_v9 = vpop.f32.mrb[55].mxu1 }
0x407f   :  { %2652 = vst [vmem:[#allocation17] sm:$0xff] %v2651_v8 }
0x4080   :  { %3493 = shalt.err (!%p3490_p4)
}
0x4081   :  { %s3494_s11 = scalar_lea.hbm %s4195_s12, 128 }
0x4082   :  { %p3495_p5 = scmp.ne.s32.totalorder %s4195_s12, %s3494_s11  ;;  %p3498_p6 = scmp.lt.u32.totalorder %s3494_s11, %s4195_s12 }
0x4084   :  { %p3500_p7 = pnand %p3498_p6, %p3495_p5 }
0x4086   :  { %3503 = shalt.err (!%p3500_p7)
}
0x4087   :  { %2662 = dma.vmem_to_hbm [thread:$0]  %s2660_s24, 128, %s4195_s12, [#allocation7]  }
0x4088   :  { %3512 = dma.done.wait [#allocation7], 128  }
0x4089   :  { %3513 = vsyncadd [#allocation7], 4294967168 }
0x408a   :  { %2666 = vsyncpa [#allocation6], 1 }
0x408b   :  { %2667 = vsyncpa [#allocation9], 1 }
0x408c   :  { %2668 = vsyncpa [#allocation12], 1 }
0x408d   :  { %2669 = vsyncpa [#allocation15], 1 }
0x408e   :  { %2670 = vsyncpa [#allocation7], 1 }

</bundles_post_ra>
